<compile_context>
chip_gen: v5e
topology: v5e:2x2
jax: 0.10.0
libtpu: 0.0.40
codegen_flags: <defaults>
</compile_context>

<pallas_src>
import functools

import jax
import jax.numpy as jnp
from jax.experimental import pallas as pl
from jax.experimental.pallas import tpu as pltpu


_BF16 = jnp.bfloat16
_F_TILE = 32  # frequencies per grid step in the spectral mix


def _round_up(x, m):
    return ((x + m - 1) // m) * m


def _row_tile(m):
    """Pick a big row tile (guide: 512-1024 ~ 85% HBM roofline) while keeping
    >= 4 grid steps so both v7x TensorCores get work."""
    for tm in (1024, 512, 256):
        if m >= 4 * tm:
            return tm
    return 128


# ----------------------------------------------------------------------------
# In-kernel exact GELU (matches F.gelu default, erf-based).
# erf built from exp/abs/where (A&S 7.1.26, <=1.5e-7 abs err) so it lowers on
# Mosaic; exp goes to the EUP slot (free), polynomial is a handful of VPU ops.
# ----------------------------------------------------------------------------
def _erf(x):
    a1 = 0.254829592
    a2 = -0.284496736
    a3 = 1.421413741
    a4 = -1.453152027
    a5 = 1.061405429
    p = 0.3275911
    ax = jnp.abs(x)
    t = 1.0 / (1.0 + p * ax)
    poly = ((((a5 * t + a4) * t + a3) * t + a2) * t + a1) * t
    y = 1.0 - poly * jnp.exp(-ax * ax)
    return jnp.where(x >= 0, y, -y)


def _gelu_exact(x):
    return 0.5 * x * (1.0 + _erf(x * 0.7071067811865476))


# ----------------------------------------------------------------------------
# Pallas kernels
# ----------------------------------------------------------------------------
def _lift_kernel(x_ref, w_ref, b_ref, o_ref):
    y = jnp.dot(x_ref[...].astype(_BF16), w_ref[...],
                preferred_element_type=jnp.float32) + b_ref[...]
    o_ref[...] = y.astype(o_ref.dtype)


def _fused_layer_kernel(x1_ref, x_ref, mw1_ref, mb1_ref, mw2_ref, mb2_ref,
                        ww_ref, wb_ref, o_ref, *, act):
    # x1 = spectral-conv output tile, x = layer input tile (residual branch).
    h = jnp.dot(x1_ref[...].astype(_BF16), mw1_ref[...],
                preferred_element_type=jnp.float32) + mb1_ref[...]
    h = _gelu_exact(h)
    y1 = jnp.dot(h.astype(_BF16), mw2_ref[...],
                 preferred_element_type=jnp.float32) + mb2_ref[...]
    y2 = jnp.dot(x_ref[...].astype(_BF16), ww_ref[...],
                 preferred_element_type=jnp.float32) + wb_ref[...]
    y = y1 + y2
    if act:
        y = _gelu_exact(y)
    o_ref[...] = y.astype(o_ref.dtype)


def _fused_q_kernel(x_ref, w1_ref, b1_ref, w2_ref, b2_ref, o_ref):
    h = jnp.dot(x_ref[...].astype(_BF16), w1_ref[...],
                preferred_element_type=jnp.float32) + b1_ref[...]
    h = _gelu_exact(h)
    y = jnp.dot(h.astype(_BF16), w2_ref[...],
                preferred_element_type=jnp.float32) + b2_ref[...]
    o_ref[...] = y.astype(o_ref.dtype)


def _freq_mix_kernel(a_ref, w_ref, o_ref):
    # a: (F_TILE, Bp, 2Cin) bf16 ; w: (F_TILE, 2Cin, Co_pad) bf16
    o_ref[...] = jnp.einsum("fbc,fcd->fbd", a_ref[...], w_ref[...],
                            preferred_element_type=jnp.float32)


# ----------------------------------------------------------------------------
# Wrappers around pallas_call
# ----------------------------------------------------------------------------
def _flatten_pad(x, tm):
    c = x.shape[-1]
    xf = x.reshape(-1, c)
    m = xf.shape[0]
    m_pad = _round_up(m, tm)
    if m_pad != m:
        xf = jnp.pad(xf, ((0, m_pad - m), (0, 0)))
    return xf, m, m_pad


_PARALLEL = pltpu.CompilerParams(dimension_semantics=("parallel",))


def lift(x, w_bf16, b2d):
    """y = x @ W + b  (the nn.Linear `p`)."""
    orig = x.shape
    cout = w_bf16.shape[1]
    tm = _row_tile(orig[0] * orig[1] * orig[2])
    xf, m, m_pad = _flatten_pad(x, tm)
    cin = xf.shape[1]
    out = pl.pallas_call(
        _lift_kernel,
        out_shape=jax.ShapeDtypeStruct((m_pad, cout), jnp.float32),
        grid=(m_pad // tm,),
        in_specs=[
            pl.BlockSpec((tm, cin), lambda i: (i, 0)),
            pl.BlockSpec((cin, cout), lambda i: (0, 0)),
            pl.BlockSpec((1, cout), lambda i: (0, 0)),
        ],
        out_specs=pl.BlockSpec((tm, cout), lambda i: (i, 0)),
        compiler_params=_PARALLEL,
    )(xf, w_bf16, b2d)
    return out[:m].reshape(orig[:-1] + (cout,))


def fused_layer(x1, x, lp, *, act):
    """x_out = [gelu]( mlp2(gelu(mlp1(x1))) + w(x) )  — one kernel per layer."""
    orig = x.shape
    c = lp["w_w"].shape[1]
    tm = _row_tile(orig[0] * orig[1] * orig[2])
    x1f, m, m_pad = _flatten_pad(x1, tm)
    xf, _, _ = _flatten_pad(x, tm)
    out = pl.pallas_call(
        functools.partial(_fused_layer_kernel, act=act),
        out_shape=jax.ShapeDtypeStruct((m_pad, c), jnp.float32),
        grid=(m_pad // tm,),
        in_specs=[
            pl.BlockSpec((tm, c), lambda i: (i, 0)),
            pl.BlockSpec((tm, c), lambda i: (i, 0)),
            pl.BlockSpec((c, c), lambda i: (0, 0)),
            pl.BlockSpec((1, c), lambda i: (0, 0)),
            pl.BlockSpec((c, c), lambda i: (0, 0)),
            pl.BlockSpec((1, c), lambda i: (0, 0)),
            pl.BlockSpec((c, c), lambda i: (0, 0)),
            pl.BlockSpec((1, c), lambda i: (0, 0)),
        ],
        out_specs=pl.BlockSpec((tm, c), lambda i: (i, 0)),
        compiler_params=_PARALLEL,
    )(x1f, xf, lp["mlp_w1"], lp["mlp_b1"], lp["mlp_w2"], lp["mlp_b2"],
      lp["w_w"], lp["w_b"])
    return out[:m].reshape(orig[:-1] + (c,))


def fused_q(x, w1, b1, w2p, b2p, out_dim):
    """Projection MLP q: gelu(x@W1+b1)@W2+b2, W2/b2 padded to 128 output lanes."""
    orig = x.shape
    cin = orig[-1]
    cmid = w1.shape[1]
    cop = w2p.shape[1]
    tm = _row_tile(orig[0] * orig[1] * orig[2])
    xf, m, m_pad = _flatten_pad(x, tm)
    out = pl.pallas_call(
        _fused_q_kernel,
        out_shape=jax.ShapeDtypeStruct((m_pad, cop), jnp.float32),
        grid=(m_pad // tm,),
        in_specs=[
            pl.BlockSpec((tm, cin), lambda i: (i, 0)),
            pl.BlockSpec((cin, cmid), lambda i: (0, 0)),
            pl.BlockSpec((1, cmid), lambda i: (0, 0)),
            pl.BlockSpec((cmid, cop), lambda i: (0, 0)),
            pl.BlockSpec((1, cop), lambda i: (0, 0)),
        ],
        out_specs=pl.BlockSpec((tm, cop), lambda i: (i, 0)),
        compiler_params=_PARALLEL,
    )(xf, w1, b1, w2p, b2p)
    return out[:m, :out_dim].reshape(orig[:-1] + (out_dim,))


def freq_mix(a_ri, w_block):
    """Per-frequency complex channel mixing as a batched real matmul."""
    f, bp, c2 = a_ri.shape
    cop = w_block.shape[2]
    return pl.pallas_call(
        _freq_mix_kernel,
        out_shape=jax.ShapeDtypeStruct((f, bp, cop), jnp.float32),
        grid=(f // _F_TILE,),
        in_specs=[
            pl.BlockSpec((_F_TILE, bp, c2), lambda i: (i, 0, 0)),
            pl.BlockSpec((_F_TILE, c2, cop), lambda i: (i, 0, 0)),
        ],
        out_specs=pl.BlockSpec((_F_TILE, bp, cop), lambda i: (i, 0, 0)),
        compiler_params=_PARALLEL,
    )(a_ri, w_block)


def spectral_conv2d(x, spec_w, modes1, modes2, cout):
    """SpectralConv2d on NHWC input x; spec_w is the precomputed real-block
    form of (weights1, weights2), shape (F_pad, 2*Cin, Co_pad) bf16."""
    b, h, w, cin = x.shape
    # TODO(synk): rfft2/irfft2 have no Pallas equivalent; kept as jnp.fft glue.
    x_ft = jnp.fft.rfft2(x, axes=(1, 2))           # (B, H, Wf, Cin) complex64
    wf = x_ft.shape[2]

    # stack [top modes1 rows ; bottom modes1 rows] along a single freq axis
    sl = jnp.concatenate([x_ft[:, :modes1, :modes2, :],
                          x_ft[:, h - modes1:, :modes2, :]], axis=1)
    f = 2 * modes1 * modes2
    a = jnp.transpose(sl, (1, 2, 0, 3)).reshape(f, b, cin)
    a_ri = jnp.concatenate([jnp.real(a), jnp.imag(a)], axis=-1)   # (F, B, 2Cin)

    bp = _round_up(b, 8)
    f_pad = spec_w.shape[0]
    a_ri = jnp.pad(a_ri, ((0, f_pad - f), (0, bp - b), (0, 0))).astype(_BF16)

    o = freq_mix(a_ri, spec_w)[:f, :b, :]                          # f32
    o_c = (o[..., :cout] + 1j * o[..., cout:2 * cout]).astype(jnp.complex64)
    o_c = jnp.transpose(o_c.reshape(2 * modes1, modes2, b, cout), (2, 0, 1, 3))

    out_ft = jnp.zeros((b, h, wf, cout), dtype=jnp.complex64)
    out_ft = out_ft.at[:, :modes1, :modes2, :].set(o_c[:, :modes1])
    out_ft = out_ft.at[:, h - modes1:, :modes2, :].set(o_c[:, modes1:])
    return jnp.fft.irfft2(out_ft, s=(h, w), axes=(1, 2)).astype(x.dtype)


# ----------------------------------------------------------------------------
# FNO_2D forward
# ----------------------------------------------------------------------------
def fno2d_forward(params, x, *, modes1, modes2, out_dim, padding=9,
                  use_position=True):
    b, s1, s2, _ = x.shape
    if use_position:
        gx = jnp.broadcast_to(
            jnp.linspace(0.0, 1.0, s1, dtype=x.dtype).reshape(1, s1, 1, 1),
            (b, s1, s2, 1))
        gy = jnp.broadcast_to(
            jnp.linspace(0.0, 1.0, s2, dtype=x.dtype).reshape(1, 1, s2, 1),
            (b, s1, s2, 1))
        x = jnp.concatenate([x, gx, gy], axis=-1)

    x = lift(x, params["p_w"], params["p_b"])                    # -> width
    # F.pad([0, pad, 0, pad]) on NCHW == pad bottom/right of H, W
    x = jnp.pad(x, ((0, 0), (0, padding), (0, padding), (0, 0)))

    width = params["p_w"].shape[1]
    n_layers = 4
    for l in range(n_layers):
        lp = params[f"layer{l}"]
        x1 = spectral_conv2d(x, lp["spec_w"], modes1, modes2, width)
        # mlp1+gelu -> mlp2 -> + w(x) (+gelu except last layer), fused:
        x = fused_layer(x1, x, lp, act=(l != n_layers - 1))

    x = x[:, :-padding, :-padding, :]
    x = fused_q(x, params["q_w1"], params["q_b1"],
                params["q_w2"], params["q_b2"], out_dim)
    return x


# ----------------------------------------------------------------------------
# One-time parameter preprocessing (block-form spectral weights, bf16 weights,
# lane-padded projection output) — keeps the per-forward XLA glue minimal.
# ----------------------------------------------------------------------------
def prepare_params(raw, modes1, modes2):
    def wcast(w):
        return w.astype(_BF16)

    def bias2d(b):
        return b.reshape(1, -1).astype(jnp.float32)

    def spectral_block(wc):
        # wc: (cin, cout, m1, m2) complex -> (m1*m2, 2*cin, 2*cout) real
        cin, cout, m1, m2 = wc.shape
        wt = jnp.transpose(wc, (2, 3, 0, 1)).reshape(m1 * m2, cin, cout)
        wr, wi = jnp.real(wt), jnp.imag(wt)
        return jnp.concatenate(
            [jnp.concatenate([wr, wi], axis=-1),
             jnp.concatenate([-wi, wr], axis=-1)], axis=1)

    p = {"p_w": wcast(raw["p_w"]), "p_b": bias2d(raw["p_b"])}
    for l in range(4):
        rl = raw[f"layer{l}"]
        cout = rl["conv_w1"].shape[1]
        wb = jnp.concatenate([spectral_block(rl["conv_w1"]),
                              spectral_block(rl["conv_w2"])], axis=0)
        f = wb.shape[0]
        f_pad = _round_up(f, _F_TILE)
        co_pad = _round_up(2 * cout, 128)          # lane-dense output stores
        wb = jnp.pad(wb, ((0, f_pad - f), (0, 0), (0, co_pad - 2 * cout)))
        p[f"layer{l}"] = {
            "spec_w": wb.astype(_BF16),
            "mlp_w1": wcast(rl["mlp_w1"]), "mlp_b1": bias2d(rl["mlp_b1"]),
            "mlp_w2": wcast(rl["mlp_w2"]), "mlp_b2": bias2d(rl["mlp_b2"]),
            "w_w": wcast(rl["w_w"]), "w_b": bias2d(rl["w_b"]),
        }
    p["q_w1"] = wcast(raw["q_w1"])
    p["q_b1"] = bias2d(raw["q_b1"])
    out_dim = raw["q_w2"].shape[1]
    o_pad = _round_up(out_dim, 128)
    p["q_w2"] = jnp.pad(raw["q_w2"], ((0, 0), (0, o_pad - out_dim))).astype(_BF16)
    p["q_b2"] = jnp.pad(raw["q_b2"], (0, o_pad - out_dim)).reshape(1, -1).astype(
        jnp.float32)
    return p


# ----------------------------------------------------------------------------
# Deterministic parameter init (shapes from FNO_2D.__init__)
# ----------------------------------------------------------------------------
def init_params(key, in_dim, appended_dim, out_dim, modes1, modes2, width):
    keys = iter(jax.random.split(key, 64))

    def nk():
        return next(keys)

    def linear_init(cin, cout):
        bound = 1.0 / float(cin) ** 0.5
        w = jax.random.uniform(nk(), (cin, cout), jnp.float32, -bound, bound)
        bb = jax.random.uniform(nk(), (cout,), jnp.float32, -bound, bound)
        return w, bb

    def spectral_init(cin, cout):
        scale = 1.0 / (cin * cout)
        wr = jax.random.uniform(nk(), (cin, cout, modes1, modes2), jnp.float32)
        wi = jax.random.uniform(nk(), (cin, cout, modes1, modes2), jnp.float32)
        return (scale * (wr + 1j * wi)).astype(jnp.complex64)

    params = {}
    params["p_w"], params["p_b"] = linear_init(in_dim + appended_dim, width)
    for l in range(4):
        lp = {}
        lp["conv_w1"] = spectral_init(width, width)
        lp["conv_w2"] = spectral_init(width, width)
        lp["mlp_w1"], lp["mlp_b1"] = linear_init(width, width)
        lp["mlp_w2"], lp["mlp_b2"] = linear_init(width, width)
        lp["w_w"], lp["w_b"] = linear_init(width, width)
        params[f"layer{l}"] = lp
    params["q_w1"], params["q_b1"] = linear_init(width, 4 * width)
    params["q_w2"], params["q_b2"] = linear_init(4 * width, out_dim)
    return params


# ----------------------------------------------------------------------------
if __name__ == "__main__":
    B, S = 2, 16
    in_dim, appended_dim, out_dim = 1, 2, 1
    modes1 = modes2 = 8
    width = 32

    key = jax.random.PRNGKey(0)
    k_x, k_p = jax.random.split(key)
    x = jax.random.normal(k_x, (B, S, S, in_dim), dtype=jnp.float32)
    raw_params = init_params(k_p, in_dim, appended_dim, out_dim,
                             modes1, modes2, width)
    params = prepare_params(raw_params, modes1, modes2)   # one-time preprocessing

    fwd = jax.jit(lambda p, xx: fno2d_forward(
        p, xx, modes1=modes1, modes2=modes2, out_dim=out_dim,
        padding=9, use_position=True))
    out = fwd(params, x)
    jax.block_until_ready(out)

    assert out.shape == (B, S, S, out_dim), out.shape
    assert jnp.all(jnp.isfinite(out))
    print("KERNEL_OK")
</pallas_src>

<mosaic_0001>
module attributes {stable_mosaic.version = 11 : i64} {
  func.func @_lift_kernel(%arg0: i32, %arg1: memref<128x3xf32, #tpu.memory_space<vmem>>, %arg2: memref<3x32xbf16, #tpu.memory_space<vmem>>, %arg3: memref<1x32xf32, #tpu.memory_space<vmem>>, %arg4: memref<128x32xf32, #tpu.memory_space<vmem>>) attributes {dimension_semantics = [#tpu.dimension_semantics<parallel>], iteration_bounds = array<i64: 4>, scalar_prefetch = 0 : i64, scratch_operands = 0 : i64, tpu.core_type = #tpu.core_type<tc>, window_params = [{transform_indices = @transform_0, window_bounds = array<i64: 128, 3>}, {pipeline_mode = #tpu.pipeline_mode<synchronous>, transform_indices = @transform_1, window_bounds = array<i64: 3, 32>}, {pipeline_mode = #tpu.pipeline_mode<synchronous>, transform_indices = @transform_2, window_bounds = array<i64: 1, 32>}, {transform_indices = @transform_3, window_bounds = array<i64: 128, 32>}]} {
    %c0 = arith.constant 0 : index
    %c0_0 = arith.constant 0 : index
    %0 = vector.load %arg1[%c0, %c0_0] : memref<128x3xf32, #tpu.memory_space<vmem>>, vector<128x3xf32>
    %1 = arith.truncf %0 : vector<128x3xf32> to vector<128x3xbf16>
    %c0_1 = arith.constant 0 : index
    %c0_2 = arith.constant 0 : index
    %2 = vector.load %arg2[%c0_1, %c0_2] : memref<3x32xbf16, #tpu.memory_space<vmem>>, vector<3x32xbf16>
    %cst = arith.constant dense<0.000000e+00> : vector<128x32xf32>
    %3 = tpu.matmul %1, %2, %cst {dimension_numbers = #tpu.dot_dimension_numbers<[1], [0], [0], [1], [0, 0, 1, 1], [], []>} : vector<128x3xbf16>, vector<3x32xbf16>, vector<128x32xf32> -> vector<128x32xf32>
    %c0_3 = arith.constant 0 : index
    %c0_4 = arith.constant 0 : index
    %4 = vector.load %arg3[%c0_3, %c0_4] : memref<1x32xf32, #tpu.memory_space<vmem>>, vector<1x32xf32>
    %5 = vector.broadcast %4 : vector<1x32xf32> to vector<128x32xf32>
    %6 = arith.addf %3, %5 : vector<128x32xf32>
    %c0_5 = arith.constant 0 : index
    %c0_6 = arith.constant 0 : index
    %7 = vector.load %arg4[%c0_5, %c0_6] : memref<128x32xf32, #tpu.memory_space<vmem>>, vector<128x32xf32>
    tpu.vector_store %arg4[%c0_5, %c0_6], %6 {strides = array<i32>} : memref<128x32xf32, #tpu.memory_space<vmem>>, vector<128x32xf32>,
    return
  }
  func.func @transform_0(%arg0: i32) -> (i32, i32) {
    %c0_i32 = arith.constant 0 : i32
    %c0_i32_0 = arith.constant 0 : i32
    return %arg0, %c0_i32 : i32, i32
  }
  func.func @transform_1(%arg0: i32) -> (i32, i32) {
    %c0_i32 = arith.constant 0 : i32
    %c0_i32_0 = arith.constant 0 : i32
    %c0_i32_1 = arith.constant 0 : i32
    return %c0_i32, %c0_i32_0 : i32, i32
  }
  func.func @transform_2(%arg0: i32) -> (i32, i32) {
    %c0_i32 = arith.constant 0 : i32
    %c0_i32_0 = arith.constant 0 : i32
    %c0_i32_1 = arith.constant 0 : i32
    return %c0_i32, %c0_i32_0 : i32, i32
  }
  func.func @transform_3(%arg0: i32) -> (i32, i32) {
    %c0_i32 = arith.constant 0 : i32
    %c0_i32_0 = arith.constant 0 : i32
    return %arg0, %c0_i32 : i32, i32
  }
}

module attributes {stable_mosaic.version = 11 : i64} {
  func.func @_freq_mix_kernel(%arg0: i32, %arg1: memref<32x8x64xbf16, #tpu.memory_space<vmem>>, %arg2: memref<32x64x128xbf16, #tpu.memory_space<vmem>>, %arg3: memref<32x8x128xf32, #tpu.memory_space<vmem>>) attributes {dimension_semantics = [#tpu.dimension_semantics<parallel>], iteration_bounds = array<i64: 4>, scalar_prefetch = 0 : i64, scratch_operands = 0 : i64, tpu.core_type = #tpu.core_type<tc>, window_params = [{transform_indices = @transform_0, window_bounds = array<i64: 32, 8, 64>}, {transform_indices = @transform_1, window_bounds = array<i64: 32, 64, 128>}, {transform_indices = @transform_2, window_bounds = array<i64: 32, 8, 128>}]} {
    %c0 = arith.constant 0 : index
    %c0_0 = arith.constant 0 : index
    %c0_1 = arith.constant 0 : index
    %0 = vector.load %arg1[%c0, %c0_0, %c0_1] : memref<32x8x64xbf16, #tpu.memory_space<vmem>>, vector<32x8x64xbf16>
    %c0_2 = arith.constant 0 : index
    %c0_3 = arith.constant 0 : index
    %c0_4 = arith.constant 0 : index
    %1 = vector.load %arg2[%c0_2, %c0_3, %c0_4] : memref<32x64x128xbf16, #tpu.memory_space<vmem>>, vector<32x64x128xbf16>
    "tpu.trace_start"() <{level = 10 : i32, message = "fbc,fcd->fbd"}> : () -> ()
    %cst = arith.constant dense<0.000000e+00> : vector<32x8x128xf32>
    %2 = tpu.matmul %0, %1, %cst {dimension_numbers = #tpu.dot_dimension_numbers<[2], [1], [1], [2], [0, 0, 0, 1, 1, 2], [0], [0]>} : vector<32x8x64xbf16>, vector<32x64x128xbf16>, vector<32x8x128xf32> -> vector<32x8x128xf32>
    "tpu.trace_stop"() : () -> ()
    %c0_5 = arith.constant 0 : index
    %c0_6 = arith.constant 0 : index
    %c0_7 = arith.constant 0 : index
    %3 = vector.load %arg3[%c0_5, %c0_6, %c0_7] : memref<32x8x128xf32, #tpu.memory_space<vmem>>, vector<32x8x128xf32>
    tpu.vector_store %arg3[%c0_5, %c0_6, %c0_7], %2 {strides = array<i32>} : memref<32x8x128xf32, #tpu.memory_space<vmem>>, vector<32x8x128xf32>,
    return
  }
  func.func @transform_0(%arg0: i32) -> (i32, i32, i32) {
    %c0_i32 = arith.constant 0 : i32
    %c0_i32_0 = arith.constant 0 : i32
    %c0_i32_1 = arith.constant 0 : i32
    return %arg0, %c0_i32, %c0_i32_0 : i32, i32, i32
  }
  func.func @transform_1(%arg0: i32) -> (i32, i32, i32) {
    %c0_i32 = arith.constant 0 : i32
    %c0_i32_0 = arith.constant 0 : i32
    %c0_i32_1 = arith.constant 0 : i32
    return %arg0, %c0_i32, %c0_i32_0 : i32, i32, i32
  }
  func.func @transform_2(%arg0: i32) -> (i32, i32, i32) {
    %c0_i32 = arith.constant 0 : i32
    %c0_i32_0 = arith.constant 0 : i32
    %c0_i32_1 = arith.constant 0 : i32
    return %arg0, %c0_i32, %c0_i32_0 : i32, i32, i32
  }
}

module attributes {stable_mosaic.version = 11 : i64} {
  func.func @_fused_layer_kernel(%arg0: i32, %arg1: memref<256x32xf32, #tpu.memory_space<vmem>>, %arg2: memref<256x32xf32, #tpu.memory_space<vmem>>, %arg3: memref<32x32xbf16, #tpu.memory_space<vmem>>, %arg4: memref<1x32xf32, #tpu.memory_space<vmem>>, %arg5: memref<32x32xbf16, #tpu.memory_space<vmem>>, %arg6: memref<1x32xf32, #tpu.memory_space<vmem>>, %arg7: memref<32x32xbf16, #tpu.memory_space<vmem>>, %arg8: memref<1x32xf32, #tpu.memory_space<vmem>>, %arg9: memref<256x32xf32, #tpu.memory_space<vmem>>) attributes {dimension_semantics = [#tpu.dimension_semantics<parallel>], iteration_bounds = array<i64: 5>, scalar_prefetch = 0 : i64, scratch_operands = 0 : i64, tpu.core_type = #tpu.core_type<tc>, window_params = [{transform_indices = @transform_0, window_bounds = array<i64: 256, 32>}, {transform_indices = @transform_1, window_bounds = array<i64: 256, 32>}, {pipeline_mode = #tpu.pipeline_mode<synchronous>, transform_indices = @transform_2, window_bounds = array<i64: 32, 32>}, {pipeline_mode = #tpu.pipeline_mode<synchronous>, transform_indices = @transform_3, window_bounds = array<i64: 1, 32>}, {pipeline_mode = #tpu.pipeline_mode<synchronous>, transform_indices = @transform_4, window_bounds = array<i64: 32, 32>}, {pipeline_mode = #tpu.pipeline_mode<synchronous>, transform_indices = @transform_5, window_bounds = array<i64: 1, 32>}, {pipeline_mode = #tpu.pipeline_mode<synchronous>, transform_indices = @transform_6, window_bounds = array<i64: 32, 32>}, {pipeline_mode = #tpu.pipeline_mode<synchronous>, transform_indices = @transform_7, window_bounds = array<i64: 1, 32>}, {transform_indices = @transform_8, window_bounds = array<i64: 256, 32>}]} {
    %c0 = arith.constant 0 : index
    %c0_0 = arith.constant 0 : index
    %0 = vector.load %arg1[%c0, %c0_0] : memref<256x32xf32, #tpu.memory_space<vmem>>, vector<256x32xf32>
    %1 = arith.truncf %0 : vector<256x32xf32> to vector<256x32xbf16>
    %c0_1 = arith.constant 0 : index
    %c0_2 = arith.constant 0 : index
    %2 = vector.load %arg3[%c0_1, %c0_2] : memref<32x32xbf16, #tpu.memory_space<vmem>>, vector<32x32xbf16>
    %cst = arith.constant dense<0.000000e+00> : vector<256x32xf32>
    %3 = tpu.matmul %1, %2, %cst {dimension_numbers = #tpu.dot_dimension_numbers<[1], [0], [0], [1], [0, 0, 1, 1], [], []>} : vector<256x32xbf16>, vector<32x32xbf16>, vector<256x32xf32> -> vector<256x32xf32>
    %c0_3 = arith.constant 0 : index
    %c0_4 = arith.constant 0 : index
    %4 = vector.load %arg4[%c0_3, %c0_4] : memref<1x32xf32, #tpu.memory_space<vmem>>, vector<1x32xf32>
    %5 = vector.broadcast %4 : vector<1x32xf32> to vector<256x32xf32>
    %6 = arith.addf %3, %5 : vector<256x32xf32>
    %cst_5 = arith.constant 5.000000e-01 : f32
    %7 = vector.broadcast %cst_5 : f32 to vector<256x32xf32>
    %8 = arith.mulf %7, %6 : vector<256x32xf32>
    %cst_6 = arith.constant 0.707106769 : f32
    %9 = vector.broadcast %cst_6 : f32 to vector<256x32xf32>
    %10 = arith.mulf %6, %9 : vector<256x32xf32>
    %11 = math.absf %10 : vector<256x32xf32>
    %cst_7 = arith.constant 0.327591091 : f32
    %12 = vector.broadcast %cst_7 : f32 to vector<256x32xf32>
    %13 = arith.mulf %12, %11 : vector<256x32xf32>
    %cst_8 = arith.constant 1.000000e+00 : f32
    %14 = vector.broadcast %cst_8 : f32 to vector<256x32xf32>
    %15 = arith.addf %14, %13 : vector<256x32xf32>
    %cst_9 = arith.constant 1.000000e+00 : f32
    %16 = vector.broadcast %cst_9 : f32 to vector<256x32xf32>
    %17 = arith.divf %16, %15 : vector<256x32xf32>
    %cst_10 = arith.constant 1.06140542 : f32
    %18 = vector.broadcast %cst_10 : f32 to vector<256x32xf32>
    %19 = arith.mulf %18, %17 : vector<256x32xf32>
    %cst_11 = arith.constant -1.45315206 : f32
    %20 = vector.broadcast %cst_11 : f32 to vector<256x32xf32>
    %21 = arith.addf %19, %20 : vector<256x32xf32>
    %22 = arith.mulf %21, %17 : vector<256x32xf32>
    %cst_12 = arith.constant 1.42141378 : f32
    %23 = vector.broadcast %cst_12 : f32 to vector<256x32xf32>
    %24 = arith.addf %22, %23 : vector<256x32xf32>
    %25 = arith.mulf %24, %17 : vector<256x32xf32>
    %cst_13 = arith.constant -0.284496725 : f32
    %26 = vector.broadcast %cst_13 : f32 to vector<256x32xf32>
    %27 = arith.addf %25, %26 : vector<256x32xf32>
    %28 = arith.mulf %27, %17 : vector<256x32xf32>
    %cst_14 = arith.constant 0.254829586 : f32
    %29 = vector.broadcast %cst_14 : f32 to vector<256x32xf32>
    %30 = arith.addf %28, %29 : vector<256x32xf32>
    %31 = arith.mulf %30, %17 : vector<256x32xf32>
    %cst_15 = arith.constant 0.000000e+00 : f32
    %32 = vector.broadcast %cst_15 : f32 to vector<256x32xf32>
    %33 = arith.subf %32, %11 : vector<256x32xf32>
    %34 = arith.mulf %33, %11 : vector<256x32xf32>
    %35 = math.exp %34 : vector<256x32xf32>
    %36 = arith.mulf %31, %35 : vector<256x32xf32>
    %cst_16 = arith.constant 1.000000e+00 : f32
    %37 = vector.broadcast %cst_16 : f32 to vector<256x32xf32>
    %38 = arith.subf %37, %36 : vector<256x32xf32>
    %cst_17 = arith.constant 0.000000e+00 : f32
    %39 = vector.broadcast %cst_17 : f32 to vector<256x32xf32>
    %40 = arith.cmpf oge, %10, %39 : vector<256x32xf32>
    %cst_18 = arith.constant 0.000000e+00 : f32
    %41 = vector.broadcast %cst_18 : f32 to vector<256x32xf32>
    %42 = arith.subf %41, %38 : vector<256x32xf32>
    %43 = arith.select %40, %38, %42 : vector<256x32xi1>, vector<256x32xf32>
    %cst_19 = arith.constant 1.000000e+00 : f32
    %44 = vector.broadcast %cst_19 : f32 to vector<256x32xf32>
    %45 = arith.addf %44, %43 : vector<256x32xf32>
    %46 = arith.mulf %8, %45 : vector<256x32xf32>
    %47 = arith.truncf %46 : vector<256x32xf32> to vector<256x32xbf16>
    %c0_20 = arith.constant 0 : index
    %c0_21 = arith.constant 0 : index
    %48 = vector.load %arg5[%c0_20, %c0_21] : memref<32x32xbf16, #tpu.memory_space<vmem>>, vector<32x32xbf16>
    %cst_22 = arith.constant dense<0.000000e+00> : vector<256x32xf32>
    %49 = tpu.matmul %47, %48, %cst_22 {dimension_numbers = #tpu.dot_dimension_numbers<[1], [0], [0], [1], [0, 0, 1, 1], [], []>} : vector<256x32xbf16>, vector<32x32xbf16>, vector<256x32xf32> -> vector<256x32xf32>
    %c0_23 = arith.constant 0 : index
    %c0_24 = arith.constant 0 : index
    %50 = vector.load %arg6[%c0_23, %c0_24] : memref<1x32xf32, #tpu.memory_space<vmem>>, vector<1x32xf32>
    %51 = vector.broadcast %50 : vector<1x32xf32> to vector<256x32xf32>
    %52 = arith.addf %49, %51 : vector<256x32xf32>
    %c0_25 = arith.constant 0 : index
    %c0_26 = arith.constant 0 : index
    %53 = vector.load %arg2[%c0_25, %c0_26] : memref<256x32xf32, #tpu.memory_space<vmem>>, vector<256x32xf32>
    %54 = arith.truncf %53 : vector<256x32xf32> to vector<256x32xbf16>
    %c0_27 = arith.constant 0 : index
    %c0_28 = arith.constant 0 : index
    %55 = vector.load %arg7[%c0_27, %c0_28] : memref<32x32xbf16, #tpu.memory_space<vmem>>, vector<32x32xbf16>
    %cst_29 = arith.constant dense<0.000000e+00> : vector<256x32xf32>
    %56 = tpu.matmul %54, %55, %cst_29 {dimension_numbers = #tpu.dot_dimension_numbers<[1], [0], [0], [1], [0, 0, 1, 1], [], []>} : vector<256x32xbf16>, vector<32x32xbf16>, vector<256x32xf32> -> vector<256x32xf32>
    %c0_30 = arith.constant 0 : index
    %c0_31 = arith.constant 0 : index
    %57 = vector.load %arg8[%c0_30, %c0_31] : memref<1x32xf32, #tpu.memory_space<vmem>>, vector<1x32xf32>
    %58 = vector.broadcast %57 : vector<1x32xf32> to vector<256x32xf32>
    %59 = arith.addf %56, %58 : vector<256x32xf32>
    %60 = arith.addf %52, %59 : vector<256x32xf32>
    %cst_32 = arith.constant 5.000000e-01 : f32
    %61 = vector.broadcast %cst_32 : f32 to vector<256x32xf32>
    %62 = arith.mulf %61, %60 : vector<256x32xf32>
    %cst_33 = arith.constant 0.707106769 : f32
    %63 = vector.broadcast %cst_33 : f32 to vector<256x32xf32>
    %64 = arith.mulf %60, %63 : vector<256x32xf32>
    %65 = math.absf %64 : vector<256x32xf32>
    %cst_34 = arith.constant 0.327591091 : f32
    %66 = vector.broadcast %cst_34 : f32 to vector<256x32xf32>
    %67 = arith.mulf %66, %65 : vector<256x32xf32>
    %cst_35 = arith.constant 1.000000e+00 : f32
    %68 = vector.broadcast %cst_35 : f32 to vector<256x32xf32>
    %69 = arith.addf %68, %67 : vector<256x32xf32>
    %cst_36 = arith.constant 1.000000e+00 : f32
    %70 = vector.broadcast %cst_36 : f32 to vector<256x32xf32>
    %71 = arith.divf %70, %69 : vector<256x32xf32>
    %cst_37 = arith.constant 1.06140542 : f32
    %72 = vector.broadcast %cst_37 : f32 to vector<256x32xf32>
    %73 = arith.mulf %72, %71 : vector<256x32xf32>
    %cst_38 = arith.constant -1.45315206 : f32
    %74 = vector.broadcast %cst_38 : f32 to vector<256x32xf32>
    %75 = arith.addf %73, %74 : vector<256x32xf32>
    %76 = arith.mulf %75, %71 : vector<256x32xf32>
    %cst_39 = arith.constant 1.42141378 : f32
    %77 = vector.broadcast %cst_39 : f32 to vector<256x32xf32>
    %78 = arith.addf %76, %77 : vector<256x32xf32>
    %79 = arith.mulf %78, %71 : vector<256x32xf32>
    %cst_40 = arith.constant -0.284496725 : f32
    %80 = vector.broadcast %cst_40 : f32 to vector<256x32xf32>
    %81 = arith.addf %79, %80 : vector<256x32xf32>
    %82 = arith.mulf %81, %71 : vector<256x32xf32>
    %cst_41 = arith.constant 0.254829586 : f32
    %83 = vector.broadcast %cst_41 : f32 to vector<256x32xf32>
    %84 = arith.addf %82, %83 : vector<256x32xf32>
    %85 = arith.mulf %84, %71 : vector<256x32xf32>
    %cst_42 = arith.constant 0.000000e+00 : f32
    %86 = vector.broadcast %cst_42 : f32 to vector<256x32xf32>
    %87 = arith.subf %86, %65 : vector<256x32xf32>
    %88 = arith.mulf %87, %65 : vector<256x32xf32>
    %89 = math.exp %88 : vector<256x32xf32>
    %90 = arith.mulf %85, %89 : vector<256x32xf32>
    %cst_43 = arith.constant 1.000000e+00 : f32
    %91 = vector.broadcast %cst_43 : f32 to vector<256x32xf32>
    %92 = arith.subf %91, %90 : vector<256x32xf32>
    %cst_44 = arith.constant 0.000000e+00 : f32
    %93 = vector.broadcast %cst_44 : f32 to vector<256x32xf32>
    %94 = arith.cmpf oge, %64, %93 : vector<256x32xf32>
    %cst_45 = arith.constant 0.000000e+00 : f32
    %95 = vector.broadcast %cst_45 : f32 to vector<256x32xf32>
    %96 = arith.subf %95, %92 : vector<256x32xf32>
    %97 = arith.select %94, %92, %96 : vector<256x32xi1>, vector<256x32xf32>
    %cst_46 = arith.constant 1.000000e+00 : f32
    %98 = vector.broadcast %cst_46 : f32 to vector<256x32xf32>
    %99 = arith.addf %98, %97 : vector<256x32xf32>
    %100 = arith.mulf %62, %99 : vector<256x32xf32>
    %c0_47 = arith.constant 0 : index
    %c0_48 = arith.constant 0 : index
    %101 = vector.load %arg9[%c0_47, %c0_48] : memref<256x32xf32, #tpu.memory_space<vmem>>, vector<256x32xf32>
    tpu.vector_store %arg9[%c0_47, %c0_48], %100 {strides = array<i32>} : memref<256x32xf32, #tpu.memory_space<vmem>>, vector<256x32xf32>,
    return
  }
  func.func @transform_0(%arg0: i32) -> (i32, i32) {
    %c0_i32 = arith.constant 0 : i32
    %c0_i32_0 = arith.constant 0 : i32
    return %arg0, %c0_i32 : i32, i32
  }
  func.func @transform_1(%arg0: i32) -> (i32, i32) {
    %c0_i32 = arith.constant 0 : i32
    %c0_i32_0 = arith.constant 0 : i32
    return %arg0, %c0_i32 : i32, i32
  }
  func.func @transform_2(%arg0: i32) -> (i32, i32) {
    %c0_i32 = arith.constant 0 : i32
    %c0_i32_0 = arith.constant 0 : i32
    %c0_i32_1 = arith.constant 0 : i32
    return %c0_i32, %c0_i32_0 : i32, i32
  }
  func.func @transform_3(%arg0: i32) -> (i32, i32) {
    %c0_i32 = arith.constant 0 : i32
    %c0_i32_0 = arith.constant 0 : i32
    %c0_i32_1 = arith.constant 0 : i32
    return %c0_i32, %c0_i32_0 : i32, i32
  }
  func.func @transform_4(%arg0: i32) -> (i32, i32) {
    %c0_i32 = arith.constant 0 : i32
    %c0_i32_0 = arith.constant 0 : i32
    %c0_i32_1 = arith.constant 0 : i32
    return %c0_i32, %c0_i32_0 : i32, i32
  }
  func.func @transform_5(%arg0: i32) -> (i32, i32) {
    %c0_i32 = arith.constant 0 : i32
    %c0_i32_0 = arith.constant 0 : i32
    %c0_i32_1 = arith.constant 0 : i32
    return %c0_i32, %c0_i32_0 : i32, i32
  }
  func.func @transform_6(%arg0: i32) -> (i32, i32) {
    %c0_i32 = arith.constant 0 : i32
    %c0_i32_0 = arith.constant 0 : i32
    %c0_i32_1 = arith.constant 0 : i32
    return %c0_i32, %c0_i32_0 : i32, i32
  }
  func.func @transform_7(%arg0: i32) -> (i32, i32) {
    %c0_i32 = arith.constant 0 : i32
    %c0_i32_0 = arith.constant 0 : i32
    %c0_i32_1 = arith.constant 0 : i32
    return %c0_i32, %c0_i32_0 : i32, i32
  }
  func.func @transform_8(%arg0: i32) -> (i32, i32) {
    %c0_i32 = arith.constant 0 : i32
    %c0_i32_0 = arith.constant 0 : i32
    return %arg0, %c0_i32 : i32, i32
  }
}

module attributes {stable_mosaic.version = 11 : i64} {
  func.func @_fused_layer_kernel(%arg0: i32, %arg1: memref<256x32xf32, #tpu.memory_space<vmem>>, %arg2: memref<256x32xf32, #tpu.memory_space<vmem>>, %arg3: memref<32x32xbf16, #tpu.memory_space<vmem>>, %arg4: memref<1x32xf32, #tpu.memory_space<vmem>>, %arg5: memref<32x32xbf16, #tpu.memory_space<vmem>>, %arg6: memref<1x32xf32, #tpu.memory_space<vmem>>, %arg7: memref<32x32xbf16, #tpu.memory_space<vmem>>, %arg8: memref<1x32xf32, #tpu.memory_space<vmem>>, %arg9: memref<256x32xf32, #tpu.memory_space<vmem>>) attributes {dimension_semantics = [#tpu.dimension_semantics<parallel>], iteration_bounds = array<i64: 5>, scalar_prefetch = 0 : i64, scratch_operands = 0 : i64, tpu.core_type = #tpu.core_type<tc>, window_params = [{transform_indices = @transform_0, window_bounds = array<i64: 256, 32>}, {transform_indices = @transform_1, window_bounds = array<i64: 256, 32>}, {pipeline_mode = #tpu.pipeline_mode<synchronous>, transform_indices = @transform_2, window_bounds = array<i64: 32, 32>}, {pipeline_mode = #tpu.pipeline_mode<synchronous>, transform_indices = @transform_3, window_bounds = array<i64: 1, 32>}, {pipeline_mode = #tpu.pipeline_mode<synchronous>, transform_indices = @transform_4, window_bounds = array<i64: 32, 32>}, {pipeline_mode = #tpu.pipeline_mode<synchronous>, transform_indices = @transform_5, window_bounds = array<i64: 1, 32>}, {pipeline_mode = #tpu.pipeline_mode<synchronous>, transform_indices = @transform_6, window_bounds = array<i64: 32, 32>}, {pipeline_mode = #tpu.pipeline_mode<synchronous>, transform_indices = @transform_7, window_bounds = array<i64: 1, 32>}, {transform_indices = @transform_8, window_bounds = array<i64: 256, 32>}]} {
    %c0 = arith.constant 0 : index
    %c0_0 = arith.constant 0 : index
    %0 = vector.load %arg1[%c0, %c0_0] : memref<256x32xf32, #tpu.memory_space<vmem>>, vector<256x32xf32>
    %1 = arith.truncf %0 : vector<256x32xf32> to vector<256x32xbf16>
    %c0_1 = arith.constant 0 : index
    %c0_2 = arith.constant 0 : index
    %2 = vector.load %arg3[%c0_1, %c0_2] : memref<32x32xbf16, #tpu.memory_space<vmem>>, vector<32x32xbf16>
    %cst = arith.constant dense<0.000000e+00> : vector<256x32xf32>
    %3 = tpu.matmul %1, %2, %cst {dimension_numbers = #tpu.dot_dimension_numbers<[1], [0], [0], [1], [0, 0, 1, 1], [], []>} : vector<256x32xbf16>, vector<32x32xbf16>, vector<256x32xf32> -> vector<256x32xf32>
    %c0_3 = arith.constant 0 : index
    %c0_4 = arith.constant 0 : index
    %4 = vector.load %arg4[%c0_3, %c0_4] : memref<1x32xf32, #tpu.memory_space<vmem>>, vector<1x32xf32>
    %5 = vector.broadcast %4 : vector<1x32xf32> to vector<256x32xf32>
    %6 = arith.addf %3, %5 : vector<256x32xf32>
    %cst_5 = arith.constant 5.000000e-01 : f32
    %7 = vector.broadcast %cst_5 : f32 to vector<256x32xf32>
    %8 = arith.mulf %7, %6 : vector<256x32xf32>
    %cst_6 = arith.constant 0.707106769 : f32
    %9 = vector.broadcast %cst_6 : f32 to vector<256x32xf32>
    %10 = arith.mulf %6, %9 : vector<256x32xf32>
    %11 = math.absf %10 : vector<256x32xf32>
    %cst_7 = arith.constant 0.327591091 : f32
    %12 = vector.broadcast %cst_7 : f32 to vector<256x32xf32>
    %13 = arith.mulf %12, %11 : vector<256x32xf32>
    %cst_8 = arith.constant 1.000000e+00 : f32
    %14 = vector.broadcast %cst_8 : f32 to vector<256x32xf32>
    %15 = arith.addf %14, %13 : vector<256x32xf32>
    %cst_9 = arith.constant 1.000000e+00 : f32
    %16 = vector.broadcast %cst_9 : f32 to vector<256x32xf32>
    %17 = arith.divf %16, %15 : vector<256x32xf32>
    %cst_10 = arith.constant 1.06140542 : f32
    %18 = vector.broadcast %cst_10 : f32 to vector<256x32xf32>
    %19 = arith.mulf %18, %17 : vector<256x32xf32>
    %cst_11 = arith.constant -1.45315206 : f32
    %20 = vector.broadcast %cst_11 : f32 to vector<256x32xf32>
    %21 = arith.addf %19, %20 : vector<256x32xf32>
    %22 = arith.mulf %21, %17 : vector<256x32xf32>
    %cst_12 = arith.constant 1.42141378 : f32
    %23 = vector.broadcast %cst_12 : f32 to vector<256x32xf32>
    %24 = arith.addf %22, %23 : vector<256x32xf32>
    %25 = arith.mulf %24, %17 : vector<256x32xf32>
    %cst_13 = arith.constant -0.284496725 : f32
    %26 = vector.broadcast %cst_13 : f32 to vector<256x32xf32>
    %27 = arith.addf %25, %26 : vector<256x32xf32>
    %28 = arith.mulf %27, %17 : vector<256x32xf32>
    %cst_14 = arith.constant 0.254829586 : f32
    %29 = vector.broadcast %cst_14 : f32 to vector<256x32xf32>
    %30 = arith.addf %28, %29 : vector<256x32xf32>
    %31 = arith.mulf %30, %17 : vector<256x32xf32>
    %cst_15 = arith.constant 0.000000e+00 : f32
    %32 = vector.broadcast %cst_15 : f32 to vector<256x32xf32>
    %33 = arith.subf %32, %11 : vector<256x32xf32>
    %34 = arith.mulf %33, %11 : vector<256x32xf32>
    %35 = math.exp %34 : vector<256x32xf32>
    %36 = arith.mulf %31, %35 : vector<256x32xf32>
    %cst_16 = arith.constant 1.000000e+00 : f32
    %37 = vector.broadcast %cst_16 : f32 to vector<256x32xf32>
    %38 = arith.subf %37, %36 : vector<256x32xf32>
    %cst_17 = arith.constant 0.000000e+00 : f32
    %39 = vector.broadcast %cst_17 : f32 to vector<256x32xf32>
    %40 = arith.cmpf oge, %10, %39 : vector<256x32xf32>
    %cst_18 = arith.constant 0.000000e+00 : f32
    %41 = vector.broadcast %cst_18 : f32 to vector<256x32xf32>
    %42 = arith.subf %41, %38 : vector<256x32xf32>
    %43 = arith.select %40, %38, %42 : vector<256x32xi1>, vector<256x32xf32>
    %cst_19 = arith.constant 1.000000e+00 : f32
    %44 = vector.broadcast %cst_19 : f32 to vector<256x32xf32>
    %45 = arith.addf %44, %43 : vector<256x32xf32>
    %46 = arith.mulf %8, %45 : vector<256x32xf32>
    %47 = arith.truncf %46 : vector<256x32xf32> to vector<256x32xbf16>
    %c0_20 = arith.constant 0 : index
    %c0_21 = arith.constant 0 : index
    %48 = vector.load %arg5[%c0_20, %c0_21] : memref<32x32xbf16, #tpu.memory_space<vmem>>, vector<32x32xbf16>
    %cst_22 = arith.constant dense<0.000000e+00> : vector<256x32xf32>
    %49 = tpu.matmul %47, %48, %cst_22 {dimension_numbers = #tpu.dot_dimension_numbers<[1], [0], [0], [1], [0, 0, 1, 1], [], []>} : vector<256x32xbf16>, vector<32x32xbf16>, vector<256x32xf32> -> vector<256x32xf32>
    %c0_23 = arith.constant 0 : index
    %c0_24 = arith.constant 0 : index
    %50 = vector.load %arg6[%c0_23, %c0_24] : memref<1x32xf32, #tpu.memory_space<vmem>>, vector<1x32xf32>
    %51 = vector.broadcast %50 : vector<1x32xf32> to vector<256x32xf32>
    %52 = arith.addf %49, %51 : vector<256x32xf32>
    %c0_25 = arith.constant 0 : index
    %c0_26 = arith.constant 0 : index
    %53 = vector.load %arg2[%c0_25, %c0_26] : memref<256x32xf32, #tpu.memory_space<vmem>>, vector<256x32xf32>
    %54 = arith.truncf %53 : vector<256x32xf32> to vector<256x32xbf16>
    %c0_27 = arith.constant 0 : index
    %c0_28 = arith.constant 0 : index
    %55 = vector.load %arg7[%c0_27, %c0_28] : memref<32x32xbf16, #tpu.memory_space<vmem>>, vector<32x32xbf16>
    %cst_29 = arith.constant dense<0.000000e+00> : vector<256x32xf32>
    %56 = tpu.matmul %54, %55, %cst_29 {dimension_numbers = #tpu.dot_dimension_numbers<[1], [0], [0], [1], [0, 0, 1, 1], [], []>} : vector<256x32xbf16>, vector<32x32xbf16>, vector<256x32xf32> -> vector<256x32xf32>
    %c0_30 = arith.constant 0 : index
    %c0_31 = arith.constant 0 : index
    %57 = vector.load %arg8[%c0_30, %c0_31] : memref<1x32xf32, #tpu.memory_space<vmem>>, vector<1x32xf32>
    %58 = vector.broadcast %57 : vector<1x32xf32> to vector<256x32xf32>
    %59 = arith.addf %56, %58 : vector<256x32xf32>
    %60 = arith.addf %52, %59 : vector<256x32xf32>
    %c0_32 = arith.constant 0 : index
    %c0_33 = arith.constant 0 : index
    %61 = vector.load %arg9[%c0_32, %c0_33] : memref<256x32xf32, #tpu.memory_space<vmem>>, vector<256x32xf32>
    tpu.vector_store %arg9[%c0_32, %c0_33], %60 {strides = array<i32>} : memref<256x32xf32, #tpu.memory_space<vmem>>, vector<256x32xf32>,
    return
  }
  func.func @transform_0(%arg0: i32) -> (i32, i32) {
    %c0_i32 = arith.constant 0 : i32
    %c0_i32_0 = arith.constant 0 : i32
    return %arg0, %c0_i32 : i32, i32
  }
  func.func @transform_1(%arg0: i32) -> (i32, i32) {
    %c0_i32 = arith.constant 0 : i32
    %c0_i32_0 = arith.constant 0 : i32
    return %arg0, %c0_i32 : i32, i32
  }
  func.func @transform_2(%arg0: i32) -> (i32, i32) {
    %c0_i32 = arith.constant 0 : i32
    %c0_i32_0 = arith.constant 0 : i32
    %c0_i32_1 = arith.constant 0 : i32
    return %c0_i32, %c0_i32_0 : i32, i32
  }
  func.func @transform_3(%arg0: i32) -> (i32, i32) {
    %c0_i32 = arith.constant 0 : i32
    %c0_i32_0 = arith.constant 0 : i32
    %c0_i32_1 = arith.constant 0 : i32
    return %c0_i32, %c0_i32_0 : i32, i32
  }
  func.func @transform_4(%arg0: i32) -> (i32, i32) {
    %c0_i32 = arith.constant 0 : i32
    %c0_i32_0 = arith.constant 0 : i32
    %c0_i32_1 = arith.constant 0 : i32
    return %c0_i32, %c0_i32_0 : i32, i32
  }
  func.func @transform_5(%arg0: i32) -> (i32, i32) {
    %c0_i32 = arith.constant 0 : i32
    %c0_i32_0 = arith.constant 0 : i32
    %c0_i32_1 = arith.constant 0 : i32
    return %c0_i32, %c0_i32_0 : i32, i32
  }
  func.func @transform_6(%arg0: i32) -> (i32, i32) {
    %c0_i32 = arith.constant 0 : i32
    %c0_i32_0 = arith.constant 0 : i32
    %c0_i32_1 = arith.constant 0 : i32
    return %c0_i32, %c0_i32_0 : i32, i32
  }
  func.func @transform_7(%arg0: i32) -> (i32, i32) {
    %c0_i32 = arith.constant 0 : i32
    %c0_i32_0 = arith.constant 0 : i32
    %c0_i32_1 = arith.constant 0 : i32
    return %c0_i32, %c0_i32_0 : i32, i32
  }
  func.func @transform_8(%arg0: i32) -> (i32, i32) {
    %c0_i32 = arith.constant 0 : i32
    %c0_i32_0 = arith.constant 0 : i32
    return %arg0, %c0_i32 : i32, i32
  }
}

module attributes {stable_mosaic.version = 11 : i64} {
  func.func @_fused_q_kernel(%arg0: i32, %arg1: memref<128x32xf32, #tpu.memory_space<vmem>>, %arg2: memref<32x128xbf16, #tpu.memory_space<vmem>>, %arg3: memref<1x128xf32, #tpu.memory_space<vmem>>, %arg4: memref<128x128xbf16, #tpu.memory_space<vmem>>, %arg5: memref<1x128xf32, #tpu.memory_space<vmem>>, %arg6: memref<128x128xf32, #tpu.memory_space<vmem>>) attributes {dimension_semantics = [#tpu.dimension_semantics<parallel>], iteration_bounds = array<i64: 4>, scalar_prefetch = 0 : i64, scratch_operands = 0 : i64, tpu.core_type = #tpu.core_type<tc>, window_params = [{transform_indices = @transform_0, window_bounds = array<i64: 128, 32>}, {pipeline_mode = #tpu.pipeline_mode<synchronous>, transform_indices = @transform_1, window_bounds = array<i64: 32, 128>}, {pipeline_mode = #tpu.pipeline_mode<synchronous>, transform_indices = @transform_2, window_bounds = array<i64: 1, 128>}, {pipeline_mode = #tpu.pipeline_mode<synchronous>, transform_indices = @transform_3, window_bounds = array<i64: 128, 128>}, {pipeline_mode = #tpu.pipeline_mode<synchronous>, transform_indices = @transform_4, window_bounds = array<i64: 1, 128>}, {transform_indices = @transform_5, window_bounds = array<i64: 128, 128>}]} {
    %c0 = arith.constant 0 : index
    %c0_0 = arith.constant 0 : index
    %0 = vector.load %arg1[%c0, %c0_0] : memref<128x32xf32, #tpu.memory_space<vmem>>, vector<128x32xf32>
    %1 = arith.truncf %0 : vector<128x32xf32> to vector<128x32xbf16>
    %c0_1 = arith.constant 0 : index
    %c0_2 = arith.constant 0 : index
    %2 = vector.load %arg2[%c0_1, %c0_2] : memref<32x128xbf16, #tpu.memory_space<vmem>>, vector<32x128xbf16>
    %cst = arith.constant dense<0.000000e+00> : vector<128x128xf32>
    %3 = tpu.matmul %1, %2, %cst {dimension_numbers = #tpu.dot_dimension_numbers<[1], [0], [0], [1], [0, 0, 1, 1], [], []>} : vector<128x32xbf16>, vector<32x128xbf16>, vector<128x128xf32> -> vector<128x128xf32>
    %c0_3 = arith.constant 0 : index
    %c0_4 = arith.constant 0 : index
    %4 = vector.load %arg3[%c0_3, %c0_4] : memref<1x128xf32, #tpu.memory_space<vmem>>, vector<1x128xf32>
    %5 = vector.broadcast %4 : vector<1x128xf32> to vector<128x128xf32>
    %6 = arith.addf %3, %5 : vector<128x128xf32>
    %cst_5 = arith.constant 5.000000e-01 : f32
    %7 = vector.broadcast %cst_5 : f32 to vector<128x128xf32>
    %8 = arith.mulf %7, %6 : vector<128x128xf32>
    %cst_6 = arith.constant 0.707106769 : f32
    %9 = vector.broadcast %cst_6 : f32 to vector<128x128xf32>
    %10 = arith.mulf %6, %9 : vector<128x128xf32>
    %11 = math.absf %10 : vector<128x128xf32>
    %cst_7 = arith.constant 0.327591091 : f32
    %12 = vector.broadcast %cst_7 : f32 to vector<128x128xf32>
    %13 = arith.mulf %12, %11 : vector<128x128xf32>
    %cst_8 = arith.constant 1.000000e+00 : f32
    %14 = vector.broadcast %cst_8 : f32 to vector<128x128xf32>
    %15 = arith.addf %14, %13 : vector<128x128xf32>
    %cst_9 = arith.constant 1.000000e+00 : f32
    %16 = vector.broadcast %cst_9 : f32 to vector<128x128xf32>
    %17 = arith.divf %16, %15 : vector<128x128xf32>
    %cst_10 = arith.constant 1.06140542 : f32
    %18 = vector.broadcast %cst_10 : f32 to vector<128x128xf32>
    %19 = arith.mulf %18, %17 : vector<128x128xf32>
    %cst_11 = arith.constant -1.45315206 : f32
    %20 = vector.broadcast %cst_11 : f32 to vector<128x128xf32>
    %21 = arith.addf %19, %20 : vector<128x128xf32>
    %22 = arith.mulf %21, %17 : vector<128x128xf32>
    %cst_12 = arith.constant 1.42141378 : f32
    %23 = vector.broadcast %cst_12 : f32 to vector<128x128xf32>
    %24 = arith.addf %22, %23 : vector<128x128xf32>
    %25 = arith.mulf %24, %17 : vector<128x128xf32>
    %cst_13 = arith.constant -0.284496725 : f32
    %26 = vector.broadcast %cst_13 : f32 to vector<128x128xf32>
    %27 = arith.addf %25, %26 : vector<128x128xf32>
    %28 = arith.mulf %27, %17 : vector<128x128xf32>
    %cst_14 = arith.constant 0.254829586 : f32
    %29 = vector.broadcast %cst_14 : f32 to vector<128x128xf32>
    %30 = arith.addf %28, %29 : vector<128x128xf32>
    %31 = arith.mulf %30, %17 : vector<128x128xf32>
    %cst_15 = arith.constant 0.000000e+00 : f32
    %32 = vector.broadcast %cst_15 : f32 to vector<128x128xf32>
    %33 = arith.subf %32, %11 : vector<128x128xf32>
    %34 = arith.mulf %33, %11 : vector<128x128xf32>
    %35 = math.exp %34 : vector<128x128xf32>
    %36 = arith.mulf %31, %35 : vector<128x128xf32>
    %cst_16 = arith.constant 1.000000e+00 : f32
    %37 = vector.broadcast %cst_16 : f32 to vector<128x128xf32>
    %38 = arith.subf %37, %36 : vector<128x128xf32>
    %cst_17 = arith.constant 0.000000e+00 : f32
    %39 = vector.broadcast %cst_17 : f32 to vector<128x128xf32>
    %40 = arith.cmpf oge, %10, %39 : vector<128x128xf32>
    %cst_18 = arith.constant 0.000000e+00 : f32
    %41 = vector.broadcast %cst_18 : f32 to vector<128x128xf32>
    %42 = arith.subf %41, %38 : vector<128x128xf32>
    %43 = arith.select %40, %38, %42 : vector<128x128xi1>, vector<128x128xf32>
    %cst_19 = arith.constant 1.000000e+00 : f32
    %44 = vector.broadcast %cst_19 : f32 to vector<128x128xf32>
    %45 = arith.addf %44, %43 : vector<128x128xf32>
    %46 = arith.mulf %8, %45 : vector<128x128xf32>
    %47 = arith.truncf %46 : vector<128x128xf32> to vector<128x128xbf16>
    %c0_20 = arith.constant 0 : index
    %c0_21 = arith.constant 0 : index
    %48 = vector.load %arg4[%c0_20, %c0_21] : memref<128x128xbf16, #tpu.memory_space<vmem>>, vector<128x128xbf16>
    %cst_22 = arith.constant dense<0.000000e+00> : vector<128x128xf32>
    %49 = tpu.matmul %47, %48, %cst_22 {dimension_numbers = #tpu.dot_dimension_numbers<[1], [0], [0], [1], [0, 0, 1, 1], [], []>} : vector<128x128xbf16>, vector<128x128xbf16>, vector<128x128xf32> -> vector<128x128xf32>
    %c0_23 = arith.constant 0 : index
    %c0_24 = arith.constant 0 : index
    %50 = vector.load %arg5[%c0_23, %c0_24] : memref<1x128xf32, #tpu.memory_space<vmem>>, vector<1x128xf32>
    %51 = vector.broadcast %50 : vector<1x128xf32> to vector<128x128xf32>
    %52 = arith.addf %49, %51 : vector<128x128xf32>
    %c0_25 = arith.constant 0 : index
    %c0_26 = arith.constant 0 : index
    %53 = vector.load %arg6[%c0_25, %c0_26] : memref<128x128xf32, #tpu.memory_space<vmem>>, vector<128x128xf32>
    tpu.vector_store %arg6[%c0_25, %c0_26], %52 {strides = array<i32>} : memref<128x128xf32, #tpu.memory_space<vmem>>, vector<128x128xf32>,
    return
  }
  func.func @transform_0(%arg0: i32) -> (i32, i32) {
    %c0_i32 = arith.constant 0 : i32
    %c0_i32_0 = arith.constant 0 : i32
    return %arg0, %c0_i32 : i32, i32
  }
  func.func @transform_1(%arg0: i32) -> (i32, i32) {
    %c0_i32 = arith.constant 0 : i32
    %c0_i32_0 = arith.constant 0 : i32
    %c0_i32_1 = arith.constant 0 : i32
    return %c0_i32, %c0_i32_0 : i32, i32
  }
  func.func @transform_2(%arg0: i32) -> (i32, i32) {
    %c0_i32 = arith.constant 0 : i32
    %c0_i32_0 = arith.constant 0 : i32
    %c0_i32_1 = arith.constant 0 : i32
    return %c0_i32, %c0_i32_0 : i32, i32
  }
  func.func @transform_3(%arg0: i32) -> (i32, i32) {
    %c0_i32 = arith.constant 0 : i32
    %c0_i32_0 = arith.constant 0 : i32
    %c0_i32_1 = arith.constant 0 : i32
    return %c0_i32, %c0_i32_0 : i32, i32
  }
  func.func @transform_4(%arg0: i32) -> (i32, i32) {
    %c0_i32 = arith.constant 0 : i32
    %c0_i32_0 = arith.constant 0 : i32
    %c0_i32_1 = arith.constant 0 : i32
    return %c0_i32, %c0_i32_0 : i32, i32
  }
  func.func @transform_5(%arg0: i32) -> (i32, i32) {
    %c0_i32 = arith.constant 0 : i32
    %c0_i32_0 = arith.constant 0 : i32
    return %arg0, %c0_i32 : i32, i32
  }
}

</mosaic_0001>

<bundles_post_ra>
// kernel: _lambda_.10
= control target key start
LH: loop header
LB: loop body
LE: loop exit
PB: predicated region body
PF: predicated region fallthrough
CT: control target
= control target key end

     0   :  { %8 = vsyncpa [#allocation3], 0  ;;  %s678_s0 = inlined_call_operand.vmem [shape: f32[512,3], index: 0, kind: input, shape index: {}]   ;;  %s679_s1 = inlined_call_operand.hbm [shape: bf16[3,32], index: 1, kind: input, shape index: {}]   ;;  %s680_s2 = inlined_call_operand.hbm [shape: f32[1,32], index: 2, kind: input, shape index: {}]   ;;  %s681_s3 = inlined_call_operand.vmem [shape: f32[512,32], index: 3, kind: output, shape index: {}]  }
   0x1   :  { %9 = vsyncpa [#allocation5], 0  ;;  %s566_s12 = smov 0  }
   0x2 LB: > { %s126_s15 = sshll.u32 %s679_s1, 4  ;;  %s410_s16 = sadd.s32 4294967295, %s541_s12   ;;  %s541_s12 = sphi %s566_s12, %s15_s12   ;;  %s127_s15 = int_to_ptr.hbm [resolvable:$true] %s126_s15 }
   0x3   : > { %p412_p0 = scmp.ge.s32.totalorder %s541_s12, 1  ;;  %p114_p1 = scmp.lt.s32.totalorder %s541_s12, 5 }
   0x4   : > { %p577_p2 = scmp.eq.s32.totalorder %s410_s16, 0  ;;  %s543_s19 = smov [#allocation2]  }
   0x5   : > { %p581_p3 = pnand %p412_p0, %p114_p1  ;;  %s128_s20 = sshll.u32 %s543_s19, 4  ;;  %s129_s20 = int_to_ptr.vmem [resolvable:$true] %s128_s20 }
   0x6   : > { %s138_s23 = sshll.u32 %s680_s2, 4  ;;  %s544_s24 = smov [#allocation4]   ;;  %s139_s23 = int_to_ptr.hbm [resolvable:$true] %s138_s23 }
   0x7   : > { %p444_p4 = pneg %p581_p3  ;;  %s140_s25 = sshll.u32 %s544_s24, 4  ;;  %s141_s25 = int_to_ptr.vmem [resolvable:$true] %s140_s25 }
   0x8   : > { %162 = sbr.rel (%p581_p3) target bundleno = 187 (0xbb), region = 32 }
   0x9   : > { %p445_p5 = pnand %p577_p2, %p444_p4 }
   0xb   : > { %447 = dma.hbm_to_vmem [thread:$0]  (!%p445_p5), %s127_s15, 32, %s129_s20, [#allocation3]  }
   0xc   : > { %450 = dma.hbm_to_vmem [thread:$0]  (!%p445_p5), %s139_s23, 16, %s141_s25, [#allocation5]  }
   0xd   : > { %532 = dma.done.wait (%p577_p2), [#allocation3], 32  }
   0xe   : > { %534 = vsyncadd (%p577_p2), [#allocation3], 4294967264 }
   0xf   : > { %536 = dma.done.wait (%p577_p2), [#allocation5], 16  }
  0x10   : > { %538 = vsyncadd (%p577_p2), [#allocation5], 4294967280  ;;  %vm259_vm0 = vcmask 1040384   ;;  %s419_s26 = sshll.u32 %s410_s16, 4  ;;  %vm260_vm1 = vcmask 1041408   ;;  %v545_v0 = vmov 65535  }
  0x11   : > { %p193_p6 = scmp.lt.s32.totalorder %s419_s26, 63  ;;  %v261_v1 = vsel %vm259_vm0, 4294967295, %v545_v0  ;;  %v229_v3 = vld [vmem:[#allocation2] sm:$0x3]  ;;  %vm234_vm2 = vcmask 23552   ;;  %vm315_vm3 = vcmask 261120  }
  0x12   : > { %v262_v2 = vsel %vm260_vm1, %v261_v1, 0  ;;  %v466_v29 = vld [vmem:[#allocation4] ss:$0 sm:$0xff] }
  0x13   : > { %s685_s26 = smov (!%p193_p6, %s419_s26), 63  ;;  %v264_v6 = vand.u32 %v262_v2, %v229_v3 }
  0x14   : > { %s420_s27 = sshll.u32 %s685_s26, 3 }
  0x15   : > { %s610_s30 = scalar_lea.vmem %s678_s0, %s420_s27  ;;  %273 = vmatpush.bf16.msra.mxu0 %v264_v6  ;;  %433 = vmatpush.bf16.msra.mxu1 %v264_v6  ;;  %s641_s6 = scalar_lea.vmem %s681_s3, %s420_s27 }
  0x16   : > { %v205_v4 = vld [vmem:[%s610_s30] sm:$0xff]  ;;  %v206_v5 = vld [vmem:[%s610_s30 + $0x8] sm:$0xff]  ;;  %434 = vmatpush.bf16.msra.mxu2 %v264_v6  ;;  %435 = vmatpush.bf16.msra.mxu3 %v264_v6  ;;  %v207_v17 = vld [vmem:[%s610_s30 + $0x10] sm:$0xff] }
  0x17   : > { %v209_v7 = vld [vmem:[%s610_s30 + $0x20] sm:$0xff]  ;;  %v210_v8 = vld [vmem:[%s610_s30 + $0x28] sm:$0xff]  ;;  %v221_v10 = vpack.c.bf16 %v206_v5, %v205_v4  ;;  %v208_v18 = vld [vmem:[%s610_s30 + $0x18] sm:$0xff] }
  0x18   : > { %v213_v9 = vld [vmem:[%s610_s30 + $0x40] sm:$0xff]  ;;  %v223_v11 = vpack.c.bf16 %v210_v8, %v209_v7  ;;  %v214_v12 = vld [vmem:[%s610_s30 + $0x48] sm:$0xff]  ;;  %v211_v19 = vld [vmem:[%s610_s30 + $0x30] sm:$0xff]  ;;  %v222_v25 = vpack.c.bf16 %v208_v18, %v207_v17 }
  0x19   : > { %v217_v13 = vld [vmem:[%s610_s30 + $0x60] sm:$0xff]  ;;  %v218_v14 = vld [vmem:[%s610_s30 + $0x68] sm:$0xff]  ;;  %v225_v15 = vpack.c.bf16 %v214_v12, %v213_v9  ;;  %423 = vmatmul.msk.bf16.vlgmr.msra.gmra.mxu0 %vm234_vm2, %v221_v10  ;;  %v212_v20 = vld [vmem:[%s610_s30 + $0x38] sm:$0xff] }
  0x1a   : > { %v227_v16 = vpack.c.bf16 %v218_v14, %v217_v13  ;;  %425 = vmatmul.msk.bf16.vlgmr.msra.gmra.mxu1 %vm234_vm2, %v223_v11  ;;  %v215_v21 = vld [vmem:[%s610_s30 + $0x50] sm:$0xff]  ;;  %v216_v22 = vld [vmem:[%s610_s30 + $0x58] sm:$0xff]  ;;  %v224_v26 = vpack.c.bf16 %v212_v20, %v211_v19 }
  0x1b   : > { %427 = vmatmul.msk.bf16.vlgmr.msra.gmra.mxu2 %vm234_vm2, %v225_v15  ;;  %v219_v23 = vld [vmem:[%s610_s30 + $0x70] sm:$0xff]  ;;  %v220_v24 = vld [vmem:[%s610_s30 + $0x78] sm:$0xff]  ;;  %v226_v27 = vpack.c.bf16 %v216_v22, %v215_v21 }
  0x1c   : > { %429 = vmatmul.msk.bf16.vlgmr.msra.gmra.mxu3 %vm234_vm2, %v227_v16  ;;  %v228_v28 = vpack.c.bf16 %v220_v24, %v219_v23 }
  0x29   : > { %424 = vmatmul.msk.bf16.gmra.mxu0 %vm234_vm2, %v222_v25 }
  0x2a   : > { %426 = vmatmul.msk.bf16.gmra.mxu1 %vm234_vm2, %v224_v26 }
  0x2b   : > { %428 = vmatmul.msk.bf16.gmra.mxu2 %vm234_vm2, %v226_v27 }
  0x2c   : > { %430 = vmatmul.msk.bf16.gmra.mxu3 %vm234_vm2, %v228_v28 }
  0x96   : > { %v275_v30 = vpop.f32.mrf.mxu0 }
  0x97   : > { %v285_v31 = vpop.f32.mrf.mxu1  ;;  %v276_v32 = vadd.f32 %v466_v29, %v275_v30 }
  0x98   : > { %v286_v33 = vadd.f32 %v466_v29, %v285_v31 }
  0x99   : > { %316 = vst.msk [vmem:[%s641_s6] sm:$0xff] %vm315_vm3, %v276_v32 }
  0x9a   : > { %320 = vst.msk [vmem:[%s641_s6 + $0x20] sm:$0xff] %vm315_vm3, %v286_v33 }
  0x9e   : > { %v295_v34 = vpop.f32.mrf.mxu2  ;;  %v277_v38 = vpop.f32.mrf.mxu0 }
  0x9f   : > { %v305_v35 = vpop.f32.mrf.mxu3  ;;  %v296_v36 = vadd.f32 %v466_v29, %v295_v34  ;;  %v287_v39 = vpop.f32.mrf.mxu1  ;;  %v278_v40 = vadd.f32 %v466_v29, %v277_v38 }
  0xa0   : > { %v306_v37 = vadd.f32 %v466_v29, %v305_v35  ;;  %v288_v41 = vadd.f32 %v466_v29, %v287_v39 }
  0xa1   : > { %324 = vst.msk [vmem:[%s641_s6 + $0x40] sm:$0xff] %vm315_vm3, %v296_v36 }
  0xa2   : > { %328 = vst.msk [vmem:[%s641_s6 + $0x60] sm:$0xff] %vm315_vm3, %v306_v37 }
  0xa3   : > { %317 = vst.msk [vmem:[%s641_s6 + $0x8] sm:$0xff] %vm315_vm3, %v278_v40 }
  0xa4   : > { %321 = vst.msk [vmem:[%s641_s6 + $0x28] sm:$0xff] %vm315_vm3, %v288_v41 }
  0xa6   : > { %v297_v42 = vpop.f32.mrf.mxu2  ;;  %v280_v46 = vpop.f32.mrf.mxu0 }
  0xa7   : > { %v307_v43 = vpop.f32.mrf.mxu3  ;;  %v298_v44 = vadd.f32 %v466_v29, %v297_v42  ;;  %v290_v47 = vpop.f32.mrf.mxu1  ;;  %v281_v48 = vadd.f32 %v466_v29, %v280_v46 }
  0xa8   : > { %v308_v45 = vadd.f32 %v466_v29, %v307_v43  ;;  %v291_v49 = vadd.f32 %v466_v29, %v290_v47 }
  0xa9   : > { %325 = vst.msk [vmem:[%s641_s6 + $0x48] sm:$0xff] %vm315_vm3, %v298_v44 }
  0xaa   : > { %329 = vst.msk [vmem:[%s641_s6 + $0x68] sm:$0xff] %vm315_vm3, %v308_v45 }
  0xab   : > { %318 = vst.msk [vmem:[%s641_s6 + $0x10] sm:$0xff] %vm315_vm3, %v281_v48 }
  0xac   : > { %322 = vst.msk [vmem:[%s641_s6 + $0x30] sm:$0xff] %vm315_vm3, %v291_v49 }
  0xae   : > { %v300_v50 = vpop.f32.mrf.mxu2  ;;  %v282_v54 = vpop.f32.mrf.mxu0 }
  0xaf   : > { %v310_v51 = vpop.f32.mrf.mxu3  ;;  %v301_v52 = vadd.f32 %v466_v29, %v300_v50  ;;  %v292_v55 = vpop.f32.mrf.mxu1  ;;  %v283_v56 = vadd.f32 %v466_v29, %v282_v54 }
  0xb0   : > { %v311_v53 = vadd.f32 %v466_v29, %v310_v51  ;;  %v293_v57 = vadd.f32 %v466_v29, %v292_v55 }
  0xb1   : > { %326 = vst.msk [vmem:[%s641_s6 + $0x50] sm:$0xff] %vm315_vm3, %v301_v52 }
  0xb2   : > { %330 = vst.msk [vmem:[%s641_s6 + $0x70] sm:$0xff] %vm315_vm3, %v311_v53 }
  0xb3   : > { %319 = vst.msk [vmem:[%s641_s6 + $0x18] sm:$0xff] %vm315_vm3, %v283_v56 }
  0xb4   : > { %323 = vst.msk [vmem:[%s641_s6 + $0x38] sm:$0xff] %vm315_vm3, %v293_v57 }
  0xb6   : > { %v302_v58 = vpop.f32.mrf.mxu2 }
  0xb7   : > { %v312_v59 = vpop.f32.mrf.mxu3  ;;  %v303_v60 = vadd.f32 %v466_v29, %v302_v58 }
  0xb8   : > { %v313_v61 = vadd.f32 %v466_v29, %v312_v59 }
  0xb9   : > { %327 = vst.msk [vmem:[%s641_s6 + $0x58] sm:$0xff] %vm315_vm3, %v303_v60 }
  0xba   : > { %331 = vst.msk [vmem:[%s641_s6 + $0x78] sm:$0xff] %vm315_vm3, %v313_v61 }
  0xbb PF: > { %s15_s12 = sadd.s32 1, %s541_s12  }
  0xbc   : > { %p12_p7 = scmp.ge.s32.totalorder %s15_s12, 6  }
  0xbe   :  { %14 = sbr.rel (!%p12_p7) target bundleno = 2 (0x2), region = 71 }
  0xc3   :  { %354 = vsyncpa [#allocation3], 1 }
  0xc4   :  { %356 = vsyncpa [#allocation3 + $0x1], 1 }
  0xc5   :  { %357 = vsyncpa [#allocation5], 1 }

// kernel: _lambda_.11
= control target key start
LH: loop header
LB: loop body
LE: loop exit
PB: predicated region body
PF: predicated region fallthrough
CT: control target
= control target key end

     0   :  { %s2560_s9 = smov 0   ;;  %s2815_s0 = inlined_call_operand.vmem [shape: bf16[128,8,64], index: 0, kind: input, shape index: {}]   ;;  %s2816_s1 = inlined_call_operand.vmem [shape: bf16[128,64,128], index: 1, kind: input, shape index: {}]   ;;  %s2817_s2 = inlined_call_operand.vmem [shape: f32[128,8,128], index: 2, kind: output, shape index: {}]  }
   0x1 LB: > { %s1842_s10 = sadd.s32 4294967295, %s2543_s9   ;;  %p1846_p0 = scmp.ge.s32.totalorder %s2543_s9, 1  ;;  %s2543_s9 = sphi %s2560_s9, %s12_s9  }
   0x2   : > { %p125_p1 = scmp.lt.s32.totalorder %s2543_s9, 5 }
   0x4   : > { %p126_p2 = pnand %p1846_p0, %p125_p1 }
   0x5   : > { %s1847_s11 = sshll.u32 (!%p126_p2), %s1842_s10, 5 }
   0x6   : > { %129 = sbr.rel (%p126_p2) target bundleno = 285 (0x11d), region = 28  ;;  %p154_p3 = scmp.lt.s32.totalorder (!%p126_p2), %s1847_s11, 127 }
   0xb   : > { %s2819_s11 = smov (!%p154_p3, %s1847_s11), 127  ;;  %vm485_vm0 = vcmask 523264  }
   0xc   : > { %s2400_s12 = sshll.u32 %s2819_s11, 5  ;;  %s1848_s16 = sshll.u32 %s2819_s11, 2 }
   0xd   : > { %s2574_s15 = scalar_lea.vmem %s2816_s1, %s2400_s12  ;;  %s2596_s19 = scalar_lea.vmem %s2815_s0, %s1848_s16 }
   0xe   : > { %v2404_v0 = vld [vmem:[%s2574_s15 + $0x18] sm:$0xff]  ;;  %v2403_v4 = vld [vmem:[%s2574_s15 + $0x10] sm:$0xff]  ;;  %v2402_v8 = vld [vmem:[%s2574_s15 + $0x8] sm:$0xff]  ;;  %s1853_s20 = sshll.u32 %s2819_s11, 3 }
   0xf   : > { %v2408_v1 = vld [vmem:[%s2574_s15 + $0x38] sm:$0xff]  ;;  %493 = vmatpush.bf16.msra.mxu0 %v2404_v0  ;;  %v2407_v5 = vld [vmem:[%s2574_s15 + $0x30] sm:$0xff]  ;;  %v2406_v9 = vld [vmem:[%s2574_s15 + $0x28] sm:$0xff]  ;;  %s2778_s23 = scalar_lea.vmem %s2817_s2, %s1853_s20 }
  0x10   : > { %v2412_v2 = vld [vmem:[%s2574_s15 + $0x58] sm:$0xff]  ;;  %533 = vmatpush.bf16.msra.mxu1 %v2408_v1  ;;  %v2411_v6 = vld [vmem:[%s2574_s15 + $0x50] sm:$0xff]  ;;  %v2410_v10 = vld [vmem:[%s2574_s15 + $0x48] sm:$0xff] }
  0x11   : > { %v2416_v3 = vld [vmem:[%s2574_s15 + $0x78] sm:$0xff]  ;;  %573 = vmatpush.bf16.msra.mxu2 %v2412_v2  ;;  %v2415_v7 = vld [vmem:[%s2574_s15 + $0x70] sm:$0xff]  ;;  %v2414_v11 = vld [vmem:[%s2574_s15 + $0x68] sm:$0xff] }
  0x12   : > { %613 = vmatpush.bf16.msra.mxu3 %v2416_v3  ;;  %v2401_v12 = vld [vmem:[%s2574_s15] sm:$0xff]  ;;  %v2428_v16 = vld [vmem:[%s2574_s15 + $0xd8] sm:$0xff]  ;;  %v175_v20 = vld [vmem:[%s2596_s19 + $0x8] sm:$0xf] }
  0x13   : > { %494 = vmatpush.bf16.msra.mxu0 %v2403_v4  ;;  %v2405_v13 = vld [vmem:[%s2574_s15 + $0x20] sm:$0xff]  ;;  %v2432_v17 = vld [vmem:[%s2574_s15 + $0xf8] sm:$0xff]  ;;  %v176_v21 = vld [vmem:[%s2596_s19 + $0xc] sm:$0xf] }
  0x14   : > { %534 = vmatpush.bf16.msra.mxu1 %v2407_v5  ;;  %v2409_v14 = vld [vmem:[%s2574_s15 + $0x40] sm:$0xff]  ;;  %v2420_v22 = vld [vmem:[%s2574_s15 + $0x98] sm:$0xff]  ;;  %v2427_v24 = vld [vmem:[%s2574_s15 + $0xd0] sm:$0xff] }
  0x15   : > { %574 = vmatpush.bf16.msra.mxu2 %v2411_v6  ;;  %v2413_v15 = vld [vmem:[%s2574_s15 + $0x60] sm:$0xff]  ;;  %v2424_v23 = vld [vmem:[%s2574_s15 + $0xb8] sm:$0xff]  ;;  %v2431_v25 = vld [vmem:[%s2574_s15 + $0xf0] sm:$0xff] }
  0x16   : > { %614 = vmatpush.bf16.msra.mxu3 %v2415_v7  ;;  %v173_v18 = vld [vmem:[%s2596_s19] sm:$0xf]  ;;  %v174_v19 = vld [vmem:[%s2596_s19 + $0x4] sm:$0xf]  ;;  %v2419_v26 = vld [vmem:[%s2574_s15 + $0x90] sm:$0xff] }
  0x17   : > { %495 = vmatpush.bf16.msra.mxu0 %v2402_v8  ;;  %v2423_v27 = vld [vmem:[%s2574_s15 + $0xb0] sm:$0xff]  ;;  %v2426_v28 = vld [vmem:[%s2574_s15 + $0xc8] sm:$0xff]  ;;  %v2425_v32 = vld [vmem:[%s2574_s15 + $0xc0] sm:$0xff] }
  0x18   : > { %535 = vmatpush.bf16.msra.mxu1 %v2406_v9  ;;  %v2430_v29 = vld [vmem:[%s2574_s15 + $0xe8] sm:$0xff]  ;;  %v2429_v33 = vld [vmem:[%s2574_s15 + $0xe0] sm:$0xff]  ;;  %v2444_v34 = vld [vmem:[%s2574_s15 + $0x158] sm:$0xff] }
  0x19   : > { %575 = vmatpush.bf16.msra.mxu2 %v2410_v10  ;;  %v2418_v30 = vld [vmem:[%s2574_s15 + $0x88] sm:$0xff]  ;;  %v2448_v35 = vld [vmem:[%s2574_s15 + $0x178] sm:$0xff]  ;;  %v2417_v36 = vld [vmem:[%s2574_s15 + $0x80] sm:$0xff] }
  0x1a   : > { %615 = vmatpush.bf16.msra.mxu3 %v2414_v11  ;;  %v2422_v31 = vld [vmem:[%s2574_s15 + $0xa8] sm:$0xff]  ;;  %v2421_v37 = vld [vmem:[%s2574_s15 + $0xa0] sm:$0xff]  ;;  %v2436_v38 = vld [vmem:[%s2574_s15 + $0x118] sm:$0xff] }
  0x1b   : > { %496 = vmatpush.bf16.msra.mxu0 %v2401_v12  ;;  %v2440_v39 = vld [vmem:[%s2574_s15 + $0x138] sm:$0xff]  ;;  %v2443_v40 = vld [vmem:[%s2574_s15 + $0x150] sm:$0xff]  ;;  %v2442_v48 = vld [vmem:[%s2574_s15 + $0x148] sm:$0xff] }
  0x1c   : > { %536 = vmatpush.bf16.msra.mxu1 %v2405_v13  ;;  %v2447_v41 = vld [vmem:[%s2574_s15 + $0x170] sm:$0xff]  ;;  %v179_v44 = vld [vmem:[%s2596_s19 + $0x18] sm:$0xf]  ;;  %v180_v45 = vld [vmem:[%s2596_s19 + $0x1c] sm:$0xf] }
  0x1d   : > { %576 = vmatpush.bf16.msra.mxu2 %v2409_v14  ;;  %v177_v42 = vld [vmem:[%s2596_s19 + $0x10] sm:$0xf]  ;;  %v178_v43 = vld [vmem:[%s2596_s19 + $0x14] sm:$0xf]  ;;  %v2446_v49 = vld [vmem:[%s2574_s15 + $0x168] sm:$0xff] }
  0x1e   : > { %616 = vmatpush.bf16.msra.mxu3 %v2413_v15  ;;  %1870 = vmatmul.msk.bf16.vlgmr.msra.gmra.mxu0 %vm485_vm0, %v173_v18  ;;  %v2435_v46 = vld [vmem:[%s2574_s15 + $0x110] sm:$0xff]  ;;  %v2434_v50 = vld [vmem:[%s2574_s15 + $0x108] sm:$0xff]  ;;  %v2441_v52 = vld [vmem:[%s2574_s15 + $0x140] sm:$0xff] }
  0x1f   : > { %1887 = vmatmul.msk.bf16.vlgmr.msra.gmra.mxu1 %vm485_vm0, %v174_v19  ;;  %653 = vmatpush.bf16.msrb.mxu0 %v2420_v22  ;;  %v2439_v47 = vld [vmem:[%s2574_s15 + $0x130] sm:$0xff]  ;;  %v2438_v51 = vld [vmem:[%s2574_s15 + $0x128] sm:$0xff]  ;;  %v2445_v53 = vld [vmem:[%s2574_s15 + $0x160] sm:$0xff] }
  0x20   : > { %1904 = vmatmul.msk.bf16.vlgmr.msra.gmra.mxu2 %vm485_vm0, %v175_v20  ;;  %693 = vmatpush.bf16.msrb.mxu1 %v2424_v23  ;;  %v2460_v54 = vld [vmem:[%s2574_s15 + $0x1d8] sm:$0xff]  ;;  %v2433_v56 = vld [vmem:[%s2574_s15 + $0x100] sm:$0xff]  ;;  %v2459_v60 = vld [vmem:[%s2574_s15 + $0x1d0] sm:$0xff] }
  0x21   : > { %733 = vmatpush.bf16.msrb.mxu2 %v2428_v16  ;;  %1921 = vmatmul.msk.bf16.vlgmr.msra.gmra.mxu3 %vm485_vm0, %v176_v21  ;;  %v2464_v55 = vld [vmem:[%s2574_s15 + $0x1f8] sm:$0xff]  ;;  %v2437_v57 = vld [vmem:[%s2574_s15 + $0x120] sm:$0xff]  ;;  %v2463_v61 = vld [vmem:[%s2574_s15 + $0x1f0] sm:$0xff] }
  0x22   : > { %773 = vmatpush.bf16.msrb.mxu3 %v2432_v17  ;;  %v2452_v58 = vld [vmem:[%s2574_s15 + $0x198] sm:$0xff]  ;;  %v2451_v62 = vld [vmem:[%s2574_s15 + $0x190] sm:$0xff]  ;;  %v181_v0 = vld [vmem:[%s2596_s19 + $0x20] sm:$0xf] }
  0x23   : > { %654 = vmatpush.bf16.msrb.mxu0 %v2419_v26  ;;  %v2456_v59 = vld [vmem:[%s2574_s15 + $0x1b8] sm:$0xff]  ;;  %v2455_v63 = vld [vmem:[%s2574_s15 + $0x1b0] sm:$0xff]  ;;  %v182_v1 = vld [vmem:[%s2596_s19 + $0x24] sm:$0xf] }
  0x24   : > { %694 = vmatpush.bf16.msrb.mxu1 %v2423_v27  ;;  %v183_v2 = vld [vmem:[%s2596_s19 + $0x28] sm:$0xf]  ;;  %v184_v3 = vld [vmem:[%s2596_s19 + $0x2c] sm:$0xf]  ;;  %v2457_v8 = vld [vmem:[%s2574_s15 + $0x1c0] sm:$0xff] }
  0x25   : > { %734 = vmatpush.bf16.msrb.mxu2 %v2427_v24  ;;  %v2458_v4 = vld [vmem:[%s2574_s15 + $0x1c8] sm:$0xff]  ;;  %v2461_v9 = vld [vmem:[%s2574_s15 + $0x1e0] sm:$0xff]  ;;  %v2476_v12 = vld [vmem:[%s2574_s15 + $0x258] sm:$0xff] }
  0x26   : > { %774 = vmatpush.bf16.msrb.mxu3 %v2431_v25  ;;  %v2462_v5 = vld [vmem:[%s2574_s15 + $0x1e8] sm:$0xff]  ;;  %v2449_v10 = vld [vmem:[%s2574_s15 + $0x180] sm:$0xff]  ;;  %v2480_v13 = vld [vmem:[%s2574_s15 + $0x278] sm:$0xff] }
  0x27   : > { %655 = vmatpush.bf16.msrb.mxu0 %v2418_v30  ;;  %v2450_v6 = vld [vmem:[%s2574_s15 + $0x188] sm:$0xff]  ;;  %v2453_v11 = vld [vmem:[%s2574_s15 + $0x1a0] sm:$0xff]  ;;  %v2468_v14 = vld [vmem:[%s2574_s15 + $0x218] sm:$0xff] }
  0x28   : > { %695 = vmatpush.bf16.msrb.mxu1 %v2422_v31  ;;  %v2454_v7 = vld [vmem:[%s2574_s15 + $0x1a8] sm:$0xff]  ;;  %v2472_v15 = vld [vmem:[%s2574_s15 + $0x238] sm:$0xff]  ;;  %v2475_v16 = vld [vmem:[%s2574_s15 + $0x250] sm:$0xff] }
  0x29   : > { %735 = vmatpush.bf16.msrb.mxu2 %v2426_v28  ;;  %v2479_v17 = vld [vmem:[%s2574_s15 + $0x270] sm:$0xff]  ;;  %v187_v22 = vld [vmem:[%s2596_s19 + $0x38] sm:$0xf]  ;;  %v188_v23 = vld [vmem:[%s2596_s19 + $0x3c] sm:$0xf] }
  0x2a   : > { %775 = vmatpush.bf16.msrb.mxu3 %v2430_v29  ;;  %v2467_v18 = vld [vmem:[%s2574_s15 + $0x210] sm:$0xff]  ;;  %v2474_v24 = vld [vmem:[%s2574_s15 + $0x248] sm:$0xff]  ;;  %v2473_v28 = vld [vmem:[%s2574_s15 + $0x240] sm:$0xff] }
  0x2b   : > { %656 = vmatpush.bf16.msrb.mxu0 %v2417_v36  ;;  %v2471_v19 = vld [vmem:[%s2574_s15 + $0x230] sm:$0xff]  ;;  %v2478_v25 = vld [vmem:[%s2574_s15 + $0x268] sm:$0xff]  ;;  %v2477_v29 = vld [vmem:[%s2574_s15 + $0x260] sm:$0xff] }
  0x2c   : > { %696 = vmatpush.bf16.msrb.mxu1 %v2421_v37  ;;  %v185_v20 = vld [vmem:[%s2596_s19 + $0x30] sm:$0xf]  ;;  %v186_v21 = vld [vmem:[%s2596_s19 + $0x34] sm:$0xf]  ;;  %v2466_v26 = vld [vmem:[%s2574_s15 + $0x208] sm:$0xff] }
  0x2d   : > { %736 = vmatpush.bf16.msrb.mxu2 %v2425_v32  ;;  %v2470_v27 = vld [vmem:[%s2574_s15 + $0x228] sm:$0xff]  ;;  %v2465_v30 = vld [vmem:[%s2574_s15 + $0x200] sm:$0xff]  ;;  %v2492_v32 = vld [vmem:[%s2574_s15 + $0x2d8] sm:$0xff] }
  0x2e   : > { %776 = vmatpush.bf16.msrb.mxu3 %v2429_v33  ;;  %1938 = vmatmul.msk.bf16.vlgmr.msrb.gmra.mxu0 %vm485_vm0, %v177_v42  ;;  %v2469_v31 = vld [vmem:[%s2574_s15 + $0x220] sm:$0xff]  ;;  %v2496_v33 = vld [vmem:[%s2574_s15 + $0x2f8] sm:$0xff]  ;;  %v2491_v36 = vld [vmem:[%s2574_s15 + $0x2d0] sm:$0xff] }
  0x2f   : > { %813 = vmatpush.bf16.msra.mxu0 %v2436_v38  ;;  %1955 = vmatmul.msk.bf16.vlgmr.msrb.gmra.mxu1 %vm485_vm0, %v178_v43  ;;  %v2495_v37 = vld [vmem:[%s2574_s15 + $0x2f0] sm:$0xff]  ;;  %v191_v42 = vld [vmem:[%s2596_s19 + $0x48] sm:$0xf]  ;;  %v192_v43 = vld [vmem:[%s2596_s19 + $0x4c] sm:$0xf] }
  0x30   : > { %853 = vmatpush.bf16.msra.mxu1 %v2440_v39  ;;  %1972 = vmatmul.msk.bf16.vlgmr.msrb.gmra.mxu2 %vm485_vm0, %v179_v44  ;;  %v2483_v38 = vld [vmem:[%s2574_s15 + $0x290] sm:$0xff]  ;;  %v2490_v44 = vld [vmem:[%s2574_s15 + $0x2c8] sm:$0xff] }
  0x31   : > { %893 = vmatpush.bf16.msra.mxu2 %v2444_v34  ;;  %1989 = vmatmul.msk.bf16.vlgmr.msrb.gmra.mxu3 %vm485_vm0, %v180_v45  ;;  %v2484_v34 = vld [vmem:[%s2574_s15 + $0x298] sm:$0xff]  ;;  %v2487_v39 = vld [vmem:[%s2574_s15 + $0x2b0] sm:$0xff]  ;;  %v2494_v45 = vld [vmem:[%s2574_s15 + $0x2e8] sm:$0xff] }
  0x32   : > { %933 = vmatpush.bf16.msra.mxu3 %v2448_v35  ;;  %v2488_v35 = vld [vmem:[%s2574_s15 + $0x2b8] sm:$0xff] }
  0x33   : > { %814 = vmatpush.bf16.msra.mxu0 %v2435_v46  ;;  %v2482_v46 = vld [vmem:[%s2574_s15 + $0x288] sm:$0xff] }
  0x34   : > { %854 = vmatpush.bf16.msra.mxu1 %v2439_v47  ;;  %v2486_v47 = vld [vmem:[%s2574_s15 + $0x2a8] sm:$0xff] }
  0x35   : > { %894 = vmatpush.bf16.msra.mxu2 %v2443_v40  ;;  %v189_v40 = vld [vmem:[%s2596_s19 + $0x40] sm:$0xf] }
  0x36   : > { %934 = vmatpush.bf16.msra.mxu3 %v2447_v41  ;;  %v190_v41 = vld [vmem:[%s2596_s19 + $0x44] sm:$0xf] }
  0x37   : > { %815 = vmatpush.bf16.msra.mxu0 %v2434_v50  ;;  %v2481_v50 = vld [vmem:[%s2574_s15 + $0x280] sm:$0xff] }
  0x38   : > { %855 = vmatpush.bf16.msra.mxu1 %v2438_v51  ;;  %v2485_v51 = vld [vmem:[%s2574_s15 + $0x2a0] sm:$0xff] }
  0x39   : > { %895 = vmatpush.bf16.msra.mxu2 %v2442_v48  ;;  %v2489_v48 = vld [vmem:[%s2574_s15 + $0x2c0] sm:$0xff] }
  0x3a   : > { %935 = vmatpush.bf16.msra.mxu3 %v2446_v49  ;;  %v2493_v49 = vld [vmem:[%s2574_s15 + $0x2e0] sm:$0xff] }
  0x3b   : > { %816 = vmatpush.bf16.msra.mxu0 %v2433_v56  ;;  %v2507_v56 = vld [vmem:[%s2574_s15 + $0x350] sm:$0xff] }
  0x3c   : > { %856 = vmatpush.bf16.msra.mxu1 %v2437_v57  ;;  %v2511_v57 = vld [vmem:[%s2574_s15 + $0x370] sm:$0xff] }
  0x3d   : > { %896 = vmatpush.bf16.msra.mxu2 %v2441_v52  ;;  %v2508_v52 = vld [vmem:[%s2574_s15 + $0x358] sm:$0xff] }
  0x3e   : > { %936 = vmatpush.bf16.msra.mxu3 %v2445_v53  ;;  %2006 = vmatmul.msk.bf16.vlgmr.msra.gmra.mxu0 %vm485_vm0, %v181_v0  ;;  %v2512_v53 = vld [vmem:[%s2574_s15 + $0x378] sm:$0xff]  ;;  %v2506_v0 = vld [vmem:[%s2574_s15 + $0x348] sm:$0xff] }
  0x3f   : > { %973 = vmatpush.bf16.msrb.mxu0 %v2452_v58  ;;  %2023 = vmatmul.msk.bf16.vlgmr.msra.gmra.mxu1 %vm485_vm0, %v182_v1  ;;  %v2499_v58 = vld [vmem:[%s2574_s15 + $0x310] sm:$0xff]  ;;  %v2510_v1 = vld [vmem:[%s2574_s15 + $0x368] sm:$0xff] }
  0x40   : > { %1013 = vmatpush.bf16.msrb.mxu1 %v2456_v59  ;;  %2040 = vmatmul.msk.bf16.vlgmr.msra.gmra.mxu2 %vm485_vm0, %v183_v2  ;;  %v2503_v59 = vld [vmem:[%s2574_s15 + $0x330] sm:$0xff]  ;;  %v2498_v2 = vld [vmem:[%s2574_s15 + $0x308] sm:$0xff] }
  0x41   : > { %1053 = vmatpush.bf16.msrb.mxu2 %v2460_v54  ;;  %2057 = vmatmul.msk.bf16.vlgmr.msra.gmra.mxu3 %vm485_vm0, %v184_v3  ;;  %v2500_v54 = vld [vmem:[%s2574_s15 + $0x318] sm:$0xff]  ;;  %v2502_v3 = vld [vmem:[%s2574_s15 + $0x328] sm:$0xff] }
  0x42   : > { %1093 = vmatpush.bf16.msrb.mxu3 %v2464_v55  ;;  %v2504_v55 = vld [vmem:[%s2574_s15 + $0x338] sm:$0xff] }
  0x43   : > { %974 = vmatpush.bf16.msrb.mxu0 %v2451_v62  ;;  %v195_v62 = vld [vmem:[%s2596_s19 + $0x58] sm:$0xf] }
  0x44   : > { %1014 = vmatpush.bf16.msrb.mxu1 %v2455_v63  ;;  %v196_v63 = vld [vmem:[%s2596_s19 + $0x5c] sm:$0xf] }
  0x45   : > { %1054 = vmatpush.bf16.msrb.mxu2 %v2459_v60  ;;  %v193_v60 = vld [vmem:[%s2596_s19 + $0x50] sm:$0xf] }
  0x46   : > { %1094 = vmatpush.bf16.msrb.mxu3 %v2463_v61  ;;  %v194_v61 = vld [vmem:[%s2596_s19 + $0x54] sm:$0xf] }
  0x47   : > { %975 = vmatpush.bf16.msrb.mxu0 %v2450_v6  ;;  %v2497_v6 = vld [vmem:[%s2574_s15 + $0x300] sm:$0xff] }
  0x48   : > { %1015 = vmatpush.bf16.msrb.mxu1 %v2454_v7  ;;  %v2501_v7 = vld [vmem:[%s2574_s15 + $0x320] sm:$0xff] }
  0x49   : > { %1055 = vmatpush.bf16.msrb.mxu2 %v2458_v4  ;;  %v2505_v4 = vld [vmem:[%s2574_s15 + $0x340] sm:$0xff] }
  0x4a   : > { %1095 = vmatpush.bf16.msrb.mxu3 %v2462_v5  ;;  %v2509_v5 = vld [vmem:[%s2574_s15 + $0x360] sm:$0xff] }
  0x4b   : > { %976 = vmatpush.bf16.msrb.mxu0 %v2449_v10  ;;  %v2516_v10 = vld [vmem:[%s2574_s15 + $0x398] sm:$0xff] }
  0x4c   : > { %1016 = vmatpush.bf16.msrb.mxu1 %v2453_v11  ;;  %v2520_v11 = vld [vmem:[%s2574_s15 + $0x3b8] sm:$0xff] }
  0x4d   : > { %1056 = vmatpush.bf16.msrb.mxu2 %v2457_v8  ;;  %v2524_v8 = vld [vmem:[%s2574_s15 + $0x3d8] sm:$0xff] }
  0x4e   : > { %1096 = vmatpush.bf16.msrb.mxu3 %v2461_v9  ;;  %2074 = vmatmul.msk.bf16.vlgmr.msrb.gmra.mxu0 %vm485_vm0, %v185_v20  ;;  %v2528_v9 = vld [vmem:[%s2574_s15 + $0x3f8] sm:$0xff]  ;;  %v2522_v20 = vld [vmem:[%s2574_s15 + $0x3c8] sm:$0xff] }
  0x4f   : > { %1133 = vmatpush.bf16.msra.mxu0 %v2468_v14  ;;  %2091 = vmatmul.msk.bf16.vlgmr.msrb.gmra.mxu1 %vm485_vm0, %v186_v21  ;;  %v2515_v14 = vld [vmem:[%s2574_s15 + $0x390] sm:$0xff]  ;;  %v2526_v21 = vld [vmem:[%s2574_s15 + $0x3e8] sm:$0xff] }
  0x50   : > { %1173 = vmatpush.bf16.msra.mxu1 %v2472_v15  ;;  %2108 = vmatmul.msk.bf16.vlgmr.msrb.gmra.mxu2 %vm485_vm0, %v187_v22  ;;  %v2519_v15 = vld [vmem:[%s2574_s15 + $0x3b0] sm:$0xff]  ;;  %v2514_v22 = vld [vmem:[%s2574_s15 + $0x388] sm:$0xff] }
  0x51   : > { %1213 = vmatpush.bf16.msra.mxu2 %v2476_v12  ;;  %2125 = vmatmul.msk.bf16.vlgmr.msrb.gmra.mxu3 %vm485_vm0, %v188_v23  ;;  %v2523_v12 = vld [vmem:[%s2574_s15 + $0x3d0] sm:$0xff]  ;;  %v2518_v23 = vld [vmem:[%s2574_s15 + $0x3a8] sm:$0xff] }
  0x52   : > { %1253 = vmatpush.bf16.msra.mxu3 %v2480_v13  ;;  %v2527_v13 = vld [vmem:[%s2574_s15 + $0x3f0] sm:$0xff] }
  0x53   : > { %1134 = vmatpush.bf16.msra.mxu0 %v2467_v18  ;;  %v199_v18 = vld [vmem:[%s2596_s19 + $0x68] sm:$0xf] }
  0x54   : > { %1174 = vmatpush.bf16.msra.mxu1 %v2471_v19  ;;  %v200_v19 = vld [vmem:[%s2596_s19 + $0x6c] sm:$0xf] }
  0x55   : > { %1214 = vmatpush.bf16.msra.mxu2 %v2475_v16  ;;  %v197_v16 = vld [vmem:[%s2596_s19 + $0x60] sm:$0xf] }
  0x56   : > { %1254 = vmatpush.bf16.msra.mxu3 %v2479_v17  ;;  %v198_v17 = vld [vmem:[%s2596_s19 + $0x64] sm:$0xf] }
  0x57   : > { %1135 = vmatpush.bf16.msra.mxu0 %v2466_v26  ;;  %v2513_v26 = vld [vmem:[%s2574_s15 + $0x380] sm:$0xff] }
  0x58   : > { %1175 = vmatpush.bf16.msra.mxu1 %v2470_v27  ;;  %v2517_v27 = vld [vmem:[%s2574_s15 + $0x3a0] sm:$0xff] }
  0x59   : > { %1215 = vmatpush.bf16.msra.mxu2 %v2474_v24  ;;  %v2521_v24 = vld [vmem:[%s2574_s15 + $0x3c0] sm:$0xff] }
  0x5a   : > { %1255 = vmatpush.bf16.msra.mxu3 %v2478_v25  ;;  %v2525_v25 = vld [vmem:[%s2574_s15 + $0x3e0] sm:$0xff] }
  0x5b   : > { %1136 = vmatpush.bf16.msra.mxu0 %v2465_v30  ;;  %v203_v30 = vld [vmem:[%s2596_s19 + $0x78] sm:$0xf] }
  0x5c   : > { %1176 = vmatpush.bf16.msra.mxu1 %v2469_v31  ;;  %v204_v31 = vld [vmem:[%s2596_s19 + $0x7c] sm:$0xf] }
  0x5d   : > { %1216 = vmatpush.bf16.msra.mxu2 %v2473_v28  ;;  %v201_v28 = vld [vmem:[%s2596_s19 + $0x70] sm:$0xf] }
  0x5e   : > { %1256 = vmatpush.bf16.msra.mxu3 %v2477_v29  ;;  %2142 = vmatmul.msk.bf16.vlgmr.msra.gmra.mxu0 %vm485_vm0, %v189_v40  ;;  %v202_v29 = vld [vmem:[%s2596_s19 + $0x74] sm:$0xf] }
  0x5f   : > { %1293 = vmatpush.bf16.msrb.mxu0 %v2484_v34  ;;  %2159 = vmatmul.msk.bf16.vlgmr.msra.gmra.mxu1 %vm485_vm0, %v190_v41 }
  0x60   : > { %1333 = vmatpush.bf16.msrb.mxu1 %v2488_v35  ;;  %2176 = vmatmul.msk.bf16.vlgmr.msra.gmra.mxu2 %vm485_vm0, %v191_v42 }
  0x61   : > { %1373 = vmatpush.bf16.msrb.mxu2 %v2492_v32  ;;  %2193 = vmatmul.msk.bf16.vlgmr.msra.gmra.mxu3 %vm485_vm0, %v192_v43 }
  0x62   : > { %1413 = vmatpush.bf16.msrb.mxu3 %v2496_v33 }
  0x63   : > { %1294 = vmatpush.bf16.msrb.mxu0 %v2483_v38 }
  0x64   : > { %1334 = vmatpush.bf16.msrb.mxu1 %v2487_v39 }
  0x65   : > { %1374 = vmatpush.bf16.msrb.mxu2 %v2491_v36 }
  0x66   : > { %1414 = vmatpush.bf16.msrb.mxu3 %v2495_v37 }
  0x67   : > { %1295 = vmatpush.bf16.msrb.mxu0 %v2482_v46 }
  0x68   : > { %1335 = vmatpush.bf16.msrb.mxu1 %v2486_v47 }
  0x69   : > { %1375 = vmatpush.bf16.msrb.mxu2 %v2490_v44 }
  0x6a   : > { %1415 = vmatpush.bf16.msrb.mxu3 %v2494_v45 }
  0x6b   : > { %1296 = vmatpush.bf16.msrb.mxu0 %v2481_v50 }
  0x6c   : > { %1336 = vmatpush.bf16.msrb.mxu1 %v2485_v51 }
  0x6d   : > { %1376 = vmatpush.bf16.msrb.mxu2 %v2489_v48 }
  0x6e   : > { %1416 = vmatpush.bf16.msrb.mxu3 %v2493_v49  ;;  %2210 = vmatmul.msk.bf16.vlgmr.msrb.gmra.mxu0 %vm485_vm0, %v193_v60 }
  0x6f   : > { %1453 = vmatpush.bf16.msra.mxu0 %v2500_v54  ;;  %2227 = vmatmul.msk.bf16.vlgmr.msrb.gmra.mxu1 %vm485_vm0, %v194_v61 }
  0x70   : > { %1493 = vmatpush.bf16.msra.mxu1 %v2504_v55  ;;  %2244 = vmatmul.msk.bf16.vlgmr.msrb.gmra.mxu2 %vm485_vm0, %v195_v62 }
  0x71   : > { %1533 = vmatpush.bf16.msra.mxu2 %v2508_v52  ;;  %2261 = vmatmul.msk.bf16.vlgmr.msrb.gmra.mxu3 %vm485_vm0, %v196_v63 }
  0x72   : > { %1573 = vmatpush.bf16.msra.mxu3 %v2512_v53 }
  0x73   : > { %1454 = vmatpush.bf16.msra.mxu0 %v2499_v58 }
  0x74   : > { %1494 = vmatpush.bf16.msra.mxu1 %v2503_v59 }
  0x75   : > { %1534 = vmatpush.bf16.msra.mxu2 %v2507_v56 }
  0x76   : > { %1574 = vmatpush.bf16.msra.mxu3 %v2511_v57 }
  0x77   : > { %1455 = vmatpush.bf16.msra.mxu0 %v2498_v2 }
  0x78   : > { %1495 = vmatpush.bf16.msra.mxu1 %v2502_v3 }
  0x79   : > { %1535 = vmatpush.bf16.msra.mxu2 %v2506_v0 }
  0x7a   : > { %1575 = vmatpush.bf16.msra.mxu3 %v2510_v1 }
  0x7b   : > { %1456 = vmatpush.bf16.msra.mxu0 %v2497_v6 }
  0x7c   : > { %1496 = vmatpush.bf16.msra.mxu1 %v2501_v7 }
  0x7d   : > { %1536 = vmatpush.bf16.msra.mxu2 %v2505_v4 }
  0x7e   : > { %1576 = vmatpush.bf16.msra.mxu3 %v2509_v5  ;;  %2278 = vmatmul.msk.bf16.vlgmr.msra.gmra.mxu0 %vm485_vm0, %v197_v16 }
  0x7f   : > { %1613 = vmatpush.bf16.msrb.mxu0 %v2516_v10  ;;  %2295 = vmatmul.msk.bf16.vlgmr.msra.gmra.mxu1 %vm485_vm0, %v198_v17 }
  0x80   : > { %1653 = vmatpush.bf16.msrb.mxu1 %v2520_v11  ;;  %2312 = vmatmul.msk.bf16.vlgmr.msra.gmra.mxu2 %vm485_vm0, %v199_v18 }
  0x81   : > { %1693 = vmatpush.bf16.msrb.mxu2 %v2524_v8  ;;  %2329 = vmatmul.msk.bf16.vlgmr.msra.gmra.mxu3 %vm485_vm0, %v200_v19 }
  0x82   : > { %1733 = vmatpush.bf16.msrb.mxu3 %v2528_v9 }
  0x83   : > { %1614 = vmatpush.bf16.msrb.mxu0 %v2515_v14 }
  0x84   : > { %1654 = vmatpush.bf16.msrb.mxu1 %v2519_v15 }
  0x85   : > { %1694 = vmatpush.bf16.msrb.mxu2 %v2523_v12 }
  0x86   : > { %1734 = vmatpush.bf16.msrb.mxu3 %v2527_v13 }
  0x87   : > { %1615 = vmatpush.bf16.msrb.mxu0 %v2514_v22 }
  0x88   : > { %1655 = vmatpush.bf16.msrb.mxu1 %v2518_v23 }
  0x89   : > { %1695 = vmatpush.bf16.msrb.mxu2 %v2522_v20 }
  0x8a   : > { %1735 = vmatpush.bf16.msrb.mxu3 %v2526_v21 }
  0x8b   : > { %1616 = vmatpush.bf16.msrb.mxu0 %v2513_v26 }
  0x8c   : > { %1656 = vmatpush.bf16.msrb.mxu1 %v2517_v27 }
  0x8d   : > { %1696 = vmatpush.bf16.msrb.mxu2 %v2521_v24 }
  0x8e   : > { %1736 = vmatpush.bf16.msrb.mxu3 %v2525_v25  ;;  %2346 = vmatmul.msk.bf16.vlgmr.msrb.gmra.mxu0 %vm485_vm0, %v201_v28 }
  0x8f   : > { %2363 = vmatmul.msk.bf16.vlgmr.msrb.gmra.mxu1 %vm485_vm0, %v202_v29 }
  0x90   : > { %2380 = vmatmul.msk.bf16.vlgmr.msrb.gmra.mxu2 %vm485_vm0, %v203_v30 }
  0x91   : > { %2397 = vmatmul.msk.bf16.vlgmr.msrb.gmra.mxu3 %vm485_vm0, %v204_v31 }
  0x9b   : > { %v498_v32 = vpop.f32.mrf.mxu0 }
  0x9c   : > { %v538_v33 = vpop.f32.mrf.mxu1  ;;  %1742 = vst [vmem:[%s2778_s23] sm:$0xff] %v498_v32 }
  0x9d   : > { %1743 = vst [vmem:[%s2778_s23 + $0x8] sm:$0xff] %v538_v33 }
  0xa3   : > { %v578_v34 = vpop.f32.mrf.mxu2  ;;  %v500_v36 = vpop.f32.mrf.mxu0 }
  0xa4   : > { %v618_v35 = vpop.f32.mrf.mxu3  ;;  %1744 = vst [vmem:[%s2778_s23 + $0x10] sm:$0xff] %v578_v34  ;;  %v540_v37 = vpop.f32.mrf.mxu1 }
  0xa5   : > { %1745 = vst [vmem:[%s2778_s23 + $0x18] sm:$0xff] %v618_v35 }
  0xab   : > { %v580_v38 = vpop.f32.mrf.mxu2  ;;  %v658_v40 = vpop.f32.mrf.mxu0 }
  0xac   : > { %v620_v39 = vpop.f32.mrf.mxu3  ;;  %v698_v41 = vpop.f32.mrf.mxu1  ;;  %1746 = vst [vmem:[%s2778_s23 + $0x20] sm:$0xff] %v658_v40 }
  0xad   : > { %1747 = vst [vmem:[%s2778_s23 + $0x28] sm:$0xff] %v698_v41 }
  0xb3   : > { %v738_v42 = vpop.f32.mrf.mxu2  ;;  %v660_v44 = vpop.f32.mrf.mxu0 }
  0xb4   : > { %v778_v43 = vpop.f32.mrf.mxu3  ;;  %1748 = vst [vmem:[%s2778_s23 + $0x30] sm:$0xff] %v738_v42  ;;  %v700_v45 = vpop.f32.mrf.mxu1 }
  0xb5   : > { %1749 = vst [vmem:[%s2778_s23 + $0x38] sm:$0xff] %v778_v43 }
  0xbb   : > { %v740_v46 = vpop.f32.mrf.mxu2  ;;  %v818_v48 = vpop.f32.mrf.mxu0 }
  0xbc   : > { %v780_v47 = vpop.f32.mrf.mxu3  ;;  %v858_v49 = vpop.f32.mrf.mxu1  ;;  %1750 = vst [vmem:[%s2778_s23 + $0x40] sm:$0xff] %v818_v48 }
  0xbd   : > { %1751 = vst [vmem:[%s2778_s23 + $0x48] sm:$0xff] %v858_v49 }
  0xc3   : > { %v898_v50 = vpop.f32.mrf.mxu2  ;;  %v820_v52 = vpop.f32.mrf.mxu0 }
  0xc4   : > { %v938_v51 = vpop.f32.mrf.mxu3  ;;  %1752 = vst [vmem:[%s2778_s23 + $0x50] sm:$0xff] %v898_v50  ;;  %v860_v53 = vpop.f32.mrf.mxu1 }
  0xc5   : > { %1753 = vst [vmem:[%s2778_s23 + $0x58] sm:$0xff] %v938_v51 }
  0xcb   : > { %v900_v54 = vpop.f32.mrf.mxu2  ;;  %v978_v56 = vpop.f32.mrf.mxu0 }
  0xcc   : > { %v940_v55 = vpop.f32.mrf.mxu3  ;;  %v1018_v57 = vpop.f32.mrf.mxu1  ;;  %1754 = vst [vmem:[%s2778_s23 + $0x60] sm:$0xff] %v978_v56 }
  0xcd   : > { %1755 = vst [vmem:[%s2778_s23 + $0x68] sm:$0xff] %v1018_v57 }
  0xd3   : > { %v1058_v58 = vpop.f32.mrf.mxu2  ;;  %v980_v60 = vpop.f32.mrf.mxu0 }
  0xd4   : > { %v1098_v59 = vpop.f32.mrf.mxu3  ;;  %1756 = vst [vmem:[%s2778_s23 + $0x70] sm:$0xff] %v1058_v58  ;;  %v1020_v61 = vpop.f32.mrf.mxu1 }
  0xd5   : > { %1757 = vst [vmem:[%s2778_s23 + $0x78] sm:$0xff] %v1098_v59 }
  0xdb   : > { %v1060_v62 = vpop.f32.mrf.mxu2  ;;  %v1138_v0 = vpop.f32.mrf.mxu0 }
  0xdc   : > { %v1100_v63 = vpop.f32.mrf.mxu3  ;;  %v1178_v1 = vpop.f32.mrf.mxu1  ;;  %1758 = vst [vmem:[%s2778_s23 + $0x80] sm:$0xff] %v1138_v0 }
  0xdd   : > { %1759 = vst [vmem:[%s2778_s23 + $0x88] sm:$0xff] %v1178_v1 }
  0xe3   : > { %v1218_v2 = vpop.f32.mrf.mxu2  ;;  %v1140_v4 = vpop.f32.mrf.mxu0 }
  0xe4   : > { %v1258_v3 = vpop.f32.mrf.mxu3  ;;  %1760 = vst [vmem:[%s2778_s23 + $0x90] sm:$0xff] %v1218_v2  ;;  %v1180_v5 = vpop.f32.mrf.mxu1 }
  0xe5   : > { %1761 = vst [vmem:[%s2778_s23 + $0x98] sm:$0xff] %v1258_v3 }
  0xeb   : > { %v1220_v6 = vpop.f32.mrf.mxu2  ;;  %v1298_v8 = vpop.f32.mrf.mxu0 }
  0xec   : > { %v1260_v7 = vpop.f32.mrf.mxu3  ;;  %v1338_v9 = vpop.f32.mrf.mxu1  ;;  %1762 = vst [vmem:[%s2778_s23 + $0xa0] sm:$0xff] %v1298_v8 }
  0xed   : > { %1763 = vst [vmem:[%s2778_s23 + $0xa8] sm:$0xff] %v1338_v9 }
  0xf3   : > { %v1378_v10 = vpop.f32.mrf.mxu2  ;;  %v1300_v12 = vpop.f32.mrf.mxu0 }
  0xf4   : > { %v1418_v11 = vpop.f32.mrf.mxu3  ;;  %1764 = vst [vmem:[%s2778_s23 + $0xb0] sm:$0xff] %v1378_v10  ;;  %v1340_v13 = vpop.f32.mrf.mxu1 }
  0xf5   : > { %1765 = vst [vmem:[%s2778_s23 + $0xb8] sm:$0xff] %v1418_v11 }
  0xfb   : > { %v1380_v14 = vpop.f32.mrf.mxu2  ;;  %v1458_v16 = vpop.f32.mrf.mxu0 }
  0xfc   : > { %v1420_v15 = vpop.f32.mrf.mxu3  ;;  %v1498_v17 = vpop.f32.mrf.mxu1  ;;  %1766 = vst [vmem:[%s2778_s23 + $0xc0] sm:$0xff] %v1458_v16 }
  0xfd   : > { %1767 = vst [vmem:[%s2778_s23 + $0xc8] sm:$0xff] %v1498_v17 }
 0x103   : > { %v1538_v18 = vpop.f32.mrf.mxu2  ;;  %v1460_v20 = vpop.f32.mrf.mxu0 }
 0x104   : > { %v1578_v19 = vpop.f32.mrf.mxu3  ;;  %1768 = vst [vmem:[%s2778_s23 + $0xd0] sm:$0xff] %v1538_v18  ;;  %v1500_v21 = vpop.f32.mrf.mxu1 }
 0x105   : > { %1769 = vst [vmem:[%s2778_s23 + $0xd8] sm:$0xff] %v1578_v19 }
 0x10b   : > { %v1540_v22 = vpop.f32.mrf.mxu2  ;;  %v1618_v24 = vpop.f32.mrf.mxu0 }
 0x10c   : > { %v1580_v23 = vpop.f32.mrf.mxu3  ;;  %v1658_v25 = vpop.f32.mrf.mxu1  ;;  %1770 = vst [vmem:[%s2778_s23 + $0xe0] sm:$0xff] %v1618_v24 }
 0x10d   : > { %1771 = vst [vmem:[%s2778_s23 + $0xe8] sm:$0xff] %v1658_v25 }
 0x113   : > { %v1698_v26 = vpop.f32.mrf.mxu2  ;;  %v1620_v28 = vpop.f32.mrf.mxu0 }
 0x114   : > { %v1738_v27 = vpop.f32.mrf.mxu3  ;;  %1772 = vst [vmem:[%s2778_s23 + $0xf0] sm:$0xff] %v1698_v26  ;;  %v1660_v29 = vpop.f32.mrf.mxu1 }
 0x115   : > { %1773 = vst [vmem:[%s2778_s23 + $0xf8] sm:$0xff] %v1738_v27 }
 0x11b   : > { %v1700_v30 = vpop.f32.mrf.mxu2 }
 0x11c   : > { %v1740_v31 = vpop.f32.mrf.mxu3 }
 0x11d PF: > { %s12_s9 = sadd.s32 1, %s2543_s9  }
 0x11e   : > { %p9_p4 = scmp.ge.s32.totalorder %s12_s9, 6  }
 0x120   :  { %11 = sbr.rel (!%p9_p4) target bundleno = 1 (0x1), region = 61 }

// kernel: reverse.8
= control target key start
LH: loop header
LB: loop body
LE: loop exit
PB: predicated region body
PF: predicated region fallthrough
CT: control target
= control target key end

     0   :  { %s1160_s0 = inlined_call_operand.vmem [shape: f32[2,32,25,12], index: 0, kind: input, shape index: {}]   ;;  %s1161_s1 = inlined_call_operand.vmem [shape: f32[2,32,25,12], index: 1, kind: output, shape index: {}]  }
   0x1   :  { %v384_v0 = vld [vmem:[%s1160_s0 + $0x160] sm:$0xff]  ;;  %v430_v24 = vld [vmem:[%s1160_s0 + $0x168] sm:$0xff]  ;;  %v478_v48 = vld [vmem:[%s1160_s0 + $0x170] sm:$0xff] }
   0x2   :  { %v385_v1 = vld [vmem:[%s1160_s0 + $0x2e0] sm:$0xff]  ;;  %4 = vst [vmem:[%s1161_s1] sm:$0xff] %v384_v0  ;;  %v432_v25 = vld [vmem:[%s1160_s0 + $0x2e8] sm:$0xff]  ;;  %v480_v49 = vld [vmem:[%s1160_s0 + $0x2f0] sm:$0xff] }
   0x3   :  { %v387_v2 = vld [vmem:[%s1160_s0 + $0x140] sm:$0xff]  ;;  %386 = vst [vmem:[%s1161_s1 + $0x180] sm:$0xff] %v385_v1  ;;  %v434_v26 = vld [vmem:[%s1160_s0 + $0x148] sm:$0xff]  ;;  %v482_v50 = vld [vmem:[%s1160_s0 + $0x150] sm:$0xff] }
   0x4   :  { %v389_v3 = vld [vmem:[%s1160_s0 + $0x2c0] sm:$0xff]  ;;  %388 = vst [vmem:[%s1161_s1 + $0x20] sm:$0xff] %v387_v2  ;;  %v436_v27 = vld [vmem:[%s1160_s0 + $0x2c8] sm:$0xff]  ;;  %v484_v51 = vld [vmem:[%s1160_s0 + $0x2d0] sm:$0xff] }
   0x5   :  { %v391_v4 = vld [vmem:[%s1160_s0 + $0x120] sm:$0xff]  ;;  %390 = vst [vmem:[%s1161_s1 + $0x1a0] sm:$0xff] %v389_v3  ;;  %v438_v28 = vld [vmem:[%s1160_s0 + $0x128] sm:$0xff]  ;;  %v486_v52 = vld [vmem:[%s1160_s0 + $0x130] sm:$0xff] }
   0x6   :  { %v393_v5 = vld [vmem:[%s1160_s0 + $0x2a0] sm:$0xff]  ;;  %392 = vst [vmem:[%s1161_s1 + $0x40] sm:$0xff] %v391_v4  ;;  %v440_v29 = vld [vmem:[%s1160_s0 + $0x2a8] sm:$0xff]  ;;  %v488_v53 = vld [vmem:[%s1160_s0 + $0x2b0] sm:$0xff] }
   0x7   :  { %v395_v6 = vld [vmem:[%s1160_s0 + $0x100] sm:$0xff]  ;;  %394 = vst [vmem:[%s1161_s1 + $0x1c0] sm:$0xff] %v393_v5  ;;  %v442_v30 = vld [vmem:[%s1160_s0 + $0x108] sm:$0xff]  ;;  %v490_v54 = vld [vmem:[%s1160_s0 + $0x110] sm:$0xff] }
   0x8   :  { %v397_v7 = vld [vmem:[%s1160_s0 + $0x280] sm:$0xff]  ;;  %396 = vst [vmem:[%s1161_s1 + $0x60] sm:$0xff] %v395_v6  ;;  %v444_v31 = vld [vmem:[%s1160_s0 + $0x288] sm:$0xff]  ;;  %v492_v55 = vld [vmem:[%s1160_s0 + $0x290] sm:$0xff] }
   0x9   :  { %v399_v8 = vld [vmem:[%s1160_s0 + $0xe0] sm:$0xff]  ;;  %398 = vst [vmem:[%s1161_s1 + $0x1e0] sm:$0xff] %v397_v7  ;;  %v446_v32 = vld [vmem:[%s1160_s0 + $0xe8] sm:$0xff]  ;;  %v494_v56 = vld [vmem:[%s1160_s0 + $0xf0] sm:$0xff] }
   0xa   :  { %v401_v9 = vld [vmem:[%s1160_s0 + $0x260] sm:$0xff]  ;;  %400 = vst [vmem:[%s1161_s1 + $0x80] sm:$0xff] %v399_v8  ;;  %v448_v33 = vld [vmem:[%s1160_s0 + $0x268] sm:$0xff]  ;;  %v496_v57 = vld [vmem:[%s1160_s0 + $0x270] sm:$0xff] }
   0xb   :  { %v403_v10 = vld [vmem:[%s1160_s0 + $0xc0] sm:$0xff]  ;;  %402 = vst [vmem:[%s1161_s1 + $0x200] sm:$0xff] %v401_v9  ;;  %v450_v34 = vld [vmem:[%s1160_s0 + $0xc8] sm:$0xff]  ;;  %v498_v58 = vld [vmem:[%s1160_s0 + $0xd0] sm:$0xff] }
   0xc   :  { %v405_v11 = vld [vmem:[%s1160_s0 + $0x240] sm:$0xff]  ;;  %404 = vst [vmem:[%s1161_s1 + $0xa0] sm:$0xff] %v403_v10  ;;  %v452_v35 = vld [vmem:[%s1160_s0 + $0x248] sm:$0xff]  ;;  %v500_v59 = vld [vmem:[%s1160_s0 + $0x250] sm:$0xff] }
   0xd   :  { %v407_v12 = vld [vmem:[%s1160_s0 + $0xa0] sm:$0xff]  ;;  %406 = vst [vmem:[%s1161_s1 + $0x220] sm:$0xff] %v405_v11  ;;  %v454_v36 = vld [vmem:[%s1160_s0 + $0xa8] sm:$0xff]  ;;  %v502_v60 = vld [vmem:[%s1160_s0 + $0xb0] sm:$0xff] }
   0xe   :  { %v409_v13 = vld [vmem:[%s1160_s0 + $0x220] sm:$0xff]  ;;  %408 = vst [vmem:[%s1161_s1 + $0xc0] sm:$0xff] %v407_v12  ;;  %v456_v37 = vld [vmem:[%s1160_s0 + $0x228] sm:$0xff]  ;;  %v504_v61 = vld [vmem:[%s1160_s0 + $0x230] sm:$0xff] }
   0xf   :  { %v411_v14 = vld [vmem:[%s1160_s0 + $0x80] sm:$0xff]  ;;  %410 = vst [vmem:[%s1161_s1 + $0x240] sm:$0xff] %v409_v13  ;;  %v458_v38 = vld [vmem:[%s1160_s0 + $0x88] sm:$0xff]  ;;  %v506_v62 = vld [vmem:[%s1160_s0 + $0x90] sm:$0xff] }
  0x10   :  { %v413_v15 = vld [vmem:[%s1160_s0 + $0x200] sm:$0xff]  ;;  %412 = vst [vmem:[%s1161_s1 + $0xe0] sm:$0xff] %v411_v14  ;;  %v460_v39 = vld [vmem:[%s1160_s0 + $0x208] sm:$0xff]  ;;  %v508_v63 = vld [vmem:[%s1160_s0 + $0x210] sm:$0xff] }
  0x11   :  { %v415_v16 = vld [vmem:[%s1160_s0 + $0x60] sm:$0xff]  ;;  %414 = vst [vmem:[%s1161_s1 + $0x260] sm:$0xff] %v413_v15  ;;  %v462_v40 = vld [vmem:[%s1160_s0 + $0x68] sm:$0xff]  ;;  %v510_v0 = vld [vmem:[%s1160_s0 + $0x70] sm:$0xff] }
  0x12   :  { %v417_v17 = vld [vmem:[%s1160_s0 + $0x1e0] sm:$0xff]  ;;  %416 = vst [vmem:[%s1161_s1 + $0x100] sm:$0xff] %v415_v16  ;;  %v464_v41 = vld [vmem:[%s1160_s0 + $0x1e8] sm:$0xff]  ;;  %v512_v1 = vld [vmem:[%s1160_s0 + $0x1f0] sm:$0xff] }
  0x13   :  { %v419_v18 = vld [vmem:[%s1160_s0 + $0x40] sm:$0xff]  ;;  %418 = vst [vmem:[%s1161_s1 + $0x280] sm:$0xff] %v417_v17  ;;  %v466_v42 = vld [vmem:[%s1160_s0 + $0x48] sm:$0xff]  ;;  %v514_v2 = vld [vmem:[%s1160_s0 + $0x50] sm:$0xff] }
  0x14   :  { %v421_v19 = vld [vmem:[%s1160_s0 + $0x1c0] sm:$0xff]  ;;  %420 = vst [vmem:[%s1161_s1 + $0x120] sm:$0xff] %v419_v18  ;;  %v468_v43 = vld [vmem:[%s1160_s0 + $0x1c8] sm:$0xff]  ;;  %v516_v3 = vld [vmem:[%s1160_s0 + $0x1d0] sm:$0xff] }
  0x15   :  { %v423_v20 = vld [vmem:[%s1160_s0 + $0x20] sm:$0xff]  ;;  %422 = vst [vmem:[%s1161_s1 + $0x2a0] sm:$0xff] %v421_v19  ;;  %v470_v44 = vld [vmem:[%s1160_s0 + $0x28] sm:$0xff]  ;;  %v518_v4 = vld [vmem:[%s1160_s0 + $0x30] sm:$0xff] }
  0x16   :  { %v425_v21 = vld [vmem:[%s1160_s0 + $0x1a0] sm:$0xff]  ;;  %424 = vst [vmem:[%s1161_s1 + $0x140] sm:$0xff] %v423_v20  ;;  %v472_v45 = vld [vmem:[%s1160_s0 + $0x1a8] sm:$0xff]  ;;  %v520_v5 = vld [vmem:[%s1160_s0 + $0x1b0] sm:$0xff] }
  0x17   :  { %v89_v22 = vld [vmem:[%s1160_s0] sm:$0xff]  ;;  %426 = vst [vmem:[%s1161_s1 + $0x2c0] sm:$0xff] %v425_v21  ;;  %v474_v46 = vld [vmem:[%s1160_s0 + $0x8] sm:$0xff]  ;;  %v522_v6 = vld [vmem:[%s1160_s0 + $0x10] sm:$0xff] }
  0x18   :  { %v428_v23 = vld [vmem:[%s1160_s0 + $0x180] sm:$0xff]  ;;  %427 = vst [vmem:[%s1161_s1 + $0x160] sm:$0xff] %v89_v22  ;;  %v476_v47 = vld [vmem:[%s1160_s0 + $0x188] sm:$0xff]  ;;  %v524_v7 = vld [vmem:[%s1160_s0 + $0x190] sm:$0xff] }
  0x19   :  { %429 = vst [vmem:[%s1161_s1 + $0x2e0] sm:$0xff] %v428_v23  ;;  %v526_v8 = vld [vmem:[%s1160_s0 + $0x178] sm:$0xff] }
  0x1a   :  { %431 = vst [vmem:[%s1161_s1 + $0x8] sm:$0xff] %v430_v24  ;;  %v528_v9 = vld [vmem:[%s1160_s0 + $0x2f8] sm:$0xff] }
  0x1b   :  { %433 = vst [vmem:[%s1161_s1 + $0x188] sm:$0xff] %v432_v25  ;;  %v530_v10 = vld [vmem:[%s1160_s0 + $0x158] sm:$0xff] }
  0x1c   :  { %435 = vst [vmem:[%s1161_s1 + $0x28] sm:$0xff] %v434_v26  ;;  %v532_v11 = vld [vmem:[%s1160_s0 + $0x2d8] sm:$0xff] }
  0x1d   :  { %437 = vst [vmem:[%s1161_s1 + $0x1a8] sm:$0xff] %v436_v27  ;;  %v534_v12 = vld [vmem:[%s1160_s0 + $0x138] sm:$0xff] }
  0x1e   :  { %439 = vst [vmem:[%s1161_s1 + $0x48] sm:$0xff] %v438_v28  ;;  %v536_v13 = vld [vmem:[%s1160_s0 + $0x2b8] sm:$0xff] }
  0x1f   :  { %441 = vst [vmem:[%s1161_s1 + $0x1c8] sm:$0xff] %v440_v29  ;;  %v538_v14 = vld [vmem:[%s1160_s0 + $0x118] sm:$0xff] }
  0x20   :  { %443 = vst [vmem:[%s1161_s1 + $0x68] sm:$0xff] %v442_v30  ;;  %v540_v15 = vld [vmem:[%s1160_s0 + $0x298] sm:$0xff] }
  0x21   :  { %445 = vst [vmem:[%s1161_s1 + $0x1e8] sm:$0xff] %v444_v31  ;;  %v542_v16 = vld [vmem:[%s1160_s0 + $0xf8] sm:$0xff] }
  0x22   :  { %447 = vst [vmem:[%s1161_s1 + $0x88] sm:$0xff] %v446_v32  ;;  %v544_v17 = vld [vmem:[%s1160_s0 + $0x278] sm:$0xff] }
  0x23   :  { %449 = vst [vmem:[%s1161_s1 + $0x208] sm:$0xff] %v448_v33  ;;  %v546_v18 = vld [vmem:[%s1160_s0 + $0xd8] sm:$0xff] }
  0x24   :  { %451 = vst [vmem:[%s1161_s1 + $0xa8] sm:$0xff] %v450_v34  ;;  %v548_v19 = vld [vmem:[%s1160_s0 + $0x258] sm:$0xff] }
  0x25   :  { %453 = vst [vmem:[%s1161_s1 + $0x228] sm:$0xff] %v452_v35  ;;  %v550_v20 = vld [vmem:[%s1160_s0 + $0xb8] sm:$0xff] }
  0x26   :  { %455 = vst [vmem:[%s1161_s1 + $0xc8] sm:$0xff] %v454_v36  ;;  %v552_v21 = vld [vmem:[%s1160_s0 + $0x238] sm:$0xff] }
  0x27   :  { %457 = vst [vmem:[%s1161_s1 + $0x248] sm:$0xff] %v456_v37  ;;  %v554_v22 = vld [vmem:[%s1160_s0 + $0x98] sm:$0xff] }
  0x28   :  { %459 = vst [vmem:[%s1161_s1 + $0xe8] sm:$0xff] %v458_v38  ;;  %v556_v23 = vld [vmem:[%s1160_s0 + $0x218] sm:$0xff] }
  0x29   :  { %461 = vst [vmem:[%s1161_s1 + $0x268] sm:$0xff] %v460_v39  ;;  %v558_v24 = vld [vmem:[%s1160_s0 + $0x78] sm:$0xff] }
  0x2a   :  { %463 = vst [vmem:[%s1161_s1 + $0x108] sm:$0xff] %v462_v40  ;;  %v560_v25 = vld [vmem:[%s1160_s0 + $0x1f8] sm:$0xff] }
  0x2b   :  { %465 = vst [vmem:[%s1161_s1 + $0x288] sm:$0xff] %v464_v41  ;;  %v562_v26 = vld [vmem:[%s1160_s0 + $0x58] sm:$0xff] }
  0x2c   :  { %467 = vst [vmem:[%s1161_s1 + $0x128] sm:$0xff] %v466_v42  ;;  %v564_v27 = vld [vmem:[%s1160_s0 + $0x1d8] sm:$0xff] }
  0x2d   :  { %469 = vst [vmem:[%s1161_s1 + $0x2a8] sm:$0xff] %v468_v43  ;;  %v566_v28 = vld [vmem:[%s1160_s0 + $0x38] sm:$0xff] }
  0x2e   :  { %471 = vst [vmem:[%s1161_s1 + $0x148] sm:$0xff] %v470_v44  ;;  %v568_v29 = vld [vmem:[%s1160_s0 + $0x1b8] sm:$0xff] }
  0x2f   :  { %473 = vst [vmem:[%s1161_s1 + $0x2c8] sm:$0xff] %v472_v45  ;;  %v570_v30 = vld [vmem:[%s1160_s0 + $0x18] sm:$0xff] }
  0x30   :  { %475 = vst [vmem:[%s1161_s1 + $0x168] sm:$0xff] %v474_v46  ;;  %v572_v31 = vld [vmem:[%s1160_s0 + $0x198] sm:$0xff] }
  0x31   :  { %477 = vst [vmem:[%s1161_s1 + $0x2e8] sm:$0xff] %v476_v47 }
  0x32   :  { %479 = vst [vmem:[%s1161_s1 + $0x10] sm:$0xff] %v478_v48 }
  0x33   :  { %481 = vst [vmem:[%s1161_s1 + $0x190] sm:$0xff] %v480_v49 }
  0x34   :  { %483 = vst [vmem:[%s1161_s1 + $0x30] sm:$0xff] %v482_v50 }
  0x35   :  { %485 = vst [vmem:[%s1161_s1 + $0x1b0] sm:$0xff] %v484_v51 }
  0x36   :  { %487 = vst [vmem:[%s1161_s1 + $0x50] sm:$0xff] %v486_v52 }
  0x37   :  { %489 = vst [vmem:[%s1161_s1 + $0x1d0] sm:$0xff] %v488_v53 }
  0x38   :  { %491 = vst [vmem:[%s1161_s1 + $0x70] sm:$0xff] %v490_v54 }
  0x39   :  { %493 = vst [vmem:[%s1161_s1 + $0x1f0] sm:$0xff] %v492_v55 }
  0x3a   :  { %495 = vst [vmem:[%s1161_s1 + $0x90] sm:$0xff] %v494_v56 }
  0x3b   :  { %497 = vst [vmem:[%s1161_s1 + $0x210] sm:$0xff] %v496_v57 }
  0x3c   :  { %499 = vst [vmem:[%s1161_s1 + $0xb0] sm:$0xff] %v498_v58 }
  0x3d   :  { %501 = vst [vmem:[%s1161_s1 + $0x230] sm:$0xff] %v500_v59 }
  0x3e   :  { %503 = vst [vmem:[%s1161_s1 + $0xd0] sm:$0xff] %v502_v60 }
  0x3f   :  { %505 = vst [vmem:[%s1161_s1 + $0x250] sm:$0xff] %v504_v61 }
  0x40   :  { %507 = vst [vmem:[%s1161_s1 + $0xf0] sm:$0xff] %v506_v62 }
  0x41   :  { %509 = vst [vmem:[%s1161_s1 + $0x270] sm:$0xff] %v508_v63 }
  0x42   :  { %511 = vst [vmem:[%s1161_s1 + $0x110] sm:$0xff] %v510_v0 }
  0x43   :  { %513 = vst [vmem:[%s1161_s1 + $0x290] sm:$0xff] %v512_v1 }
  0x44   :  { %515 = vst [vmem:[%s1161_s1 + $0x130] sm:$0xff] %v514_v2 }
  0x45   :  { %517 = vst [vmem:[%s1161_s1 + $0x2b0] sm:$0xff] %v516_v3 }
  0x46   :  { %519 = vst [vmem:[%s1161_s1 + $0x150] sm:$0xff] %v518_v4 }
  0x47   :  { %521 = vst [vmem:[%s1161_s1 + $0x2d0] sm:$0xff] %v520_v5 }
  0x48   :  { %523 = vst [vmem:[%s1161_s1 + $0x170] sm:$0xff] %v522_v6 }
  0x49   :  { %525 = vst [vmem:[%s1161_s1 + $0x2f0] sm:$0xff] %v524_v7 }
  0x4a   :  { %527 = vst [vmem:[%s1161_s1 + $0x18] sm:$0xff] %v526_v8 }
  0x4b   :  { %529 = vst [vmem:[%s1161_s1 + $0x198] sm:$0xff] %v528_v9 }
  0x4c   :  { %531 = vst [vmem:[%s1161_s1 + $0x38] sm:$0xff] %v530_v10 }
  0x4d   :  { %533 = vst [vmem:[%s1161_s1 + $0x1b8] sm:$0xff] %v532_v11 }
  0x4e   :  { %535 = vst [vmem:[%s1161_s1 + $0x58] sm:$0xff] %v534_v12 }
  0x4f   :  { %537 = vst [vmem:[%s1161_s1 + $0x1d8] sm:$0xff] %v536_v13 }
  0x50   :  { %539 = vst [vmem:[%s1161_s1 + $0x78] sm:$0xff] %v538_v14 }
  0x51   :  { %541 = vst [vmem:[%s1161_s1 + $0x1f8] sm:$0xff] %v540_v15 }
  0x52   :  { %543 = vst [vmem:[%s1161_s1 + $0x98] sm:$0xff] %v542_v16 }
  0x53   :  { %545 = vst [vmem:[%s1161_s1 + $0x218] sm:$0xff] %v544_v17 }
  0x54   :  { %547 = vst [vmem:[%s1161_s1 + $0xb8] sm:$0xff] %v546_v18 }
  0x55   :  { %549 = vst [vmem:[%s1161_s1 + $0x238] sm:$0xff] %v548_v19 }
  0x56   :  { %551 = vst [vmem:[%s1161_s1 + $0xd8] sm:$0xff] %v550_v20 }
  0x57   :  { %553 = vst [vmem:[%s1161_s1 + $0x258] sm:$0xff] %v552_v21 }
  0x58   :  { %555 = vst [vmem:[%s1161_s1 + $0xf8] sm:$0xff] %v554_v22 }
  0x59   :  { %557 = vst [vmem:[%s1161_s1 + $0x278] sm:$0xff] %v556_v23 }
  0x5a   :  { %559 = vst [vmem:[%s1161_s1 + $0x118] sm:$0xff] %v558_v24 }
  0x5b   :  { %561 = vst [vmem:[%s1161_s1 + $0x298] sm:$0xff] %v560_v25 }
  0x5c   :  { %563 = vst [vmem:[%s1161_s1 + $0x138] sm:$0xff] %v562_v26 }
  0x5d   :  { %565 = vst [vmem:[%s1161_s1 + $0x2b8] sm:$0xff] %v564_v27 }
  0x5e   :  { %567 = vst [vmem:[%s1161_s1 + $0x158] sm:$0xff] %v566_v28 }
  0x5f   :  { %569 = vst [vmem:[%s1161_s1 + $0x2d8] sm:$0xff] %v568_v29 }
  0x60   :  { %571 = vst [vmem:[%s1161_s1 + $0x178] sm:$0xff] %v570_v30 }
  0x61   :  { %573 = vst [vmem:[%s1161_s1 + $0x2f8] sm:$0xff] %v572_v31 }

// kernel: _lambda_.12
= control target key start
LH: loop header
LB: loop body
LE: loop exit
PB: predicated region body
PF: predicated region fallthrough
CT: control target
= control target key end

     0   :  { %s4031_s27 = smov 0   ;;  %s6630_s0 = inlined_call_operand.vmem [shape: f32[1280,32], index: 0, kind: input, shape index: {}]   ;;  %s6631_s1 = inlined_call_operand.vmem [shape: f32[1280,32], index: 1, kind: input, shape index: {}]   ;;  %s6632_s2 = inlined_call_operand.vmem [shape: bf16[32,32], index: 2, kind: input, shape index: {}]   ;;  %s6633_s3 = inlined_call_operand.vmem [shape: f32[1,32], index: 3, kind: input, shape index: {}]   ;;  %s6634_s4 = inlined_call_operand.vmem [shape: bf16[32,32], index: 4, kind: input, shape index: {}]   ;;  %s6635_s5 = inlined_call_operand.vmem [shape: f32[1,32], index: 5, kind: input, shape index: {}]   ;;  %s6636_s6 = inlined_call_operand.vmem [shape: bf16[32,32], index: 6, kind: input, shape index: {}]   ;;  %s6637_s7 = inlined_call_operand.vmem [shape: f32[1,32], index: 7, kind: input, shape index: {}]   ;;  %s6638_s8 = inlined_call_operand.vmem [shape: f32[1280,32], index: 8, kind: output, shape index: {}]  }
   0x1 LB: > { %s3608_s28 = sadd.s32 4294967295, %s3984_s27   ;;  %p3612_p0 = scmp.ge.s32.totalorder %s3984_s27, 1  ;;  %s3984_s27 = sphi %s4031_s27, %s18_s27  }
   0x2   : > { %p274_p1 = scmp.lt.s32.totalorder %s3984_s27, 6 }
   0x4   : > { %p275_p2 = pnand %p3612_p0, %p274_p1 }
   0x5   : > { %s3613_s9 = sshll.u32 (!%p275_p2), %s3608_s28, 5 }
   0x6   : > { %278 = sbr.rel (%p275_p2) target bundleno = 831 (0x33f), region = 52  ;;  %p314_p3 = scmp.lt.s32.totalorder (!%p275_p2), %s3613_s9, 159 }
   0xb   : > { %v3694_v0 = vld [vmem:[%s6632_s2 + $0x8] sm:$0xff]  ;;  %v3693_v1 = vld [vmem:[%s6632_s2] sm:$0xff]  ;;  %s6674_s9 = smov (!%p314_p3, %s3613_s9), 159  ;;  %vm400_vm0 = vcmask 261120  }
   0xc   : > { %455 = vmatpush.bf16.msra.mxu0 %v3694_v0  ;;  %3699 = vmatpush.bf16.msra.mxu3 %v3694_v0  ;;  %s4045_s12 = sshll.u32 %s6674_s9, 3  ;;  %v4094_v40 = vld [vmem:[%s6633_s3] ss:$0 sm:$0xff] }
   0xd   : > { %s4051_s15 = scalar_lea.vmem %s6630_s0, %s4045_s12  ;;  %s4469_s26 = scalar_lea.vmem %s6631_s1, %s4045_s12 }
   0xe   : > { %v332_v2 = vld [vmem:[%s4051_s15] sm:$0xff]  ;;  %v333_v3 = vld [vmem:[%s4051_s15 + $0x8] sm:$0xff]  ;;  %v334_v8 = vld [vmem:[%s4051_s15 + $0x10] sm:$0xff]  ;;  %s5588_s19 = scalar_lea.vmem %s6638_s8, %s4045_s12 }
   0xf   : > { %v356_v4 = vld [vmem:[%s4051_s15 + $0xc0] sm:$0xff]  ;;  %v364_v5 = vpack.c.bf16 %v333_v3, %v332_v2  ;;  %v357_v6 = vld [vmem:[%s4051_s15 + $0xc8] sm:$0xff]  ;;  %v335_v9 = vld [vmem:[%s4051_s15 + $0x18] sm:$0xff] }
  0x10   : > { %456 = vmatpush.bf16.msra.mxu0 %v3693_v1  ;;  %3700 = vmatpush.bf16.msra.mxu3 %v3693_v1  ;;  %v376_v7 = vpack.c.bf16 %v357_v6, %v356_v4  ;;  %v358_v10 = vld [vmem:[%s4051_s15 + $0xd0] sm:$0xff]  ;;  %v359_v11 = vld [vmem:[%s4051_s15 + $0xd8] sm:$0xff]  ;;  %v365_v12 = vpack.c.bf16 %v335_v9, %v334_v8  ;;  %v336_v14 = vld [vmem:[%s4051_s15 + $0x20] sm:$0xff] }
  0x11   : > { %v377_v13 = vpack.c.bf16 %v359_v11, %v358_v10  ;;  %v337_v15 = vld [vmem:[%s4051_s15 + $0x28] sm:$0xff]  ;;  %v360_v16 = vld [vmem:[%s4051_s15 + $0xe0] sm:$0xff]  ;;  %v338_v20 = vld [vmem:[%s4051_s15 + $0x30] sm:$0xff] }
  0x12   : > { %v361_v17 = vld [vmem:[%s4051_s15 + $0xe8] sm:$0xff]  ;;  %v366_v18 = vpack.c.bf16 %v337_v15, %v336_v14  ;;  %v339_v21 = vld [vmem:[%s4051_s15 + $0x38] sm:$0xff]  ;;  %v362_v22 = vld [vmem:[%s4051_s15 + $0xf0] sm:$0xff] }
  0x13   : > { %3627 = vmatmul.msk.bf16.vlgmr.msra.gmra.mxu0 %vm400_vm0, %v364_v5  ;;  %3639 = vmatmul.msk.bf16.vlgmr.msra.gmra.mxu3 %vm400_vm0, %v376_v7  ;;  %v378_v19 = vpack.c.bf16 %v361_v17, %v360_v16  ;;  %v363_v23 = vld [vmem:[%s4051_s15 + $0xf8] sm:$0xff]  ;;  %v367_v24 = vpack.c.bf16 %v339_v21, %v338_v20  ;;  %v340_v26 = vld [vmem:[%s4051_s15 + $0x40] sm:$0xff]  ;;  %v341_v27 = vld [vmem:[%s4051_s15 + $0x48] sm:$0xff] }
  0x14   : > { %v379_v25 = vpack.c.bf16 %v363_v23, %v362_v22  ;;  %v368_v28 = vpack.c.bf16 %v341_v27, %v340_v26  ;;  %v342_v29 = vld [vmem:[%s4051_s15 + $0x50] sm:$0xff]  ;;  %v343_v30 = vld [vmem:[%s4051_s15 + $0x58] sm:$0xff]  ;;  %v344_v32 = vld [vmem:[%s4051_s15 + $0x60] sm:$0xff] }
  0x15   : > { %v369_v31 = vpack.c.bf16 %v343_v30, %v342_v29  ;;  %v345_v33 = vld [vmem:[%s4051_s15 + $0x68] sm:$0xff]  ;;  %v346_v35 = vld [vmem:[%s4051_s15 + $0x70] sm:$0xff]  ;;  %v347_v36 = vld [vmem:[%s4051_s15 + $0x78] sm:$0xff] }
  0x16   : > { %v370_v34 = vpack.c.bf16 %v345_v33, %v344_v32  ;;  %v371_v37 = vpack.c.bf16 %v347_v36, %v346_v35  ;;  %v348_v38 = vld [vmem:[%s4051_s15 + $0x80] sm:$0xff]  ;;  %v349_v39 = vld [vmem:[%s4051_s15 + $0x88] sm:$0xff]  ;;  %v350_v54 = vld [vmem:[%s4051_s15 + $0x90] sm:$0xff] }
  0x17   : > { %v372_v41 = vpack.c.bf16 %v349_v39, %v348_v38  ;;  %v351_v55 = vld [vmem:[%s4051_s15 + $0x98] sm:$0xff] }
  0x18   : > { %v373_v60 = vpack.c.bf16 %v351_v55, %v350_v54 }
  0x23   : > { %3628 = vmatmul.msk.bf16.gmra.mxu0 %vm400_vm0, %v365_v12  ;;  %3640 = vmatmul.msk.bf16.gmra.mxu3 %vm400_vm0, %v377_v13 }
  0x33   : > { %3629 = vmatmul.msk.bf16.gmra.mxu0 %vm400_vm0, %v366_v18  ;;  %3641 = vmatmul.msk.bf16.gmra.mxu3 %vm400_vm0, %v378_v19 }
  0x43   : > { %3630 = vmatmul.msk.bf16.gmra.mxu0 %vm400_vm0, %v367_v24  ;;  %3642 = vmatmul.msk.bf16.gmra.mxu3 %vm400_vm0, %v379_v25 }
  0x53   : > { %3631 = vmatmul.msk.bf16.gmra.mxu0 %vm400_vm0, %v368_v28 }
  0x63   : > { %3632 = vmatmul.msk.bf16.gmra.mxu0 %vm400_vm0, %v369_v31 }
  0x73   : > { %3633 = vmatmul.msk.bf16.gmra.mxu0 %vm400_vm0, %v370_v34 }
  0x83   : > { %3634 = vmatmul.msk.bf16.gmra.mxu0 %vm400_vm0, %v371_v37 }
  0x90   : > { %v458_v42 = vpop.f32.mrf.mxu0 }
  0x91   : > { %v4097_v43 = vadd.f32 %v4094_v40, %v458_v42 }
  0x93   : > { %v4100_v44 = vmul.f32 0.70710677, %v4097_v43  ;;  %3635 = vmatmul.msk.bf16.gmra.mxu0 %vm400_vm0, %v372_v41 }
  0x95   : > { %v4104_v45 = vand.u32 2147483647, %v4100_v44 }
  0x96   : > { %v518_v47 = vpop.f32.mrf.mxu3 }
  0x97   : > { %v634_v46 = vmul.f32 0.3275911, %v4104_v45  ;;  %v4108_v48 = vadd.f32 %v4094_v40, %v518_v47  ;;  %v1466_v54 = vsub.f32 0.0, %v4104_v45 }
  0x98   : > { %v460_v49 = vpop.f32.mrf.mxu0 }
  0x99   : > { %v666_v50 = vadd.f32 1.0, %v634_v46  ;;  %v4111_v51 = vadd.f32 %v4094_v40, %v460_v49  ;;  %v4114_v52 = vmul.f32 0.70710677, %v4108_v48 }
  0x9b   : > { %3716 = vrcp.f32 %v666_v50  ;;  %v4117_v53 = vand.u32 2147483647, %v4114_v52  ;;  %v4122_v56 = vmul.f32 0.70710677, %v4111_v51  ;;  %v707_v5 = vand.u32 2147483647, %v666_v50 }
  0x9c   : > { %v709_v8 = vand.u32 2147483648, %v666_v50  ;;  %vm703_vm2 = vweird.f32 %v666_v50 }
  0x9d   : > { %v658_v57 = vmul.f32 0.3275911, %v4117_v53  ;;  %v4126_v58 = vand.u32 2147483647, %v4122_v56  ;;  %vm708_vm3 = vcmp.eq.f32.partialorder %v707_v5, 8.507059e+37 }
  0x9e   : > { %v520_v59 = vpop.f32.mrf.mxu3  ;;  %v710_v14 = vor.u32 1.1754944e-38, %v709_v8 }
  0x9f   : > { %v690_v61 = vadd.f32 1.0, %v658_v57  ;;  %v4129_v62 = vadd.f32 %v4094_v40, %v520_v59  ;;  %v635_v0 = vmul.f32 0.3275911, %v4126_v58 }
  0xa0   : > { %v463_v1 = vpop.f32.mrf.mxu0 }
  0xa1   : > { %v3717_v63 = vpop.eup %3716  ;;  %3718 = vrcp.f32 %v690_v61  ;;  %v667_v3 = vadd.f32 1.0, %v635_v0  ;;  %v4134_v6 = vmul.f32 0.70710677, %v4129_v62  ;;  %v4137_v7 = vadd.f32 %v4094_v40, %v463_v1 }
  0xa2   : > { %v699_v2 = vmul.f32 %v3717_v63, %v666_v50  ;;  %vm704_vm1 = vweird.f32 %v3717_v63  ;;  %vm1063_vm5 = vweird.f32 %v690_v61  ;;  %v1067_v18 = vand.u32 2147483647, %v690_v61 }
  0xa3   : > { %3636 = vmatmul.msk.bf16.gmra.mxu0 %vm400_vm0, %v373_v60  ;;  %3720 = vrcp.f32 %v667_v3  ;;  %v4140_v10 = vand.u32 2147483647, %v4134_v6  ;;  %v4143_v13 = vmul.f32 0.70710677, %v4137_v7  ;;  %vm705_vm4 = vmor %vm703_vm2, %vm704_vm1  ;;  %v1069_v19 = vand.u32 2147483648, %v690_v61 }
  0xa4   : > { %v700_v4 = vsub.f32 1.0, %v699_v2  ;;  %vm1068_vm8 = vcmp.eq.f32.partialorder %v1067_v18, 8.507059e+37  ;;  %v722_v35 = vand.u32 2147483647, %v667_v3  ;;  %v724_v36 = vand.u32 2147483648, %v667_v3 }
  0xa5   : > { %v659_v16 = vmul.f32 0.3275911, %v4140_v10  ;;  %v4147_v20 = vand.u32 2147483647, %v4143_v13  ;;  %v1070_v30 = vor.u32 1.1754944e-38, %v1069_v19  ;;  %vm718_vm10 = vweird.f32 %v667_v3 }
  0xa6   : > { %v701_v9 = vmul.f32 %v3717_v63, %v700_v4  ;;  %v523_v41 = vpop.f32.mrf.mxu3  ;;  %vm723_vm12 = vcmp.eq.f32.partialorder %v722_v35, 8.507059e+37  ;;  %v725_v55 = vor.u32 1.1754944e-38, %v724_v36 }
  0xa7   : > { %v3719_v11 = vpop.eup %3718  ;;  %v691_v23 = vadd.f32 1.0, %v659_v16  ;;  %v636_v26 = vmul.f32 0.3275911, %v4147_v20  ;;  %v4162_v50 = vadd.f32 %v4094_v40, %v523_v41 }
  0xa8   : > { %v702_v12 = vadd.f32 %v3717_v63, %v701_v9  ;;  %v1059_v15 = vmul.f32 %v3719_v11, %v690_v61  ;;  %vm1064_vm6 = vweird.f32 %v3719_v11 }
  0xa9   : > { %v3721_v24 = vpop.eup %3720  ;;  %3722 = vrcp.f32 %v691_v23  ;;  %vm1065_vm7 = vmor %vm1063_vm5, %vm1064_vm6  ;;  %v4154_v33 = vadd.f32 1.0, %v636_v26  ;;  %vm1078_vm13 = vweird.f32 %v691_v23  ;;  %v1084_v61 = vand.u32 2147483648, %v691_v23  ;;  %v465_v26 = vpop.f32.mrf.mxu0 }
  0xaa   : > { %v706_v17 = vsel %vm705_vm4, %v3717_v63, %v702_v12  ;;  %v1060_v22 = vsub.f32 1.0, %v1059_v15  ;;  %v714_v28 = vmul.f32 %v3721_v24, %v667_v3  ;;  %vm719_vm9 = vweird.f32 %v3721_v24 }
  0xab   : > { %v4149_v21 = vsel %vm708_vm3, %v710_v14, %v706_v17  ;;  %3724 = vrcp.f32 %v4154_v33  ;;  %vm720_vm11 = vmor %vm718_vm10, %vm719_vm9  ;;  %v1082_v1 = vand.u32 2147483647, %v691_v23  ;;  %v4171_v5 = vmul.f32 0.70710677, %v4162_v50 }
  0xac   : > { %v1178_v25 = vmul.f32 1.0614054, %v4149_v21  ;;  %v1061_v27 = vmul.f32 %v3719_v11, %v1060_v22  ;;  %v715_v32 = vsub.f32 1.0, %v714_v28  ;;  %v1085_v15 = vor.u32 1.1754944e-38, %v1084_v61 }
  0xad   : > { %v1490_v17 = vsub.f32 0.0, %v4117_v53  ;;  %vm1083_vm1 = vcmp.eq.f32.partialorder %v1082_v1, 8.507059e+37  ;;  %v4180_v19 = vand.u32 2147483647, %v4171_v5  ;;  %vm733_vm3 = vweird.f32 %v4154_v33 }
  0xae   : > { %v1210_v29 = vadd.f32 -1.4531521, %v1178_v25  ;;  %v1062_v31 = vadd.f32 %v3719_v11, %v1061_v27  ;;  %v716_v38 = vmul.f32 %v3721_v24, %v715_v32  ;;  %v737_v25 = vand.u32 2147483647, %v4154_v33 }
  0xaf   : > { %v3723_v42 = vpop.eup %3722  ;;  %vm1658_vm10 = vcmp.ge.f32.partialorder %v4100_v44, 0.0 }
  0xb0   : > { %v1242_v34 = vmul.f32 %v1210_v29, %v4149_v21  ;;  %v1066_v37 = vsel %vm1065_vm7, %v3719_v11, %v1062_v31  ;;  %v717_v49 = vadd.f32 %v3721_v24, %v716_v38  ;;  %v1074_v57 = vmul.f32 %v3723_v42, %v691_v23 }
  0xb1   : > { %v4157_v39 = vsel %vm1068_vm8, %v1070_v30, %v1066_v37  ;;  %vm1079_vm14 = vweird.f32 %v3723_v42  ;;  %v3725_v8 = vpop.eup %3724  ;;  %v1498_v23 = vmul.f32 %v1466_v54, %v4104_v45  ;;  %v739_v29 = vand.u32 2147483648, %v4154_v33 }
  0xb2   : > { %v1274_v46 = vadd.f32 1.4214138, %v1242_v34  ;;  %v1202_v47 = vmul.f32 1.0614054, %v4157_v39  ;;  %v721_v60 = vsel %vm720_vm11, %v3721_v24, %v717_v49  ;;  %v1075_v0 = vsub.f32 1.0, %v1074_v57  ;;  %vm4173_vm15 = vmor %vm1078_vm13, %vm1079_vm14 }
  0xb3   : > { %v4165_v63 = vsel %vm723_vm12, %v725_v55, %v721_v60  ;;  %v729_v16 = vmul.f32 %v3725_v8, %v4154_v33  ;;  %v660_v30 = vmul.f32 0.3275911, %v4180_v19  ;;  %vm734_vm2 = vweird.f32 %v3725_v8 }
  0xb4   : > { %v1234_v59 = vadd.f32 -1.4531521, %v1202_v47  ;;  %v1306_v2 = vmul.f32 %v1274_v46, %v4149_v21  ;;  %v1179_v4 = vmul.f32 1.0614054, %v4165_v63  ;;  %v1076_v9 = vmul.f32 %v3723_v42, %v1075_v0  ;;  %vm735_vm4 = vmor %vm733_vm3, %vm734_vm2 }
  0xb5   : > { %v730_v24 = vsub.f32 1.0, %v729_v16  ;;  %v1522_v45 = vmul.f32 %v1490_v17, %v4117_v53  ;;  %v4194_v36 = vadd.f32 1.0, %v660_v30  ;;  %v4197_v37 = vadd.f32 %v4094_v40, %v465_v26 }
  0xb6   : > { %v1266_v3 = vmul.f32 %v1234_v59, %v4157_v39  ;;  %v1211_v12 = vadd.f32 -1.4531521, %v1179_v4  ;;  %v1077_v18 = vadd.f32 %v3723_v42, %v1076_v9  ;;  %v1338_v22 = vadd.f32 -0.28449672, %v1306_v2 }
  0xb7   : > { %v731_v34 = vmul.f32 %v3725_v8, %v730_v24  ;;  %v1530_v41 = vmul.f32 1.442695, %v1498_v23  ;;  %v740_v49 = vor.u32 1.1754944e-38, %v739_v29  ;;  %3726 = vrcp.f32 %v4194_v36 }
  0xb8   : > { %v1298_v11 = vadd.f32 1.4214138, %v1266_v3  ;;  %v1243_v27 = vmul.f32 %v1211_v12, %v4165_v63  ;;  %v1081_v28 = vsel %vm4173_vm15, %v3723_v42, %v1077_v18  ;;  %v1370_v38 = vmul.f32 %v1338_v22, %v4149_v21 }
  0xb9   : > { %v4190_v32 = vsel %vm1083_vm1, %v1085_v15, %v1081_v28  ;;  %v732_v42 = vadd.f32 %v3725_v8, %v731_v34  ;;  %v1467_v54 = vsub.f32 0.0, %v4126_v58  ;;  %vm738_vm5 = vcmp.eq.f32.partialorder %v737_v25, 8.507059e+37 }
  0xba   : > { %v1330_v31 = vmul.f32 %v1298_v11, %v4157_v39  ;;  %v1203_v35 = vmul.f32 1.0614054, %v4190_v32  ;;  %v1275_v46 = vadd.f32 1.4214138, %v1243_v27  ;;  %v1578_v57 = vmul.f32 1.442695, %v1522_v45 }
  0xbb   : > { %v736_v55 = vsel %vm735_vm4, %v3725_v8, %v732_v42  ;;  %v4207_v61 = vmul.f32 0.70710677, %v4197_v37  ;;  %v1402_v33 = vadd.f32 0.2548296, %v1370_v38  ;;  %v1491_v0 = vsub.f32 0.0, %v4140_v10 }
  0xbc   : > { %v1235_v47 = vadd.f32 -1.4531521, %v1203_v35  ;;  %v1362_v53 = vadd.f32 -0.28449672, %v1330_v31  ;;  %v4204_v60 = vsel %vm738_vm5, %v740_v49, %v736_v55  ;;  %v1307_v2 = vmul.f32 %v1275_v46, %v4165_v63 }
  0xbd   : > { %v1180_v1 = vmul.f32 1.0614054, %v4204_v60  ;;  %v3727_v9 = vpop.eup %3726  ;;  %3728 = vpow2.f32 %v1530_v41  ;;  %v1499_v11 = vmul.f32 %v1467_v54, %v4126_v58  ;;  %v4216_v14 = vand.u32 2147483647, %v4207_v61 }
  0xbe   : > { %v1267_v59 = vmul.f32 %v1235_v47, %v4190_v32  ;;  %v1394_v4 = vmul.f32 %v1362_v53, %v4157_v39  ;;  %v1434_v15 = vmul.f32 %v1402_v33, %v4149_v21  ;;  %3730 = vpow2.f32 %v1578_v57  ;;  %v468_v33 = vpop.f32.mrf.mxu0 }
  0xbf   : > { %v1212_v8 = vadd.f32 -1.4531521, %v1180_v1  ;;  %v1523_v16 = vmul.f32 %v1491_v0, %v4140_v10  ;;  %v1339_v18 = vadd.f32 -0.28449672, %v1307_v2  ;;  %v1089_v23 = vmul.f32 %v3727_v9, %v4194_v36  ;;  %v525_v10 = vpop.f32.mrf.mxu3  ;;  %v4258_v2 = vld [vmem:[%s6636_s6 + $0x8] sm:$0xff] }
  0xc0   : > { %v1299_v3 = vadd.f32 1.4214138, %v1267_v59  ;;  %v637_v24 = vmul.f32 0.3275911, %v4216_v14  ;;  %v1426_v25 = vadd.f32 0.2548296, %v1394_v4  ;;  %vm1093_vm6 = vweird.f32 %v4194_v36  ;;  %2113 = vmatpush.bf16.msra.mxu2 %v4258_v2 }
  0xc1   : > { %v1244_v17 = vmul.f32 %v1212_v8, %v4204_v60  ;;  %v1097_v58 = vand.u32 2147483647, %v4194_v36  ;;  %v1099_v26 = vand.u32 2147483648, %v4194_v36  ;;  %v1090_v21 = vsub.f32 1.0, %v1089_v23 }
  0xc2   : > { %v1331_v12 = vmul.f32 %v1299_v3, %v4190_v32  ;;  %vm1094_vm7 = vweird.f32 %v3727_v9  ;;  %v4226_v28 = vadd.f32 1.0, %v637_v24  ;;  %v1532_v29 = vmul.f32 1.442695, %v1499_v11 }
  0xc3   : > { %v1276_v27 = vadd.f32 1.4214138, %v1244_v17  ;;  %v1580_v30 = vmul.f32 1.442695, %v1523_v16  ;;  %v1468_v31 = vsub.f32 0.0, %v4147_v20  ;;  %v3729_v34 = vpop.eup %3728  ;;  %v1371_v45 = vmul.f32 %v1339_v18, %v4165_v63  ;;  %vm4235_vm8 = vmor %vm1093_vm6, %vm1094_vm7 }
  0xc4   : > { %v1363_v22 = vadd.f32 -0.28449672, %v1331_v12  ;;  %v1091_v38 = vmul.f32 %v3727_v9, %v1090_v21  ;;  %3732 = vrcp.f32 %v4226_v28  ;;  %v3731_v41 = vpop.eup %3730  ;;  %v1594_v42 = vmul.f32 %v3729_v34, %v1434_v15 }
  0xc5   : > { %v1458_v46 = vmul.f32 %v1426_v25, %v4157_v39  ;;  %v1100_v49 = vor.u32 1.1754944e-38, %v1099_v26  ;;  %v4240_v53 = vadd.f32 %v4094_v40, %v525_v10  ;;  %v4243_v54 = vmul.f32 0.5, %v4097_v43 }
  0xc6   : > { %v1395_v35 = vmul.f32 %v1363_v22, %v4190_v32  ;;  %v1308_v55 = vmul.f32 %v1276_v27, %v4204_v60  ;;  %v1092_v57 = vadd.f32 %v3727_v9, %v1091_v38  ;;  %vm1098_vm9 = vcmp.eq.f32.partialorder %v1097_v58, 8.507059e+37 }
  0xc7   : > { %v4247_v59 = vmul.f32 0.5, %v4111_v51  ;;  %3734 = vpow2.f32 %v1580_v30  ;;  %v4250_v39 = vmul.f32 0.5, %v4137_v7  ;;  %v1500_v36 = vmul.f32 %v1468_v31, %v4147_v20 }
  0xc8   : > { %v1403_v0 = vadd.f32 0.2548296, %v1371_v45  ;;  %3736 = vpow2.f32 %v1532_v29  ;;  %v1427_v1 = vadd.f32 0.2548296, %v1395_v35  ;;  %v1096_v43 = vsel %vm4235_vm8, %v3727_v9, %v1092_v57 }
  0xc9   : > { %v1626_v51 = vsub.f32 1.0, %v1594_v42  ;;  %v1618_v3 = vmul.f32 %v3731_v41, %v1458_v46  ;;  %v4261_v7 = vsel %vm1098_vm9, %v1100_v49, %v1096_v43  ;;  %v4264_v20 = vmul.f32 0.70710677, %v4240_v53 }
  0xca   : > { %v3733_v4 = vpop.eup %3732  ;;  %v4267_v8 = vmul.f32 0.5, %v4108_v48  ;;  %v1340_v11 = vadd.f32 -0.28449672, %v1308_v55  ;;  %v1204_v9 = vmul.f32 1.0614054, %v4261_v7  ;;  %v4271_v12 = vadd.f32 %v4094_v40, %v468_v33 }
  0xcb   : > { %v1534_v15 = vmul.f32 1.442695, %v1500_v36  ;;  %v1492_v16 = vsub.f32 0.0, %v4180_v19  ;;  %v744_v17 = vmul.f32 %v3733_v4, %v4226_v28  ;;  %v4277_v18 = vand.u32 2147483647, %v4264_v20 }
  0xcc   : > { %v1435_v22 = vmul.f32 %v1403_v0, %v4165_v63  ;;  %v1459_v48 = vmul.f32 %v1427_v1, %v4190_v32  ;;  %v1236_v23 = vadd.f32 -1.4531521, %v1204_v9  ;;  %v4282_v24 = vmul.f32 0.70710677, %v4271_v12 }
  0xcd   : > { %v3735_v25 = vpop.eup %3734  ;;  %v1690_v58 = vsub.f32 0.0, %v1626_v51  ;;  %v1650_v26 = vsub.f32 1.0, %v1618_v3  ;;  %v745_v27 = vsub.f32 1.0, %v744_v17  ;;  %v661_v21 = vmul.f32 0.3275911, %v4277_v18  ;;  %v353_v17 = vld [vmem:[%s4051_s15 + $0xa8] sm:$0xff] }
  0xce   : > { %v3737_v10 = vpop.eup %3736  ;;  %v1372_v29 = vmul.f32 %v1340_v11, %v4204_v60  ;;  %v752_v30 = vand.u32 2147483647, %v4226_v28  ;;  %v754_v31 = vand.u32 2147483648, %v4226_v28  ;;  %v4289_v63 = vand.u32 2147483647, %v4282_v24 }
  0xcf   : > { %v1268_v32 = vmul.f32 %v1236_v23, %v4261_v7  ;;  %v746_v34 = vmul.f32 %v3733_v4, %v745_v27  ;;  %vm749_vm11 = vweird.f32 %v3733_v4  ;;  %v4292_v45 = vadd.f32 1.0, %v661_v21 }
  0xd0   : > { %vm1682_vm12 = vcmp.ge.f32.partialorder %v4114_v52, 0.0  ;;  %v4295_v35 = vmul.f32 %v3737_v10, %v1435_v22  ;;  %v1619_v38 = vmul.f32 %v3735_v25, %v1459_v48  ;;  %3738 = vpow2.f32 %v1534_v15 }
  0xd1   : > { %v747_v41 = vadd.f32 %v3733_v4, %v746_v34  ;;  %vm748_vm13 = vweird.f32 %v4226_v28  ;;  %3740 = vrcp.f32 %v4292_v45  ;;  %v638_v42 = vmul.f32 0.3275911, %v4289_v63 }
  0xd2   : > { %v1722_v46 = vsel %vm1658_vm10, %v1626_v51, %v1690_v58  ;;  %v1714_v47 = vsub.f32 0.0, %v1650_v26  ;;  %v1524_v49 = vmul.f32 %v1492_v16, %v4180_v19  ;;  %vm750_vm14 = vmor %vm748_vm13, %vm749_vm11  ;;  %v755_v55 = vor.u32 1.1754944e-38, %v754_v31  ;;  %v352_v16 = vld [vmem:[%s4051_s15 + $0xa0] sm:$0xff] }
  0xd3   : > { %v1404_v57 = vadd.f32 0.2548296, %v1372_v29  ;;  %v1300_v36 = vadd.f32 1.4214138, %v1268_v32  ;;  %v751_v33 = vsel %vm750_vm14, %v3733_v4, %v747_v41  ;;  %vm753_vm15 = vcmp.eq.f32.partialorder %v752_v30, 8.507059e+37 }
  0xd4   : > { %v1627_v28 = vsub.f32 1.0, %v4295_v35  ;;  %vm1659_vm1 = vcmp.ge.f32.partialorder %v4122_v56, 0.0  ;;  %v1651_v0 = vsub.f32 1.0, %v1619_v38  ;;  %v4305_v1 = vsel %vm753_vm15, %v755_v55, %v751_v33 }
  0xd5   : > { %v1469_v44 = vsub.f32 0.0, %v4216_v14  ;;  %v4309_v43 = vmul.f32 0.5, %v4129_v62  ;;  %vm1683_vm2 = vcmp.ge.f32.partialorder %v4134_v6, 0.0  ;;  %v1181_v19 = vmul.f32 1.0614054, %v4305_v1 }
  0xd6   : > { %v4313_v51 = vadd.f32 1.0, %v638_v42  ;;  %v3739_v3 = vpop.eup %3738  ;;  %v4315_v4 = vadd.f32 1.0, %v1722_v46  ;;  %v1746_v11 = vsel %vm1682_vm12, %v1650_v26, %v1714_v47  ;;  %v1582_v9 = vmul.f32 1.442695, %v1524_v49  ;;  %v470_v26 = vpop.f32.mrf.mxu0 }
  0xd7   : > { %v4320_v15 = vmul.f32 0.5, %v4197_v37  ;;  %v3741_v62 = vpop.eup %3740  ;;  %v1436_v22 = vmul.f32 %v1404_v57, %v4204_v60  ;;  %v1332_v48 = vmul.f32 %v1300_v36, %v4261_v7  ;;  %v1213_v23 = vadd.f32 -1.4531521, %v1181_v19  ;;  %v528_v60 = vpop.f32.mrf.mxu3 }
  0xd8   : > { %3742 = vrcp.f32 %v4313_v51  ;;  %v1691_v25 = vsub.f32 0.0, %v1627_v28  ;;  %v1715_v58 = vsub.f32 0.0, %v1651_v0  ;;  %v1501_v27 = vmul.f32 %v1469_v44, %v4216_v14  ;;  %v4339_v14 = vld [vmem:[%s6636_s6] sm:$0xff] }
  0xd9   : > { %v1104_v52 = vmul.f32 %v3741_v62, %v4292_v45  ;;  %v1245_v37 = vmul.f32 %v1213_v23, %v4305_v1  ;;  %vm1108_vm3 = vweird.f32 %v4292_v45  ;;  %v1114_v21 = vand.u32 2147483648, %v4292_v45  ;;  %2114 = vmatpush.bf16.msra.mxu2 %v4339_v14 }
  0xda   : > { %v374_v10 = vpack.c.bf16 %v353_v17, %v352_v16  ;;  %vm1109_vm4 = vweird.f32 %v3741_v62  ;;  %v1112_v30 = vand.u32 2147483647, %v4292_v45  ;;  %v4334_v31 = vadd.f32 %v4094_v40, %v528_v60 }
  0xdb   : > { %v1105_v29 = vsub.f32 1.0, %v1104_v52  ;;  %v4341_v32 = vmul.f32 %v3739_v3, %v1436_v22  ;;  %v1364_v34 = vadd.f32 -0.28449672, %v1332_v48  ;;  %3744 = vpow2.f32 %v1582_v9  ;;  %vm4358_vm5 = vmor %vm1108_vm3, %vm1109_vm4 }
  0xdc   : > { %3637 = vmatmul.msk.bf16.gmra.mxu0 %vm400_vm0, %v374_v10  ;;  %v4345_v35 = vadd.f32 %v4094_v40, %v470_v26  ;;  %v1747_v38 = vsel %vm1683_vm2, %v1651_v0, %v1715_v58  ;;  %v1277_v41 = vadd.f32 1.4214138, %v1245_v37  ;;  %v4350_v46 = vmul.f32 0.70710677, %v4334_v31 }
  0xdd   : > { %v1106_v42 = vmul.f32 %v3741_v62, %v1105_v29  ;;  %v1778_v49 = vadd.f32 1.0, %v1746_v11  ;;  %v1723_v55 = vsel %vm1659_vm1, %v1627_v28, %v1691_v25  ;;  %v1115_v6 = vor.u32 1.1754944e-38, %v1114_v21  ;;  %v354_v21 = vld [vmem:[%s4051_s15 + $0xb0] sm:$0xff] }
  0xde   : > { %v3743_v47 = vpop.eup %3742  ;;  %v4363_v36 = vmul.f32 0.70710677, %v4345_v35  ;;  %v1536_v33 = vmul.f32 1.442695, %v1501_v27  ;;  %vm1113_vm6 = vcmp.eq.f32.partialorder %v1112_v30, 8.507059e+37  ;;  %v1779_v19 = vadd.f32 1.0, %v1747_v38 }
  0xdf   : > { %v1107_v0 = vadd.f32 %v3741_v62, %v1106_v42  ;;  %v759_v44 = vmul.f32 %v3743_v47, %v4313_v51  ;;  %v1396_v56 = vmul.f32 %v1364_v34, %v4261_v7  ;;  %v4368_v28 = vand.u32 2147483647, %v4350_v46  ;;  %v355_v34 = vld [vmem:[%s4051_s15 + $0xb8] sm:$0xff] }
  0xe0   : > { %v4371_v45 = vand.u32 2147483647, %v4363_v36  ;;  %v1628_v3 = vsub.f32 1.0, %v4341_v32  ;;  %v1309_v11 = vmul.f32 %v1277_v41, %v4305_v1  ;;  %v767_v48 = vand.u32 2147483647, %v4313_v51  ;;  %v530_v32 = vpop.f32.mrf.mxu3 }
  0xe1   : > { %v1111_v9 = vsel %vm4358_vm5, %v3741_v62, %v1107_v0  ;;  %v760_v16 = vsub.f32 1.0, %v759_v44  ;;  %v3745_v17 = vpop.eup %3744  ;;  %v769_v23 = vand.u32 2147483648, %v4313_v51  ;;  %v662_v25 = vmul.f32 0.3275911, %v4368_v28 }
  0xe2   : > { %v4377_v22 = vsel %vm1113_vm6, %v1115_v6, %v1111_v9  ;;  %vm1660_vm7 = vcmp.ge.f32.partialorder %v4143_v13, 0.0  ;;  %vm764_vm8 = vweird.f32 %v3743_v47  ;;  %v639_v62 = vmul.f32 0.3275911, %v4371_v45 }
  0xe3   : > { %v1205_v58 = vmul.f32 1.0614054, %v4377_v22  ;;  %v761_v27 = vmul.f32 %v3743_v47, %v760_v16  ;;  %v1755_v52 = vadd.f32 1.0, %v1723_v55  ;;  %v1428_v26 = vadd.f32 0.2548296, %v1396_v56 }
  0xe4   : > { %vm763_vm9 = vweird.f32 %v4313_v51  ;;  %v4386_v37 = vadd.f32 1.0, %v662_v25  ;;  %v1341_v10 = vadd.f32 -0.28449672, %v1309_v11  ;;  %v4389_v30 = vadd.f32 1.0, %v639_v62 }
  0xe5   : > { %v1237_v60 = vadd.f32 -1.4531521, %v1205_v58  ;;  %v762_v29 = vadd.f32 %v3743_v47, %v761_v27  ;;  %v4393_v38 = vmul.f32 %v1779_v19, %v4309_v43  ;;  %v1493_v41 = vsub.f32 0.0, %v4277_v18  ;;  %vm765_vm10 = vmor %vm763_vm9, %vm764_vm8 }
  0xe6   : > { %v770_v42 = vor.u32 1.1754944e-38, %v769_v23  ;;  %3746 = vrcp.f32 %v4386_v37  ;;  %v1692_v51 = vsub.f32 0.0, %v1628_v3  ;;  %vm768_vm11 = vcmp.eq.f32.partialorder %v767_v48, 8.507059e+37 }
  0xe7   : > { %v1269_v55 = vmul.f32 %v1237_v60, %v4377_v22  ;;  %v766_v57 = vsel %vm765_vm10, %v3743_v47, %v762_v29  ;;  %3748 = vrcp.f32 %v4389_v30  ;;  %v4403_v0 = vadd.f32 %v4094_v40, %v530_v32 }
  0xe8   : > { %v4399_v6 = vsel %vm768_vm11, %v770_v42, %v766_v57  ;;  %v375_v43 = vpack.c.bf16 %v355_v34, %v354_v21  ;;  %v4406_v44 = vmul.f32 0.5, %v4162_v50  ;;  %v1460_v19 = vmul.f32 %v1428_v26, %v4261_v7  ;;  %v3696_v26 = vld [vmem:[%s6634_s4 + $0x8] sm:$0xff] }
  0xe9   : > { %v1373_v56 = vmul.f32 %v1341_v10, %v4305_v1  ;;  %v1182_v11 = vmul.f32 1.0614054, %v4399_v6  ;;  %v4413_v47 = vmul.f32 %v4315_v4, %v4243_v54  ;;  %v4416_v9 = vmul.f32 %v1778_v49, %v4267_v8  ;;  %1908 = vmatpush.bf16.msra.mxu1 %v3696_v26  ;;  %3701 = vmatpush.bf16.msrb.mxu3 %v3696_v26 }
  0xea   : > { %3750 = vpow2.f32 %v1536_v33  ;;  %v1301_v16 = vadd.f32 1.4214138, %v1269_v55  ;;  %v4419_v48 = vmul.f32 %v1755_v52, %v4247_v59  ;;  %v1525_v50 = vmul.f32 %v1493_v41, %v4277_v18 }
  0xeb   : > { %v4423_v7 = vmul.f32 0.5, %v4271_v12  ;;  %v1214_v23 = vadd.f32 -1.4531521, %v1182_v11  ;;  %v1830_v58 = vpack.c.bf16 %v4393_v38, %v4416_v9  ;;  %v1724_v54 = vsel %vm1660_vm7, %v1628_v3, %v1692_v51  ;;  %v473_v11 = vpop.f32.mrf.mxu0 }
  0xec   : > { %v3747_v25 = vpop.eup %3746  ;;  %v1470_v8 = vsub.f32 0.0, %v4289_v63  ;;  %v4431_v4 = vmul.f32 0.70710677, %v4403_v0  ;;  %3638 = vmatmul.msk.bf16.gmra.mxu0 %vm400_vm0, %v375_v43  ;;  %v4434_v59 = vmul.f32 %v3745_v17, %v1460_v19  ;;  %v1405_v18 = vadd.f32 0.2548296, %v1373_v56 }
  0xed   : > { %v1246_v12 = vmul.f32 %v1214_v23, %v4399_v6  ;;  %v1119_v49 = vmul.f32 %v3747_v25, %v4386_v37  ;;  %v3749_v33 = vpop.eup %3748  ;;  %v1333_v27 = vmul.f32 %v1301_v16, %v4377_v22  ;;  %vm1123_vm12 = vweird.f32 %v4386_v37 }
  0xee   : > { %v1129_v13 = vand.u32 2147483648, %v4386_v37  ;;  %v4442_v3 = vand.u32 2147483647, %v4431_v4  ;;  %vm1684_vm13 = vcmp.ge.f32.partialorder %v4171_v5, 0.0  ;;  %vm1124_vm14 = vweird.f32 %v3747_v25 }
  0xef   : > { %v1278_v62 = vadd.f32 1.4214138, %v1246_v12  ;;  %v1120_v17 = vsub.f32 1.0, %v1119_v49  ;;  %v1127_v52 = vand.u32 2147483647, %v4386_v37  ;;  %v4449_v10 = vadd.f32 1.0, %v1724_v54  ;;  %vm4459_vm15 = vmor %vm1123_vm12, %vm1124_vm14 }
  0xf0   : > { %v3751_v21 = vpop.eup %3750  ;;  %v1584_v60 = vmul.f32 1.442695, %v1525_v50  ;;  %v774_v29 = vmul.f32 %v3749_v33, %v4389_v30  ;;  %v663_v32 = vmul.f32 0.3275911, %v4442_v3  ;;  %v1652_v34 = vsub.f32 1.0, %v4434_v59  ;;  %v1992_v12 = vld [vmem:[%s4469_s26 + $0x8] sm:$0xff] }
  0xf1   : > { %v1437_v41 = vmul.f32 %v1405_v18, %v4305_v1  ;;  %v1502_v42 = vmul.f32 %v1470_v8, %v4289_v63  ;;  %v1121_v51 = vmul.f32 %v3747_v25, %v1120_v17  ;;  %v1365_v55 = vadd.f32 -0.28449672, %v1333_v27  ;;  %v1991_v18 = vld [vmem:[%s4469_s26] sm:$0xff] }
  0xf2   : > { %v1130_v43 = vor.u32 1.1754944e-38, %v1129_v13  ;;  %v775_v19 = vsub.f32 1.0, %v774_v29  ;;  %v4463_v56 = vadd.f32 1.0, %v663_v32  ;;  %v1310_v63 = vmul.f32 %v1278_v62, %v4399_v6 }
  0xf3   : > { %v1122_v1 = vadd.f32 %v3747_v25, %v1121_v51  ;;  %vm1128_vm1 = vcmp.eq.f32.partialorder %v1127_v52, 8.507059e+37  ;;  %v784_v37 = vand.u32 2147483648, %v4389_v30  ;;  %vm779_vm2 = vweird.f32 %v3749_v33 }
  0xf4   : > { %v776_v16 = vmul.f32 %v3749_v33, %v775_v19  ;;  %v782_v50 = vand.u32 2147483647, %v4389_v30  ;;  %3752 = vrcp.f32 %v4463_v56  ;;  %v1716_v23 = vsub.f32 0.0, %v1652_v34 }
  0xf5   : > { %v1538_v54 = vmul.f32 1.442695, %v1502_v42  ;;  %v1126_v8 = vsel %vm4459_vm15, %v3747_v25, %v1122_v1  ;;  %v4478_v59 = vadd.f32 %v4094_v40, %v473_v11  ;;  %v1397_v49 = vmul.f32 %v1365_v55, %v4377_v22 }
  0xf6   : > { %v4483_v27 = vsel %vm1128_vm1, %v1130_v43, %v1126_v8  ;;  %v777_v13 = vadd.f32 %v3749_v33, %v776_v16  ;;  %vm778_vm3 = vweird.f32 %v4389_v30  ;;  %v4486_v62 = vmul.f32 %v3751_v21, %v1437_v41  ;;  %v533_v16 = vpop.f32.mrf.mxu3 }
  0xf7   : > { %v1342_v17 = vadd.f32 -0.28449672, %v1310_v63  ;;  %v1206_v52 = vmul.f32 1.0614054, %v4483_v27  ;;  %vm780_vm4 = vmor %vm778_vm3, %vm779_vm2  ;;  %v785_v25 = vor.u32 1.1754944e-38, %v784_v37  ;;  %3754 = vpow2.f32 %v1584_v60 }
  0xf8   : > { %v781_v26 = vsel %vm780_vm4, %v3749_v33, %v777_v13  ;;  %vm783_vm5 = vcmp.eq.f32.partialorder %v782_v50, 8.507059e+37  ;;  %v2023_v29 = vpack.c.bf16 %v1992_v12, %v1991_v18  ;;  %3756 = vpow2.f32 %v1538_v54  ;;  %v3695_v12 = vld [vmem:[%s6634_s4] sm:$0xff] }
  0xf9   : > { %v1238_v32 = vadd.f32 -1.4531521, %v1206_v52  ;;  %v4490_v42 = vsel %vm783_vm5, %v785_v25, %v781_v26  ;;  %v4493_v51 = vmul.f32 0.70710677, %v4478_v59  ;;  %v1748_v21 = vsel %vm1684_vm13, %v1652_v34, %v1716_v23  ;;  %1909 = vmatpush.bf16.msra.mxu1 %v3695_v12  ;;  %3702 = vmatpush.bf16.msrb.mxu3 %v3695_v12 }
  0xfa   : > { %v3753_v30 = vpop.eup %3752  ;;  %v1429_v41 = vadd.f32 0.2548296, %v1397_v49  ;;  %v1494_v55 = vsub.f32 0.0, %v4368_v28  ;;  %v1183_v57 = vmul.f32 1.0614054, %v4490_v42  ;;  %3675 = vmatmul.msk.bf16.vlgmr.msra.gmra.mxu2 %vm400_vm0, %v2023_v29  ;;  %v1629_v33 = vsub.f32 1.0, %v4486_v62 }
  0xfb   : > { %vm1661_vm6 = vcmp.ge.f32.partialorder %v4207_v61, 0.0  ;;  %v1374_v60 = vmul.f32 %v1342_v17, %v4399_v6  ;;  %v1270_v43 = vmul.f32 %v1238_v32, %v4483_v27  ;;  %v1134_v19 = vmul.f32 %v3753_v30, %v4463_v56 }
  0xfc   : > { %v1215_v11 = vadd.f32 -1.4531521, %v1183_v57  ;;  %vm1138_vm7 = vweird.f32 %v4463_v56  ;;  %v1142_v5 = vand.u32 2147483647, %v4463_v56  ;;  %v1144_v34 = vand.u32 2147483648, %v4463_v56  ;;  %3663 = vmatmul.msk.bf16.vlgmr.msrb.gmra.mxu3 %vm400_vm0, %v1830_v58 }
  0xfd   : > { %v1302_v63 = vadd.f32 1.4214138, %v1270_v43  ;;  %v1135_v1 = vsub.f32 1.0, %v1134_v19  ;;  %vm1139_vm8 = vweird.f32 %v3753_v30  ;;  %v4509_v37 = vand.u32 2147483647, %v4493_v51  ;;  %v3755_v50 = vpop.eup %3754  ;;  %3703 = vmatpush.bf16.msra.mxu3 %v4258_v2 }
  0xfe   : > { %v1461_v23 = vmul.f32 %v1429_v41, %v4377_v22  ;;  %v1526_v54 = vmul.f32 %v1494_v55, %v4368_v28  ;;  %v1247_v8 = vmul.f32 %v1215_v11, %v4490_v42  ;;  %v4515_v18 = vadd.f32 %v4094_v40, %v533_v16  ;;  %v3757_v49 = vpop.eup %3756  ;;  %vm4526_vm9 = vmor %vm1138_vm7, %vm1139_vm8  ;;  %v475_v11 = vpop.f32.mrf.mxu0 }
  0xff   : > { %v1406_v13 = vadd.f32 0.2548296, %v1374_v60  ;;  %v1471_v62 = vsub.f32 0.0, %v4371_v45  ;;  %v1136_v17 = vmul.f32 %v3753_v30, %v1135_v1  ;;  %v640_v52 = vmul.f32 0.3275911, %v4509_v37 }
 0x100   : > { %v1693_v25 = vsub.f32 0.0, %v1629_v33  ;;  %v1334_v22 = vmul.f32 %v1302_v63, %v4483_v27  ;;  %v1145_v26 = vor.u32 1.1754944e-38, %v1144_v34  ;;  %v4531_v29 = vmul.f32 0.70710677, %v4515_v18 }
 0x101   : > { %v1279_v32 = vadd.f32 1.4214138, %v1247_v8  ;;  %v1137_v41 = vadd.f32 %v3753_v30, %v1136_v17  ;;  %vm4533_vm10 = vcmp.eq.f32.partialorder %v1142_v5, 8.507059e+37  ;;  %v4537_v57 = vadd.f32 1.0, %v640_v52  ;;  %3704 = vmatpush.bf16.msra.mxu3 %v4339_v14 }
 0x102   : > { %v4542_v56 = vmul.f32 %v4449_v10, %v4250_v39  ;;  %v4545_v60 = vmul.f32 0.5, %v4240_v53  ;;  %v1621_v43 = vmul.f32 %v3755_v50, %v1461_v23  ;;  %v4548_v19 = vand.u32 2147483647, %v4531_v29 }
 0x103   : > { %v1438_v5 = vmul.f32 %v1406_v13, %v4399_v6  ;;  %v1503_v34 = vmul.f32 %v1471_v62, %v4371_v45  ;;  %v1141_v63 = vsel %vm4526_vm9, %v3753_v30, %v1137_v41  ;;  %3758 = vrcp.f32 %v4537_v57 }
 0x104   : > { %v1780_v53 = vadd.f32 1.0, %v1748_v21  ;;  %v1725_v39 = vsel %vm1661_vm6, %v1629_v33, %v1693_v25  ;;  %v1366_v2 = vadd.f32 -0.28449672, %v1334_v22  ;;  %v4563_v6 = vsel %vm4533_vm10, %v1145_v26, %v1141_v63 }
 0x105   : > { %v1586_v45 = vmul.f32 1.442695, %v1526_v54  ;;  %v1311_v10 = vmul.f32 %v1279_v32, %v4490_v42  ;;  %v1207_v30 = vmul.f32 1.0614054, %v4563_v6  ;;  %v4568_v1 = vadd.f32 %v4094_v40, %v475_v11 }
 0x106   : > { %v1653_v38 = vsub.f32 1.0, %v1621_v43  ;;  %vm1685_vm11 = vcmp.ge.f32.partialorder %v4264_v20, 0.0  ;;  %v4573_v61 = vmul.f32 0.5, %v4345_v35  ;;  %v664_v9 = vmul.f32 0.3275911, %v4548_v19 }
 0x107   : > { %v1757_v58 = vadd.f32 1.0, %v1725_v39  ;;  %v4576_v21 = vmul.f32 %v3757_v49, %v1438_v5  ;;  %v1540_v33 = vmul.f32 1.442695, %v1503_v34  ;;  %v1239_v16 = vadd.f32 -1.4531521, %v1207_v30 }
 0x108   : > { %v4579_v50 = vmul.f32 %v1780_v53, %v4406_v44  ;;  %v4582_v40 = vmul.f32 0.5, %v4334_v31  ;;  %v1398_v14 = vmul.f32 %v1366_v2, %v4483_v27  ;;  %v4585_v23 = vadd.f32 1.0, %v664_v9 }
 0x109   : > { %v3759_v54 = vpop.eup %3758  ;;  %3760 = vpow2.f32 %v1586_v45  ;;  %v1343_v35 = vadd.f32 -0.28449672, %v1311_v10  ;;  %v1271_v8 = vmul.f32 %v1239_v16, %v4563_v6  ;;  %v4589_v12 = vmul.f32 0.70710677, %v4568_v1 }
 0x10a   : > { %v1717_v49 = vsub.f32 0.0, %v1653_v38  ;;  %v1495_v13 = vsub.f32 0.0, %v4442_v3  ;;  %v789_v44 = vmul.f32 %v3759_v54, %v4537_v57  ;;  %3762 = vrcp.f32 %v4585_v23 }
 0x10b   : > { %v4595_v31 = vmul.f32 %v1757_v58, %v4320_v15  ;;  %v1630_v62 = vsub.f32 1.0, %v4576_v21  ;;  %3764 = vpow2.f32 %v1540_v33  ;;  %v797_v17 = vand.u32 2147483647, %v4537_v57 }
 0x10c   : > { %vm1662_vm12 = vcmp.ge.f32.partialorder %v4282_v24, 0.0  ;;  %v1430_v52 = vadd.f32 0.2548296, %v1398_v14  ;;  %v4601_v25 = vmul.f32 0.5, %v4478_v59  ;;  %v790_v22 = vsub.f32 1.0, %v789_v44  ;;  %v535_v59 = vpop.f32.mrf.mxu3 }
 0x10d   : > { %v799_v28 = vand.u32 2147483648, %v4537_v57  ;;  %v1375_v26 = vmul.f32 %v1343_v35, %v4490_v42  ;;  %v4606_v32 = vmul.f32 0.5, %v4403_v0  ;;  %v1303_v15 = vadd.f32 1.4214138, %v1271_v8  ;;  %v478_v35 = vpop.f32.mrf.mxu0 }
 0x10e   : > { %v4609_v41 = vand.u32 2147483647, %v4589_v12  ;;  %v1749_v55 = vsel %vm1685_vm11, %v1653_v38, %v1717_v49  ;;  %v1527_v43 = vmul.f32 %v1495_v13, %v4442_v3  ;;  %v791_v11 = vmul.f32 %v3759_v54, %v790_v22  ;;  %v4628_v38 = vld [vmem:[%s6633_s3] ss:$0 sm:$0xff] }
 0x10f   : > { %vm794_vm13 = vweird.f32 %v3759_v54  ;;  %v3761_v5 = vpop.eup %3760  ;;  %v1694_v34 = vsub.f32 0.0, %v1630_v62  ;;  %vm793_vm14 = vweird.f32 %v4537_v57  ;;  %vm4615_vm15 = vcmp.eq.f32.partialorder %v797_v17, 8.507059e+37 }
 0x110   : > { %v1472_v0 = vsub.f32 0.0, %v4509_v37  ;;  %v3763_v53 = vpop.eup %3762  ;;  %v1462_v39 = vmul.f32 %v1430_v52, %v4483_v27  ;;  %v792_v20 = vadd.f32 %v3759_v54, %v791_v11  ;;  %v800_v2 = vor.u32 1.1754944e-38, %v799_v28  ;;  %vm795_vm1 = vmor %vm793_vm14, %vm794_vm13 }
 0x111   : > { %v641_v3 = vmul.f32 0.3275911, %v4609_v41  ;;  %v3765_v45 = vpop.eup %3764  ;;  %v1407_v10 = vadd.f32 0.2548296, %v1375_v26  ;;  %v1335_v30 = vmul.f32 %v1303_v15, %v4563_v6  ;;  %v1149_v57 = vmul.f32 %v3763_v53, %v4585_v23 }
 0x112   : > { %v4631_v9 = vadd.f32 %v4628_v38, %v535_v59  ;;  %v796_v27 = vsel %vm795_vm1, %v3759_v54, %v792_v20  ;;  %vm1153_vm2 = vweird.f32 %v4585_v23  ;;  %v1159_v58 = vand.u32 2147483648, %v4585_v23 }
 0x113   : > { %v4635_v21 = vadd.f32 1.0, %v641_v3  ;;  %v4639_v33 = vsel %vm4615_vm15, %v800_v2, %v796_v27  ;;  %v1150_v16 = vsub.f32 1.0, %v1149_v57  ;;  %vm1154_vm3 = vweird.f32 %v3763_v53 }
 0x114   : > { %v1157_v14 = vand.u32 2147483647, %v4585_v23  ;;  %v1781_v8 = vadd.f32 1.0, %v1749_v55  ;;  %v1588_v49 = vmul.f32 1.442695, %v1527_v43  ;;  %v1726_v54 = vsel %vm1662_vm12, %v1630_v62, %v1694_v34  ;;  %vm4651_vm4 = vmor %vm1153_vm2, %vm1154_vm3 }
 0x115   : > { %v1184_v13 = vmul.f32 1.0614054, %v4639_v33  ;;  %3766 = vrcp.f32 %v4635_v21  ;;  %v1439_v44 = vmul.f32 %v1407_v10, %v4490_v42  ;;  %v1367_v17 = vadd.f32 -0.28449672, %v1335_v30 }
 0x116   : > { %v1151_v52 = vmul.f32 %v3763_v53, %v1150_v16  ;;  %v4647_v22 = vmul.f32 %v3761_v5, %v1462_v39  ;;  %v1160_v15 = vor.u32 1.1754944e-38, %v1159_v58  ;;  %v4656_v55 = vmul.f32 0.70710677, %v4631_v9 }
 0x117   : > { %v1216_v28 = vadd.f32 -1.4531521, %v1184_v13  ;;  %v1504_v24 = vmul.f32 %v1472_v0, %v4509_v37  ;;  %vm1158_vm5 = vcmp.eq.f32.partialorder %v1157_v14, 8.507059e+37  ;;  %v4660_v42 = vadd.f32 %v4628_v38, %v478_v35  ;;  %v480_v14 = vpop.f32.mrf.mxu0 }
 0x118   : > { %v1152_v62 = vadd.f32 %v3763_v53, %v1151_v52  ;;  %vm1686_vm6 = vcmp.ge.f32.partialorder %v4350_v46, 0.0  ;;  %v1496_v23 = vsub.f32 0.0, %v4548_v19  ;;  %v4666_v11 = vand.u32 2147483647, %v4656_v55  ;;  %v1994_v52 = vld [vmem:[%s4469_s26 + $0x18] sm:$0xff] }
 0x119   : > { %v1248_v43 = vmul.f32 %v1216_v28, %v4639_v33  ;;  %v1818_v59 = vpack.c.bf16 %v4419_v48, %v4413_v47  ;;  %v1599_v5 = vmul.f32 %v3765_v45, %v1439_v44  ;;  %v1399_v37 = vmul.f32 %v1367_v17, %v4563_v6  ;;  %v1993_v17 = vld [vmem:[%s4469_s26 + $0x10] sm:$0xff] }
 0x11a   : > { %3768 = vpow2.f32 %v1588_v49  ;;  %v1156_v34 = vsel %vm4651_vm4, %v3763_v53, %v1152_v62  ;;  %v1654_v0 = vsub.f32 1.0, %v4647_v22  ;;  %v665_v20 = vmul.f32 0.3275911, %v4666_v11 }
 0x11b   : > { %v3767_v63 = vpop.eup %3766  ;;  %v4674_v39 = vsel %vm1158_vm5, %v1160_v15, %v1156_v34  ;;  %v4678_v2 = vmul.f32 0.70710677, %v4660_v42  ;;  %3651 = vmatmul.msk.bf16.vlgmr.msra.gmra.mxu1 %vm400_vm0, %v1818_v59  ;;  %v4682_v47 = vmul.f32 %v1781_v8, %v4545_v60  ;;  %v1758_v48 = vadd.f32 1.0, %v1726_v54 }
 0x11c   : > { %v1208_v3 = vmul.f32 1.0614054, %v4674_v39  ;;  %v804_v53 = vmul.f32 %v3767_v63, %v4635_v21  ;;  %vm1663_vm7 = vcmp.ge.f32.partialorder %v4363_v36, 0.0  ;;  %v1280_v45 = vadd.f32 1.4214138, %v1248_v43 }
 0x11d   : > { %v1542_v10 = vmul.f32 1.442695, %v1504_v24  ;;  %v1528_v30 = vmul.f32 %v1496_v23, %v4548_v19  ;;  %v4688_v57 = vadd.f32 1.0, %v665_v20  ;;  %v1631_v27 = vsub.f32 1.0, %v1599_v5 }
 0x11e   : > { %v1431_v58 = vadd.f32 0.2548296, %v1399_v37  ;;  %v1240_v16 = vadd.f32 -1.4531521, %v1208_v3  ;;  %v805_v60 = vsub.f32 1.0, %v804_v53  ;;  %v1718_v35 = vsub.f32 0.0, %v1654_v0 }
 0x11f   : > { %v814_v8 = vand.u32 2147483648, %v4635_v21  ;;  %3770 = vrcp.f32 %v4688_v57  ;;  %v4693_v49 = vand.u32 2147483647, %v4678_v2  ;;  %vm809_vm8 = vweird.f32 %v3767_v63 }
 0x120   : > { %v3769_v13 = vpop.eup %3768  ;;  %v1272_v19 = vmul.f32 %v1240_v16, %v4674_v39  ;;  %v806_v54 = vmul.f32 %v3767_v63, %v805_v60  ;;  %v812_v44 = vand.u32 2147483647, %v4635_v21  ;;  %v4700_v22 = vmul.f32 %v1758_v48, %v4423_v7 }
 0x121   : > { %v1312_v28 = vmul.f32 %v1280_v45, %v4639_v33  ;;  %3772 = vpow2.f32 %v1542_v10  ;;  %v4704_v26 = vmul.f32 0.5, %v4568_v1  ;;  %v1695_v15 = vsub.f32 0.0, %v1631_v27 }
 0x122   : > { %v1463_v24 = vmul.f32 %v1431_v58, %v4563_v6  ;;  %v807_v62 = vadd.f32 %v3767_v63, %v806_v54  ;;  %vm808_vm9 = vweird.f32 %v4635_v21  ;;  %v1304_v43 = vadd.f32 1.4214138, %v1272_v19 }
 0x123   : > { %vm810_vm10 = vmor %vm808_vm9, %vm809_vm8  ;;  %v815_v23 = vor.u32 1.1754944e-38, %v814_v8  ;;  %v642_v59 = vmul.f32 0.3275911, %v4693_v49  ;;  %v2024_v5 = vpack.c.bf16 %v1994_v52, %v1993_v17  ;;  %v1750_v7 = vsel %vm1686_vm6, %v1654_v0, %v1718_v35 }
 0x124   : > { %v1590_v37 = vmul.f32 1.442695, %v1528_v30  ;;  %v811_v34 = vsel %vm810_vm10, %v3767_v63, %v807_v62  ;;  %vm813_vm11 = vcmp.eq.f32.partialorder %v812_v44, 8.507059e+37  ;;  %v1344_v20 = vadd.f32 -0.28449672, %v1312_v28 }
 0x125   : > { %v3771_v1 = vpop.eup %3770  ;;  %v4711_v48 = vsel %vm813_vm11, %v815_v23, %v811_v34  ;;  %v1473_v6 = vsub.f32 0.0, %v4609_v41  ;;  %v4714_v3 = vadd.f32 1.0, %v642_v59  ;;  %3676 = vmatmul.msk.bf16.gmra.mxu2 %vm400_vm0, %v2024_v5  ;;  %v1727_v21 = vsel %vm1663_vm7, %v1631_v27, %v1695_v15  ;;  %v483_v27 = vpop.f32.mrf.mxu0 }
 0x126   : > { %v4719_v53 = vmul.f32 %v3769_v13, %v1463_v24  ;;  %v1185_v46 = vmul.f32 1.0614054, %v4711_v48  ;;  %v1164_v63 = vmul.f32 %v3771_v1, %v4688_v57  ;;  %v1336_v45 = vmul.f32 %v1304_v43, %v4674_v39 }
 0x127   : > { %v4723_v0 = vpop.eup %3772  ;;  %vm1168_vm12 = vweird.f32 %v4688_v57  ;;  %v1174_v10 = vand.u32 2147483648, %v4688_v57  ;;  %3774 = vrcp.f32 %v4714_v3  ;;  %vm1169_vm13 = vweird.f32 %v3771_v1 }
 0x128   : > { %v1217_v30 = vadd.f32 -1.4531521, %v1185_v46  ;;  %v1165_v58 = vsub.f32 1.0, %v1164_v63  ;;  %v1172_v36 = vand.u32 2147483647, %v4688_v57  ;;  %v1782_v16 = vadd.f32 1.0, %v1750_v7  ;;  %vm4742_vm15 = vmor %vm1168_vm12, %vm1169_vm13 }
 0x129   : > { %v1376_v60 = vmul.f32 %v1344_v20, %v4639_v33  ;;  %v1505_v35 = vmul.f32 %v1473_v6, %v4609_v41  ;;  %v4733_v8 = vadd.f32 %v4628_v38, %v480_v14  ;;  %v4736_v13 = vmul.f32 0.5, %v4515_v18 }
 0x12a   : > { %3776 = vpow2.f32 %v1590_v37  ;;  %v1249_v19 = vmul.f32 %v1217_v30, %v4711_v48  ;;  %v1166_v54 = vmul.f32 %v3771_v1, %v1165_v58  ;;  %v1759_v44 = vadd.f32 1.0, %v1727_v21 }
 0x12b   : > { %vm1687_vm14 = vcmp.ge.f32.partialorder %v4431_v4, 0.0  ;;  %v1368_v17 = vadd.f32 -0.28449672, %v1336_v45  ;;  %v1175_v41 = vor.u32 1.1754944e-38, %v1174_v10  ;;  %v4747_v14 = vmul.f32 0.70710677, %v4733_v8 }
 0x12c   : > { %v1655_v18 = vsub.f32 1.0, %v4719_v53  ;;  %v1281_v28 = vadd.f32 1.4214138, %v1249_v19  ;;  %v1167_v15 = vadd.f32 %v3771_v1, %v1166_v54  ;;  %vm1173_vm1 = vcmp.eq.f32.partialorder %v1172_v36, 8.507059e+37 }
 0x12d   : > { %v3775_v24 = vpop.eup %3774  ;;  %v4751_v62 = vmul.f32 %v1782_v16, %v4582_v40  ;;  %v1408_v43 = vadd.f32 0.2548296, %v1376_v60  ;;  %v1544_v23 = vmul.f32 1.442695, %v1505_v35  ;;  %v4754_v57 = vand.u32 2147483647, %v4747_v14  ;;  %v485_v60 = vpop.f32.mrf.mxu0 }
 0x12e   : > { %v1313_v59 = vmul.f32 %v1281_v28, %v4711_v48  ;;  %v1171_v5 = vsel %vm4742_vm15, %v3771_v1, %v1167_v15  ;;  %v4760_v7 = vmul.f32 0.5, %v4660_v42  ;;  %v4763_v37 = vadd.f32 %v4628_v38, %v483_v27 }
 0x12f   : > { %v1400_v34 = vmul.f32 %v1368_v17, %v4674_v39  ;;  %v4766_v40 = vsel %vm1173_vm1, %v1175_v41, %v1171_v5  ;;  %v819_v20 = vmul.f32 %v3775_v24, %v4714_v3  ;;  %v643_v6 = vmul.f32 0.3275911, %v4754_v57 }
 0x130   : > { %v3777_v21 = vpop.eup %3776  ;;  %v1719_v53 = vsub.f32 0.0, %v1655_v18  ;;  %v1345_v46 = vadd.f32 -0.28449672, %v1313_v59  ;;  %v1209_v63 = vmul.f32 1.0614054, %v4766_v40  ;;  %v1497_v1 = vsub.f32 0.0, %v4666_v11 }
 0x131   : > { %v1440_v42 = vmul.f32 %v1408_v43, %v4639_v33  ;;  %v820_v45 = vsub.f32 1.0, %v819_v20  ;;  %v829_v10 = vand.u32 2147483648, %v4714_v3  ;;  %v4774_v30 = vadd.f32 1.0, %v643_v6 }
 0x132   : > { %v1377_v58 = vmul.f32 %v1345_v46, %v4711_v48  ;;  %v1241_v36 = vadd.f32 -1.4531521, %v1209_v63  ;;  %v827_v27 = vand.u32 2147483647, %v4714_v3  ;;  %v4779_v16 = vmul.f32 0.70710677, %v4763_v37 }
 0x133   : > { %v1432_v35 = vadd.f32 0.2548296, %v1400_v34  ;;  %v821_v19 = vmul.f32 %v3775_v24, %v820_v45  ;;  %vm824_vm2 = vweird.f32 %v3775_v24  ;;  %3778 = vrcp.f32 %v4774_v30 }
 0x134   : > { %v1751_v33 = vsel %vm1687_vm14, %v1655_v18, %v1719_v53  ;;  %v1273_v54 = vmul.f32 %v1241_v36, %v4766_v40  ;;  %v1529_v17 = vmul.f32 %v1497_v1, %v4666_v11  ;;  %v1474_v52 = vsub.f32 0.0, %v4693_v49 }
 0x135   : > { %v4788_v41 = vmul.f32 %v4723_v0, %v1440_v42  ;;  %v822_v28 = vadd.f32 %v3775_v24, %v821_v19  ;;  %vm823_vm3 = vweird.f32 %v4714_v3  ;;  %v830_v15 = vor.u32 1.1754944e-38, %v829_v10 }
 0x136   : > { %v4792_v43 = vmul.f32 %v1759_v44, %v4573_v61  ;;  %v1409_v4 = vadd.f32 0.2548296, %v1377_v58  ;;  %v1305_v18 = vadd.f32 1.4214138, %v1273_v54  ;;  %vm825_vm4 = vmor %vm823_vm3, %vm824_vm2  ;;  %v4795_v59 = vand.u32 2147483647, %v4779_v16 }
 0x137   : > { %v1464_v11 = vmul.f32 %v1432_v35, %v4674_v39  ;;  %3780 = vpow2.f32 %v1544_v23  ;;  %v826_v0 = vsel %vm825_vm4, %v3775_v24, %v822_v28  ;;  %vm828_vm5 = vcmp.eq.f32.partialorder %v827_v27, 8.507059e+37  ;;  %v1995_v61 = vld [vmem:[%s4469_s26 + $0x20] sm:$0xff]  ;;  %v1996_v44 = vld [vmem:[%s4469_s26 + $0x28] sm:$0xff]  ;;  %v488_v35 = vpop.f32.mrf.mxu0 }
 0x138   : > { %v1783_v5 = vadd.f32 1.0, %v1751_v33  ;;  %v1337_v34 = vmul.f32 %v1305_v18, %v4766_v40  ;;  %v4799_v3 = vsel %vm828_vm5, %v830_v15, %v826_v0  ;;  %v644_v20 = vmul.f32 0.3275911, %v4795_v59 }
 0x139   : > { %v3779_v6 = vpop.eup %3778  ;;  %v1632_v53 = vsub.f32 1.0, %v4788_v41  ;;  %v1592_v46 = vmul.f32 1.442695, %v1529_v17  ;;  %v1186_v63 = vmul.f32 1.0614054, %v4799_v3  ;;  %v1819_v39 = vpack.c.bf16 %v4595_v31, %v4542_v56 }
 0x13a   : > { %vm1664_vm6 = vcmp.ge.f32.partialorder %v4493_v51, 0.0  ;;  %v1441_v24 = vmul.f32 %v1409_v4, %v4711_v48  ;;  %v1369_v23 = vadd.f32 -0.28449672, %v1337_v34  ;;  %v1506_v1 = vmul.f32 %v1474_v52, %v4693_v49 }
 0x13b   : > { %v834_v42 = vmul.f32 %v3779_v6, %v4774_v30  ;;  %v4812_v45 = vmul.f32 %v3777_v21, %v1464_v11  ;;  %v1218_v10 = vadd.f32 -1.4531521, %v1186_v63  ;;  %v4814_v58 = vadd.f32 1.0, %v644_v20  ;;  %3652 = vmatmul.msk.bf16.gmra.mxu1 %vm400_vm0, %v1819_v39 }
 0x13c   : > { %v2025_v36 = vpack.c.bf16 %v1996_v44, %v1995_v61  ;;  %v4818_v27 = vmul.f32 %v1783_v5, %v4606_v32  ;;  %v842_v31 = vand.u32 2147483647, %v4774_v30  ;;  %v844_v48 = vand.u32 2147483648, %v4774_v30 }
 0x13d   : > { %v835_v56 = vsub.f32 1.0, %v834_v42  ;;  %v3781_v49 = vpop.eup %3780  ;;  %v1401_v19 = vmul.f32 %v1369_v23, %v4766_v40  ;;  %v1250_v21 = vmul.f32 %v1218_v10, %v4799_v3  ;;  %3782 = vrcp.f32 %v4814_v58 }
 0x13e   : > { %3677 = vmatmul.msk.bf16.gmra.mxu2 %vm400_vm0, %v2025_v36  ;;  %v4827_v33 = vadd.f32 %v4628_v38, %v485_v60  ;;  %v1601_v32 = vmul.f32 %v3781_v49, %v1441_v24  ;;  %3784 = vpow2.f32 %v1592_v46  ;;  %vm839_vm7 = vweird.f32 %v3779_v6 }
 0x13f   : > { %v836_v54 = vmul.f32 %v3779_v6, %v835_v56  ;;  %v1696_v17 = vsub.f32 0.0, %v1632_v53  ;;  %v1656_v52 = vsub.f32 1.0, %v4812_v45  ;;  %v1282_v41 = vadd.f32 1.4214138, %v1250_v21  ;;  %v490_v56 = vpop.f32.mrf.mxu0 }
 0x140   : > { %v1546_v28 = vmul.f32 1.442695, %v1506_v1  ;;  %vm1688_vm8 = vcmp.ge.f32.partialorder %v4531_v29, 0.0  ;;  %vm838_vm9 = vweird.f32 %v4774_v30  ;;  %vm843_vm10 = vcmp.eq.f32.partialorder %v842_v31, 8.507059e+37 }
 0x141   : > { %v837_v15 = vadd.f32 %v3779_v6, %v836_v54  ;;  %v1475_v4 = vsub.f32 0.0, %v4754_v57  ;;  %vm1665_vm11 = vcmp.ge.f32.partialorder %v4589_v12, 0.0  ;;  %v1433_v60 = vadd.f32 0.2548296, %v1401_v19  ;;  %vm840_vm12 = vmor %vm838_vm9, %vm839_vm7 }
 0x142   : > { %v1314_v18 = vmul.f32 %v1282_v41, %v4799_v3  ;;  %v845_v11 = vor.u32 1.1754944e-38, %v844_v48  ;;  %v4836_v0 = vmul.f32 0.70710677, %v4827_v33  ;;  %v1633_v5 = vsub.f32 1.0, %v1601_v32 }
 0x143   : > { %v841_v34 = vsel %vm840_vm12, %v3779_v6, %v837_v15  ;;  %v1831_v20 = vpack.c.bf16 %v4682_v47, %v4579_v50  ;;  %v4841_v30 = vadd.f32 %v4628_v38, %v488_v35  ;;  %v3783_v61 = vpop.eup %3782  ;;  %v1728_v44 = vsel %vm1664_vm6, %v1632_v53, %v1696_v17 }
 0x144   : > { %3786 = vpow2.f32 %v1546_v28  ;;  %v4845_v46 = vsel %vm843_vm10, %v845_v11, %v841_v34  ;;  %v4848_v63 = vand.u32 2147483647, %v4836_v0  ;;  %v3785_v39 = vpop.eup %3784  ;;  %v1720_v24 = vsub.f32 0.0, %v1656_v52 }
 0x145   : > { %v1187_v6 = vmul.f32 1.0614054, %v4845_v46  ;;  %v1507_v23 = vmul.f32 %v1475_v4, %v4754_v57  ;;  %v849_v50 = vmul.f32 %v3783_v61, %v4814_v58  ;;  %3664 = vmatmul.msk.bf16.gmra.mxu3 %vm400_vm0, %v1831_v20  ;;  %v1465_v47 = vmul.f32 %v1433_v60, %v4766_v40 }
 0x146   : > { %v1346_v51 = vadd.f32 -0.28449672, %v1314_v18  ;;  %v1476_v53 = vsub.f32 0.0, %v4795_v59  ;;  %v645_v1 = vmul.f32 0.3275911, %v4848_v63  ;;  %v1697_v42 = vsub.f32 0.0, %v1633_v5 }
 0x147   : > { %v1219_v45 = vadd.f32 -1.4531521, %v1187_v6  ;;  %v850_v10 = vsub.f32 1.0, %v849_v50  ;;  %v4858_v36 = vmul.f32 0.70710677, %v4841_v30  ;;  %v859_v31 = vand.u32 2147483648, %v4814_v58 }
 0x148   : > { %v857_v57 = vand.u32 2147483647, %v4814_v58  ;;  %v4862_v48 = vadd.f32 1.0, %v645_v1  ;;  %v1820_v40 = vpack.c.bf16 %v4792_v43, %v4700_v22  ;;  %vm854_vm13 = vweird.f32 %v3783_v61 }
 0x149   : > { %v1251_v35 = vmul.f32 %v1219_v45, %v4845_v46  ;;  %v851_v49 = vmul.f32 %v3783_v61, %v850_v10  ;;  %v4868_v19 = vand.u32 2147483647, %v4858_v36  ;;  %v1625_v32 = vmul.f32 %v3785_v39, %v1465_v47  ;;  %v1997_v47 = vld [vmem:[%s4469_s26 + $0x30] sm:$0xff] }
 0x14a   : > { %v4870_v21 = vpop.eup %3786  ;;  %v1548_v54 = vmul.f32 1.442695, %v1507_v23  ;;  %vm853_vm14 = vweird.f32 %v4814_v58  ;;  %3788 = vrcp.f32 %v4862_v48  ;;  %v1729_v17 = vsel %vm1665_vm11, %v1633_v5, %v1697_v42 }
 0x14b   : > { %v1378_v22 = vmul.f32 %v1346_v51, %v4799_v3  ;;  %v1283_v43 = vadd.f32 1.4214138, %v1251_v35  ;;  %v852_v41 = vadd.f32 %v3783_v61, %v851_v49  ;;  %v1760_v28 = vadd.f32 1.0, %v1728_v44  ;;  %vm855_vm15 = vmor %vm853_vm14, %vm854_vm13  ;;  %3653 = vmatmul.msk.bf16.gmra.mxu1 %vm400_vm0, %v1820_v40  ;;  %v1998_v51 = vld [vmem:[%s4469_s26 + $0x38] sm:$0xff] }
 0x14c   : > { %v1752_v15 = vsel %vm1688_vm8, %v1656_v52, %v1720_v24  ;;  %v860_v4 = vor.u32 1.1754944e-38, %v859_v31  ;;  %v646_v60 = vmul.f32 0.3275911, %v4868_v19  ;;  %vm858_vm1 = vcmp.eq.f32.partialorder %v857_v57, 8.507059e+37 }
 0x14d   : > { %v1315_v58 = vmul.f32 %v1283_v43, %v4845_v46  ;;  %v856_v18 = vsel %vm855_vm15, %v3783_v61, %v852_v41  ;;  %v1508_v12 = vmul.f32 %v1476_v53, %v4795_v59  ;;  %v1761_v11 = vadd.f32 1.0, %v1729_v17  ;;  %v493_v53 = vpop.f32.mrf.mxu0 }
 0x14e   : > { %v1657_v5 = vsub.f32 1.0, %v1625_v32  ;;  %v4883_v34 = vsel %vm858_vm1, %v860_v4, %v856_v18  ;;  %v4885_v29 = vadd.f32 1.0, %v646_v60  ;;  %v1410_v52 = vadd.f32 0.2548296, %v1378_v22 }
 0x14f   : > { %v1347_v20 = vadd.f32 -0.28449672, %v1315_v58  ;;  %3790 = vpow2.f32 %v1548_v54  ;;  %v1188_v44 = vmul.f32 1.0614054, %v4883_v34  ;;  %v4889_v24 = vmul.f32 %v1760_v28, %v4601_v25 }
 0x150   : > { %v3789_v39 = vpop.eup %3788  ;;  %v4892_v61 = vmul.f32 0.5, %v4631_v9  ;;  %vm1689_vm2 = vcmp.ge.f32.partialorder %v4656_v55, 0.0  ;;  %3792 = vrcp.f32 %v4885_v29  ;;  %v4896_v59 = vadd.f32 1.0, %v1752_v15 }
 0x151   : > { %v1379_v6 = vmul.f32 %v1347_v20, %v4845_v46  ;;  %v1220_v23 = vadd.f32 -1.4531521, %v1188_v44  ;;  %v864_v50 = vmul.f32 %v3789_v39, %v4862_v48  ;;  %v1793_v25 = vmul.f32 %v1761_v11, %v4704_v26 }
 0x152   : > { %v1721_v1 = vsub.f32 0.0, %v1657_v5  ;;  %v4903_v42 = vmul.f32 1.442695, %v1508_v12  ;;  %v1477_v9 = vsub.f32 0.0, %v4848_v63  ;;  %v1442_v45 = vmul.f32 %v1410_v52, %v4799_v3 }
 0x153   : > { %v1411_v10 = vadd.f32 0.2548296, %v1379_v6  ;;  %v1252_v57 = vmul.f32 %v1220_v23, %v4883_v34  ;;  %v865_v31 = vsub.f32 1.0, %v864_v50  ;;  %v872_v40 = vand.u32 2147483647, %v4862_v48 }
 0x154   : > { %v874_v35 = vand.u32 2147483648, %v4862_v48  ;;  %v2026_v49 = vpack.c.bf16 %v1998_v51, %v1997_v47  ;;  %v4911_v32 = vadd.f32 %v4628_v38, %v490_v56  ;;  %vm869_vm3 = vweird.f32 %v3789_v39 }
 0x155   : > { %v3791_v26 = vpop.eup %3790  ;;  %v1443_v54 = vmul.f32 %v1411_v10, %v4845_v46  ;;  %v1284_v17 = vadd.f32 1.4214138, %v1252_v57  ;;  %v866_v22 = vmul.f32 %v3789_v39, %v865_v31  ;;  %v1753_v3 = vsel %vm1689_vm2, %v1657_v5, %v1721_v1  ;;  %v495_v6 = vpop.f32.mrf.mxu0  ;;  %v2000_v31 = vld [vmem:[%s4469_s26 + $0x48] sm:$0xff] }
 0x156   : > { %v3793_v43 = vpop.eup %3792  ;;  %vm868_vm4 = vweird.f32 %v4862_v48  ;;  %3678 = vmatmul.msk.bf16.gmra.mxu2 %vm400_vm0, %v2026_v49  ;;  %v4919_v41 = vmul.f32 0.70710677, %v4911_v32  ;;  %v1832_v56 = vpack.c.bf16 %v4818_v27, %v4751_v62  ;;  %v1602_v60 = vmul.f32 %v4870_v21, %v1442_v45 }
 0x157   : > { %v1603_v28 = vmul.f32 %v3791_v26, %v1443_v54  ;;  %v1316_v46 = vmul.f32 %v1284_v17, %v4883_v34  ;;  %v867_v15 = vadd.f32 %v3789_v39, %v866_v22  ;;  %v879_v4 = vmul.f32 %v3793_v43, %v4885_v29  ;;  %vm870_vm5 = vmor %vm868_vm4, %vm869_vm3 }
 0x158   : > { %vm873_vm6 = vcmp.eq.f32.partialorder %v872_v40, 8.507059e+37  ;;  %v875_v55 = vor.u32 1.1754944e-38, %v874_v35  ;;  %v4927_v48 = vand.u32 2147483647, %v4919_v41  ;;  %3665 = vmatmul.msk.bf16.gmra.mxu3 %vm400_vm0, %v1832_v56  ;;  %v887_v62 = vand.u32 2147483647, %v4885_v29 }
 0x159   : > { %v871_v58 = vsel %vm870_vm5, %v3789_v39, %v867_v15  ;;  %v880_v18 = vsub.f32 1.0, %v879_v4  ;;  %v889_v27 = vand.u32 2147483648, %v4885_v29  ;;  %v1348_v12 = vadd.f32 -0.28449672, %v1316_v46 }
 0x15a   : > { %v4932_v11 = vsel %vm873_vm6, %v875_v55, %v871_v58  ;;  %v647_v5 = vmul.f32 0.3275911, %v4927_v48  ;;  %v4936_v21 = vadd.f32 %v4628_v38, %v493_v53  ;;  %v1635_v52 = vsub.f32 1.0, %v1603_v28 }
 0x15b   : > { %v1189_v20 = vmul.f32 1.0614054, %v4932_v11  ;;  %v881_v44 = vmul.f32 %v3793_v43, %v880_v18  ;;  %vm884_vm7 = vweird.f32 %v3793_v43  ;;  %v1785_v39 = vadd.f32 1.0, %v1753_v3 }
 0x15c   : > { %v1509_v23 = vmul.f32 %v1477_v9, %v4848_v63  ;;  %v4940_v50 = vadd.f32 1.0, %v647_v5  ;;  %v1821_v47 = vpack.c.bf16 %v1793_v25, %v4889_v24  ;;  %v1634_v51 = vsub.f32 1.0, %v1602_v60  ;;  %v1999_v9 = vld [vmem:[%s4469_s26 + $0x40] sm:$0xff] }
 0x15d   : > { %v1221_v1 = vadd.f32 -1.4531521, %v1189_v20  ;;  %v882_v45 = vadd.f32 %v3793_v43, %v881_v44  ;;  %vm883_vm8 = vweird.f32 %v4885_v29  ;;  %v1380_v53 = vmul.f32 %v1348_v12, %v4883_v34  ;;  %v498_v58 = vpop.f32.mrf.mxu0 }
 0x15e   : > { %vm885_vm9 = vmor %vm883_vm8, %vm884_vm7  ;;  %v890_v10 = vor.u32 1.1754944e-38, %v889_v27  ;;  %3794 = vrcp.f32 %v4940_v50  ;;  %v4947_v57 = vmul.f32 0.70710677, %v4936_v21  ;;  %3654 = vmatmul.msk.bf16.gmra.mxu1 %vm400_vm0, %v1821_v47  ;;  %v1699_v63 = vsub.f32 0.0, %v1635_v52 }
 0x15f   : > { %v1253_v24 = vmul.f32 %v1221_v1, %v4932_v11  ;;  %v886_v25 = vsel %vm885_vm9, %v3793_v43, %v882_v45  ;;  %vm888_vm10 = vcmp.eq.f32.partialorder %v887_v62, 8.507059e+37  ;;  %v1817_v29 = vmul.f32 %v1785_v39, %v4892_v61 }
 0x160   : > { %vm1666_vm11 = vcmp.ge.f32.partialorder %v4678_v2, 0.0  ;;  %v1552_v40 = vmul.f32 1.442695, %v1509_v23  ;;  %v4955_v35 = vsel %vm888_vm10, %v890_v10, %v886_v25  ;;  %v1698_v49 = vsub.f32 0.0, %v1634_v51 }
 0x161   : > { %vm1667_vm12 = vcmp.ge.f32.partialorder %v4747_v14, 0.0  ;;  %v1285_v26 = vadd.f32 1.4214138, %v1253_v24  ;;  %v1190_v54 = vmul.f32 1.0614054, %v4955_v35  ;;  %v1816_v17 = vmul.f32 %v4896_v59, %v4736_v13 }
 0x162   : > { %v1412_v22 = vadd.f32 0.2548296, %v1380_v53  ;;  %v4962_v43 = vand.u32 2147483647, %v4947_v57  ;;  %v2027_v3 = vpack.c.bf16 %v2000_v31, %v1999_v9  ;;  %v1731_v61 = vsel %vm1667_vm12, %v1635_v52, %v1699_v63 }
 0x163   : > { %3796 = vpow2.f32 %v4903_v42  ;;  %v1317_v56 = vmul.f32 %v1285_v26, %v4932_v11  ;;  %v1222_v28 = vadd.f32 -1.4531521, %v1190_v54  ;;  %v1478_v14 = vsub.f32 0.0, %v4868_v19 }
 0x164   : > { %v3795_v46 = vpop.eup %3794  ;;  %3798 = vpow2.f32 %v1552_v40  ;;  %v648_v15 = vmul.f32 0.3275911, %v4962_v43  ;;  %v1833_v4 = vpack.c.bf16 %v1817_v29, %v1816_v17  ;;  %v1730_v13 = vsel %vm1666_vm11, %v1634_v51, %v1698_v49 }
 0x165   : > { %v1349_v59 = vadd.f32 -0.28449672, %v1317_v56  ;;  %v1254_v60 = vmul.f32 %v1222_v28, %v4955_v35  ;;  %v894_v55 = vmul.f32 %v3795_v46, %v4940_v50  ;;  %v1763_v42 = vadd.f32 1.0, %v1731_v61  ;;  %v500_v56 = vpop.f32.mrf.mxu0 }
 0x166   : > { %v1444_v18 = vmul.f32 %v1412_v22, %v4883_v34  ;;  %v4973_v62 = vadd.f32 1.0, %v648_v15  ;;  %3679 = vmatmul.msk.bf16.gmra.mxu2 %vm400_vm0, %v2027_v3  ;;  %v4977_v27 = vadd.f32 %v4628_v38, %v495_v6  ;;  %v547_v12 = vmul.f32 0.5, %v4733_v8 }
 0x167   : > { %v1381_v2 = vmul.f32 %v1349_v59, %v4932_v11  ;;  %v1286_v5 = vadd.f32 1.4214138, %v1254_v60  ;;  %v895_v52 = vsub.f32 1.0, %v894_v55  ;;  %v1762_v20 = vadd.f32 1.0, %v1730_v13 }
 0x168   : > { %v902_v44 = vand.u32 2147483647, %v4940_v50  ;;  %v904_v39 = vand.u32 2147483648, %v4940_v50  ;;  %3800 = vrcp.f32 %v4973_v62  ;;  %3666 = vmatmul.msk.bf16.gmra.mxu3 %vm400_vm0, %v1833_v4  ;;  %vm899_vm13 = vweird.f32 %v3795_v46 }
 0x169   : > { %v3797_v34 = vpop.eup %3796  ;;  %v1413_v23 = vadd.f32 0.2548296, %v1381_v2  ;;  %v896_v47 = vmul.f32 %v3795_v46, %v895_v52  ;;  %v4986_v6 = vadd.f32 %v4628_v38, %v498_v58  ;;  %v1795_v51 = vmul.f32 %v1763_v42, %v547_v12 }
 0x16a   : > { %v3799_v8 = vpop.eup %3798  ;;  %v1604_v1 = vmul.f32 %v3797_v34, %v1444_v18  ;;  %v1510_v45 = vmul.f32 %v1478_v14, %v4868_v19  ;;  %v4990_v53 = vmul.f32 0.70710677, %v4977_v27  ;;  %v1318_v63 = vmul.f32 %v1286_v5, %v4955_v35 }
 0x16b   : > { %v1445_v10 = vmul.f32 %v1413_v23, %v4932_v11  ;;  %v897_v24 = vadd.f32 %v3795_v46, %v896_v47  ;;  %vm898_vm14 = vweird.f32 %v4940_v50  ;;  %v1794_v25 = vmul.f32 %v1762_v20, %v4760_v7 }
 0x16c   : > { %vm900_vm15 = vmor %vm898_vm14, %vm899_vm13  ;;  %v905_v9 = vor.u32 1.1754944e-38, %v904_v39  ;;  %v1479_v31 = vsub.f32 0.0, %v4927_v48  ;;  %v4998_v29 = vand.u32 2147483647, %v4990_v53  ;;  %vm903_vm1 = vcmp.eq.f32.partialorder %v902_v44, 8.507059e+37  ;;  %v2001_v44 = vld [vmem:[%s4469_s26 + $0x50] sm:$0xff] }
 0x16d   : > { %v1605_v19 = vmul.f32 %v3799_v8, %v1445_v10  ;;  %v901_v40 = vsel %vm900_vm15, %v3795_v46, %v897_v24  ;;  %v5001_v49 = vmul.f32 0.70710677, %v4986_v6  ;;  %v1636_v26 = vsub.f32 1.0, %v1604_v1  ;;  %v2002_v39 = vld [vmem:[%s4469_s26 + $0x58] sm:$0xff] }
 0x16e   : > { %v3801_v11 = vpop.eup %3800  ;;  %v5003_v54 = vsel %vm903_vm1, %v905_v9, %v901_v40  ;;  %v649_v50 = vmul.f32 0.3275911, %v4998_v29  ;;  %v1822_v7 = vpack.c.bf16 %v1795_v51, %v1794_v25  ;;  %v1350_v22 = vadd.f32 -0.28449672, %v1318_v63  ;;  %v503_v9 = vpop.f32.mrf.mxu0 }
 0x16f   : > { %v1637_v17 = vsub.f32 1.0, %v1605_v19  ;;  %v1191_v3 = vmul.f32 1.0614054, %v5003_v54  ;;  %v909_v61 = vmul.f32 %v3801_v11, %v4973_v62  ;;  %v548_v28 = vmul.f32 0.5, %v4763_v37 }
 0x170   : > { %v1554_v46 = vmul.f32 1.442695, %v1510_v45  ;;  %v1511_v14 = vmul.f32 %v1479_v31, %v4927_v48  ;;  %v5010_v15 = vadd.f32 1.0, %v649_v50  ;;  %3655 = vmatmul.msk.bf16.gmra.mxu1 %vm400_vm0, %v1822_v7  ;;  %v5014_v60 = vand.u32 2147483647, %v5001_v49 }
 0x171   : > { %v1701_v4 = vsub.f32 0.0, %v1637_v17  ;;  %v1223_v13 = vadd.f32 -1.4531521, %v1191_v3  ;;  %v910_v59 = vsub.f32 1.0, %v909_v61  ;;  %v1700_v55 = vsub.f32 0.0, %v1636_v26 }
 0x172   : > { %v917_v58 = vand.u32 2147483647, %v4973_v62  ;;  %v919_v37 = vand.u32 2147483648, %v4973_v62  ;;  %3802 = vrcp.f32 %v5010_v15  ;;  %v1382_v48 = vmul.f32 %v1350_v22, %v4955_v35  ;;  %v2016_v22 = vld [vmem:[%s4469_s26 + $0xc8] sm:$0xff] }
 0x173   : > { %v1255_v42 = vmul.f32 %v1223_v13, %v5003_v54  ;;  %v911_v18 = vmul.f32 %v3801_v11, %v910_v59  ;;  %vm914_vm2 = vweird.f32 %v3801_v11  ;;  %vm1668_vm3 = vcmp.ge.f32.partialorder %v4779_v16, 0.0 }
 0x174   : > { %vm1669_vm4 = vcmp.ge.f32.partialorder %v4836_v0, 0.0  ;;  %v1556_v12 = vmul.f32 1.442695, %v1511_v14  ;;  %vm913_vm5 = vweird.f32 %v4973_v62  ;;  %v650_v20 = vmul.f32 0.3275911, %v5014_v60 }
 0x175   : > { %v1733_v2 = vsel %vm1669_vm4, %v1637_v17, %v1701_v4  ;;  %v1287_v5 = vadd.f32 1.4214138, %v1255_v42  ;;  %v912_v52 = vadd.f32 %v3801_v11, %v911_v18  ;;  %v1732_v34 = vsel %vm1668_vm3, %v1636_v26, %v1700_v55  ;;  %vm915_vm6 = vmor %vm913_vm5, %vm914_vm2  ;;  %v2015_v17 = vld [vmem:[%s4469_s26 + $0xc0] sm:$0xff] }
 0x176   : > { %3804 = vpow2.f32 %v1554_v46  ;;  %vm918_vm7 = vcmp.eq.f32.partialorder %v917_v58, 8.507059e+37  ;;  %v920_v23 = vor.u32 1.1754944e-38, %v919_v37  ;;  %v1414_v47 = vadd.f32 0.2548296, %v1382_v48 }
 0x177   : > { %v1319_v16 = vmul.f32 %v1287_v5, %v5003_v54  ;;  %v916_v8 = vsel %vm915_vm6, %v3801_v11, %v912_v52  ;;  %v5028_v0 = vadd.f32 1.0, %v650_v20  ;;  %v1765_v62 = vadd.f32 1.0, %v1733_v2 }
 0x178   : > { %v3803_v51 = vpop.eup %3802  ;;  %3806 = vpow2.f32 %v1556_v12  ;;  %v5030_v1 = vsel %vm918_vm7, %v920_v23, %v916_v8  ;;  %v2028_v45 = vpack.c.bf16 %v2002_v39, %v2001_v44  ;;  %v1764_v10 = vadd.f32 1.0, %v1732_v34 }
 0x179   : > { %v1351_v63 = vadd.f32 -0.28449672, %v1319_v16  ;;  %v1192_v24 = vmul.f32 1.0614054, %v5030_v1  ;;  %v924_v25 = vmul.f32 %v3803_v51, %v5010_v15  ;;  %v549_v31 = vmul.f32 0.5, %v4827_v33 }
 0x17a   : > { %v5036_v19 = vmul.f32 0.5, %v4841_v30  ;;  %3808 = vrcp.f32 %v5028_v0  ;;  %3680 = vmatmul.msk.bf16.gmra.mxu2 %vm400_vm0, %v2028_v45  ;;  %v5041_v40 = vadd.f32 %v4628_v38, %v500_v56  ;;  %v1446_v11 = vmul.f32 %v1414_v47, %v4955_v35  ;;  %v2004_v45 = vld [vmem:[%s4469_s26 + $0x68] sm:$0xff] }
 0x17b   : > { %v1383_v26 = vmul.f32 %v1351_v63, %v5003_v54  ;;  %v1224_v50 = vadd.f32 -1.4531521, %v1192_v24  ;;  %v925_v7 = vsub.f32 1.0, %v924_v25  ;;  %v1797_v33 = vmul.f32 %v1765_v62, %v549_v31  ;;  %v2003_v62 = vld [vmem:[%s4469_s26 + $0x60] sm:$0xff] }
 0x17c   : > { %v3805_v3 = vpop.eup %3804  ;;  %v1480_v30 = vsub.f32 0.0, %v4962_v43  ;;  %v932_v61 = vand.u32 2147483647, %v5010_v15  ;;  %v934_v46 = vand.u32 2147483648, %v5010_v15  ;;  %v1796_v14 = vmul.f32 %v1764_v10, %v548_v28  ;;  %v505_v10 = vpop.f32.mrf.mxu0 }
 0x17d   : > { %v1256_v38 = vmul.f32 %v1224_v50, %v5030_v1  ;;  %v926_v56 = vmul.f32 %v3803_v51, %v925_v7  ;;  %vm929_vm8 = vweird.f32 %v3803_v51  ;;  %v1415_v4 = vadd.f32 0.2548296, %v1383_v26 }
 0x17e   : > { %v3807_v35 = vpop.eup %3806  ;;  %v1481_v13 = vsub.f32 0.0, %v4998_v29  ;;  %v5053_v59 = vmul.f32 0.70710677, %v5041_v40  ;;  %v2035_v55 = vpack.c.bf16 %v2016_v22, %v2015_v17  ;;  %v5055_v58 = vmul.f32 %v3805_v3, %v1446_v11 }
 0x17f   : > { %v1288_v37 = vadd.f32 1.4214138, %v1256_v38  ;;  %v927_v48 = vadd.f32 %v3803_v51, %v926_v56  ;;  %vm928_vm9 = vweird.f32 %v5010_v15  ;;  %vm933_vm11 = vcmp.eq.f32.partialorder %v932_v61, 8.507059e+37  ;;  %v5067_v15 = vld [vmem:[%s6633_s3] ss:$0 sm:$0xff]  ;;  %v2017_v38 = vld [vmem:[%s4469_s26 + $0xd0] sm:$0xff] }
 0x180   : > { %v3809_v42 = vpop.eup %3808  ;;  %vm930_vm10 = vmor %vm928_vm9, %vm929_vm8  ;;  %v935_v28 = vor.u32 1.1754944e-38, %v934_v46  ;;  %v5059_v18 = vand.u32 2147483647, %v5053_v59  ;;  %3687 = vmatmul.msk.bf16.vlgmr.msra.gmra.mxu3 %vm400_vm0, %v2035_v55  ;;  %v1823_v12 = vpack.c.bf16 %v1797_v33, %v1796_v14  ;;  %v5070_v20 = vadd.f32 %v5067_v15, %v503_v9  ;;  %v2018_v56 = vld [vmem:[%s4469_s26 + $0xd8] sm:$0xff] }
 0x181   : > { %v1320_v2 = vmul.f32 %v1288_v37, %v5030_v1  ;;  %v931_v5 = vsel %vm930_vm10, %v3803_v51, %v927_v48  ;;  %v939_v52 = vmul.f32 %v3809_v42, %v5028_v0  ;;  %vm1670_vm12 = vcmp.ge.f32.partialorder %v4858_v36, 0.0 }
 0x182   : > { %v1447_v44 = vmul.f32 %v1415_v4, %v5003_v54  ;;  %v1512_v39 = vmul.f32 %v1480_v30, %v4962_v43  ;;  %v5075_v34 = vsel %vm933_vm11, %v935_v28, %v931_v5  ;;  %v651_v23 = vmul.f32 0.3275911, %v5059_v18  ;;  %3656 = vmatmul.msk.bf16.gmra.mxu1 %vm400_vm0, %v1823_v12 }
 0x183   : > { %v1638_v47 = vsub.f32 1.0, %v5055_v58  ;;  %v1193_v16 = vmul.f32 1.0614054, %v5075_v34  ;;  %v1513_v8 = vmul.f32 %v1481_v13, %v4998_v29  ;;  %v940_v51 = vsub.f32 1.0, %v939_v52 }
 0x184   : > { %vm944_vm13 = vweird.f32 %v3809_v42  ;;  %v947_v54 = vand.u32 2147483647, %v5028_v0  ;;  %v949_v43 = vand.u32 2147483648, %v5028_v0  ;;  %v5086_v63 = vadd.f32 1.0, %v651_v23  ;;  %v508_v52 = vpop.f32.mrf.mxu0 }
 0x185   : > { %v1352_v24 = vadd.f32 -0.28449672, %v1320_v2  ;;  %v1225_v25 = vadd.f32 -1.4531521, %v1193_v16  ;;  %v941_v9 = vmul.f32 %v3809_v42, %v940_v51  ;;  %v5089_v31 = vmul.f32 0.70710677, %v5070_v20 }
 0x186   : > { %v5091_v11 = vmul.f32 %v3807_v35, %v1447_v44  ;;  %v1558_v29 = vmul.f32 1.442695, %v1512_v39  ;;  %3810 = vrcp.f32 %v5086_v63  ;;  %v2029_v26 = vpack.c.bf16 %v2004_v45, %v2003_v62 }
 0x187   : > { %v1702_v50 = vsub.f32 0.0, %v1638_v47  ;;  %v1257_v7 = vmul.f32 %v1225_v25, %v5075_v34  ;;  %v942_v17 = vadd.f32 %v3809_v42, %v941_v9  ;;  %vm943_vm14 = vweird.f32 %v5028_v0 }
 0x188   : > { %v5097_v22 = vmul.f32 0.5, %v4911_v32  ;;  %v1560_v3 = vmul.f32 1.442695, %v1513_v8  ;;  %vm945_vm15 = vmor %vm943_vm14, %vm944_vm13  ;;  %vm948_vm1 = vcmp.eq.f32.partialorder %v947_v54, 8.507059e+37  ;;  %v950_v33 = vor.u32 1.1754944e-38, %v949_v43 }
 0x189   : > { %v1384_v30 = vmul.f32 %v1352_v24, %v5030_v1  ;;  %v1289_v61 = vadd.f32 1.4214138, %v1257_v7  ;;  %v946_v46 = vsel %vm945_vm15, %v3809_v42, %v942_v17  ;;  %v5102_v14 = vand.u32 2147483647, %v5089_v31 }
 0x18a   : > { %v1639_v35 = vsub.f32 1.0, %v5091_v11  ;;  %3812 = vpow2.f32 %v1558_v29  ;;  %v5107_v0 = vsel %vm948_vm1, %v950_v33, %v946_v46  ;;  %v1482_v32 = vsub.f32 0.0, %v5014_v60  ;;  %3681 = vmatmul.msk.bf16.gmra.mxu2 %vm400_vm0, %v2029_v26 }
 0x18b   : > { %v1734_v4 = vsel %vm1670_vm12, %v1638_v47, %v1702_v50  ;;  %vm1671_vm2 = vcmp.ge.f32.partialorder %v4919_v41, 0.0  ;;  %v1321_v13 = vmul.f32 %v1289_v61, %v5075_v34  ;;  %v1194_v55 = vmul.f32 1.0614054, %v5107_v0 }
 0x18c   : > { %v652_v58 = vmul.f32 0.3275911, %v5102_v14  ;;  %v3811_v37 = vpop.eup %3810  ;;  %v5118_v48 = vmul.f32 0.5, %v4936_v21  ;;  %v5121_v42 = vmul.f32 0.5, %v4977_v27  ;;  %3814 = vpow2.f32 %v1560_v3 }
 0x18d   : > { %v2036_v28 = vpack.c.bf16 %v2018_v56, %v2017_v38  ;;  %v1416_v12 = vadd.f32 0.2548296, %v1384_v30  ;;  %v1353_v36 = vadd.f32 -0.28449672, %v1321_v13  ;;  %v1226_v2 = vadd.f32 -1.4531521, %v1194_v55 }
 0x18e   : > { %v954_v5 = vmul.f32 %v3811_v37, %v5086_v63  ;;  %v1766_v44 = vadd.f32 1.0, %v1734_v4  ;;  %v1703_v39 = vsub.f32 0.0, %v1639_v35  ;;  %v1514_v23 = vmul.f32 %v1482_v32, %v5014_v60 }
 0x18f   : > { %v5125_v47 = vadd.f32 1.0, %v652_v58  ;;  %v1385_v21 = vmul.f32 %v1353_v36, %v5075_v34  ;;  %v1258_v16 = vmul.f32 %v1226_v2, %v5107_v0  ;;  %v5130_v8 = vadd.f32 %v5067_v15, %v505_v10 }
 0x190   : > { %v955_v27 = vsub.f32 1.0, %v954_v5  ;;  %v3813_v51 = vpop.eup %3812  ;;  %v962_v62 = vand.u32 2147483647, %v5086_v63  ;;  %v964_v45 = vand.u32 2147483648, %v5086_v63  ;;  %3688 = vmatmul.msk.bf16.gmra.mxu3 %vm400_vm0, %v2036_v28  ;;  %v5137_v60 = vadd.f32 %v5067_v15, %v508_v52 }
 0x191   : > { %3816 = vrcp.f32 %v5125_v47  ;;  %v1448_v54 = vmul.f32 %v1416_v12, %v5030_v1  ;;  %v1290_v43 = vadd.f32 1.4214138, %v1258_v16  ;;  %vm959_vm3 = vweird.f32 %v3811_v37 }
 0x192   : > { %v956_v24 = vmul.f32 %v3811_v37, %v955_v27  ;;  %v3815_v25 = vpop.eup %3814  ;;  %v5141_v10 = vmul.f32 %v1766_v44, %v5036_v19  ;;  %v1417_v9 = vadd.f32 0.2548296, %v1385_v21  ;;  %v1562_v11 = vmul.f32 1.442695, %v1514_v23  ;;  %v510_v21 = vpop.f32.mrf.mxu0 }
 0x193   : > { %v1483_v29 = vsub.f32 0.0, %v5059_v18  ;;  %v1322_v26 = vmul.f32 %v1290_v43, %v5107_v0  ;;  %vm958_vm4 = vweird.f32 %v5086_v63  ;;  %v5147_v7 = vmul.f32 0.70710677, %v5130_v8 }
 0x194   : > { %v957_v50 = vadd.f32 %v3811_v37, %v956_v24  ;;  %v1735_v1 = vsel %vm1671_vm2, %v1639_v35, %v1703_v39  ;;  %vm960_vm5 = vmor %vm958_vm4, %vm959_vm3  ;;  %vm963_vm6 = vcmp.eq.f32.partialorder %v962_v62, 8.507059e+37  ;;  %v965_v17 = vor.u32 1.1754944e-38, %v964_v45 }
 0x195   : > { %v5152_v19 = vmul.f32 0.70710677, %v5137_v60  ;;  %v1608_v3 = vmul.f32 %v3813_v51, %v1448_v54  ;;  %v1354_v33 = vadd.f32 -0.28449672, %v1322_v26  ;;  %v5155_v61 = vand.u32 2147483647, %v5147_v7 }
 0x196   : > { %v961_v30 = vsel %vm960_vm5, %v3811_v37, %v957_v50  ;;  %v1449_v63 = vmul.f32 %v1417_v9, %v5075_v34  ;;  %3818 = vpow2.f32 %v1562_v11  ;;  %v1515_v32 = vmul.f32 %v1483_v29, %v5059_v18  ;;  %v2005_v29 = vld [vmem:[%s4469_s26 + $0x70] sm:$0xff]  ;;  %v2006_v26 = vld [vmem:[%s4469_s26 + $0x78] sm:$0xff] }
 0x197   : > { %v3817_v46 = vpop.eup %3816  ;;  %v5158_v38 = vsel %vm963_vm6, %v965_v17, %v961_v30  ;;  %v5161_v41 = vand.u32 2147483647, %v5152_v19  ;;  %v1386_v56 = vmul.f32 %v1354_v33, %v5107_v0  ;;  %v1767_v13 = vadd.f32 1.0, %v1735_v1 }
 0x198   : > { %v1195_v35 = vmul.f32 1.0614054, %v5158_v38  ;;  %v969_v4 = vmul.f32 %v3817_v46, %v5125_v47  ;;  %vm1672_vm7 = vcmp.ge.f32.partialorder %v4947_v57, 0.0  ;;  %v1484_v55 = vsub.f32 0.0, %v5102_v14 }
 0x199   : > { %v653_v34 = vmul.f32 0.3275911, %v5155_v61  ;;  %v654_v58 = vmul.f32 0.3275911, %v5161_v41  ;;  %v1640_v37 = vsub.f32 1.0, %v1608_v3  ;;  %v5171_v2 = vmul.f32 %v3815_v25, %v1449_v63 }
 0x19a   : > { %v1418_v28 = vadd.f32 0.2548296, %v1386_v56  ;;  %v1227_v12 = vadd.f32 -1.4531521, %v1195_v35  ;;  %v970_v36 = vsub.f32 1.0, %v969_v4  ;;  %v979_v5 = vand.u32 2147483648, %v5125_v47 }
 0x19b   : > { %v5174_v18 = vadd.f32 1.0, %v653_v34  ;;  %v5176_v52 = vadd.f32 1.0, %v654_v58  ;;  %vm974_vm8 = vweird.f32 %v3817_v46  ;;  %v977_v23 = vand.u32 2147483647, %v5125_v47 }
 0x19c   : > { %v1259_v44 = vmul.f32 %v1227_v12, %v5158_v38  ;;  %v971_v39 = vmul.f32 %v3817_v46, %v970_v36  ;;  %v3819_v16 = vpop.eup %3818  ;;  %v1450_v27 = vmul.f32 %v1418_v28, %v5107_v0  ;;  %v1564_v51 = vmul.f32 1.442695, %v1515_v32  ;;  %v2019_v36 = vld [vmem:[%s4469_s26 + $0xe0] sm:$0xff] }
 0x19d   : > { %v1516_v62 = vmul.f32 %v1484_v55, %v5102_v14  ;;  %3820 = vrcp.f32 %v5174_v18  ;;  %v1704_v45 = vsub.f32 0.0, %v1640_v37  ;;  %vm973_vm9 = vweird.f32 %v5125_v47 }
 0x19e   : > { %v1291_v54 = vadd.f32 1.4214138, %v1259_v44  ;;  %v972_v43 = vadd.f32 %v3817_v46, %v971_v39  ;;  %v1799_v24 = vmul.f32 %v1767_v13, %v5097_v22  ;;  %v1641_v25 = vsub.f32 1.0, %v5171_v2  ;;  %vm975_vm10 = vmor %vm973_vm9, %vm974_vm8  ;;  %v513_v44 = vpop.f32.mrf.mxu0 }
 0x19f   : > { %v980_v9 = vor.u32 1.1754944e-38, %v979_v5  ;;  %3822 = vrcp.f32 %v5176_v52  ;;  %vm978_vm11 = vcmp.eq.f32.partialorder %v977_v23, 8.507059e+37  ;;  %v1485_v14 = vsub.f32 0.0, %v5155_v61  ;;  %v2020_v5 = vld [vmem:[%s4469_s26 + $0xe8] sm:$0xff] }
 0x1a0   : > { %v1323_v0 = vmul.f32 %v1291_v54, %v5158_v38  ;;  %v976_v11 = vsel %vm975_vm10, %v3817_v46, %v972_v43  ;;  %v5191_v50 = vmul.f32 %v3819_v16, %v1450_v27  ;;  %3824 = vpow2.f32 %v1564_v51 }
 0x1a1   : > { %v5193_v47 = vsel %vm978_vm11, %v980_v9, %v976_v11  ;;  %v992_v22 = vand.u32 2147483647, %v5174_v18  ;;  %v5198_v1 = vsel %vm1672_vm7, %v1640_v37, %v1704_v45  ;;  %v5201_v33 = vmul.f32 1.442695, %v1516_v62 }
 0x1a2   : > { %v1355_v17 = vadd.f32 -0.28449672, %v1323_v0  ;;  %v1196_v3 = vmul.f32 1.0614054, %v5193_v47  ;;  %v1705_v46 = vsub.f32 0.0, %v1641_v25  ;;  %v994_v63 = vand.u32 2147483648, %v5174_v18 }
 0x1a3   : > { %v3821_v30 = vpop.eup %3820  ;;  %v1824_v56 = vpack.c.bf16 %v1799_v24, %v5141_v10  ;;  %v2030_v35 = vpack.c.bf16 %v2006_v26, %v2005_v29  ;;  %v5210_v13 = vmul.f32 %v1485_v14, %v5155_v61  ;;  %vm1673_vm12 = vcmp.ge.f32.partialorder %v4990_v53, 0.0 }
 0x1a4   : > { %v1387_v32 = vmul.f32 %v1355_v17, %v5158_v38  ;;  %v1228_v57 = vadd.f32 -1.4531521, %v1196_v3  ;;  %v984_v4 = vmul.f32 %v3821_v30, %v5174_v18  ;;  %v1642_v34 = vsub.f32 1.0, %v5191_v50 }
 0x1a5   : > { %v3823_v55 = vpop.eup %3822  ;;  %vm988_vm13 = vweird.f32 %v5174_v18  ;;  %vm5215_vm14 = vcmp.eq.f32.partialorder %v992_v22, 8.507059e+37  ;;  %v1486_v58 = vsub.f32 0.0, %v5161_v41  ;;  %3657 = vmatmul.msk.bf16.gmra.mxu1 %vm400_vm0, %v1824_v56  ;;  %3682 = vmatmul.msk.bf16.gmra.mxu2 %vm400_vm0, %v2030_v35  ;;  %vm1674_vm15 = vcmp.ge.f32.partialorder %v5001_v49, 0.0 }
 0x1a6   : > { %v1419_v37 = vadd.f32 0.2548296, %v1387_v32  ;;  %v1260_v61 = vmul.f32 %v1228_v57, %v5193_v47  ;;  %v985_v28 = vsub.f32 1.0, %v984_v4  ;;  %v999_v12 = vmul.f32 %v3823_v55, %v5176_v52  ;;  %v3825_v39 = vpop.eup %3824 }
 0x1a7   : > { %vm989_vm1 = vweird.f32 %v3821_v30  ;;  %v995_v23 = vor.u32 1.1754944e-38, %v994_v63  ;;  %v1007_v16 = vand.u32 2147483647, %v5176_v52  ;;  %v5229_v27 = vadd.f32 %v5067_v15, %v510_v21 }
 0x1a8   : > { %v1451_v51 = vmul.f32 %v1419_v37, %v5158_v38  ;;  %v1292_v62 = vadd.f32 1.4214138, %v1260_v61  ;;  %v986_v45 = vmul.f32 %v3821_v30, %v985_v28  ;;  %v1000_v54 = vsub.f32 1.0, %v999_v12  ;;  %vm990_vm3 = vmor %vm988_vm13, %vm989_vm1 }
 0x1a9   : > { %v1009_v43 = vand.u32 2147483648, %v5176_v52  ;;  %v5234_v24 = vmul.f32 0.70710677, %v5229_v27  ;;  %v2037_v9 = vpack.c.bf16 %v2020_v5, %v2019_v36  ;;  %v5237_v0 = vadd.f32 %v5067_v15, %v513_v44 }
 0x1aa   : > { %v1324_v11 = vmul.f32 %v1292_v62, %v5193_v47  ;;  %v987_v14 = vadd.f32 %v3821_v30, %v986_v45  ;;  %v1001_v29 = vmul.f32 %v3823_v55, %v1000_v54  ;;  %vm1004_vm2 = vweird.f32 %v3823_v55  ;;  %v2007_v45 = vld [vmem:[%s4469_s26 + $0x80] sm:$0xff]  ;;  %v1911_v54 = vpop.f32.mrf.mxu1 }
 0x1ab   : > { %v1706_v21 = vsub.f32 0.0, %v1642_v34  ;;  %vm1003_vm4 = vweird.f32 %v5176_v52  ;;  %v5245_v38 = vand.u32 2147483647, %v5234_v24  ;;  %3689 = vmatmul.msk.bf16.gmra.mxu3 %vm400_vm0, %v2037_v9  ;;  %v5249_v26 = vmul.f32 0.70710677, %v5237_v0 }
 0x1ac   : > { %v1611_v50 = vmul.f32 %v3825_v39, %v1451_v51  ;;  %v1356_v22 = vadd.f32 -0.28449672, %v1324_v11  ;;  %v991_v17 = vsel %vm990_vm3, %v3821_v30, %v987_v14  ;;  %v1002_v3 = vadd.f32 %v3823_v55, %v1001_v29  ;;  %vm1005_vm5 = vmor %vm1003_vm4, %vm1004_vm2  ;;  %v515_v29 = vpop.f32.mrf.mxu0 }
 0x1ad   : > { %v5253_v63 = vsel %vm5215_vm14, %v995_v23, %v991_v17  ;;  %v1010_v18 = vor.u32 1.1754944e-38, %v1009_v43  ;;  %v655_v52 = vmul.f32 0.3275911, %v5245_v38  ;;  %v5257_v56 = vand.u32 2147483647, %v5249_v26 }
 0x1ae   : > { %v1737_v35 = vsel %vm1673_vm12, %v1641_v25, %v1705_v46  ;;  %v1197_v32 = vmul.f32 1.0614054, %v5253_v63  ;;  %v1006_v30 = vsel %vm1005_vm5, %v3823_v55, %v1002_v3  ;;  %vm1008_vm6 = vcmp.eq.f32.partialorder %v1007_v16, 8.507059e+37 }
 0x1af   : > { %v1388_v57 = vmul.f32 %v1356_v22, %v5193_v47  ;;  %v5265_v4 = vsel %vm1008_vm6, %v1010_v18, %v1006_v30  ;;  %v5267_v10 = vadd.f32 1.0, %v655_v52  ;;  %v656_v37 = vmul.f32 0.3275911, %v5257_v56  ;;  %v2021_v18 = vld [vmem:[%s4469_s26 + $0xf0] sm:$0xff]  ;;  %v2022_v52 = vld [vmem:[%s4469_s26 + $0xf8] sm:$0xff] }
 0x1b0   : > { %v1738_v61 = vsel %vm1674_vm15, %v1642_v34, %v1706_v21  ;;  %v1643_v28 = vsub.f32 1.0, %v1611_v50  ;;  %v1229_v2 = vadd.f32 -1.4531521, %v1197_v32  ;;  %v1198_v53 = vmul.f32 1.0614054, %v5265_v4  ;;  %v2116_v21 = vpop.f32.mrf.mxu2 }
 0x1b1   : > { %v1768_v25 = vadd.f32 1.0, %v5198_v1  ;;  %v1769_v46 = vadd.f32 1.0, %v1737_v35  ;;  %v554_v55 = vmul.f32 0.5, %v4986_v6  ;;  %3826 = vrcp.f32 %v5267_v10 }
 0x1b2   : > { %v5277_v12 = vmul.f32 0.5, %v5041_v40  ;;  %v1261_v36 = vmul.f32 %v1229_v2, %v5253_v63  ;;  %v1230_v5 = vadd.f32 -1.4531521, %v1198_v53  ;;  %v1518_v49 = vmul.f32 %v1486_v58, %v5161_v41  ;;  %v5323_v53 = vld [vmem:[%s6635_s5] ss:$0 sm:$0xff] }
 0x1b3   : > { %v1770_v34 = vadd.f32 1.0, %v1738_v61  ;;  %v1420_v44 = vadd.f32 0.2548296, %v1388_v57  ;;  %v1568_v39 = vmul.f32 1.442695, %v5210_v13  ;;  %v5282_v1 = vadd.f32 1.0, %v656_v37 }
 0x1b4   : > { %v1707_v23 = vsub.f32 0.0, %v1643_v28  ;;  %3828 = vpow2.f32 %v5201_v33  ;;  %v1293_v6 = vadd.f32 1.4214138, %v1261_v36  ;;  %v1262_v40 = vmul.f32 %v1230_v5, %v5265_v4  ;;  %v2008_v33 = vld [vmem:[%s4469_s26 + $0x88] sm:$0xff]  ;;  %v5310_v57 = vld [vmem:[%s6637_s7] ss:$0 sm:$0xff] }
 0x1b5   : > { %v1800_v16 = vmul.f32 %v1768_v25, %v5118_v48  ;;  %v1801_v51 = vmul.f32 %v1769_v46, %v5121_v42  ;;  %vm1675_vm7 = vcmp.ge.f32.partialorder %v5053_v59, 0.0  ;;  %v5290_v41 = vmul.f32 0.5, %v5070_v20 }
 0x1b6   : > { %v1325_v58 = vmul.f32 %v1293_v6, %v5253_v63  ;;  %v1294_v13 = vadd.f32 1.4214138, %v1262_v40  ;;  %v1570_v62 = vmul.f32 1.442695, %v1518_v49  ;;  %3830 = vrcp.f32 %v5282_v1 }
 0x1b7   : > { %v3827_v43 = vpop.eup %3826  ;;  %v5296_v48 = vmul.f32 %v1770_v34, %v554_v55  ;;  %v1452_v42 = vmul.f32 %v1420_v44, %v5193_v47  ;;  %3832 = vpow2.f32 %v1568_v39  ;;  %v1487_v59 = vsub.f32 0.0, %v5245_v38 }
 0x1b8   : > { %v1739_v20 = vsel %vm1675_vm7, %v1643_v28, %v1707_v23  ;;  %v1357_v9 = vadd.f32 -0.28449672, %v1325_v58  ;;  %v1326_v11 = vmul.f32 %v1294_v13, %v5265_v4  ;;  %v1014_v14 = vmul.f32 %v3827_v43, %v5267_v10 }
 0x1b9   : > { %v1022_v50 = vand.u32 2147483647, %v5267_v10  ;;  %v1024_v22 = vand.u32 2147483648, %v5267_v10  ;;  %v1825_v17 = vpack.c.bf16 %v1801_v51, %v1800_v16  ;;  %v2031_v3 = vpack.c.bf16 %v2008_v33, %v2007_v45  ;;  %v1913_v33 = vpop.f32.mrf.mxu1 }
 0x1ba   : > { %v3829_v47 = vpop.eup %3828  ;;  %v1389_v35 = vmul.f32 %v1357_v9, %v5253_v63  ;;  %v1358_v32 = vadd.f32 -0.28449672, %v1326_v11  ;;  %3834 = vpow2.f32 %v1570_v62  ;;  %v1015_v30 = vsub.f32 1.0, %v1014_v14  ;;  %v2118_v11 = vpop.f32.mrf.mxu2 }
 0x1bb   : > { %v1771_v37 = vadd.f32 1.0, %v1739_v20  ;;  %v5312_v61 = vmul.f32 %v3829_v47, %v1452_v42  ;;  %v1519_v28 = vmul.f32 %v1487_v59, %v5245_v38  ;;  %3658 = vmatmul.msk.bf16.gmra.mxu1 %vm400_vm0, %v1825_v17  ;;  %3683 = vmatmul.msk.bf16.gmra.mxu2 %vm400_vm0, %v2031_v3  ;;  %v5318_v2 = vadd.f32 %v5067_v15, %v515_v29 }
 0x1bc   : > { %v3831_v25 = vpop.eup %3830  ;;  %v1421_v46 = vadd.f32 0.2548296, %v1389_v35  ;;  %v1016_v55 = vmul.f32 %v3827_v43, %v1015_v30  ;;  %vm1019_vm8 = vweird.f32 %v3827_v43  ;;  %v2038_v36 = vpack.c.bf16 %v2022_v52, %v2021_v18  ;;  %v2009_v18 = vld [vmem:[%s4469_s26 + $0x90] sm:$0xff]  ;;  %v2010_v52 = vld [vmem:[%s4469_s26 + $0x98] sm:$0xff] }
 0x1bd   : > { %v3833_v5 = vpop.eup %3832  ;;  %vm1018_vm9 = vweird.f32 %v5267_v10  ;;  %vm5326_vm10 = vcmp.eq.f32.partialorder %v1022_v50, 8.507059e+37  ;;  %v1025_v49 = vor.u32 1.1754944e-38, %v1024_v22  ;;  %v1029_v15 = vmul.f32 %v3831_v25, %v5282_v1 }
 0x1be   : > { %v1390_v34 = vmul.f32 %v1358_v32, %v5265_v4  ;;  %v1017_v44 = vadd.f32 %v3827_v43, %v1016_v55  ;;  %v1037_v39 = vand.u32 2147483647, %v5282_v1  ;;  %v2117_v23 = vadd.f32 %v5310_v57, %v2116_v21  ;;  %3690 = vmatmul.msk.bf16.gmra.mxu3 %vm400_vm0, %v2038_v36  ;;  %vm1020_vm12 = vmor %vm1018_vm9, %vm1019_vm8 }
 0x1bf   : > { %vm1676_vm11 = vcmp.ge.f32.partialorder %v5089_v31, 0.0  ;;  %v1030_v10 = vsub.f32 1.0, %v1029_v15  ;;  %v1039_v6 = vand.u32 2147483648, %v5282_v1  ;;  %v5338_v40 = vmul.f32 0.70710677, %v5318_v2 }
 0x1c0   : > { %v1912_v16 = vadd.f32 %v5323_v53, %v1911_v54  ;;  %v3835_v51 = vpop.eup %3834  ;;  %v1644_v58 = vsub.f32 1.0, %v5312_v61  ;;  %v1453_v13 = vmul.f32 %v1421_v46, %v5253_v63  ;;  %v1021_v62 = vsel %vm1020_vm12, %v3827_v43, %v1017_v44 }
 0x1c1   : > { %v1488_v45 = vsub.f32 0.0, %v5257_v56  ;;  %v5346_v42 = vsel %vm5326_vm10, %v1025_v49, %v1021_v62  ;;  %v1031_v59 = vmul.f32 %v3831_v25, %v1030_v10  ;;  %vm1034_vm13 = vweird.f32 %v3831_v25  ;;  %v1916_v15 = vpop.f32.mrf.mxu1 }
 0x1c2   : > { %v5349_v20 = vand.u32 2147483647, %v5338_v40  ;;  %v1803_v54 = vmul.f32 %v1771_v37, %v5277_v12  ;;  %v1422_v9 = vadd.f32 0.2548296, %v1390_v34  ;;  %v1199_v63 = vmul.f32 1.0614054, %v5346_v42  ;;  %v2121_v10 = vpop.f32.mrf.mxu2 }
 0x1c3   : > { %v5353_v43 = vadd.f32 %v2117_v23, %v1912_v16  ;;  %v1572_v14 = vmul.f32 1.442695, %v1519_v28  ;;  %v1032_v29 = vadd.f32 %v3831_v25, %v1031_v59  ;;  %vm1033_vm14 = vweird.f32 %v5282_v1 }
 0x1c4   : > { %v657_v21 = vmul.f32 0.3275911, %v5349_v20  ;;  %v1708_v50 = vsub.f32 0.0, %v1644_v58  ;;  %v1613_v22 = vmul.f32 %v3833_v5, %v1453_v13  ;;  %v1231_v17 = vadd.f32 -1.4531521, %v1199_v63  ;;  %vm1035_vm15 = vmor %vm1033_vm14, %vm1034_vm13 }
 0x1c5   : > { %v1040_v3 = vor.u32 1.1754944e-38, %v1039_v6  ;;  %v1036_v12 = vsel %vm1035_vm15, %v3831_v25, %v1032_v29  ;;  %vm1038_vm1 = vcmp.eq.f32.partialorder %v1037_v39, 8.507059e+37  ;;  %v1520_v47 = vmul.f32 %v1488_v45, %v5257_v56 }
 0x1c6   : > { %v5360_v35 = vadd.f32 1.0, %v657_v21  ;;  %v1454_v32 = vmul.f32 %v1422_v9, %v5265_v4  ;;  %v1263_v30 = vmul.f32 %v1231_v17, %v5346_v42  ;;  %v5367_v37 = vmul.f32 0.70710677, %v5353_v43 }
 0x1c7   : > { %v5364_v1 = vsel %vm1038_vm1, %v1040_v3, %v1036_v12  ;;  %v1826_v28 = vpack.c.bf16 %v1803_v54, %v5296_v48  ;;  %v2032_v25 = vpack.c.bf16 %v2010_v52, %v2009_v18  ;;  %v1740_v56 = vsel %vm1676_vm11, %v1644_v58, %v1708_v50 }
 0x1c8   : > { %v1200_v61 = vmul.f32 1.0614054, %v5364_v1  ;;  %3836 = vrcp.f32 %v5360_v35  ;;  %v5375_v46 = vmul.f32 0.5, %v5130_v8  ;;  %v1645_v4 = vsub.f32 1.0, %v1613_v22 }
 0x1c9   : > { %v1295_v55 = vadd.f32 1.4214138, %v1263_v30  ;;  %vm1677_vm2 = vcmp.ge.f32.partialorder %v5147_v7, 0.0  ;;  %v5379_v36 = vmul.f32 0.5, %v5137_v60  ;;  %v5382_v5 = vmul.f32 0.5, %v5229_v27 }
 0x1ca   : > { %v1232_v38 = vadd.f32 -1.4531521, %v1200_v61  ;;  %v5386_v49 = vmul.f32 0.5, %v5237_v0  ;;  %v1574_v31 = vmul.f32 1.442695, %v1520_v47  ;;  %v1772_v34 = vadd.f32 1.0, %v1740_v56 }
 0x1cb   : > { %v1327_v48 = vmul.f32 %v1295_v55, %v5346_v42  ;;  %v5389_v8 = vand.u32 2147483647, %v5367_v37  ;;  %v1614_v44 = vmul.f32 %v3835_v51, %v1454_v32  ;;  %3838 = vpow2.f32 %v1572_v14  ;;  %3659 = vmatmul.msk.bf16.gmra.mxu1 %vm400_vm0, %v1826_v28  ;;  %3684 = vmatmul.msk.bf16.gmra.mxu2 %vm400_vm0, %v2032_v25 }
 0x1cc   : > { %v1264_v60 = vmul.f32 %v1232_v38, %v5364_v1  ;;  %v1709_v27 = vsub.f32 0.0, %v1645_v4  ;;  %v1914_v0 = vadd.f32 %v5323_v53, %v1913_v33  ;;  %v2119_v58 = vadd.f32 %v5310_v57, %v2118_v11  ;;  %v5408_v11 = vpop.f32.mrf.mxu3 }
 0x1cd   : > { %v1359_v39 = vadd.f32 -0.28449672, %v1327_v48  ;;  %v2324_v23 = vmul.f32 0.3275911, %v5389_v8  ;;  %v2122_v51 = vadd.f32 %v5310_v57, %v2121_v10  ;;  %v1917_v13 = vadd.f32 %v5323_v53, %v1916_v15 }
 0x1ce   : > { %v3837_v6 = vpop.eup %3836  ;;  %v1296_v16 = vadd.f32 1.4214138, %v1264_v60  ;;  %vm1678_vm3 = vcmp.ge.f32.partialorder %v5152_v19, 0.0  ;;  %3840 = vpow2.f32 %v1574_v31  ;;  %v1646_v54 = vsub.f32 1.0, %v1614_v44 }
 0x1cf   : > { %v1391_v62 = vmul.f32 %v1359_v39, %v5346_v42  ;;  %v1044_v45 = vmul.f32 %v3837_v6, %v5360_v35  ;;  %v5402_v59 = vadd.f32 1.0, %v2324_v23  ;;  %v1489_v9 = vsub.f32 0.0, %v5349_v20 }
 0x1d0   : > { %v1328_v33 = vmul.f32 %v1296_v16, %v5364_v1  ;;  %v5406_v63 = vadd.f32 %v2119_v58, %v1914_v0  ;;  %v1741_v14 = vsel %vm1677_vm2, %v1645_v4, %v1709_v27  ;;  %v1052_v17 = vand.u32 2147483647, %v5360_v35 }
 0x1d1   : > { %v1423_v29 = vadd.f32 0.2548296, %v1391_v62  ;;  %v1045_v21 = vsub.f32 1.0, %v1044_v45  ;;  %3842 = vrcp.f32 %v5402_v59  ;;  %v3839_v50 = vpop.eup %3838  ;;  %v1054_v3 = vand.u32 2147483648, %v5360_v35 }
 0x1d2   : > { %v1360_v22 = vadd.f32 -0.28449672, %v1328_v33  ;;  %v5415_v18 = vadd.f32 %v2122_v51, %v1917_v13  ;;  %vm1049_vm4 = vweird.f32 %v3837_v6  ;;  %v5419_v47 = vmul.f32 0.70710677, %v5406_v63 }
 0x1d3   : > { %v1455_v52 = vmul.f32 %v1423_v29, %v5346_v42  ;;  %v1046_v12 = vmul.f32 %v3837_v6, %v1045_v21  ;;  %v1773_v7 = vadd.f32 1.0, %v1741_v14  ;;  %v1710_v32 = vsub.f32 0.0, %v1646_v54 }
 0x1d4   : > { %vm1679_vm5 = vcmp.ge.f32.partialorder %v5234_v24, 0.0  ;;  %v1392_v30 = vmul.f32 %v1360_v22, %v5364_v1  ;;  %v1521_v61 = vmul.f32 %v1489_v9, %v5349_v20  ;;  %v3841_v28 = vpop.eup %3840  ;;  %vm1048_vm6 = vweird.f32 %v5360_v35  ;;  %v5447_v19 = vpop.f32.mrf.mxu3 }
 0x1d5   : > { %v1615_v25 = vmul.f32 %v3839_v50, %v1455_v52  ;;  %v1047_v56 = vadd.f32 %v3837_v6, %v1046_v12  ;;  %v5426_v42 = vand.u32 2147483647, %v5419_v47  ;;  %vm1050_vm7 = vmor %vm1048_vm6, %vm1049_vm4  ;;  %v1055_v55 = vor.u32 1.1754944e-38, %v1054_v3  ;;  %v2123_v9 = vpop.f32.mrf.mxu2 }
 0x1d6   : > { %v1424_v4 = vadd.f32 0.2548296, %v1392_v30  ;;  %v3156_v38 = vsub.f32 0.0, %v5389_v8  ;;  %v5430_v48 = vmul.f32 0.70710677, %v5415_v18  ;;  %vm1053_vm8 = vcmp.eq.f32.partialorder %v1052_v17, 8.507059e+37 }
 0x1d7   : > { %v3843_v31 = vpop.eup %3842  ;;  %v1647_v15 = vsub.f32 1.0, %v1615_v25  ;;  %v1051_v44 = vsel %vm1050_vm7, %v3837_v6, %v1047_v56  ;;  %v2325_v20 = vmul.f32 0.3275911, %v5426_v42  ;;  %v1804_v60 = vmul.f32 %v1772_v34, %v5290_v41  ;;  %v1918_v34 = vpop.f32.mrf.mxu1 }
 0x1d8   : > { %v1742_v35 = vsel %vm1678_vm3, %v1646_v54, %v1710_v32  ;;  %v5436_v27 = vsel %vm1053_vm8, %v1055_v55, %v1051_v44  ;;  %v2389_v39 = vmul.f32 %v3843_v31, %v5402_v59  ;;  %v1456_v0 = vmul.f32 %v1424_v4, %v5364_v1  ;;  %v2011_v4 = vld [vmem:[%s4469_s26 + $0xa0] sm:$0xff]  ;;  %v2012_v55 = vld [vmem:[%s4469_s26 + $0xa8] sm:$0xff] }
 0x1d9   : > { %v1711_v23 = vsub.f32 0.0, %v1647_v15  ;;  %v1201_v10 = vmul.f32 1.0614054, %v5436_v27  ;;  %v5441_v16 = vadd.f32 1.0, %v2325_v20  ;;  %v1576_v6 = vmul.f32 1.442695, %v1521_v61 }
 0x1da   : > { %v2390_v58 = vsub.f32 1.0, %v2389_v39  ;;  %v3188_v51 = vmul.f32 %v3156_v38, %v5389_v8  ;;  %v5445_v41 = vand.u32 2147483647, %v5430_v48  ;;  %v1805_v13 = vmul.f32 %v1773_v7, %v5375_v46 }
 0x1db   : > { %v1233_v62 = vadd.f32 -1.4531521, %v1201_v10  ;;  %v2399_v45 = vand.u32 2147483648, %v5402_v59  ;;  %3844 = vrcp.f32 %v5441_v16  ;;  %v1774_v1 = vadd.f32 1.0, %v1742_v35 }
 0x1dc   : > { %v2391_v54 = vmul.f32 %v3843_v31, %v2390_v58  ;;  %vm2394_vm9 = vweird.f32 %v3843_v31  ;;  %v2397_v33 = vand.u32 2147483647, %v5402_v59  ;;  %v1743_v8 = vsel %vm1679_vm5, %v1647_v15, %v1711_v23  ;;  %v5483_v39 = vpop.f32.mrf.mxu3 }
 0x1dd   : > { %v5455_v14 = vmul.f32 %v3841_v28, %v1456_v0  ;;  %v1265_v29 = vmul.f32 %v1233_v62, %v5436_v27  ;;  %v2326_v46 = vmul.f32 0.3275911, %v5445_v41  ;;  %3846 = vpow2.f32 %v1576_v6  ;;  %v2126_v62 = vpop.f32.mrf.mxu2 }
 0x1de   : > { %v2392_v21 = vadd.f32 %v3843_v31, %v2391_v54  ;;  %vm2393_vm10 = vweird.f32 %v5402_v59  ;;  %v3220_v50 = vmul.f32 1.442695, %v3188_v51  ;;  %v2400_v17 = vor.u32 1.1754944e-38, %v2399_v45 }
 0x1df   : > { %v1297_v22 = vadd.f32 1.4214138, %v1265_v29  ;;  %vm2395_vm11 = vmor %vm2393_vm10, %vm2394_vm9  ;;  %v3157_v3 = vsub.f32 0.0, %v5426_v42  ;;  %v5461_v52 = vadd.f32 1.0, %v2326_v46  ;;  %v1775_v24 = vadd.f32 1.0, %v1743_v8  ;;  %v1921_v23 = vpop.f32.mrf.mxu1 }
 0x1e0   : > { %v2396_v12 = vsel %vm2395_vm11, %v3843_v31, %v2392_v21  ;;  %vm2398_vm12 = vcmp.eq.f32.partialorder %v2397_v33, 8.507059e+37  ;;  %v1827_v7 = vpack.c.bf16 %v1805_v13, %v1804_v60  ;;  %v1648_v30 = vsub.f32 1.0, %v5455_v14 }
 0x1e1   : > { %v3845_v32 = vpop.eup %3844  ;;  %v1329_v61 = vmul.f32 %v1297_v22, %v5436_v27  ;;  %v5465_v59 = vsel %vm2398_vm12, %v2400_v17, %v2396_v12  ;;  %3848 = vrcp.f32 %v5461_v52  ;;  %v5469_v28 = vmul.f32 %v1774_v1, %v5379_v36 }
 0x1e2   : > { %v2868_v25 = vmul.f32 1.0614054, %v5465_v59  ;;  %3850 = vpow2.f32 %v3220_v50  ;;  %v2404_v56 = vmul.f32 %v3845_v32, %v5441_v16  ;;  %3660 = vmatmul.msk.bf16.gmra.mxu1 %vm400_vm0, %v1827_v7  ;;  %v2412_v31 = vand.u32 2147483647, %v5441_v16 }
 0x1e3   : > { %v1361_v38 = vadd.f32 -0.28449672, %v1329_v61  ;;  %v5478_v15 = vmul.f32 %v3157_v3, %v5426_v42  ;;  %v2124_v44 = vadd.f32 %v5310_v57, %v2123_v9  ;;  %v3847_v20 = vpop.eup %3846  ;;  %vm2408_vm13 = vweird.f32 %v5441_v16 }
 0x1e4   : > { %v2900_v36 = vadd.f32 -1.4531521, %v2868_v25  ;;  %v2405_v60 = vsub.f32 1.0, %v2404_v56  ;;  %v2414_v35 = vand.u32 2147483648, %v5441_v16  ;;  %v5486_v0 = vmul.f32 %v1775_v24, %v5382_v5 }
 0x1e5   : > { %v1712_v10 = vsub.f32 0.0, %v1648_v30  ;;  %v1393_v42 = vmul.f32 %v1361_v38, %v5436_v27  ;;  %v2033_v6 = vpack.c.bf16 %v2012_v55, %v2011_v4  ;;  %vm2409_vm14 = vweird.f32 %v3845_v32 }
 0x1e6   : > { %v2932_v58 = vmul.f32 %v2900_v36, %v5465_v59  ;;  %v2406_v51 = vmul.f32 %v3845_v32, %v2405_v60  ;;  %v1919_v13 = vadd.f32 %v5323_v53, %v1918_v34  ;;  %vm5493_vm15 = vcmp.eq.f32.partialorder %v2412_v31, 8.507059e+37  ;;  %vm2410_vm2 = vmor %vm2408_vm13, %vm2409_vm14 }
 0x1e7   : > { %v3849_v45 = vpop.eup %3848  ;;  %v1425_v1 = vadd.f32 0.2548296, %v1393_v42  ;;  %3685 = vmatmul.msk.bf16.gmra.mxu2 %vm400_vm0, %v2033_v6  ;;  %v2127_v5 = vadd.f32 %v5310_v57, %v2126_v62  ;;  %v1922_v33 = vadd.f32 %v5323_v53, %v1921_v23  ;;  %v2415_v46 = vor.u32 1.1754944e-38, %v2414_v35  ;;  %v5532_v35 = vpop.f32.mrf.mxu3 }
 0x1e8   : > { %v3851_v9 = vpop.eup %3850  ;;  %v2964_v8 = vadd.f32 1.4214138, %v2932_v58  ;;  %v2407_v29 = vadd.f32 %v3845_v32, %v2406_v51  ;;  %v2419_v21 = vmul.f32 %v3849_v45, %v5461_v52  ;;  %vm1680_vm1 = vcmp.ge.f32.partialorder %v5249_v26, 0.0 }
 0x1e9   : > { %v1457_v34 = vmul.f32 %v1425_v1, %v5436_v27  ;;  %v3158_v50 = vsub.f32 0.0, %v5445_v41  ;;  %v5507_v22 = vadd.f32 %v2124_v44, %v1919_v13  ;;  %v5509_v17 = vadd.f32 %v2127_v5, %v1922_v33  ;;  %v1923_v33 = vpop.f32.mrf.mxu1 }
 0x1ea   : > { %v2996_v3 = vmul.f32 %v2964_v8, %v5465_v59  ;;  %v2411_v24 = vsel %vm2410_vm2, %v3845_v32, %v2407_v29  ;;  %v2420_v12 = vsub.f32 1.0, %v2419_v21  ;;  %v2427_v7 = vand.u32 2147483647, %v5461_v52 }
 0x1eb   : > { %v1617_v61 = vmul.f32 %v3847_v20, %v1457_v34  ;;  %v5515_v27 = vsel %vm5493_vm15, %v2415_v46, %v2411_v24  ;;  %v2429_v16 = vand.u32 2147483648, %v5461_v52  ;;  %v5519_v25 = vmul.f32 0.70710677, %v5507_v22  ;;  %v2014_v46 = vld [vmem:[%s4469_s26 + $0xb8] sm:$0xff] }
 0x1ec   : > { %v3028_v56 = vadd.f32 -0.28449672, %v2996_v3  ;;  %v2869_v4 = vmul.f32 1.0614054, %v5515_v27  ;;  %v2421_v55 = vmul.f32 %v3849_v45, %v2420_v12  ;;  %vm2424_vm3 = vweird.f32 %v3849_v45 }
 0x1ed   : > { %v1649_v38 = vsub.f32 1.0, %v1617_v61  ;;  %vm2423_vm4 = vweird.f32 %v5461_v52  ;;  %v5524_v32 = vand.u32 2147483647, %v5519_v25  ;;  %v5527_v31 = vmul.f32 0.70710677, %v5509_v17 }
 0x1ee   : > { %v3060_v44 = vmul.f32 %v3028_v56, %v5465_v59  ;;  %v2901_v20 = vadd.f32 -1.4531521, %v2869_v4  ;;  %v2422_v36 = vadd.f32 %v3849_v45, %v2421_v55  ;;  %v1828_v60 = vpack.c.bf16 %v5486_v0, %v5469_v28  ;;  %vm2425_vm5 = vmor %vm2423_vm4, %vm2424_vm3 }
 0x1ef   : > { %vm2428_vm6 = vcmp.eq.f32.partialorder %v2427_v7, 8.507059e+37  ;;  %v2430_v23 = vor.u32 1.1754944e-38, %v2429_v16  ;;  %v3190_v52 = vmul.f32 %v3158_v50, %v5445_v41  ;;  %v2327_v42 = vmul.f32 0.3275911, %v5524_v32 }
 0x1f0   : > { %v1713_v6 = vsub.f32 0.0, %v1649_v38  ;;  %v3092_v58 = vadd.f32 0.2548296, %v3060_v44  ;;  %v2933_v51 = vmul.f32 %v2901_v20, %v5515_v27  ;;  %v2426_v13 = vsel %vm2425_vm5, %v3849_v45, %v2422_v36 }
 0x1f1   : > { %v3222_v62 = vmul.f32 1.442695, %v5478_v15  ;;  %v5538_v1 = vsel %vm2428_vm6, %v2430_v23, %v2426_v13  ;;  %v5540_v54 = vadd.f32 1.0, %v2327_v42  ;;  %v5543_v28 = vand.u32 2147483647, %v5527_v31  ;;  %v2128_v15 = vpop.f32.mrf.mxu2 }
 0x1f2   : > { %v1744_v41 = vsel %vm1680_vm1, %v1648_v30, %v1712_v10  ;;  %v3124_v0 = vmul.f32 %v3092_v58, %v5465_v59  ;;  %v2965_v5 = vadd.f32 1.4214138, %v2933_v51  ;;  %v2870_v45 = vmul.f32 1.0614054, %v5538_v1  ;;  %3661 = vmatmul.msk.bf16.gmra.mxu1 %vm400_vm0, %v1828_v60  ;;  %v2013_v59 = vld [vmem:[%s4469_s26 + $0xb0] sm:$0xff] }
 0x1f3   : > { %v561_v8 = vmul.f32 0.5, %v5318_v2  ;;  %vm1681_vm7 = vcmp.ge.f32.partialorder %v5338_v40, 0.0  ;;  %v3224_v29 = vmul.f32 1.442695, %v3190_v52  ;;  %3852 = vrcp.f32 %v5540_v54 }
 0x1f4   : > { %v1745_v26 = vsel %vm1681_vm7, %v1649_v38, %v1713_v6  ;;  %v3284_v14 = vmul.f32 %v3851_v9, %v3124_v0  ;;  %v2997_v30 = vmul.f32 %v2965_v5, %v5515_v27  ;;  %v2902_v10 = vadd.f32 -1.4531521, %v2870_v45 }
 0x1f5   : > { %v1776_v21 = vadd.f32 1.0, %v1744_v41  ;;  %v2228_v34 = vmul.f32 0.5, %v5353_v43  ;;  %vm3348_vm8 = vcmp.ge.f32.partialorder %v5367_v37, 0.0  ;;  %v2328_v50 = vmul.f32 0.3275911, %v5543_v28  ;;  %v5566_v43 = vpop.f32.mrf.mxu3 }
 0x1f6   : > { %v3316_v2 = vsub.f32 1.0, %v3284_v14  ;;  %v3029_v3 = vadd.f32 -0.28449672, %v2997_v30  ;;  %3854 = vpow2.f32 %v3222_v62  ;;  %v2934_v40 = vmul.f32 %v2902_v10, %v5538_v1  ;;  %v1926_v62 = vpop.f32.mrf.mxu1 }
 0x1f7   : > { %v1777_v24 = vadd.f32 1.0, %v1745_v26  ;;  %v3159_v9 = vsub.f32 0.0, %v5524_v32  ;;  %v5563_v12 = vadd.f32 1.0, %v2328_v50  ;;  %v2034_v7 = vpack.c.bf16 %v2014_v46, %v2013_v59 }
 0x1f8   : > { %v3380_v61 = vsub.f32 0.0, %v3316_v2  ;;  %v3061_v16 = vmul.f32 %v3029_v3, %v5515_v27  ;;  %v2966_v56 = vadd.f32 1.4214138, %v2934_v40  ;;  %3856 = vpow2.f32 %v3224_v29 }
 0x1f9   : > { %v3853_v4 = vpop.eup %3852  ;;  %v1808_v55 = vmul.f32 %v1776_v21, %v5386_v49  ;;  %v5570_v38 = vmul.f32 0.5, %v5406_v63  ;;  %3858 = vrcp.f32 %v5563_v12  ;;  %v2129_v44 = vadd.f32 %v5310_v57, %v2128_v15  ;;  %3686 = vmatmul.msk.bf16.gmra.mxu2 %vm400_vm0, %v2034_v7  ;;  %v2131_v13 = vpop.f32.mrf.mxu2 }
 0x1fa   : > { %v3412_v20 = vsel %vm3348_vm8, %v3316_v2, %v3380_v61  ;;  %v3093_v36 = vadd.f32 0.2548296, %v3061_v16  ;;  %v2998_v60 = vmul.f32 %v2966_v56, %v5538_v1  ;;  %v2434_v23 = vmul.f32 %v3853_v4, %v5540_v54 }
 0x1fb   : > { %v1809_v52 = vmul.f32 %v1777_v24, %v561_v8  ;;  %v3444_v42 = vadd.f32 1.0, %v3412_v20  ;;  %vm3349_vm9 = vcmp.ge.f32.partialorder %v5419_v47, 0.0  ;;  %v2442_v49 = vand.u32 2147483647, %v5540_v54 }
 0x1fc   : > { %v5582_v63 = vmul.f32 %v3159_v9, %v5524_v32  ;;  %v3855_v6 = vpop.eup %3854  ;;  %v3125_v37 = vmul.f32 %v3093_v36, %v5515_v27  ;;  %v3030_v58 = vadd.f32 -0.28449672, %v2998_v60  ;;  %v2435_v51 = vsub.f32 1.0, %v2434_v23 }
 0x1fd   : > { %vm2438_vm10 = vweird.f32 %v5540_v54  ;;  %v3476_v41 = vmul.f32 %v3444_v42, %v2228_v34  ;;  %v2444_v0 = vand.u32 2147483648, %v5540_v54  ;;  %v1924_v32 = vadd.f32 %v5323_v53, %v1923_v33  ;;  %v5616_v61 = vpop.f32.mrf.mxu3 }
 0x1fe   : > { %v2132_v5 = vadd.f32 %v5310_v57, %v2131_v13  ;;  %v3857_v45 = vpop.eup %3856  ;;  %v3285_v15 = vmul.f32 %v3855_v6, %v3125_v37  ;;  %v3062_v8 = vmul.f32 %v3030_v58, %v5538_v1  ;;  %v2436_v29 = vmul.f32 %v3853_v4, %v2435_v51  ;;  %v1928_v6 = vpop.f32.mrf.mxu1 }
 0x1ff   : > { %vm2439_vm11 = vweird.f32 %v3853_v4  ;;  %v3859_v27 = vpop.eup %3858  ;;  %3508 = vst.msk [vmem:[%s5588_s19] sm:$0xff] %vm400_vm0, %v3476_v41  ;;  %vm5598_vm12 = vcmp.eq.f32.partialorder %v2442_v49, 8.507059e+37  ;;  %v5602_v14 = vadd.f32 %v2129_v44, %v1924_v32  ;;  %v1927_v30 = vadd.f32 %v5323_v53, %v1926_v62 }
 0x200   : > { %v1829_v33 = vpack.c.bf16 %v1809_v52, %v1808_v55  ;;  %v3317_v10 = vsub.f32 1.0, %v3285_v15  ;;  %v3094_v59 = vadd.f32 0.2548296, %v3062_v8  ;;  %v2437_v46 = vadd.f32 %v3853_v4, %v2436_v29  ;;  %vm2440_vm13 = vmor %vm2438_vm10, %vm2439_vm11 }
 0x201   : > { %v2449_v21 = vmul.f32 %v3859_v27, %v5563_v12  ;;  %v2445_v34 = vor.u32 1.1754944e-38, %v2444_v0  ;;  %v2457_v50 = vand.u32 2147483647, %v5563_v12  ;;  %v5610_v2 = vmul.f32 0.70710677, %v5602_v14  ;;  %v2133_v47 = vpop.f32.mrf.mxu2 }
 0x202   : > { %v5612_v3 = vadd.f32 %v2132_v5, %v1927_v30  ;;  %v3381_v40 = vsub.f32 0.0, %v3317_v10  ;;  %v3126_v24 = vmul.f32 %v3094_v59, %v5538_v1  ;;  %v2441_v9 = vsel %vm2440_vm13, %v3853_v4, %v2437_v46  ;;  %3662 = vmatmul.msk.bf16.gmra.mxu1 %vm400_vm0, %v1829_v33 }
 0x203   : > { %v2450_v7 = vsub.f32 1.0, %v2449_v21  ;;  %v5620_v54 = vsel %vm5598_vm12, %v2445_v34, %v2441_v9  ;;  %vm2454_vm14 = vweird.f32 %v3859_v27  ;;  %v2459_v16 = vand.u32 2147483648, %v5563_v12 }
 0x204   : > { %v5624_v56 = vand.u32 2147483647, %v5610_v2  ;;  %v3413_v55 = vsel %vm3349_vm9, %v3317_v10, %v3381_v40  ;;  %v3286_v1 = vmul.f32 %v3857_v45, %v3126_v24  ;;  %v2871_v4 = vmul.f32 1.0614054, %v5620_v54 }
 0x205   : > { %v2451_v44 = vmul.f32 %v3859_v27, %v2450_v7  ;;  %v3445_v20 = vadd.f32 1.0, %v3413_v55  ;;  %v3160_v36 = vsub.f32 0.0, %v5543_v28  ;;  %v5632_v23 = vmul.f32 0.70710677, %v5612_v3 }
 0x206   : > { %v2329_v60 = vmul.f32 0.3275911, %v5624_v56  ;;  %v3318_v52 = vsub.f32 1.0, %v3286_v1  ;;  %v2903_v42 = vadd.f32 -1.4531521, %v2871_v4  ;;  %vm2453_vm15 = vweird.f32 %v5563_v12  ;;  %v1931_v55 = vpop.f32.mrf.mxu1 }
 0x207   : > { %v2452_v49 = vadd.f32 %v3859_v27, %v2451_v44  ;;  %v3477_v37 = vmul.f32 %v3445_v20, %v5570_v38  ;;  %vm2455_vm1 = vmor %vm2453_vm15, %vm2454_vm14  ;;  %v2460_v58 = vor.u32 1.1754944e-38, %v2459_v16  ;;  %v5640_v13 = vand.u32 2147483647, %v5632_v23 }
 0x208   : > { %v5637_v51 = vadd.f32 1.0, %v2329_v60  ;;  %v3382_v62 = vsub.f32 0.0, %v3318_v52  ;;  %v2935_v41 = vmul.f32 %v2903_v42, %v5620_v54  ;;  %vm2458_vm2 = vcmp.eq.f32.partialorder %v2457_v50, 8.507059e+37 }
 0x209   : > { %v2456_v0 = vsel %vm2455_vm1, %v3859_v27, %v2452_v49  ;;  %3509 = vst.msk [vmem:[%s5588_s19 + $0x8] sm:$0xff] %vm400_vm0, %v3477_v37  ;;  %vm3350_vm3 = vcmp.ge.f32.partialorder %v5430_v48, 0.0  ;;  %v3226_v12 = vmul.f32 1.442695, %v5582_v63  ;;  %v3192_v15 = vmul.f32 %v3160_v36, %v5543_v28  ;;  %v5655_v63 = vpop.f32.mrf.mxu3  ;;  %v2136_v16 = vpop.f32.mrf.mxu2 }
 0x20a   : > { %v5647_v38 = vsel %vm2458_vm2, %v2460_v58, %v2456_v0  ;;  %3860 = vrcp.f32 %v5637_v51  ;;  %v3414_v32 = vsel %vm3350_vm3, %v3318_v52, %v3382_v62  ;;  %v2967_v5 = vadd.f32 1.4214138, %v2935_v41 }
 0x20b   : > { %v2872_v45 = vmul.f32 1.0614054, %v5647_v38  ;;  %v2230_v8 = vmul.f32 0.5, %v5415_v18  ;;  %v3446_v29 = vadd.f32 1.0, %v3414_v32  ;;  %v2330_v27 = vmul.f32 0.3275911, %v5640_v13 }
 0x20c   : > { %v2999_v48 = vmul.f32 %v2967_v5, %v5620_v54  ;;  %v5659_v30 = vadd.f32 %v5323_v53, %v5408_v11  ;;  %v1929_v28 = vadd.f32 %v5323_v53, %v1928_v6  ;;  %3862 = vpow2.f32 %v3226_v12 }
 0x20d   : > { %v2904_v26 = vadd.f32 -1.4531521, %v2872_v45  ;;  %v3478_v33 = vmul.f32 %v3446_v29, %v2230_v8  ;;  %v5661_v10 = vadd.f32 1.0, %v2330_v27  ;;  %v3228_v46 = vmul.f32 1.442695, %v3192_v15 }
 0x20e   : > { %v3031_v59 = vadd.f32 -0.28449672, %v2999_v48  ;;  %v5669_v34 = vadd.f32 %v5323_v53, %v5447_v19  ;;  %v3161_v11 = vsub.f32 0.0, %v5624_v56  ;;  %v2134_v50 = vadd.f32 %v5310_v57, %v2133_v47 }
 0x20f   : > { %v2936_v18 = vmul.f32 %v2904_v26, %v5647_v38  ;;  %3510 = vst.msk [vmem:[%s5588_s19 + $0x10] sm:$0xff] %vm400_vm0, %v3478_v33  ;;  %3864 = vrcp.f32 %v5661_v10  ;;  %v5675_v40 = vmul.f32 0.5, %v5507_v22  ;;  %v2472_v1 = vand.u32 2147483647, %v5637_v51 }
 0x210   : > { %v3861_v21 = vpop.eup %3860  ;;  %v3063_v24 = vmul.f32 %v3031_v59, %v5620_v54  ;;  %v2474_v19 = vand.u32 2147483648, %v5637_v51  ;;  %v5681_v4 = vadd.f32 %v2134_v50, %v1929_v28  ;;  %v2137_v44 = vadd.f32 %v5310_v57, %v2136_v16 }
 0x211   : > { %v2968_v9 = vadd.f32 1.4214138, %v2936_v18  ;;  %v2464_v7 = vmul.f32 %v3861_v21, %v5637_v51  ;;  %3866 = vpow2.f32 %v3228_v46  ;;  %vm2468_vm4 = vweird.f32 %v5637_v51  ;;  %v5703_v45 = vpop.f32.mrf.mxu3 }
 0x212   : > { %v3095_v20 = vadd.f32 0.2548296, %v3063_v24  ;;  %v3193_v60 = vmul.f32 %v3161_v11, %v5624_v56  ;;  %v5688_v52 = vmul.f32 0.70710677, %v5681_v4  ;;  %v1932_v42 = vadd.f32 %v5323_v53, %v1931_v55  ;;  %v3863_v49 = vpop.eup %3862 }
 0x213   : > { %v3000_v36 = vmul.f32 %v2968_v9, %v5647_v38  ;;  %v2465_v22 = vsub.f32 1.0, %v2464_v7  ;;  %vm2469_vm5 = vweird.f32 %v3861_v21  ;;  %vm5692_vm6 = vcmp.eq.f32.partialorder %v2472_v1, 8.507059e+37 }
 0x214   : > { %v3127_v47 = vmul.f32 %v3095_v20, %v5620_v54  ;;  %v2475_v41 = vor.u32 1.1754944e-38, %v2474_v19  ;;  %v5697_v0 = vand.u32 2147483647, %v5688_v52  ;;  %v5699_v56 = vadd.f32 %v2137_v44, %v1932_v42  ;;  %vm2470_vm7 = vmor %vm2468_vm4, %vm2469_vm5 }
 0x215   : > { %v3032_v6 = vadd.f32 -0.28449672, %v3000_v36  ;;  %v2466_v37 = vmul.f32 %v3861_v21, %v2465_v22  ;;  %v3865_v58 = vpop.eup %3864  ;;  %v2487_v15 = vand.u32 2147483647, %v5661_v10  ;;  %v2489_v8 = vand.u32 2147483648, %v5661_v10  ;;  %v1933_v22 = vpop.f32.mrf.mxu1 }
 0x216   : > { %v3287_v12 = vmul.f32 %v3863_v49, %v3127_v47  ;;  %v2479_v54 = vmul.f32 %v3865_v58, %v5661_v10  ;;  %v3162_v29 = vsub.f32 0.0, %v5640_v13  ;;  %v2331_v27 = vmul.f32 0.3275911, %v5697_v0 }
 0x217   : > { %v3064_v32 = vmul.f32 %v3032_v6, %v5647_v38  ;;  %v2467_v5 = vadd.f32 %v3861_v21, %v2466_v37  ;;  %v3867_v48 = vpop.eup %3866  ;;  %vm2484_vm8 = vweird.f32 %v3865_v58  ;;  %v5718_v46 = vmul.f32 0.70710677, %v5699_v56 }
 0x218   : > { %v3319_v26 = vsub.f32 1.0, %v3287_v12  ;;  %v2480_v59 = vsub.f32 1.0, %v2479_v54  ;;  %v5715_v51 = vadd.f32 1.0, %v2331_v27  ;;  %vm3351_vm9 = vcmp.ge.f32.partialorder %v5519_v25, 0.0 }
 0x219   : > { %v3096_v33 = vadd.f32 0.2548296, %v3064_v32  ;;  %v2471_v28 = vsel %vm2470_vm7, %v3861_v21, %v2467_v5  ;;  %v3230_v21 = vmul.f32 1.442695, %v3193_v60  ;;  %vm2483_vm10 = vweird.f32 %v5661_v10  ;;  %v2176_v62 = vpop.f32.mrf.mxu3 }
 0x21a   : > { %v5713_v18 = vsel %vm5692_vm6, %v2475_v41, %v2471_v28  ;;  %v3383_v11 = vsub.f32 0.0, %v3319_v26  ;;  %v2481_v9 = vmul.f32 %v3865_v58, %v2480_v59  ;;  %3868 = vrcp.f32 %v5715_v51  ;;  %vm2485_vm11 = vmor %vm2483_vm10, %vm2484_vm8 }
 0x21b   : > { %v3128_v50 = vmul.f32 %v3096_v33, %v5647_v38  ;;  %v2873_v24 = vmul.f32 1.0614054, %v5713_v18  ;;  %vm2488_vm12 = vcmp.eq.f32.partialorder %v2487_v15, 8.507059e+37  ;;  %v2490_v44 = vor.u32 1.1754944e-38, %v2489_v8 }
 0x21c   : > { %v3415_v7 = vsel %vm3351_vm9, %v3319_v26, %v3383_v11  ;;  %v2482_v1 = vadd.f32 %v3865_v58, %v2481_v9  ;;  %v3194_v38 = vmul.f32 %v3162_v29, %v5640_v13  ;;  %v5729_v10 = vand.u32 2147483647, %v5718_v46 }
 0x21d   : > { %v3288_v16 = vmul.f32 %v3867_v48, %v3128_v50  ;;  %v2905_v55 = vadd.f32 -1.4531521, %v2873_v24  ;;  %v3447_v19 = vadd.f32 1.0, %v3415_v7  ;;  %v2232_v42 = vmul.f32 0.5, %v5509_v17 }
 0x21e   : > { %v2486_v36 = vsel %vm2485_vm11, %v3865_v58, %v2482_v1  ;;  %vm3352_vm13 = vcmp.ge.f32.partialorder %v5527_v31, 0.0  ;;  %v5737_v13 = vmul.f32 0.5, %v5602_v14  ;;  %v2138_v58 = vpop.f32.mrf.mxu2  ;;  %3870 = vpow2.f32 %v3230_v21 }
 0x21f   : > { %v3320_v20 = vsub.f32 1.0, %v3288_v16  ;;  %v2937_v25 = vmul.f32 %v2905_v55, %v5713_v18  ;;  %v3479_v60 = vmul.f32 %v3447_v19, %v5675_v40  ;;  %v5734_v49 = vsel %vm2488_vm12, %v2490_v44, %v2486_v36 }
 0x220   : > { %v2874_v37 = vmul.f32 1.0614054, %v5734_v49  ;;  %v3869_v41 = vpop.eup %3868  ;;  %v3232_v40 = vmul.f32 1.442695, %v3194_v38  ;;  %v2332_v17 = vmul.f32 0.3275911, %v5729_v10  ;;  %v1934_v31 = vadd.f32 %v5323_v53, %v1933_v22 }
 0x221   : > { %v3384_v47 = vsub.f32 0.0, %v3320_v20  ;;  %v2969_v6 = vadd.f32 1.4214138, %v2937_v25  ;;  %3511 = vst.msk [vmem:[%s5588_s19 + $0x18] sm:$0xff] %vm400_vm0, %v3479_v60  ;;  %v2494_v14 = vmul.f32 %v3869_v41, %v5715_v51  ;;  %v2139_v8 = vadd.f32 %v5310_v57, %v2138_v58 }
 0x222   : > { %v2906_v5 = vadd.f32 -1.4531521, %v2874_v37  ;;  %v5746_v15 = vadd.f32 1.0, %v2332_v17  ;;  %v2177_v29 = vadd.f32 %v5310_v57, %v2176_v62  ;;  %v2502_v53 = vand.u32 2147483647, %v5715_v51 }
 0x223   : > { %v3416_v12 = vsel %vm3352_vm13, %v3320_v20, %v3384_v47  ;;  %v3001_v32 = vmul.f32 %v2969_v6, %v5713_v18  ;;  %v2495_v26 = vsub.f32 1.0, %v2494_v14  ;;  %v2504_v28 = vand.u32 2147483648, %v5715_v51 }
 0x224   : > { %v3448_v54 = vadd.f32 1.0, %v3416_v12  ;;  %v2938_v48 = vmul.f32 %v2906_v5, %v5734_v49  ;;  %3872 = vrcp.f32 %v5746_v15  ;;  %v5754_v59 = vadd.f32 %v2139_v8, %v1934_v31  ;;  %v3871_v9 = vpop.eup %3870 }
 0x225   : > { %v3033_v27 = vadd.f32 -0.28449672, %v3001_v32  ;;  %v2496_v24 = vmul.f32 %v3869_v41, %v2495_v26  ;;  %vm2499_vm14 = vweird.f32 %v3869_v41  ;;  %v5760_v57 = vmul.f32 0.5, %v5612_v3 }
 0x226   : > { %v3480_v33 = vmul.f32 %v3448_v54, %v2232_v42  ;;  %v2970_v50 = vadd.f32 1.4214138, %v2938_v48  ;;  %3874 = vpow2.f32 %v3232_v40  ;;  %v3163_v21 = vsub.f32 0.0, %v5697_v0  ;;  %v2141_v48 = vpop.f32.mrf.mxu2 }
 0x227   : > { %v3065_v11 = vmul.f32 %v3033_v27, %v5713_v18  ;;  %v5764_v7 = vadd.f32 %v2177_v29, %v5659_v30  ;;  %v2497_v1 = vadd.f32 %v3869_v41, %v2496_v24  ;;  %vm2498_vm15 = vweird.f32 %v5715_v51  ;;  %v1936_v24 = vpop.f32.mrf.mxu1 }
 0x228   : > { %3512 = vst.msk [vmem:[%s5588_s19 + $0x20] sm:$0xff] %vm400_vm0, %v3480_v33  ;;  %v3002_v55 = vmul.f32 %v2970_v50, %v5734_v49  ;;  %vm3353_vm1 = vcmp.ge.f32.partialorder %v5610_v2, 0.0  ;;  %vm2500_vm2 = vmor %vm2498_vm15, %vm2499_vm14  ;;  %v2505_v19 = vor.u32 1.1754944e-38, %v2504_v28  ;;  %v3164_v44 = vsub.f32 0.0, %v5729_v10 }
 0x229   : > { %v3097_v16 = vadd.f32 0.2548296, %v3065_v11  ;;  %v5771_v3 = vmul.f32 0.70710677, %v5754_v59  ;;  %v5774_v38 = vmul.f32 0.70710677, %v5764_v7  ;;  %v2501_v25 = vsel %vm2500_vm2, %v3869_v41, %v2497_v1 }
 0x22a   : > { %v3034_v20 = vadd.f32 -0.28449672, %v3002_v55  ;;  %vm2503_vm3 = vcmp.eq.f32.partialorder %v2502_v53, 8.507059e+37  ;;  %v3873_v36 = vpop.eup %3872  ;;  %v3195_v51 = vmul.f32 %v3163_v21, %v5697_v0  ;;  %v2517_v62 = vand.u32 2147483647, %v5746_v15 }
 0x22b   : > { %v3129_v30 = vmul.f32 %v3097_v16, %v5713_v18  ;;  %v5777_v22 = vsel %vm2503_vm3, %v2505_v19, %v2501_v25  ;;  %v5781_v60 = vand.u32 2147483647, %v5771_v3  ;;  %v5784_v42 = vand.u32 2147483647, %v5774_v38  ;;  %v5805_v53 = vld [vmem:[%s6637_s7] ss:$0 sm:$0xff] }
 0x22c   : > { %v3066_v6 = vmul.f32 %v3034_v20, %v5734_v49  ;;  %v2875_v37 = vmul.f32 1.0614054, %v5777_v22  ;;  %v2509_v18 = vmul.f32 %v3873_v36, %v5746_v15  ;;  %v3875_v58 = vpop.eup %3874  ;;  %v3196_v41 = vmul.f32 %v3164_v44, %v5729_v10 }
 0x22d   : > { %v3289_v47 = vmul.f32 %v3871_v9, %v3129_v30  ;;  %v2333_v0 = vmul.f32 0.3275911, %v5781_v60  ;;  %v2348_v40 = vmul.f32 0.3275911, %v5784_v42  ;;  %vm2514_vm4 = vweird.f32 %v3873_v36  ;;  %v5820_v30 = vld [vmem:[%s6635_s5] ss:$0 sm:$0xff] }
 0x22e   : > { %v3098_v31 = vadd.f32 0.2548296, %v3066_v6  ;;  %v2907_v12 = vadd.f32 -1.4531521, %v2875_v37  ;;  %v2510_v32 = vsub.f32 1.0, %v2509_v18  ;;  %v2519_v5 = vand.u32 2147483648, %v5746_v15 }
 0x22f   : > { %v3321_v17 = vsub.f32 1.0, %v3289_v47  ;;  %v5794_v14 = vadd.f32 1.0, %v2333_v0  ;;  %v5796_v54 = vadd.f32 1.0, %v2348_v40  ;;  %v3234_v26 = vmul.f32 1.442695, %v3195_v51 }
 0x230   : > { %v3130_v29 = vmul.f32 %v3098_v31, %v5734_v49  ;;  %v2939_v10 = vmul.f32 %v2907_v12, %v5777_v22  ;;  %v2511_v27 = vmul.f32 %v3873_v36, %v2510_v32  ;;  %vm2513_vm5 = vweird.f32 %v5746_v15 }
 0x231   : > { %v3385_v8 = vsub.f32 0.0, %v3321_v17  ;;  %3876 = vrcp.f32 %v5794_v14  ;;  %v2142_v33 = vadd.f32 %v5805_v53, %v2141_v48  ;;  %vm2515_vm6 = vmor %vm2513_vm5, %vm2514_vm4  ;;  %vm2518_vm7 = vcmp.eq.f32.partialorder %v2517_v62, 8.507059e+37 }
 0x232   : > { %v3290_v49 = vmul.f32 %v3875_v58, %v3130_v29  ;;  %v2971_v11 = vadd.f32 1.4214138, %v2939_v10  ;;  %v2512_v50 = vadd.f32 %v3873_v36, %v2511_v27  ;;  %v2520_v15 = vor.u32 1.1754944e-38, %v2519_v5  ;;  %v2178_v5 = vpop.f32.mrf.mxu3 }
 0x233   : > { %v3417_v28 = vsel %vm3353_vm1, %v3321_v17, %v3385_v8  ;;  %v3236_v21 = vmul.f32 1.442695, %v3196_v41  ;;  %3878 = vrcp.f32 %v5796_v54  ;;  %v3165_v44 = vsub.f32 0.0, %v5781_v60 }
 0x234   : > { %v3449_v9 = vadd.f32 1.0, %v3417_v28  ;;  %v3322_v16 = vsub.f32 1.0, %v3290_v49  ;;  %v3003_v55 = vmul.f32 %v2971_v11, %v5777_v22  ;;  %v2516_v1 = vsel %vm2515_vm6, %v3873_v36, %v2512_v50 }
 0x235   : > { %v5814_v19 = vsel %vm2518_vm7, %v2520_v15, %v2516_v1  ;;  %v1937_v20 = vadd.f32 %v5820_v30, %v1936_v24  ;;  %3880 = vpow2.f32 %v3234_v26  ;;  %vm3354_vm8 = vcmp.ge.f32.partialorder %v5632_v23, 0.0 }
 0x236   : > { %v3481_v2 = vmul.f32 %v3449_v9, %v5737_v13  ;;  %v3386_v25 = vsub.f32 0.0, %v3322_v16  ;;  %v3035_v51 = vadd.f32 -0.28449672, %v3003_v55  ;;  %v2876_v36 = vmul.f32 1.0614054, %v5814_v19 }
 0x237   : > { %v3877_v47 = vpop.eup %3876  ;;  %3882 = vpow2.f32 %v3236_v21  ;;  %v2532_v13 = vand.u32 2147483647, %v5794_v14  ;;  %v2534_v6 = vand.u32 2147483648, %v5794_v14  ;;  %v5832_v0 = vmul.f32 %v3165_v44, %v5781_v60 }
 0x238   : > { %3513 = vst.msk [vmem:[%s5588_s19 + $0x28] sm:$0xff] %vm400_vm0, %v3481_v2  ;;  %v3418_v37 = vsel %vm3354_vm8, %v3322_v16, %v3386_v25  ;;  %v3067_v18 = vmul.f32 %v3035_v51, %v5777_v22  ;;  %v2908_v58 = vadd.f32 -1.4531521, %v2876_v36  ;;  %v2524_v62 = vmul.f32 %v3877_v47, %v5794_v14 }
 0x239   : > { %v3450_v41 = vadd.f32 1.0, %v3418_v37  ;;  %v3180_v40 = vsub.f32 0.0, %v5784_v42  ;;  %v5835_v17 = vadd.f32 %v2142_v33, %v1937_v20  ;;  %v3879_v23 = vpop.eup %3878  ;;  %vm2528_vm9 = vweird.f32 %v5794_v14  ;;  %v1938_v20 = vpop.f32.mrf.mxu1 }
 0x23a   : > { %v3099_v31 = vadd.f32 0.2548296, %v3067_v18  ;;  %v2940_v12 = vmul.f32 %v2908_v58, %v5814_v19  ;;  %v2525_v32 = vsub.f32 1.0, %v2524_v62  ;;  %vm3355_vm10 = vcmp.ge.f32.partialorder %v5688_v52, 0.0 }
 0x23b   : > { %v3482_v8 = vmul.f32 %v3450_v41, %v5760_v57  ;;  %vm5841_vm11 = vcmp.eq.f32.partialorder %v2532_v13, 8.507059e+37  ;;  %v2535_v29 = vor.u32 1.1754944e-38, %v2534_v6  ;;  %v2749_v10 = vmul.f32 %v3879_v23, %v5796_v54  ;;  %v3881_v27 = vpop.eup %3880 }
 0x23c   : > { %v3131_v48 = vmul.f32 %v3099_v31, %v5777_v22  ;;  %v2972_v26 = vadd.f32 1.4214138, %v2940_v12  ;;  %v2526_v33 = vmul.f32 %v3877_v47, %v2525_v32  ;;  %vm2529_vm12 = vweird.f32 %v3877_v47 }
 0x23d   : > { %v3883_v28 = vpop.eup %3882  ;;  %3514 = vst.msk [vmem:[%s5588_s19 + $0x30] sm:$0xff] %vm400_vm0, %v3482_v8  ;;  %v2750_v49 = vsub.f32 1.0, %v2749_v10  ;;  %v2757_v57 = vand.u32 2147483647, %v5796_v54  ;;  %v5851_v11 = vmul.f32 0.70710677, %v5835_v17  ;;  %v2179_v50 = vadd.f32 %v5805_v53, %v2178_v5  ;;  %vm2530_vm13 = vmor %vm2528_vm9, %vm2529_vm12 }
 0x23e   : > { %v3291_v24 = vmul.f32 %v3881_v27, %v3131_v48  ;;  %v3004_v9 = vmul.f32 %v2972_v26, %v5814_v19  ;;  %v2527_v15 = vadd.f32 %v3877_v47, %v2526_v33  ;;  %v2759_v22 = vand.u32 2147483648, %v5796_v54 }
 0x23f   : > { %v2751_v21 = vmul.f32 %v3879_v23, %v2750_v49  ;;  %vm2754_vm14 = vweird.f32 %v3879_v23  ;;  %v5859_v16 = vand.u32 2147483647, %v5851_v11  ;;  %v5862_v55 = vadd.f32 %v2179_v50, %v5669_v34 }
 0x240   : > { %v3323_v1 = vsub.f32 1.0, %v3291_v24  ;;  %v3036_v2 = vadd.f32 -0.28449672, %v3004_v9  ;;  %v2531_v44 = vsel %vm2530_vm13, %v3877_v47, %v2527_v15  ;;  %vm2753_vm15 = vweird.f32 %v5796_v54  ;;  %v2143_v54 = vpop.f32.mrf.mxu2 }
 0x241   : > { %v5867_v25 = vsel %vm5841_vm11, %v2535_v29, %v2531_v44  ;;  %v2752_v14 = vadd.f32 %v3879_v23, %v2751_v21  ;;  %vm2758_vm1 = vcmp.eq.f32.partialorder %v2757_v57, 8.507059e+37  ;;  %v2334_v51 = vmul.f32 0.3275911, %v5859_v16  ;;  %vm2755_vm2 = vmor %vm2753_vm15, %vm2754_vm14 }
 0x242   : > { %v3387_v36 = vsub.f32 0.0, %v3323_v1  ;;  %v3068_v13 = vmul.f32 %v3036_v2, %v5814_v19  ;;  %v2877_v34 = vmul.f32 1.0614054, %v5867_v25  ;;  %v2760_v6 = vor.u32 1.1754944e-38, %v2759_v22 }
 0x243   : > { %v2756_v47 = vsel %vm2755_vm2, %v3879_v23, %v2752_v14  ;;  %v5873_v37 = vadd.f32 1.0, %v2334_v51  ;;  %v5876_v18 = vmul.f32 0.70710677, %v5862_v55  ;;  %v1939_v58 = vadd.f32 %v5820_v30, %v1938_v20 }
 0x244   : > { %v3419_v62 = vsel %vm3355_vm10, %v3323_v1, %v3387_v36  ;;  %v3100_v41 = vadd.f32 0.2548296, %v3068_v13  ;;  %v2909_v31 = vadd.f32 -1.4531521, %v2877_v34  ;;  %v5881_v12 = vsel %vm2758_vm1, %v2760_v6, %v2756_v47 }
 0x245   : > { %v2235_v32 = vmul.f32 0.5, %v5681_v4  ;;  %v3451_v5 = vadd.f32 1.0, %v3419_v62  ;;  %v2892_v23 = vmul.f32 1.0614054, %v5881_v12  ;;  %3884 = vrcp.f32 %v5873_v37 }
 0x246   : > { %v3132_v8 = vmul.f32 %v3100_v41, %v5814_v19  ;;  %v2941_v60 = vmul.f32 %v2909_v31, %v5867_v25  ;;  %v3212_v29 = vmul.f32 %v3180_v40, %v5784_v42  ;;  %v2144_v52 = vadd.f32 %v5805_v53, %v2143_v54 }
 0x247   : > { %v3483_v10 = vmul.f32 %v3451_v5, %v2235_v32  ;;  %v3238_v27 = vmul.f32 1.442695, %v5832_v0  ;;  %v2924_v48 = vadd.f32 -1.4531521, %v2892_v23  ;;  %v5892_v4 = vand.u32 2147483647, %v5876_v18 }
 0x248   : > { %v5896_v26 = vadd.f32 %v5820_v30, %v5483_v39  ;;  %v3292_v33 = vmul.f32 %v3883_v28, %v3132_v8  ;;  %v2973_v49 = vadd.f32 1.4214138, %v2941_v60  ;;  %v5898_v19 = vadd.f32 %v2144_v52, %v1939_v58  ;;  %v2181_v58 = vpop.f32.mrf.mxu3 }
 0x249   : > { %v5902_v42 = vadd.f32 %v5820_v30, %v5532_v35  ;;  %3515 = vst.msk [vmem:[%s5588_s19 + $0x38] sm:$0xff] %vm400_vm0, %v3483_v10  ;;  %v2236_v0 = vmul.f32 0.5, %v5699_v56  ;;  %v2956_v40 = vmul.f32 %v2924_v48, %v5881_v12  ;;  %v2349_v57 = vmul.f32 0.3275911, %v5892_v4  ;;  %v1941_v48 = vpop.f32.mrf.mxu1 }
 0x24a   : > { %v3324_v50 = vsub.f32 1.0, %v3292_v33  ;;  %vm3356_vm3 = vcmp.ge.f32.partialorder %v5718_v46, 0.0  ;;  %v3005_v39 = vmul.f32 %v2973_v49, %v5867_v25  ;;  %v3268_v28 = vmul.f32 1.442695, %v3212_v29 }
 0x24b   : > { %v3885_v24 = vpop.eup %3884  ;;  %v5912_v9 = vmul.f32 0.5, %v5754_v59  ;;  %3886 = vpow2.f32 %v3238_v27  ;;  %v2988_v35 = vadd.f32 1.4214138, %v2956_v40  ;;  %v5914_v15 = vadd.f32 1.0, %v2349_v57  ;;  %v2146_v57 = vpop.f32.mrf.mxu2 }
 0x24c   : > { %v3388_v22 = vsub.f32 0.0, %v3324_v50  ;;  %v3037_v56 = vadd.f32 -0.28449672, %v3005_v39  ;;  %v2539_v21 = vmul.f32 %v3885_v24, %v5873_v37  ;;  %v5918_v1 = vmul.f32 0.70710677, %v5898_v19 }
 0x24d   : > { %v5921_v2 = vmul.f32 0.5, %v5764_v7  ;;  %v3020_v44 = vmul.f32 %v2988_v35, %v5881_v12  ;;  %v3166_v20 = vsub.f32 0.0, %v5859_v16  ;;  %3888 = vrcp.f32 %v5914_v15 }
 0x24e   : > { %v3420_v59 = vsel %vm3356_vm3, %v3324_v50, %v3388_v22  ;;  %v3069_v14 = vmul.f32 %v3037_v56, %v5867_v25  ;;  %3890 = vpow2.f32 %v3268_v28  ;;  %v2540_v51 = vsub.f32 1.0, %v2539_v21 }
 0x24f   : > { %v3452_v36 = vadd.f32 1.0, %v3420_v59  ;;  %v3052_v13 = vadd.f32 -0.28449672, %v3020_v44  ;;  %v2547_v34 = vand.u32 2147483647, %v5873_v37  ;;  %v2549_v7 = vand.u32 2147483648, %v5873_v37 }
 0x250   : > { %v3101_v6 = vadd.f32 0.2548296, %v3069_v14  ;;  %v2541_v47 = vmul.f32 %v3885_v24, %v2540_v51  ;;  %vm2544_vm4 = vweird.f32 %v3885_v24  ;;  %v5932_v54 = vand.u32 2147483647, %v5918_v1 }
 0x251   : > { %v3887_v46 = vpop.eup %3886  ;;  %v3484_v62 = vmul.f32 %v3452_v36, %v2236_v0  ;;  %vm3357_vm5 = vcmp.ge.f32.partialorder %v5771_v3, 0.0  ;;  %v3084_v41 = vmul.f32 %v3052_v13, %v5881_v12  ;;  %v3198_v31 = vmul.f32 %v3166_v20, %v5859_v16 }
 0x252   : > { %v3133_v32 = vmul.f32 %v3101_v6, %v5867_v25  ;;  %v2542_v5 = vadd.f32 %v3885_v24, %v2541_v47  ;;  %vm2543_vm6 = vweird.f32 %v5873_v37  ;;  %v2335_v23 = vmul.f32 0.3275911, %v5932_v54 }
 0x253   : > { %v3889_v8 = vpop.eup %3888  ;;  %3516 = vst.msk [vmem:[%s5588_s19 + $0x40] sm:$0xff] %vm400_vm0, %v3484_v62  ;;  %v3116_v60 = vadd.f32 0.2548296, %v3084_v41  ;;  %vm2545_vm7 = vmor %vm2543_vm6, %vm2544_vm4  ;;  %vm2548_vm8 = vcmp.eq.f32.partialorder %v2547_v34, 8.507059e+37  ;;  %v2550_v29 = vor.u32 1.1754944e-38, %v2549_v7  ;;  %v2182_v52 = vadd.f32 %v5805_v53, %v2181_v58 }
 0x254   : > { %v3891_v10 = vpop.eup %3890  ;;  %v3293_v27 = vmul.f32 %v3887_v46, %v3133_v32  ;;  %vm3372_vm9 = vcmp.ge.f32.partialorder %v5774_v38, 0.0  ;;  %v2546_v16 = vsel %vm2545_vm7, %v3885_v24, %v2542_v5  ;;  %v2764_v25 = vmul.f32 %v3889_v8, %v5914_v15 }
 0x255   : > { %v2772_v37 = vand.u32 2147483647, %v5914_v15  ;;  %v3148_v33 = vmul.f32 %v3116_v60, %v5881_v12  ;;  %v5948_v49 = vsel %vm2548_vm8, %v2550_v29, %v2546_v16  ;;  %v2774_v0 = vand.u32 2147483648, %v5914_v15 }
 0x256   : > { %v5951_v40 = vadd.f32 1.0, %v2335_v23  ;;  %v3325_v50 = vsub.f32 1.0, %v3293_v27  ;;  %v2878_v39 = vmul.f32 1.0614054, %v5948_v49  ;;  %v2765_v28 = vsub.f32 1.0, %v2764_v25  ;;  %v2183_v25 = vpop.f32.mrf.mxu3 }
 0x257   : > { %v2147_v24 = vadd.f32 %v5805_v53, %v2146_v57  ;;  %v3308_v35 = vmul.f32 %v3891_v10, %v3148_v33  ;;  %v5957_v22 = vadd.f32 %v2182_v52, %v5896_v26  ;;  %v1942_v12 = vadd.f32 %v5820_v30, %v1941_v48 }
 0x258   : > { %3892 = vrcp.f32 %v5951_v40  ;;  %v3389_v56 = vsub.f32 0.0, %v3325_v50  ;;  %v2910_v21 = vadd.f32 -1.4531521, %v2878_v39  ;;  %v2766_v44 = vmul.f32 %v3889_v8, %v2765_v28 }
 0x259   : > { %vm2769_vm10 = vweird.f32 %v3889_v8  ;;  %v3340_v20 = vsub.f32 1.0, %v3308_v35  ;;  %v3240_v59 = vmul.f32 1.442695, %v3198_v31  ;;  %vm2768_vm11 = vweird.f32 %v5914_v15 }
 0x25a   : > { %v3181_v14 = vsub.f32 0.0, %v5892_v4  ;;  %v3421_v51 = vsel %vm3357_vm5, %v3325_v50, %v3389_v56  ;;  %v2942_v36 = vmul.f32 %v2910_v21, %v5948_v49  ;;  %v2767_v13 = vadd.f32 %v3889_v8, %v2766_v44  ;;  %vm2770_vm12 = vmor %vm2768_vm11, %vm2769_vm10 }
 0x25b   : > { %v2775_v26 = vor.u32 1.1754944e-38, %v2774_v0  ;;  %v3453_v34 = vadd.f32 1.0, %v3421_v51  ;;  %v3404_v7 = vsub.f32 0.0, %v3340_v20  ;;  %v3167_v6 = vsub.f32 0.0, %v5932_v54 }
 0x25c   : > { %v5967_v47 = vmul.f32 0.70710677, %v5957_v22  ;;  %v2974_v58 = vadd.f32 1.4214138, %v2942_v36  ;;  %v2771_v15 = vsel %vm2770_vm12, %v3889_v8, %v2767_v13  ;;  %vm2773_vm13 = vcmp.eq.f32.partialorder %v2772_v37, 8.507059e+37 }
 0x25d   : > { %v5969_v46 = vadd.f32 %v2147_v24, %v1942_v12  ;;  %v3485_v62 = vmul.f32 %v3453_v34, %v5912_v9  ;;  %v3436_v41 = vsel %vm3372_vm9, %v3340_v20, %v3404_v7  ;;  %v5974_v31 = vsel %vm2773_vm13, %v2775_v26, %v2771_v15  ;;  %v2148_v7 = vpop.f32.mrf.mxu2 }
 0x25e   : > { %v3893_v3 = vpop.eup %3892  ;;  %v2318_v32 = vand.u32 2147483647, %v5967_v47  ;;  %v3468_v5 = vadd.f32 1.0, %v3436_v41  ;;  %v3006_v23 = vmul.f32 %v2974_v58, %v5948_v49  ;;  %v2893_v60 = vmul.f32 1.0614054, %v5974_v31 }
 0x25f   : > { %v2554_v8 = vmul.f32 %v3893_v3, %v5951_v40  ;;  %3517 = vst.msk [vmem:[%s5588_s19 + $0x48] sm:$0xff] %vm400_vm0, %v3485_v62  ;;  %3894 = vpow2.f32 %v3240_v59  ;;  %v3213_v9 = vmul.f32 %v3181_v14, %v5892_v4  ;;  %v3199_v38 = vmul.f32 %v3167_v6, %v5932_v54 }
 0x260   : > { %v2350_v29 = vmul.f32 0.3275911, %v2318_v32  ;;  %v3500_v52 = vmul.f32 %v3468_v5, %v5921_v2  ;;  %v3038_v10 = vadd.f32 -0.28449672, %v3006_v23  ;;  %v2925_v27 = vadd.f32 -1.4531521, %v2893_v60 }
 0x261   : > { %v2555_v16 = vsub.f32 1.0, %v2554_v8  ;;  %v2562_v37 = vand.u32 2147483647, %v5951_v40  ;;  %v2564_v48 = vand.u32 2147483648, %v5951_v40  ;;  %v5990_v0 = vmul.f32 0.70710677, %v5969_v46 }
 0x262   : > { %v5987_v33 = vadd.f32 1.0, %v2350_v29  ;;  %3532 = vst.msk [vmem:[%s5588_s19 + $0xc0] sm:$0xff] %vm400_vm0, %v3500_v52  ;;  %v3070_v4 = vmul.f32 %v3038_v10, %v5948_v49  ;;  %v2957_v54 = vmul.f32 %v2925_v27, %v5974_v31  ;;  %vm2559_vm14 = vweird.f32 %v3893_v3  ;;  %v1943_v29 = vpop.f32.mrf.mxu1 }
 0x263   : > { %v2556_v2 = vmul.f32 %v3893_v3, %v2555_v16  ;;  %v5998_v57 = vadd.f32 %v5820_v30, %v5566_v43  ;;  %v3270_v50 = vmul.f32 1.442695, %v3213_v9  ;;  %v2184_v39 = vadd.f32 %v5805_v53, %v2183_v25 }
 0x264   : > { %3896 = vrcp.f32 %v5987_v33  ;;  %v3102_v28 = vadd.f32 0.2548296, %v3070_v4  ;;  %v2989_v24 = vadd.f32 1.4214138, %v2957_v54  ;;  %vm2558_vm15 = vweird.f32 %v5951_v40 }
 0x265   : > { %v2557_v35 = vadd.f32 %v3893_v3, %v2556_v2  ;;  %v3895_v12 = vpop.eup %3894  ;;  %v2238_v56 = vmul.f32 0.5, %v5835_v17  ;;  %vm2560_vm1 = vmor %vm2558_vm15, %vm2559_vm14  ;;  %v2565_v21 = vor.u32 1.1754944e-38, %v2564_v48  ;;  %v3242_v44 = vmul.f32 1.442695, %v3199_v38 }
 0x266   : > { %v6005_v20 = vand.u32 2147483647, %v5990_v0  ;;  %v3134_v43 = vmul.f32 %v3102_v28, %v5948_v49  ;;  %v3021_v59 = vmul.f32 %v2989_v24, %v5974_v31  ;;  %vm2563_vm2 = vcmp.eq.f32.partialorder %v2562_v37, 8.507059e+37 }
 0x267   : > { %v2561_v14 = vsel %vm2560_vm1, %v3893_v3, %v2557_v35  ;;  %v3182_v36 = vsub.f32 0.0, %v2318_v32  ;;  %v6013_v13 = vadd.f32 %v2184_v39, %v5902_v42  ;;  %3898 = vpow2.f32 %v3270_v50 }
 0x268   : > { %v6009_v51 = vsel %vm2563_vm2, %v2565_v21, %v2561_v14  ;;  %v2336_v40 = vmul.f32 0.3275911, %v6005_v20  ;;  %v3294_v17 = vmul.f32 %v3895_v12, %v3134_v43  ;;  %v3053_v26 = vadd.f32 -0.28449672, %v3021_v59 }
 0x269   : > { %v2879_v34 = vmul.f32 1.0614054, %v6009_v51  ;;  %vm3358_vm3 = vcmp.ge.f32.partialorder %v5851_v11, 0.0  ;;  %3900 = vpow2.f32 %v3242_v44  ;;  %v6020_v58 = vmul.f32 0.70710677, %v6013_v13 }
 0x26a   : > { %v3897_v6 = vpop.eup %3896  ;;  %v6017_v49 = vadd.f32 1.0, %v2336_v40  ;;  %v3326_v15 = vsub.f32 1.0, %v3294_v17  ;;  %v3085_v3 = vmul.f32 %v3053_v26, %v5974_v31  ;;  %v6025_v41 = vmul.f32 0.5, %v5862_v55 }
 0x26b   : > { %v2911_v42 = vadd.f32 -1.4531521, %v2879_v34  ;;  %v2779_v62 = vmul.f32 %v3897_v6, %v5987_v33  ;;  %v3214_v5 = vmul.f32 %v3182_v36, %v2318_v32  ;;  %v2149_v23 = vadd.f32 %v5805_v53, %v2148_v7 }
 0x26c   : > { %3902 = vrcp.f32 %v6017_v49  ;;  %v3390_v60 = vsub.f32 0.0, %v3326_v15  ;;  %v3117_v8 = vadd.f32 0.2548296, %v3085_v3  ;;  %vm3373_vm4 = vcmp.ge.f32.partialorder %v5876_v18, 0.0 }
 0x26d   : > { %v2943_v9 = vmul.f32 %v2911_v42, %v6009_v51  ;;  %v2780_v38 = vsub.f32 1.0, %v2779_v62  ;;  %vm2784_vm5 = vweird.f32 %v3897_v6  ;;  %v2787_v52 = vand.u32 2147483647, %v5987_v33  ;;  %v3899_v32 = vpop.eup %3898 }
 0x26e   : > { %v2789_v10 = vand.u32 2147483648, %v5987_v33  ;;  %v6034_v55 = vand.u32 2147483647, %v6020_v58  ;;  %v3422_v27 = vsel %vm3358_vm3, %v3326_v15, %v3390_v60  ;;  %v3149_v16 = vmul.f32 %v3117_v8, %v5974_v31 }
 0x26f   : > { %v2975_v25 = vadd.f32 1.4214138, %v2943_v9  ;;  %v2781_v37 = vmul.f32 %v3897_v6, %v2780_v38  ;;  %v3901_v48 = vpop.eup %3900  ;;  %v3454_v4 = vadd.f32 1.0, %v3422_v27  ;;  %vm2783_vm6 = vweird.f32 %v5987_v33 }
 0x270   : > { %v2351_v54 = vmul.f32 0.3275911, %v6034_v55  ;;  %v1944_v2 = vadd.f32 %v5820_v30, %v1943_v29  ;;  %v3309_v50 = vmul.f32 %v3899_v32, %v3149_v16  ;;  %v3272_v24 = vmul.f32 1.442695, %v3214_v5  ;;  %vm2785_vm7 = vmor %vm2783_vm6, %vm2784_vm5  ;;  %v2186_v5 = vpop.f32.mrf.mxu3 }
 0x271   : > { %v3007_v39 = vmul.f32 %v2975_v25, %v6009_v51  ;;  %v2782_v28 = vadd.f32 %v3897_v6, %v2781_v37  ;;  %v3486_v35 = vmul.f32 %v3454_v4, %v2238_v56  ;;  %vm2788_vm8 = vcmp.eq.f32.partialorder %v2787_v52, 8.507059e+37 }
 0x272   : > { %v3903_v11 = vpop.eup %3902  ;;  %v2790_v31 = vor.u32 1.1754944e-38, %v2789_v10  ;;  %v6044_v12 = vadd.f32 1.0, %v2351_v54  ;;  %v3341_v21 = vsub.f32 1.0, %v3309_v50  ;;  %v3168_v14 = vsub.f32 0.0, %v6005_v20 }
 0x273   : > { %v3039_v33 = vadd.f32 -0.28449672, %v3007_v39  ;;  %v2786_v44 = vsel %vm2785_vm7, %v3897_v6, %v2782_v28  ;;  %v2569_v43 = vmul.f32 %v3903_v11, %v6017_v49  ;;  %3518 = vst.msk [vmem:[%s5588_s19 + $0x50] sm:$0xff] %vm400_vm0, %v3486_v35  ;;  %v6053_v56 = vadd.f32 %v2149_v23, %v1944_v2 }
 0x274   : > { %v6049_v59 = vsel %vm2788_vm8, %v2790_v31, %v2786_v44  ;;  %3904 = vrcp.f32 %v6044_v12  ;;  %v3405_v36 = vsub.f32 0.0, %v3341_v21  ;;  %v6058_v34 = vmul.f32 0.5, %v5898_v19 }
 0x275   : > { %v3071_v40 = vmul.f32 %v3039_v33, %v6009_v51  ;;  %v2894_v17 = vmul.f32 1.0614054, %v6049_v59  ;;  %v2570_v26 = vsub.f32 1.0, %v2569_v43  ;;  %vm2574_vm9 = vweird.f32 %v3903_v11  ;;  %v1946_v33 = vpop.f32.mrf.mxu1 }
 0x276   : > { %v2577_v7 = vand.u32 2147483647, %v6017_v49  ;;  %v2579_v6 = vand.u32 2147483648, %v6017_v49  ;;  %v3437_v15 = vsel %vm3373_vm4, %v3341_v21, %v3405_v36  ;;  %vm3359_vm10 = vcmp.ge.f32.partialorder %v5918_v1, 0.0  ;;  %v2151_v21 = vpop.f32.mrf.mxu2 }
 0x277   : > { %v3103_v3 = vadd.f32 0.2548296, %v3071_v40  ;;  %v2926_v42 = vadd.f32 -1.4531521, %v2894_v17  ;;  %v2571_v62 = vmul.f32 %v3903_v11, %v2570_v26  ;;  %v3469_v23 = vadd.f32 1.0, %v3437_v15 }
 0x278   : > { %3906 = vpow2.f32 %v3272_v24  ;;  %vm2573_vm11 = vweird.f32 %v6017_v49  ;;  %v3200_v19 = vmul.f32 %v3168_v14, %v6005_v20  ;;  %v6070_v18 = vmul.f32 0.70710677, %v6053_v56 }
 0x279   : > { %v3135_v60 = vmul.f32 %v3103_v3, %v6009_v51  ;;  %v2958_v8 = vmul.f32 %v2926_v42, %v6049_v59  ;;  %v2572_v9 = vadd.f32 %v3903_v11, %v2571_v62  ;;  %v3501_v29 = vmul.f32 %v3469_v23, %v6025_v41  ;;  %vm2575_vm12 = vmor %vm2573_vm11, %vm2574_vm9 }
 0x27a   : > { %v3905_v38 = vpop.eup %3904  ;;  %vm2578_vm13 = vcmp.eq.f32.partialorder %v2577_v7, 8.507059e+37  ;;  %v2580_v52 = vor.u32 1.1754944e-38, %v2579_v6  ;;  %v2187_v49 = vadd.f32 %v5805_v53, %v2186_v5  ;;  %v2804_v16 = vand.u32 2147483648, %v6044_v12 }
 0x27b   : > { %v3295_v10 = vmul.f32 %v3901_v48, %v3135_v60  ;;  %v2990_v32 = vadd.f32 1.4214138, %v2958_v8  ;;  %v2576_v20 = vsel %vm2575_vm12, %v3903_v11, %v2572_v9  ;;  %v2794_v51 = vmul.f32 %v3905_v38, %v6044_v12  ;;  %3533 = vst.msk [vmem:[%s5588_s19 + $0xc8] sm:$0xff] %vm400_vm0, %v3501_v29 }
 0x27c   : > { %v6078_v27 = vsel %vm2578_vm13, %v2580_v52, %v2576_v20  ;;  %v3183_v25 = vsub.f32 0.0, %v6034_v55  ;;  %v6083_v41 = vand.u32 2147483647, %v6070_v18  ;;  %vm2799_vm14 = vweird.f32 %v3905_v38 }
 0x27d   : > { %v3327_v37 = vsub.f32 1.0, %v3295_v10  ;;  %v3022_v4 = vmul.f32 %v2990_v32, %v6049_v59  ;;  %v2880_v48 = vmul.f32 1.0614054, %v6078_v27  ;;  %v2795_v54 = vsub.f32 1.0, %v2794_v51 }
 0x27e   : > { %v3907_v2 = vpop.eup %3906  ;;  %v2802_v50 = vand.u32 2147483647, %v6044_v12  ;;  %v2337_v39 = vmul.f32 0.3275911, %v6083_v41  ;;  %v6090_v28 = vadd.f32 %v2187_v49, %v5998_v57  ;;  %vm2798_vm15 = vweird.f32 %v6044_v12 }
 0x27f   : > { %v3391_v24 = vsub.f32 0.0, %v3327_v37  ;;  %v3054_v11 = vadd.f32 -0.28449672, %v3022_v4  ;;  %v2912_v35 = vadd.f32 -1.4531521, %v2880_v48  ;;  %v2796_v31 = vmul.f32 %v3905_v38, %v2795_v54  ;;  %vm2800_vm1 = vmor %vm2798_vm15, %vm2799_vm14 }
 0x280   : > { %v2805_v44 = vor.u32 1.1754944e-38, %v2804_v16  ;;  %v6093_v43 = vadd.f32 1.0, %v2337_v39  ;;  %v2152_v14 = vadd.f32 %v5805_v53, %v2151_v21  ;;  %v6103_v12 = vmul.f32 0.70710677, %v6090_v28 }
 0x281   : > { %v3423_v36 = vsel %vm3359_vm10, %v3327_v37, %v3391_v24  ;;  %v3086_v40 = vmul.f32 %v3054_v11, %v6049_v59  ;;  %v2944_v57 = vmul.f32 %v2912_v35, %v6078_v27  ;;  %v2797_v17 = vadd.f32 %v3905_v38, %v2796_v31 }
 0x282   : > { %v3455_v26 = vadd.f32 1.0, %v3423_v36  ;;  %3908 = vrcp.f32 %v6093_v43  ;;  %v1947_v7 = vadd.f32 %v5820_v30, %v1946_v33  ;;  %vm2803_vm2 = vcmp.eq.f32.partialorder %v2802_v50, 8.507059e+37 }
 0x283   : > { %v3118_v6 = vadd.f32 0.2548296, %v3086_v40  ;;  %v2976_v15 = vadd.f32 1.4214138, %v2944_v57  ;;  %v2801_v1 = vsel %vm2800_vm1, %v3905_v38, %v2797_v17  ;;  %v3244_v42 = vmul.f32 1.442695, %v3200_v19  ;;  %v2188_v57 = vpop.f32.mrf.mxu3 }
 0x284   : > { %v3487_v3 = vmul.f32 %v3455_v26, %v6058_v34  ;;  %v6107_v62 = vsel %vm2803_vm2, %v2805_v44, %v2801_v1  ;;  %v6111_v5 = vadd.f32 %v5820_v30, %v5616_v61  ;;  %v2254_v9 = vmul.f32 0.5, %v5957_v22 }
 0x285   : > { %v3150_v23 = vmul.f32 %v3118_v6, %v6049_v59  ;;  %v3008_v60 = vmul.f32 %v2976_v15, %v6078_v27  ;;  %v2895_v8 = vmul.f32 1.0614054, %v6107_v62  ;;  %v3215_v38 = vmul.f32 %v3183_v25, %v6034_v55  ;;  %v1948_v15 = vpop.f32.mrf.mxu1 }
 0x286   : > { %3519 = vst.msk [vmem:[%s5588_s19 + $0x58] sm:$0xff] %vm400_vm0, %v3487_v3  ;;  %v6121_v34 = vand.u32 2147483647, %v6103_v12  ;;  %v6123_v19 = vadd.f32 %v2152_v14, %v1947_v7  ;;  %vm3374_vm3 = vcmp.ge.f32.partialorder %v5967_v47, 0.0  ;;  %v6127_v49 = vmul.f32 0.5, %v5969_v46 }
 0x287   : > { %v3310_v29 = vmul.f32 %v3907_v2, %v3150_v23  ;;  %v3040_v61 = vadd.f32 -0.28449672, %v3008_v60  ;;  %v2927_v59 = vadd.f32 -1.4531521, %v2895_v8  ;;  %3910 = vpow2.f32 %v3244_v42 }
 0x288   : > { %v3909_v52 = vpop.eup %3908  ;;  %v2352_v10 = vmul.f32 0.3275911, %v6121_v34  ;;  %v6131_v22 = vmul.f32 0.70710677, %v6123_v19  ;;  %v3274_v16 = vmul.f32 1.442695, %v3215_v38  ;;  %vm2588_vm6 = vweird.f32 %v6093_v43 }
 0x289   : > { %v3342_v55 = vsub.f32 1.0, %v3310_v29  ;;  %v3072_v32 = vmul.f32 %v3040_v61, %v6078_v27  ;;  %v2959_v20 = vmul.f32 %v2927_v59, %v6107_v62  ;;  %v2584_v51 = vmul.f32 %v3909_v52, %v6093_v43 }
 0x28a   : > { %v3169_v25 = vsub.f32 0.0, %v6083_v41  ;;  %v6137_v37 = vadd.f32 1.0, %v2352_v10  ;;  %v6140_v46 = vand.u32 2147483647, %v6131_v22  ;;  %vm2589_vm4 = vweird.f32 %v3909_v52 }
 0x28b   : > { %v3406_v4 = vsub.f32 0.0, %v3342_v55  ;;  %v3104_v48 = vadd.f32 0.2548296, %v3072_v32  ;;  %v2991_v54 = vadd.f32 1.4214138, %v2959_v20  ;;  %v2585_v2 = vsub.f32 1.0, %v2584_v51  ;;  %vm2590_vm7 = vmor %vm2588_vm6, %vm2589_vm4 }
 0x28c   : > { %v2592_v50 = vand.u32 2147483647, %v6093_v43  ;;  %v2594_v39 = vand.u32 2147483648, %v6093_v43  ;;  %3912 = vrcp.f32 %v6137_v37  ;;  %vm3360_vm5 = vcmp.ge.f32.partialorder %v5990_v0, 0.0 }
 0x28d   : > { %v3438_v24 = vsel %vm3374_vm3, %v3342_v55, %v3406_v4  ;;  %v3136_v11 = vmul.f32 %v3104_v48, %v6078_v27  ;;  %v3023_v35 = vmul.f32 %v2991_v54, %v6107_v62  ;;  %v2586_v31 = vmul.f32 %v3909_v52, %v2585_v2  ;;  %v3911_v21 = vpop.eup %3910 }
 0x28e   : > { %v3470_v33 = vadd.f32 1.0, %v3438_v24  ;;  %v3201_v44 = vmul.f32 %v3169_v25, %v6083_v41  ;;  %v2338_v47 = vmul.f32 0.3275911, %v6140_v46  ;;  %3914 = vpow2.f32 %v3274_v16  ;;  %v2153_v41 = vpop.f32.mrf.mxu2 }
 0x28f   : > { %v3296_v14 = vmul.f32 %v3911_v21, %v3136_v11  ;;  %v3055_v36 = vadd.f32 -0.28449672, %v3023_v35  ;;  %v2587_v40 = vadd.f32 %v3909_v52, %v2586_v31  ;;  %vm2593_vm8 = vcmp.eq.f32.partialorder %v2592_v50, 8.507059e+37 }
 0x290   : > { %v3502_v17 = vmul.f32 %v3470_v33, %v2254_v9  ;;  %v2595_v27 = vor.u32 1.1754944e-38, %v2594_v39  ;;  %v6155_v43 = vadd.f32 1.0, %v2338_v47  ;;  %v2255_v3 = vmul.f32 0.5, %v6013_v13 }
 0x291   : > { %v3328_v26 = vsub.f32 1.0, %v3296_v14  ;;  %v3087_v7 = vmul.f32 %v3055_v36, %v6107_v62  ;;  %v2591_v6 = vsel %vm2590_vm7, %v3909_v52, %v2587_v40  ;;  %v3246_v23 = vmul.f32 1.442695, %v3201_v44 }
 0x292   : > { %v3913_v1 = vpop.eup %3912  ;;  %3534 = vst.msk [vmem:[%s5588_s19 + $0xd0] sm:$0xff] %vm400_vm0, %v3502_v17  ;;  %v6160_v42 = vsel %vm2593_vm8, %v2595_v27, %v2591_v6  ;;  %v2189_v60 = vadd.f32 %v5805_v53, %v2188_v57  ;;  %vm3375_vm9 = vcmp.ge.f32.partialorder %v6020_v58, 0.0  ;;  %v2817_v61 = vand.u32 2147483647, %v6137_v37 }
 0x293   : > { %v3392_v8 = vsub.f32 0.0, %v3328_v26  ;;  %v3119_v9 = vadd.f32 0.2548296, %v3087_v7  ;;  %v2881_v38 = vmul.f32 1.0614054, %v6160_v42  ;;  %v2809_v29 = vmul.f32 %v3913_v1, %v6137_v37 }
 0x294   : > { %3916 = vrcp.f32 %v6155_v43  ;;  %v2154_v59 = vadd.f32 %v5805_v53, %v2153_v41  ;;  %v1949_v13 = vadd.f32 %v5820_v30, %v1948_v15  ;;  %v3915_v20 = vpop.eup %3914  ;;  %vm2814_vm10 = vweird.f32 %v3913_v1 }
 0x295   : > { %v3424_v52 = vsel %vm3360_vm5, %v3328_v26, %v3392_v8  ;;  %v3151_v10 = vmul.f32 %v3119_v9, %v6107_v62  ;;  %v2913_v55 = vadd.f32 -1.4531521, %v2881_v38  ;;  %v2810_v32 = vsub.f32 1.0, %v2809_v29 }
 0x296   : > { %v3456_v51 = vadd.f32 1.0, %v3424_v52  ;;  %v2819_v16 = vand.u32 2147483648, %v6137_v37  ;;  %v3184_v25 = vsub.f32 0.0, %v6121_v34  ;;  %v6177_v54 = vadd.f32 %v2189_v60, %v6111_v5 }
 0x297   : > { %v3311_v4 = vmul.f32 %v3915_v20, %v3151_v10  ;;  %v2945_v53 = vmul.f32 %v2913_v55, %v6160_v42  ;;  %v2811_v48 = vmul.f32 %v3913_v1, %v2810_v32  ;;  %3918 = vpow2.f32 %v3246_v23 }
 0x298   : > { %v3488_v0 = vmul.f32 %v3456_v51, %v6127_v49  ;;  %vm2813_vm11 = vweird.f32 %v6137_v37  ;;  %v6181_v62 = vadd.f32 %v2154_v59, %v1949_v13  ;;  %vm2818_vm12 = vcmp.eq.f32.partialorder %v2817_v61, 8.507059e+37 }
 0x299   : > { %v3343_v2 = vsub.f32 1.0, %v3311_v4  ;;  %v2977_v50 = vadd.f32 1.4214138, %v2945_v53  ;;  %v2812_v39 = vadd.f32 %v3913_v1, %v2811_v48  ;;  %vm2815_vm13 = vmor %vm2813_vm11, %vm2814_vm10  ;;  %v2820_v11 = vor.u32 1.1754944e-38, %v2819_v16 }
 0x29a   : > { %v3917_v24 = vpop.eup %3916  ;;  %3520 = vst.msk [vmem:[%s5588_s19 + $0x60] sm:$0xff] %vm400_vm0, %v3488_v0  ;;  %v3216_v5 = vmul.f32 %v3184_v25, %v6121_v34  ;;  %v6188_v35 = vmul.f32 0.70710677, %v6177_v54  ;;  %v6191_v49 = vmul.f32 0.70710677, %v6181_v62  ;;  %v3170_v36 = vsub.f32 0.0, %v6140_v46  ;;  %v2191_v25 = vpop.f32.mrf.mxu3 }
 0x29b   : > { %v3407_v37 = vsub.f32 0.0, %v3343_v2  ;;  %v3009_v31 = vmul.f32 %v2977_v50, %v6160_v42  ;;  %v2816_v21 = vsel %vm2815_vm13, %v3913_v1, %v2812_v39  ;;  %v2599_v33 = vmul.f32 %v3917_v24, %v6155_v43  ;;  %v6238_v39 = vld [vmem:[%s6637_s7] ss:$0 sm:$0xff] }
 0x29c   : > { %v6195_v44 = vsel %vm2818_vm12, %v2820_v11, %v2816_v21  ;;  %v2607_v14 = vand.u32 2147483647, %v6155_v43  ;;  %v2321_v34 = vand.u32 2147483647, %v6188_v35  ;;  %v2609_v7 = vand.u32 2147483648, %v6155_v43  ;;  %v1951_v21 = vpop.f32.mrf.mxu1 }
 0x29d   : > { %v3439_v40 = vsel %vm3375_vm9, %v3343_v2, %v3407_v37  ;;  %v3041_v47 = vadd.f32 -0.28449672, %v3009_v31  ;;  %v2896_v57 = vmul.f32 1.0614054, %v6195_v44  ;;  %v2600_v17 = vsub.f32 1.0, %v2599_v33  ;;  %v3919_v27 = vpop.eup %3918 }
 0x29e   : > { %v3471_v26 = vadd.f32 1.0, %v3439_v40  ;;  %v2353_v6 = vmul.f32 0.3275911, %v2321_v34  ;;  %v6205_v41 = vand.u32 2147483647, %v6191_v49  ;;  %vm2604_vm14 = vweird.f32 %v3917_v24 }
 0x29f   : > { %v3073_v15 = vmul.f32 %v3041_v47, %v6160_v42  ;;  %v2928_v1 = vadd.f32 -1.4531521, %v2896_v57  ;;  %v2601_v23 = vmul.f32 %v3917_v24, %v2600_v17  ;;  %v3202_v60 = vmul.f32 %v3170_v36, %v6140_v46 }
 0x2a0   : > { %v3503_v58 = vmul.f32 %v3471_v26, %v2255_v3  ;;  %v6209_v8 = vadd.f32 1.0, %v2353_v6  ;;  %v2339_v9 = vmul.f32 0.3275911, %v6205_v41  ;;  %vm2603_vm15 = vweird.f32 %v6155_v43 }
 0x2a1   : > { %v3105_v38 = vadd.f32 0.2548296, %v3073_v15  ;;  %v2960_v29 = vmul.f32 %v2928_v1, %v6195_v44  ;;  %v2602_v61 = vadd.f32 %v3917_v24, %v2601_v23  ;;  %v1987_v59 = vadd.f32 %v5820_v30, %v5655_v63  ;;  %vm2605_vm1 = vmor %vm2603_vm15, %vm2604_vm14 }
 0x2a2   : > { %3535 = vst.msk [vmem:[%s5588_s19 + $0xd8] sm:$0xff] %vm400_vm0, %v3503_v58  ;;  %v3276_v13 = vmul.f32 1.442695, %v3216_v5  ;;  %v2610_v3 = vor.u32 1.1754944e-38, %v2609_v7  ;;  %3920 = vrcp.f32 %v6209_v8  ;;  %vm2608_vm2 = vcmp.eq.f32.partialorder %v2607_v14, 8.507059e+37 }
 0x2a3   : > { %v3137_v46 = vmul.f32 %v3105_v38, %v6160_v42  ;;  %v2992_v52 = vadd.f32 1.4214138, %v2960_v29  ;;  %v2606_v10 = vsel %vm2605_vm1, %v3917_v24, %v2602_v61  ;;  %v3248_v32 = vmul.f32 1.442695, %v3202_v60  ;;  %v6262_v7 = vld [vmem:[%s6635_s5] ss:$0 sm:$0xff] }
 0x2a4   : > { %v6220_v55 = vsel %vm2608_vm2, %v2610_v3, %v2606_v10  ;;  %v3185_v20 = vsub.f32 0.0, %v2321_v34  ;;  %v6222_v43 = vadd.f32 1.0, %v2339_v9  ;;  %v2241_v63 = vmul.f32 0.5, %v6053_v56  ;;  %v2156_v56 = vpop.f32.mrf.mxu2 }
 0x2a5   : > { %v3297_v30 = vmul.f32 %v3919_v27, %v3137_v46  ;;  %v3024_v51 = vmul.f32 %v2992_v52, %v6195_v44  ;;  %v2882_v16 = vmul.f32 1.0614054, %v6220_v55  ;;  %vm3361_vm3 = vcmp.ge.f32.partialorder %v6070_v18, 0.0 }
 0x2a6   : > { %v6229_v42 = vmul.f32 0.5, %v6090_v28  ;;  %v2832_v4 = vand.u32 2147483647, %v6209_v8  ;;  %3922 = vrcp.f32 %v6222_v43  ;;  %v6233_v50 = vmul.f32 %v3185_v20, %v2321_v34 }
 0x2a7   : > { %v3329_v53 = vsub.f32 1.0, %v3297_v30  ;;  %v3056_v48 = vadd.f32 -0.28449672, %v3024_v51  ;;  %3924 = vpow2.f32 %v3276_v13  ;;  %v2914_v0 = vadd.f32 -1.4531521, %v2882_v16 }
 0x2a8   : > { %v3921_v2 = vpop.eup %3920  ;;  %3926 = vpow2.f32 %v3248_v32  ;;  %v2157_v28 = vadd.f32 %v6238_v39, %v2156_v56  ;;  %v2192_v24 = vadd.f32 %v6238_v39, %v2191_v25  ;;  %vm2828_vm4 = vweird.f32 %v6209_v8 }
 0x2a9   : > { %v3393_v11 = vsub.f32 0.0, %v3329_v53  ;;  %v3088_v5 = vmul.f32 %v3056_v48, %v6195_v44  ;;  %v2946_v37 = vmul.f32 %v2914_v0, %v6220_v55  ;;  %v2824_v31 = vmul.f32 %v3921_v2, %v6209_v8 }
 0x2aa   : > { %vm6246_vm5 = vcmp.eq.f32.partialorder %v2832_v4, 8.507059e+37  ;;  %v2834_v14 = vand.u32 2147483648, %v6209_v8  ;;  %v6251_v36 = vadd.f32 %v2192_v24, %v1987_v59  ;;  %vm3376_vm6 = vcmp.ge.f32.partialorder %v6103_v12, 0.0 }
 0x2ab   : > { %v3425_v34 = vsel %vm3361_vm3, %v3329_v53, %v3393_v11  ;;  %v3120_v40 = vadd.f32 0.2548296, %v3088_v5  ;;  %v2978_v47 = vadd.f32 1.4214138, %v2946_v37  ;;  %v2825_v57 = vsub.f32 1.0, %v2824_v31  ;;  %v2193_v11 = vpop.f32.mrf.mxu3 }
 0x2ac   : > { %v3923_v17 = vpop.eup %3922  ;;  %v3457_v27 = vadd.f32 1.0, %v3425_v34  ;;  %vm2829_vm7 = vweird.f32 %v3921_v2  ;;  %v6257_v26 = vmul.f32 0.70710677, %v6251_v36  ;;  %v1952_v18 = vadd.f32 %v6262_v7, %v1951_v21 }
 0x2ad   : > { %v3925_v6 = vpop.eup %3924  ;;  %v3152_v15 = vmul.f32 %v3120_v40, %v6195_v44  ;;  %v3010_v1 = vmul.f32 %v2978_v47, %v6220_v55  ;;  %v2826_v23 = vmul.f32 %v3921_v2, %v2825_v57  ;;  %v2614_v58 = vmul.f32 %v3923_v17, %v6222_v43  ;;  %vm2830_vm8 = vmor %vm2828_vm4, %vm2829_vm7 }
 0x2ae   : > { %v3927_v60 = vpop.eup %3926  ;;  %v3489_v9 = vmul.f32 %v3457_v27, %v2241_v63  ;;  %v2835_v38 = vor.u32 1.1754944e-38, %v2834_v14  ;;  %v2622_v29 = vand.u32 2147483647, %v6222_v43  ;;  %v6270_v61 = vand.u32 2147483647, %v6257_v26 }
 0x2af   : > { %v3312_v59 = vmul.f32 %v3925_v6, %v3152_v15  ;;  %v3042_v13 = vadd.f32 -0.28449672, %v3010_v1  ;;  %v2827_v3 = vadd.f32 %v3921_v2, %v2826_v23  ;;  %v2615_v46 = vsub.f32 1.0, %v2614_v58  ;;  %v1953_v23 = vpop.f32.mrf.mxu1 }
 0x2b0   : > { %3521 = vst.msk [vmem:[%s5588_s19 + $0x68] sm:$0xff] %vm400_vm0, %v3489_v9  ;;  %vm2619_vm9 = vweird.f32 %v3923_v17  ;;  %v2624_v44 = vand.u32 2147483648, %v6222_v43  ;;  %v2354_v52 = vmul.f32 0.3275911, %v6270_v61  ;;  %v6279_v10 = vadd.f32 %v2157_v28, %v1952_v18 }
 0x2b1   : > { %v3344_v32 = vsub.f32 1.0, %v3312_v59  ;;  %v3074_v20 = vmul.f32 %v3042_v13, %v6220_v55  ;;  %v2831_v63 = vsel %vm2830_vm8, %v3921_v2, %v2827_v3  ;;  %v2616_v30 = vmul.f32 %v3923_v17, %v2615_v46  ;;  %v2158_v3 = vpop.f32.mrf.mxu2 }
 0x2b2   : > { %v6284_v51 = vsel %vm6246_vm5, %v2835_v38, %v2831_v63  ;;  %vm2618_vm10 = vweird.f32 %v6222_v43  ;;  %v3171_v8 = vsub.f32 0.0, %v6205_v41  ;;  %v6288_v16 = vadd.f32 1.0, %v2354_v52 }
 0x2b3   : > { %v3408_v25 = vsub.f32 0.0, %v3344_v32  ;;  %v3106_v4 = vadd.f32 0.2548296, %v3074_v20  ;;  %v2897_v53 = vmul.f32 1.0614054, %v6284_v51  ;;  %v2617_v48 = vadd.f32 %v3923_v17, %v2616_v30  ;;  %vm2620_vm11 = vmor %vm2618_vm10, %vm2619_vm9 }
 0x2b4   : > { %vm2623_vm12 = vcmp.eq.f32.partialorder %v2622_v29, 8.507059e+37  ;;  %v2625_v0 = vor.u32 1.1754944e-38, %v2624_v44  ;;  %3928 = vrcp.f32 %v6288_v16  ;;  %v6294_v56 = vmul.f32 0.70710677, %v6279_v10 }
 0x2b5   : > { %v3440_v43 = vsel %vm3376_vm6, %v3344_v32, %v3408_v25  ;;  %v3138_v2 = vmul.f32 %v3106_v4, %v6220_v55  ;;  %v2929_v28 = vadd.f32 -1.4531521, %v2897_v53  ;;  %v2621_v24 = vsel %vm2620_vm11, %v3923_v17, %v2617_v48 }
 0x2b6   : > { %v3472_v5 = vadd.f32 1.0, %v3440_v43  ;;  %v3278_v37 = vmul.f32 1.442695, %v6233_v50  ;;  %v6300_v31 = vsel %vm2623_vm12, %v2625_v0, %v2621_v24  ;;  %v3203_v21 = vmul.f32 %v3171_v8, %v6205_v41 }
 0x2b7   : > { %v1989_v33 = vadd.f32 %v6262_v7, %v5703_v45  ;;  %v3298_v14 = vmul.f32 %v3927_v60, %v3138_v2  ;;  %v2961_v12 = vmul.f32 %v2929_v28, %v6284_v51  ;;  %v2883_v34 = vmul.f32 1.0614054, %v6300_v31 }
 0x2b8   : > { %v3504_v55 = vmul.f32 %v3472_v5, %v6229_v42  ;;  %v2242_v40 = vmul.f32 0.5, %v6123_v19  ;;  %v6310_v47 = vand.u32 2147483647, %v6294_v56  ;;  %v2194_v50 = vadd.f32 %v6238_v39, %v2193_v11 }
 0x2b9   : > { %v3330_v57 = vsub.f32 1.0, %v3298_v14  ;;  %vm3362_vm13 = vcmp.ge.f32.partialorder %v6131_v22, 0.0  ;;  %v2993_v41 = vadd.f32 1.4214138, %v2961_v12  ;;  %v2915_v17 = vadd.f32 -1.4531521, %v2883_v34  ;;  %v1956_v34 = vpop.f32.mrf.mxu1 }
 0x2ba   : > { %v3929_v45 = vpop.eup %3928  ;;  %3536 = vst.msk [vmem:[%s5588_s19 + $0xe0] sm:$0xff] %vm400_vm0, %v3504_v55  ;;  %v6317_v27 = vmul.f32 0.5, %v6177_v54  ;;  %3930 = vpow2.f32 %v3278_v37  ;;  %v3250_v42 = vmul.f32 1.442695, %v3203_v21  ;;  %v2340_v19 = vmul.f32 0.3275911, %v6310_v47 }
 0x2bb   : > { %v3394_v18 = vsub.f32 0.0, %v3330_v57  ;;  %v3025_v6 = vmul.f32 %v2993_v41, %v6284_v51  ;;  %v2947_v15 = vmul.f32 %v2915_v17, %v6300_v31  ;;  %v2839_v1 = vmul.f32 %v3929_v45, %v6288_v16 }
 0x2bc   : > { %v2847_v58 = vand.u32 2147483647, %v6288_v16  ;;  %v3186_v60 = vsub.f32 0.0, %v6270_v61  ;;  %v6325_v9 = vadd.f32 1.0, %v2340_v19  ;;  %v6327_v54 = vadd.f32 %v2194_v50, %v1989_v33  ;;  %v2161_v19 = vpop.f32.mrf.mxu2 }
 0x2bd   : > { %v3426_v38 = vsel %vm3362_vm13, %v3330_v57, %v3394_v18  ;;  %v3057_v29 = vadd.f32 -0.28449672, %v3025_v6  ;;  %v2979_v59 = vadd.f32 1.4214138, %v2947_v15  ;;  %v2840_v13 = vsub.f32 1.0, %v2839_v1 }
 0x2be   : > { %v3458_v46 = vadd.f32 1.0, %v3426_v38  ;;  %v2849_v44 = vand.u32 2147483648, %v6288_v16  ;;  %3932 = vrcp.f32 %v6325_v9  ;;  %v1954_v52 = vadd.f32 %v6262_v7, %v1953_v23 }
 0x2bf   : > { %v3089_v32 = vmul.f32 %v3057_v29, %v6284_v51  ;;  %v3011_v20 = vmul.f32 %v2979_v59, %v6300_v31  ;;  %v2841_v63 = vmul.f32 %v3929_v45, %v2840_v13  ;;  %vm2844_vm14 = vweird.f32 %v3929_v45 }
 0x2c0   : > { %v3931_v22 = vpop.eup %3930  ;;  %v3490_v30 = vmul.f32 %v3458_v46, %v2242_v40  ;;  %3934 = vpow2.f32 %v3250_v42  ;;  %v2159_v8 = vadd.f32 %v6238_v39, %v2158_v3  ;;  %v6338_v25 = vmul.f32 0.70710677, %v6327_v54 }
 0x2c1   : > { %v3121_v4 = vadd.f32 0.2548296, %v3089_v32  ;;  %v3043_v53 = vadd.f32 -0.28449672, %v3011_v20  ;;  %v2842_v48 = vadd.f32 %v3929_v45, %v2841_v63  ;;  %vm2843_vm15 = vweird.f32 %v6288_v16 }
 0x2c2   : > { %3522 = vst.msk [vmem:[%s5588_s19 + $0x70] sm:$0xff] %vm400_vm0, %v3490_v30  ;;  %vm2845_vm1 = vmor %vm2843_vm15, %vm2844_vm14  ;;  %v2850_v0 = vor.u32 1.1754944e-38, %v2849_v44  ;;  %v3218_v43 = vmul.f32 %v3186_v60, %v6270_v61  ;;  %v6345_v2 = vand.u32 2147483647, %v6338_v25  ;;  %v6347_v28 = vadd.f32 %v2159_v8, %v1954_v52 }
 0x2c3   : > { %v3153_v24 = vmul.f32 %v3121_v4, %v6284_v51  ;;  %v3075_v11 = vmul.f32 %v3043_v53, %v6300_v31  ;;  %v2846_v5 = vsel %vm2845_vm1, %v3929_v45, %v2842_v48  ;;  %vm2848_vm2 = vcmp.eq.f32.partialorder %v2847_v58, 8.507059e+37  ;;  %v1958_v48 = vpop.f32.mrf.mxu1 }
 0x2c4   : > { %v3933_v37 = vpop.eup %3932  ;;  %vm3377_vm3 = vcmp.ge.f32.partialorder %v6188_v35, 0.0  ;;  %v6353_v16 = vmul.f32 0.5, %v6181_v62  ;;  %v6355_v21 = vsel %vm2848_vm2, %v2850_v0, %v2846_v5  ;;  %v2355_v61 = vmul.f32 0.3275911, %v6345_v2 }
 0x2c5   : > { %v3313_v33 = vmul.f32 %v3931_v22, %v3153_v24  ;;  %v3107_v14 = vadd.f32 0.2548296, %v3075_v11  ;;  %v2898_v12 = vmul.f32 1.0614054, %v6355_v21  ;;  %v2629_v51 = vmul.f32 %v3933_v37, %v6325_v9 }
 0x2c6   : > { %v3935_v55 = vpop.eup %3934  ;;  %v3280_v40 = vmul.f32 1.442695, %v3218_v43  ;;  %v3172_v50 = vsub.f32 0.0, %v6310_v47  ;;  %v6361_v57 = vadd.f32 1.0, %v2355_v61  ;;  %v6364_v62 = vmul.f32 0.70710677, %v6347_v28 }
 0x2c7   : > { %v3345_v41 = vsub.f32 1.0, %v3313_v33  ;;  %v3139_v17 = vmul.f32 %v3107_v14, %v6300_v31  ;;  %v2930_v45 = vadd.f32 -1.4531521, %v2898_v12  ;;  %v2630_v42 = vsub.f32 1.0, %v2629_v51 }
 0x2c8   : > { %vm2634_vm4 = vweird.f32 %v3933_v37  ;;  %v2637_v18 = vand.u32 2147483647, %v6325_v9  ;;  %v2639_v6 = vand.u32 2147483648, %v6325_v9  ;;  %3936 = vrcp.f32 %v6361_v57 }
 0x2c9   : > { %v3409_v15 = vsub.f32 0.0, %v3345_v41  ;;  %v3299_v1 = vmul.f32 %v3935_v55, %v3139_v17  ;;  %v2962_v23 = vmul.f32 %v2930_v45, %v6355_v21  ;;  %v2631_v58 = vmul.f32 %v3933_v37, %v2630_v42 }
 0x2ca   : > { %vm3363_vm5 = vcmp.ge.f32.partialorder %v6191_v49, 0.0  ;;  %vm2633_vm6 = vweird.f32 %v6325_v9  ;;  %v3204_v31 = vmul.f32 %v3172_v50, %v6310_v47  ;;  %v6375_v60 = vand.u32 2147483647, %v6364_v62 }
 0x2cb   : > { %v3441_v38 = vsel %vm3377_vm3, %v3345_v41, %v3409_v15  ;;  %v3331_v29 = vsub.f32 1.0, %v3299_v1  ;;  %v2994_v59 = vadd.f32 1.4214138, %v2962_v23  ;;  %v2632_v13 = vadd.f32 %v3933_v37, %v2631_v58  ;;  %vm2635_vm7 = vmor %vm2633_vm6, %vm2634_vm4 }
 0x2cc   : > { %v3473_v3 = vadd.f32 1.0, %v3441_v38  ;;  %3938 = vpow2.f32 %v3280_v40  ;;  %v2640_v46 = vor.u32 1.1754944e-38, %v2639_v6  ;;  %v2341_v44 = vmul.f32 0.3275911, %v6375_v60 }
 0x2cd   : > { %v3395_v9 = vsub.f32 0.0, %v3331_v29  ;;  %v3026_v47 = vmul.f32 %v2994_v59, %v6355_v21  ;;  %v2636_v52 = vsel %vm2635_vm7, %v3933_v37, %v2632_v13  ;;  %vm2638_vm8 = vcmp.eq.f32.partialorder %v2637_v18, 8.507059e+37  ;;  %v2163_v37 = vpop.f32.mrf.mxu2 }
 0x2ce   : > { %v3937_v32 = vpop.eup %3936  ;;  %v3505_v35 = vmul.f32 %v3473_v3, %v6317_v27  ;;  %v6383_v20 = vsel %vm2638_vm8, %v2640_v46, %v2636_v52  ;;  %v3252_v63 = vmul.f32 1.442695, %v3204_v31  ;;  %v6385_v22 = vadd.f32 1.0, %v2341_v44  ;;  %v1961_v3 = vpop.f32.mrf.mxu1 }
 0x2cf   : > { %v3427_v30 = vsel %vm3363_vm5, %v3331_v29, %v3395_v9  ;;  %v3058_v8 = vadd.f32 -0.28449672, %v3026_v47  ;;  %v2884_v4 = vmul.f32 1.0614054, %v6383_v20  ;;  %v2854_v53 = vmul.f32 %v3937_v32, %v6361_v57 }
 0x2d0   : > { %3537 = vst.msk [vmem:[%s5588_s19 + $0xe8] sm:$0xff] %vm400_vm0, %v3505_v35  ;;  %v3459_v0 = vadd.f32 1.0, %v3427_v30  ;;  %v3187_v43 = vsub.f32 0.0, %v6345_v2  ;;  %3940 = vrcp.f32 %v6385_v22  ;;  %v2162_v27 = vadd.f32 %v6238_v39, %v2161_v19 }
 0x2d1   : > { %v3090_v24 = vmul.f32 %v3058_v8, %v6355_v21  ;;  %v2916_v49 = vadd.f32 -1.4531521, %v2884_v4  ;;  %v2855_v11 = vsub.f32 1.0, %v2854_v53  ;;  %v2862_v5 = vand.u32 2147483647, %v6361_v57 }
 0x2d2   : > { %v3939_v61 = vpop.eup %3938  ;;  %v3491_v33 = vmul.f32 %v3459_v0, %v6353_v16  ;;  %v6400_v14 = vmul.f32 0.5, %v6251_v36  ;;  %v2864_v12 = vand.u32 2147483648, %v6361_v57  ;;  %v1957_v51 = vadd.f32 %v6262_v7, %v1956_v34 }
 0x2d3   : > { %v3122_v55 = vadd.f32 0.2548296, %v3090_v24  ;;  %v2948_v40 = vmul.f32 %v2916_v49, %v6383_v20  ;;  %v2856_v50 = vmul.f32 %v3937_v32, %v2855_v11  ;;  %vm2859_vm9 = vweird.f32 %v3937_v32 }
 0x2d4   : > { %3523 = vst.msk [vmem:[%s5588_s19 + $0x78] sm:$0xff] %vm400_vm0, %v3491_v33  ;;  %vm3378_vm10 = vcmp.ge.f32.partialorder %v6257_v26, 0.0  ;;  %3942 = vpow2.f32 %v3252_v63  ;;  %vm2858_vm11 = vweird.f32 %v6361_v57  ;;  %v3219_v16 = vmul.f32 %v3187_v43, %v6345_v2 }
 0x2d5   : > { %v6410_v36 = vadd.f32 %v2162_v27, %v1957_v51  ;;  %v3154_v41 = vmul.f32 %v3122_v55, %v6355_v21  ;;  %v2980_v17 = vadd.f32 1.4214138, %v2948_v40  ;;  %v2857_v34 = vadd.f32 %v3937_v32, %v2856_v50  ;;  %vm2860_vm13 = vmor %vm2858_vm11, %vm2859_vm9  ;;  %v2166_v30 = vpop.f32.mrf.mxu2 }
 0x2d6   : > { %vm2863_vm12 = vcmp.eq.f32.partialorder %v2862_v5, 8.507059e+37  ;;  %v3941_v45 = vpop.eup %3940  ;;  %v2865_v42 = vor.u32 1.1754944e-38, %v2864_v12  ;;  %v3173_v19 = vsub.f32 0.0, %v6375_v60  ;;  %v1959_v6 = vadd.f32 %v6262_v7, %v1958_v48 }
 0x2d7   : > { %v6415_v18 = vmul.f32 0.70710677, %v6410_v36  ;;  %v3314_v57 = vmul.f32 %v3939_v61, %v3154_v41  ;;  %v3012_v2 = vmul.f32 %v2980_v17, %v6383_v20  ;;  %v2861_v15 = vsel %vm2860_vm13, %v3937_v32, %v2857_v34 }
 0x2d8   : > { %v2644_v1 = vmul.f32 %v3941_v45, %v6385_v22  ;;  %v6420_v21 = vsel %vm2863_vm12, %v2865_v42, %v2861_v15  ;;  %v2652_v23 = vand.u32 2147483647, %v6385_v22  ;;  %v2164_v31 = vadd.f32 %v6238_v39, %v2163_v37 }
 0x2d9   : > { %v2310_v58 = vand.u32 2147483647, %v6415_v18  ;;  %v3346_v38 = vsub.f32 1.0, %v3314_v57  ;;  %v3044_v29 = vadd.f32 -0.28449672, %v3012_v2  ;;  %vm2649_vm14 = vweird.f32 %v3941_v45 }
 0x2da   : > { %v2899_v59 = vmul.f32 1.0614054, %v6420_v21  ;;  %v2645_v13 = vsub.f32 1.0, %v2644_v1  ;;  %v3943_v46 = vpop.eup %3942  ;;  %v2654_v44 = vand.u32 2147483648, %v6385_v22  ;;  %v6427_v47 = vadd.f32 %v2164_v31, %v1959_v6 }
 0x2db   : > { %v2342_v9 = vmul.f32 0.3275911, %v2310_v58  ;;  %v3410_v52 = vsub.f32 0.0, %v3346_v38  ;;  %v3076_v32 = vmul.f32 %v3044_v29, %v6383_v20  ;;  %vm2648_vm15 = vweird.f32 %v6385_v22 }
 0x2dc   : > { %v2931_v35 = vadd.f32 -1.4531521, %v2899_v59  ;;  %v2646_v63 = vmul.f32 %v3941_v45, %v2645_v13  ;;  %v2167_v4 = vadd.f32 %v6238_v39, %v2166_v30  ;;  %v1962_v53 = vadd.f32 %v6262_v7, %v1961_v3  ;;  %vm2650_vm1 = vmor %vm2648_vm15, %vm2649_vm14  ;;  %v1963_v13 = vpop.f32.mrf.mxu1 }
 0x2dd   : > { %v6431_v8 = vadd.f32 1.0, %v2342_v9  ;;  %v3442_v48 = vsel %vm3378_vm10, %v3346_v38, %v3410_v52  ;;  %v3108_v0 = vadd.f32 0.2548296, %v3076_v32  ;;  %v2655_v49 = vor.u32 1.1754944e-38, %v2654_v44  ;;  %v2168_v52 = vpop.f32.mrf.mxu2 }
 0x2de   : > { %v2963_v43 = vmul.f32 %v2931_v35, %v6420_v21  ;;  %v2647_v27 = vadd.f32 %v3941_v45, %v2646_v63  ;;  %v3474_v24 = vadd.f32 1.0, %v3442_v48  ;;  %v6441_v22 = vmul.f32 0.70710677, %v6427_v47 }
 0x2df   : > { %3944 = vrcp.f32 %v6431_v8  ;;  %v3140_v11 = vmul.f32 %v3108_v0, %v6383_v20  ;;  %vm2653_vm2 = vcmp.eq.f32.partialorder %v2652_v23, 8.507059e+37  ;;  %v3282_v61 = vmul.f32 1.442695, %v3219_v16 }
 0x2e0   : > { %v2995_v5 = vadd.f32 1.4214138, %v2963_v43  ;;  %v2651_v37 = vsel %vm2650_vm1, %v3941_v45, %v2647_v27  ;;  %v3506_v26 = vmul.f32 %v3474_v24, %v6400_v14  ;;  %v6447_v12 = vadd.f32 %v2167_v4, %v1962_v53 }
 0x2e1   : > { %v6445_v33 = vsel %vm2653_vm2, %v2655_v49, %v2651_v37  ;;  %v3300_v51 = vmul.f32 %v3943_v46, %v3140_v11  ;;  %v2244_v50 = vmul.f32 0.5, %v6279_v10  ;;  %v3205_v20 = vmul.f32 %v3173_v19, %v6375_v60 }
 0x2e2   : > { %v3027_v55 = vmul.f32 %v2995_v5, %v6420_v21  ;;  %v2885_v40 = vmul.f32 1.0614054, %v6445_v33  ;;  %3538 = vst.msk [vmem:[%s5588_s19 + $0xf0] sm:$0xff] %vm400_vm0, %v3506_v26  ;;  %v3174_v41 = vsub.f32 0.0, %v2310_v58  ;;  %v6456_v17 = vand.u32 2147483647, %v6441_v22 }
 0x2e3   : > { %v3332_v14 = vsub.f32 1.0, %v3300_v51  ;;  %vm3364_vm3 = vcmp.ge.f32.partialorder %v6294_v56, 0.0  ;;  %v6460_v42 = vmul.f32 0.5, %v6327_v54  ;;  %3946 = vpow2.f32 %v3282_v61 }
 0x2e4   : > { %v3059_v16 = vadd.f32 -0.28449672, %v3027_v55  ;;  %v2917_v34 = vadd.f32 -1.4531521, %v2885_v40  ;;  %v2343_v6 = vmul.f32 0.3275911, %v6456_v17  ;;  %v3206_v1 = vmul.f32 %v3174_v41, %v2310_v58 }
 0x2e5   : > { %v3945_v45 = vpop.eup %3944  ;;  %v6464_v10 = vmul.f32 0.70710677, %v6447_v12  ;;  %v3396_v60 = vsub.f32 0.0, %v3332_v14  ;;  %v3254_v15 = vmul.f32 1.442695, %v3205_v20  ;;  %vm3379_vm4 = vcmp.ge.f32.partialorder %v6338_v25, 0.0  ;;  %v2171_v25 = vpop.f32.mrf.mxu2 }
 0x2e6   : > { %v3091_v19 = vmul.f32 %v3059_v16, %v6420_v21  ;;  %v2949_v57 = vmul.f32 %v2917_v34, %v6445_v33  ;;  %v2659_v2 = vmul.f32 %v3945_v45, %v6431_v8  ;;  %v6469_v23 = vadd.f32 1.0, %v2343_v6 }
 0x2e7   : > { %v6472_v54 = vand.u32 2147483647, %v6464_v10  ;;  %v3428_v31 = vsel %vm3364_vm3, %v3332_v14, %v3396_v60  ;;  %v2667_v46 = vand.u32 2147483647, %v6431_v8  ;;  %v2669_v44 = vand.u32 2147483648, %v6431_v8 }
 0x2e8   : > { %v3123_v38 = vadd.f32 0.2548296, %v3091_v19  ;;  %v2981_v29 = vadd.f32 1.4214138, %v2949_v57  ;;  %v2660_v59 = vsub.f32 1.0, %v2659_v2  ;;  %v3460_v3 = vadd.f32 1.0, %v3428_v31 }
 0x2e9   : > { %3948 = vrcp.f32 %v6469_v23  ;;  %vm2664_vm5 = vweird.f32 %v3945_v45  ;;  %v3947_v32 = vpop.eup %3946  ;;  %v2344_v63 = vmul.f32 0.3275911, %v6472_v54  ;;  %v1964_v30 = vadd.f32 %v6262_v7, %v1963_v13 }
 0x2ea   : > { %v3155_v58 = vmul.f32 %v3123_v38, %v6420_v21  ;;  %v3013_v9 = vmul.f32 %v2981_v29, %v6445_v33  ;;  %v2661_v56 = vmul.f32 %v3945_v45, %v2660_v59  ;;  %v3492_v35 = vmul.f32 %v3460_v3, %v2244_v50 }
 0x2eb   : > { %3950 = vpow2.f32 %v3254_v15  ;;  %vm2663_vm6 = vweird.f32 %v6431_v8  ;;  %v2670_v21 = vor.u32 1.1754944e-38, %v2669_v44  ;;  %v3256_v0 = vmul.f32 1.442695, %v3206_v1 }
 0x2ec   : > { %v3315_v4 = vmul.f32 %v3947_v32, %v3155_v58  ;;  %v3045_v53 = vadd.f32 -0.28449672, %v3013_v9  ;;  %v2662_v48 = vadd.f32 %v3945_v45, %v2661_v56  ;;  %3524 = vst.msk [vmem:[%s5588_s19 + $0x80] sm:$0xff] %vm400_vm0, %v3492_v35  ;;  %vm2665_vm7 = vmor %vm2663_vm6, %vm2664_vm5  ;;  %v6487_v43 = vadd.f32 1.0, %v2344_v63 }
 0x2ed   : > { %v2169_v27 = vadd.f32 %v6238_v39, %v2168_v52  ;;  %vm2668_vm8 = vcmp.eq.f32.partialorder %v2667_v46, 8.507059e+37  ;;  %v6492_v37 = vmul.f32 0.5, %v6347_v28  ;;  %vm3365_vm9 = vcmp.ge.f32.partialorder %v6364_v62, 0.0 }
 0x2ee   : > { %v3347_v24 = vsub.f32 1.0, %v3315_v4  ;;  %v3077_v49 = vmul.f32 %v3045_v53, %v6445_v33  ;;  %v2666_v11 = vsel %vm2665_vm7, %v3945_v45, %v2662_v48  ;;  %3952 = vrcp.f32 %v6487_v43  ;;  %v1966_v45 = vpop.f32.mrf.mxu1 }
 0x2ef   : > { %v3949_v5 = vpop.eup %3948  ;;  %v6494_v26 = vsel %vm2668_vm8, %v2670_v21, %v2666_v11  ;;  %v6497_v8 = vadd.f32 %v2169_v27, %v1964_v30  ;;  %3954 = vpow2.f32 %v3256_v0  ;;  %v2682_v20 = vand.u32 2147483647, %v6469_v23 }
 0x2f0   : > { %v3411_v61 = vsub.f32 0.0, %v3347_v24  ;;  %v3109_v51 = vadd.f32 0.2548296, %v3077_v49  ;;  %v2886_v55 = vmul.f32 1.0614054, %v6494_v26  ;;  %v2674_v40 = vmul.f32 %v3949_v5, %v6469_v23 }
 0x2f1   : > { %v3951_v50 = vpop.eup %3950  ;;  %v3175_v28 = vsub.f32 0.0, %v6456_v17  ;;  %vm2678_vm10 = vweird.f32 %v6469_v23  ;;  %vm2679_vm11 = vweird.f32 %v3949_v5  ;;  %v2684_v60 = vand.u32 2147483648, %v6469_v23 }
 0x2f2   : > { %v3443_v41 = vsel %vm3379_vm4, %v3347_v24, %v3411_v61  ;;  %v3141_v14 = vmul.f32 %v3109_v51, %v6445_v33  ;;  %v2918_v16 = vadd.f32 -1.4531521, %v2886_v55  ;;  %v2675_v34 = vsub.f32 1.0, %v2674_v40  ;;  %vm2680_vm13 = vmor %vm2678_vm10, %vm2679_vm11 }
 0x2f3   : > { %v3475_v6 = vadd.f32 1.0, %v3443_v41  ;;  %v6511_v15 = vmul.f32 0.70710677, %v6497_v8  ;;  %vm6514_vm12 = vcmp.eq.f32.partialorder %v2682_v20, 8.507059e+37  ;;  %v2172_v38 = vadd.f32 %v6238_v39, %v2171_v25 }
 0x2f4   : > { %v3301_v19 = vmul.f32 %v3951_v50, %v3141_v14  ;;  %v2950_v57 = vmul.f32 %v2918_v16, %v6494_v26  ;;  %v2676_v2 = vmul.f32 %v3949_v5, %v2675_v34  ;;  %v3953_v1 = vpop.eup %3952  ;;  %v1967_v29 = vadd.f32 %v6262_v7, %v1966_v45 }
 0x2f5   : > { %v3507_v33 = vmul.f32 %v3475_v6, %v6460_v42  ;;  %v2689_v46 = vmul.f32 %v3953_v1, %v6487_v43  ;;  %v3955_v44 = vpop.eup %3954  ;;  %v2685_v42 = vor.u32 1.1754944e-38, %v2684_v60  ;;  %v2697_v58 = vand.u32 2147483647, %v6487_v43 }
 0x2f6   : > { %v3333_v59 = vsub.f32 1.0, %v3301_v19  ;;  %v2982_v13 = vadd.f32 1.4214138, %v2950_v57  ;;  %v2677_v3 = vadd.f32 %v3949_v5, %v2676_v2  ;;  %v6528_v9 = vand.u32 2147483647, %v6511_v15  ;;  %v1968_v34 = vpop.f32.mrf.mxu1  ;;  %v2173_v2 = vpop.f32.mrf.mxu2 }
 0x2f7   : > { %3539 = vst.msk [vmem:[%s5588_s19 + $0xf8] sm:$0xff] %vm400_vm0, %v3507_v33  ;;  %v6530_v56 = vadd.f32 %v2172_v38, %v1967_v29  ;;  %v2690_v63 = vsub.f32 1.0, %v2689_v46  ;;  %vm2694_vm14 = vweird.f32 %v3953_v1  ;;  %v2699_v23 = vand.u32 2147483648, %v6487_v43 }
 0x2f8   : > { %v3397_v52 = vsub.f32 0.0, %v3333_v59  ;;  %v3014_v32 = vmul.f32 %v2982_v13, %v6494_v26  ;;  %v2681_v35 = vsel %vm2680_vm13, %v3949_v5, %v2677_v3  ;;  %v2345_v4 = vmul.f32 0.3275911, %v6528_v9 }
 0x2f9   : > { %v6535_v30 = vsel %vm6514_vm12, %v2685_v42, %v2681_v35  ;;  %v2691_v0 = vmul.f32 %v3953_v1, %v2690_v63  ;;  %v3207_v24 = vmul.f32 %v3175_v28, %v6456_v17  ;;  %v6546_v11 = vmul.f32 0.70710677, %v6530_v56 }
 0x2fa   : > { %v3429_v53 = vsel %vm3365_vm9, %v3333_v59, %v3397_v52  ;;  %v3046_v48 = vadd.f32 -0.28449672, %v3014_v32  ;;  %v2887_v21 = vmul.f32 1.0614054, %v6535_v30  ;;  %v6543_v49 = vadd.f32 1.0, %v2345_v4 }
 0x2fb   : > { %v3461_v27 = vadd.f32 1.0, %v3429_v53  ;;  %v2692_v51 = vadd.f32 %v3953_v1, %v2691_v0  ;;  %vm2693_vm15 = vweird.f32 %v6487_v43  ;;  %v2700_v55 = vor.u32 1.1754944e-38, %v2699_v23 }
 0x2fc   : > { %v3078_v5 = vmul.f32 %v3046_v48, %v6494_v26  ;;  %v2919_v61 = vadd.f32 -1.4531521, %v2887_v21  ;;  %vm2695_vm1 = vmor %vm2693_vm15, %vm2694_vm14  ;;  %v3176_v40 = vsub.f32 0.0, %v6472_v54  ;;  %3956 = vrcp.f32 %v6543_v49 }
 0x2fd   : > { %v3493_v62 = vmul.f32 %v3461_v27, %v6492_v37  ;;  %v2696_v20 = vsel %vm2695_vm1, %v3953_v1, %v2692_v51  ;;  %vm2698_vm2 = vcmp.eq.f32.partialorder %v2697_v58, 8.507059e+37  ;;  %v3258_v28 = vmul.f32 1.442695, %v3207_v24 }
 0x2fe   : > { %v3110_v17 = vadd.f32 0.2548296, %v3078_v5  ;;  %v2951_v50 = vmul.f32 %v2919_v61, %v6535_v30  ;;  %v6557_v41 = vsel %vm2698_vm2, %v2700_v55, %v2696_v20  ;;  %v6560_v43 = vand.u32 2147483647, %v6546_v11 }
 0x2ff   : > { %3525 = vst.msk [vmem:[%s5588_s19 + $0x88] sm:$0xff] %vm400_vm0, %v3493_v62  ;;  %v2888_v16 = vmul.f32 1.0614054, %v6557_v41  ;;  %v3208_v45 = vmul.f32 %v3176_v40, %v6472_v54  ;;  %3958 = vpow2.f32 %v3258_v28  ;;  %v1969_v33 = vadd.f32 %v6262_v7, %v1968_v34 }
 0x300   : > { %v3142_v37 = vmul.f32 %v3110_v17, %v6494_v26  ;;  %v2983_v14 = vadd.f32 1.4214138, %v2951_v50  ;;  %v2346_v6 = vmul.f32 0.3275911, %v6560_v43  ;;  %vm3366_vm3 = vcmp.ge.f32.partialorder %v6415_v18, 0.0 }
 0x301   : > { %v2920_v57 = vadd.f32 -1.4531521, %v2888_v16  ;;  %v3260_v54 = vmul.f32 1.442695, %v3208_v45  ;;  %v2174_v59 = vadd.f32 %v6238_v39, %v2173_v2  ;;  %v2712_v7 = vand.u32 2147483647, %v6543_v49 }
 0x302   : > { %v3302_v60 = vmul.f32 %v3955_v44, %v3142_v37  ;;  %v3015_v19 = vmul.f32 %v2983_v14, %v6535_v30  ;;  %v3957_v25 = vpop.eup %3956  ;;  %v6567_v1 = vadd.f32 1.0, %v2346_v6  ;;  %v2714_v42 = vand.u32 2147483648, %v6543_v49 }
 0x303   : > { %v2952_v38 = vmul.f32 %v2920_v57, %v6557_v41  ;;  %v2704_v29 = vmul.f32 %v3957_v25, %v6543_v49  ;;  %vm2709_vm4 = vweird.f32 %v3957_v25  ;;  %v6578_v58 = vadd.f32 %v2174_v59, %v1969_v33 }
 0x304   : > { %v3334_v26 = vsub.f32 1.0, %v3302_v60  ;;  %v3047_v31 = vadd.f32 -0.28449672, %v3015_v19  ;;  %3960 = vrcp.f32 %v6567_v1  ;;  %v2246_v39 = vmul.f32 0.5, %v6410_v36 }
 0x305   : > { %v2984_v46 = vadd.f32 1.4214138, %v2952_v38  ;;  %v2705_v44 = vsub.f32 1.0, %v2704_v29  ;;  %v3959_v63 = vpop.eup %3958  ;;  %vm2708_vm5 = vweird.f32 %v6543_v49  ;;  %v6585_v21 = vmul.f32 0.70710677, %v6578_v58 }
 0x306   : > { %v3398_v13 = vsub.f32 0.0, %v3334_v26  ;;  %v3079_v3 = vmul.f32 %v3047_v31, %v6535_v30  ;;  %3962 = vpow2.f32 %v3260_v54  ;;  %vm2710_vm6 = vmor %vm2708_vm5, %vm2709_vm4  ;;  %vm2713_vm7 = vcmp.eq.f32.partialorder %v2712_v7, 8.507059e+37 }
 0x307   : > { %v3016_v18 = vmul.f32 %v2984_v46, %v6557_v41  ;;  %v2706_v35 = vmul.f32 %v3957_v25, %v2705_v44  ;;  %v2715_v24 = vor.u32 1.1754944e-38, %v2714_v42  ;;  %v3177_v51 = vsub.f32 0.0, %v6528_v9 }
 0x308   : > { %v3430_v52 = vsel %vm3366_vm3, %v3334_v26, %v3398_v13  ;;  %v3111_v32 = vadd.f32 0.2548296, %v3079_v3  ;;  %v6594_v62 = vand.u32 2147483647, %v6585_v21  ;;  %v2727_v20 = vand.u32 2147483647, %v6567_v1 }
 0x309   : > { %v3462_v23 = vadd.f32 1.0, %v3430_v52  ;;  %v3048_v53 = vadd.f32 -0.28449672, %v3016_v18  ;;  %v2707_v48 = vadd.f32 %v3957_v25, %v2706_v35  ;;  %v2729_v28 = vand.u32 2147483648, %v6567_v1 }
 0x30a   : > { %v3143_v4 = vmul.f32 %v3111_v32, %v6535_v30  ;;  %v3961_v0 = vpop.eup %3960  ;;  %v2347_v37 = vmul.f32 0.3275911, %v6594_v62  ;;  %vm3367_vm9 = vcmp.ge.f32.partialorder %v6441_v22, 0.0  ;;  %v3209_v60 = vmul.f32 %v3177_v51, %v6528_v9 }
 0x30b   : > { %v3494_v27 = vmul.f32 %v3462_v23, %v2246_v39  ;;  %v3080_v36 = vmul.f32 %v3048_v53, %v6557_v41  ;;  %v2711_v61 = vsel %vm2710_vm6, %v3957_v25, %v2707_v48  ;;  %v2719_v49 = vmul.f32 %v3961_v0, %v6567_v1 }
 0x30c   : > { %v3303_v5 = vmul.f32 %v3959_v63, %v3143_v4  ;;  %v2716_v30 = vsel %vm2713_vm7, %v2715_v24, %v2711_v61  ;;  %vm2724_vm8 = vweird.f32 %v3961_v0  ;;  %v3963_v6 = vpop.eup %3962  ;;  %vm2723_vm10 = vweird.f32 %v6567_v1 }
 0x30d   : > { %3526 = vst.msk [vmem:[%s5588_s19 + $0x90] sm:$0xff] %vm400_vm0, %v3494_v27  ;;  %v3112_v40 = vadd.f32 0.2548296, %v3080_v36  ;;  %v2889_v17 = vmul.f32 1.0614054, %v2716_v30  ;;  %v2720_v50 = vsub.f32 1.0, %v2719_v49  ;;  %vm2725_vm11 = vmor %vm2723_vm10, %vm2724_vm8 }
 0x30e   : > { %v3335_v55 = vsub.f32 1.0, %v3303_v5  ;;  %v2379_v19 = vadd.f32 1.0, %v2347_v37  ;;  %v2247_v26 = vmul.f32 0.5, %v6427_v47  ;;  %vm2728_vm12 = vcmp.eq.f32.partialorder %v2727_v20, 8.507059e+37 }
 0x30f   : > { %v3144_v16 = vmul.f32 %v3112_v40, %v6557_v41  ;;  %v2921_v34 = vadd.f32 -1.4531521, %v2889_v17  ;;  %v2721_v45 = vmul.f32 %v3961_v0, %v2720_v50  ;;  %v2730_v41 = vor.u32 1.1754944e-38, %v2729_v28 }
 0x310   : > { %v3399_v14 = vsub.f32 0.0, %v3335_v55  ;;  %3964 = vrcp.f32 %v2379_v19  ;;  %v3262_v54 = vmul.f32 1.442695, %v3209_v60  ;;  %v3178_v59 = vsub.f32 0.0, %v6560_v43 }
 0x311   : > { %v3304_v2 = vmul.f32 %v3963_v6, %v3144_v16  ;;  %v2953_v25 = vmul.f32 %v2921_v34, %v2716_v30  ;;  %v2722_v33 = vadd.f32 %v3961_v0, %v2721_v45  ;;  %vm3368_vm13 = vcmp.ge.f32.partialorder %v6464_v10, 0.0 }
 0x312   : > { %v3431_v57 = vsel %vm3367_vm9, %v3335_v55, %v3399_v14  ;;  %v2248_v52 = vmul.f32 0.5, %v6447_v12  ;;  %3966 = vpow2.f32 %v3262_v54  ;;  %v3210_v18 = vmul.f32 %v3178_v59, %v6560_v43 }
 0x313   : > { %v3463_v31 = vadd.f32 1.0, %v3431_v57  ;;  %v3336_v38 = vsub.f32 1.0, %v3304_v2  ;;  %v2985_v29 = vadd.f32 1.4214138, %v2953_v25  ;;  %v2726_v22 = vsel %vm2725_vm11, %v3961_v0, %v2722_v33 }
 0x314   : > { %v2731_v1 = vsel %vm2728_vm12, %v2730_v41, %v2726_v22  ;;  %v3264_v10 = vmul.f32 1.442695, %v3210_v18  ;;  %v2742_v0 = vand.u32 2147483647, %v2379_v19  ;;  %v2744_v27 = vand.u32 2147483648, %v2379_v19 }
 0x315   : > { %v3495_v9 = vmul.f32 %v3463_v31, %v2247_v26  ;;  %v3400_v13 = vsub.f32 0.0, %v3336_v38  ;;  %v3017_v3 = vmul.f32 %v2985_v29, %v2716_v30  ;;  %v2890_v46 = vmul.f32 1.0614054, %v2731_v1 }
 0x316   : > { %v3965_v42 = vpop.eup %3964  ;;  %vm2738_vm15 = vweird.f32 %v2379_v19  ;;  %3968 = vpow2.f32 %v3264_v10  ;;  %v2745_v51 = vor.u32 1.1754944e-38, %v2744_v27  ;;  %vm2743_vm2 = vcmp.eq.f32.partialorder %v2742_v0, 8.507059e+37 }
 0x317   : > { %3527 = vst.msk [vmem:[%s5588_s19 + $0x98] sm:$0xff] %vm400_vm0, %v3495_v9  ;;  %v3432_v47 = vsel %vm3368_vm13, %v3336_v38, %v3400_v13  ;;  %v3049_v44 = vadd.f32 -0.28449672, %v3017_v3  ;;  %v2922_v7 = vadd.f32 -1.4531521, %v2890_v46  ;;  %v2734_v39 = vmul.f32 %v3965_v42, %v2379_v19 }
 0x318   : > { %v3464_v32 = vadd.f32 1.0, %v3432_v47  ;;  %vm2739_vm14 = vweird.f32 %v3965_v42  ;;  %v3967_v12 = vpop.eup %3966  ;;  %v3179_v20 = vsub.f32 0.0, %v6594_v62  ;;  %vm3369_vm3 = vcmp.ge.f32.partialorder %v6511_v15, 0.0 }
 0x319   : > { %v3081_v35 = vmul.f32 %v3049_v44, %v2716_v30  ;;  %v2954_v63 = vmul.f32 %v2922_v7, %v2731_v1  ;;  %v2735_v48 = vsub.f32 1.0, %v2734_v39  ;;  %vm2740_vm1 = vmor %vm2738_vm15, %vm2739_vm14  ;;  %v2249_v6 = vmul.f32 0.5, %v6497_v8 }
 0x31a   : > { %v3496_v23 = vmul.f32 %v3464_v32, %v2248_v52  ;;  %v3211_v19 = vmul.f32 %v3179_v20, %v6594_v62  ;;  %vm3370_vm4 = vcmp.ge.f32.partialorder %v6546_v11, 0.0  ;;  %v2250_v8 = vmul.f32 0.5, %v6530_v56 }
 0x31b   : > { %v3113_v4 = vadd.f32 0.2548296, %v3081_v35  ;;  %v2986_v53 = vadd.f32 1.4214138, %v2954_v63  ;;  %v2736_v36 = vmul.f32 %v3965_v42, %v2735_v48  ;;  %vm3371_vm5 = vcmp.ge.f32.partialorder %v6585_v21, 0.0 }
 0x31c   : > { %3528 = vst.msk [vmem:[%s5588_s19 + $0xa0] sm:$0xff] %vm400_vm0, %v3496_v23  ;;  %v3969_v45 = vpop.eup %3968  ;;  %v3266_v31 = vmul.f32 1.442695, %v3211_v19  ;;  %v2251_v47 = vmul.f32 0.5, %v6578_v58 }
 0x31d   : > { %v3145_v24 = vmul.f32 %v3113_v4, %v2716_v30  ;;  %v3018_v5 = vmul.f32 %v2986_v53, %v2731_v1  ;;  %v2737_v43 = vadd.f32 %v3965_v42, %v2736_v36 }
 0x31e   : > { %3970 = vpow2.f32 %v3266_v31 }
 0x31f   : > { %v3305_v61 = vmul.f32 %v3967_v12, %v3145_v24  ;;  %v3050_v49 = vadd.f32 -0.28449672, %v3018_v5  ;;  %v2741_v17 = vsel %vm2740_vm1, %v3965_v42, %v2737_v43 }
 0x320   : > { %v2746_v50 = vsel %vm2743_vm2, %v2745_v51, %v2741_v17 }
 0x321   : > { %v3337_v55 = vsub.f32 1.0, %v3305_v61  ;;  %v3082_v40 = vmul.f32 %v3050_v49, %v2731_v1  ;;  %v2891_v37 = vmul.f32 1.0614054, %v2746_v50 }
 0x323   : > { %v3401_v28 = vsub.f32 0.0, %v3337_v55  ;;  %v3114_v30 = vadd.f32 0.2548296, %v3082_v40  ;;  %v2923_v34 = vadd.f32 -1.4531521, %v2891_v37 }
 0x324   : > { %v3971_v59 = vpop.eup %3970 }
 0x325   : > { %v3433_v14 = vsel %vm3369_vm3, %v3337_v55, %v3401_v28  ;;  %v3146_v16 = vmul.f32 %v3114_v30, %v2731_v1  ;;  %v2955_v2 = vmul.f32 %v2923_v34, %v2746_v50 }
 0x326   : > { %v3465_v60 = vadd.f32 1.0, %v3433_v14 }
 0x327   : > { %v3306_v57 = vmul.f32 %v3969_v45, %v3146_v16  ;;  %v2987_v26 = vadd.f32 1.4214138, %v2955_v2 }
 0x328   : > { %v3497_v25 = vmul.f32 %v3465_v60, %v2249_v6 }
 0x329   : > { %v3338_v33 = vsub.f32 1.0, %v3306_v57  ;;  %v3019_v15 = vmul.f32 %v2987_v26, %v2746_v50 }
 0x32a   : > { %3529 = vst.msk [vmem:[%s5588_s19 + $0xa8] sm:$0xff] %vm400_vm0, %v3497_v25 }
 0x32b   : > { %v3402_v41 = vsub.f32 0.0, %v3338_v33  ;;  %v3051_v29 = vadd.f32 -0.28449672, %v3019_v15 }
 0x32d   : > { %v3434_v38 = vsel %vm3370_vm4, %v3338_v33, %v3402_v41  ;;  %v3083_v62 = vmul.f32 %v3051_v29, %v2746_v50 }
 0x32e   : > { %v3466_v22 = vadd.f32 1.0, %v3434_v38 }
 0x32f   : > { %v3115_v54 = vadd.f32 0.2548296, %v3083_v62 }
 0x330   : > { %v3498_v9 = vmul.f32 %v3466_v22, %v2250_v8 }
 0x331   : > { %v3147_v1 = vmul.f32 %v3115_v54, %v2746_v50 }
 0x332   : > { %3530 = vst.msk [vmem:[%s5588_s19 + $0xb0] sm:$0xff] %vm400_vm0, %v3498_v9 }
 0x333   : > { %v3307_v13 = vmul.f32 %v3971_v59, %v3147_v1 }
 0x335   : > { %v3339_v3 = vsub.f32 1.0, %v3307_v13 }
 0x337   : > { %v3403_v46 = vsub.f32 0.0, %v3339_v3 }
 0x339   : > { %v3435_v11 = vsel %vm3371_vm5, %v3339_v3, %v3403_v46 }
 0x33a   : > { %v3467_v44 = vadd.f32 1.0, %v3435_v11 }
 0x33c   : > { %v3499_v56 = vmul.f32 %v3467_v44, %v2251_v47 }
 0x33e   : > { %3531 = vst.msk [vmem:[%s5588_s19 + $0xb8] sm:$0xff] %vm400_vm0, %v3499_v56 }
 0x33f PF: > { %s18_s27 = sadd.s32 1, %s3984_s27  }
 0x340   : > { %p15_p4 = scmp.ge.s32.totalorder %s18_s27, 7  }
 0x342   :  { %17 = sbr.rel (!%p15_p4) target bundleno = 1 (0x1), region = 85 }

// kernel: _lambda_.18
= control target key start
LH: loop header
LB: loop body
LE: loop exit
PB: predicated region body
PF: predicated region fallthrough
CT: control target
= control target key end

     0   :  { %s2619_s27 = smov 0   ;;  %s4179_s0 = inlined_call_operand.vmem [shape: f32[1280,32], index: 0, kind: input, shape index: {}]   ;;  %s4180_s1 = inlined_call_operand.vmem [shape: f32[1280,32], index: 1, kind: input, shape index: {}]   ;;  %s4181_s2 = inlined_call_operand.vmem [shape: bf16[32,32], index: 2, kind: input, shape index: {}]   ;;  %s4182_s3 = inlined_call_operand.vmem [shape: f32[1,32], index: 3, kind: input, shape index: {}]   ;;  %s4183_s4 = inlined_call_operand.vmem [shape: bf16[32,32], index: 4, kind: input, shape index: {}]   ;;  %s4184_s5 = inlined_call_operand.vmem [shape: f32[1,32], index: 5, kind: input, shape index: {}]   ;;  %s4185_s6 = inlined_call_operand.vmem [shape: bf16[32,32], index: 6, kind: input, shape index: {}]   ;;  %s4186_s7 = inlined_call_operand.vmem [shape: f32[1,32], index: 7, kind: input, shape index: {}]   ;;  %s4187_s8 = inlined_call_operand.vmem [shape: f32[1280,32], index: 8, kind: output, shape index: {}]  }
   0x1 LB: > { %s2328_s28 = sadd.s32 4294967295, %s2572_s27   ;;  %p2332_p0 = scmp.ge.s32.totalorder %s2572_s27, 1  ;;  %s2572_s27 = sphi %s2619_s27, %s18_s27  }
   0x2   : > { %p274_p1 = scmp.lt.s32.totalorder %s2572_s27, 6 }
   0x4   : > { %p275_p2 = pnand %p2332_p0, %p274_p1 }
   0x5   : > { %s2333_s9 = sshll.u32 (!%p275_p2), %s2328_s28, 5 }
   0x6   : > { %278 = sbr.rel (%p275_p2) target bundleno = 644 (0x284), region = 52  ;;  %p314_p3 = scmp.lt.s32.totalorder (!%p275_p2), %s2333_s9, 159 }
   0xb   : > { %v2414_v0 = vld [vmem:[%s4181_s2 + $0x8] sm:$0xff]  ;;  %v2413_v1 = vld [vmem:[%s4181_s2] sm:$0xff]  ;;  %s4213_s9 = smov (!%p314_p3, %s2333_s9), 159  ;;  %vm400_vm0 = vcmask 261120  }
   0xc   : > { %455 = vmatpush.bf16.msra.mxu0 %v2414_v0  ;;  %2419 = vmatpush.bf16.msra.mxu3 %v2414_v0  ;;  %s2633_s12 = sshll.u32 %s4213_s9, 3  ;;  %v2682_v40 = vld [vmem:[%s4182_s3] ss:$0 sm:$0xff] }
   0xd   : > { %s2639_s15 = scalar_lea.vmem %s4179_s0, %s2633_s12  ;;  %s3073_s26 = scalar_lea.vmem %s4180_s1, %s2633_s12 }
   0xe   : > { %v332_v2 = vld [vmem:[%s2639_s15] sm:$0xff]  ;;  %v333_v3 = vld [vmem:[%s2639_s15 + $0x8] sm:$0xff]  ;;  %v334_v8 = vld [vmem:[%s2639_s15 + $0x10] sm:$0xff]  ;;  %s3962_s19 = scalar_lea.vmem %s4187_s8, %s2633_s12 }
   0xf   : > { %v356_v4 = vld [vmem:[%s2639_s15 + $0xc0] sm:$0xff]  ;;  %v364_v5 = vpack.c.bf16 %v333_v3, %v332_v2  ;;  %v357_v6 = vld [vmem:[%s2639_s15 + $0xc8] sm:$0xff]  ;;  %v335_v9 = vld [vmem:[%s2639_s15 + $0x18] sm:$0xff] }
  0x10   : > { %456 = vmatpush.bf16.msra.mxu0 %v2413_v1  ;;  %2420 = vmatpush.bf16.msra.mxu3 %v2413_v1  ;;  %v376_v7 = vpack.c.bf16 %v357_v6, %v356_v4  ;;  %v358_v10 = vld [vmem:[%s2639_s15 + $0xd0] sm:$0xff]  ;;  %v359_v11 = vld [vmem:[%s2639_s15 + $0xd8] sm:$0xff]  ;;  %v365_v12 = vpack.c.bf16 %v335_v9, %v334_v8  ;;  %v336_v14 = vld [vmem:[%s2639_s15 + $0x20] sm:$0xff] }
  0x11   : > { %v377_v13 = vpack.c.bf16 %v359_v11, %v358_v10  ;;  %v337_v15 = vld [vmem:[%s2639_s15 + $0x28] sm:$0xff]  ;;  %v360_v16 = vld [vmem:[%s2639_s15 + $0xe0] sm:$0xff]  ;;  %v338_v20 = vld [vmem:[%s2639_s15 + $0x30] sm:$0xff] }
  0x12   : > { %v361_v17 = vld [vmem:[%s2639_s15 + $0xe8] sm:$0xff]  ;;  %v366_v18 = vpack.c.bf16 %v337_v15, %v336_v14  ;;  %v339_v21 = vld [vmem:[%s2639_s15 + $0x38] sm:$0xff]  ;;  %v362_v22 = vld [vmem:[%s2639_s15 + $0xf0] sm:$0xff] }
  0x13   : > { %2347 = vmatmul.msk.bf16.vlgmr.msra.gmra.mxu0 %vm400_vm0, %v364_v5  ;;  %2359 = vmatmul.msk.bf16.vlgmr.msra.gmra.mxu3 %vm400_vm0, %v376_v7  ;;  %v378_v19 = vpack.c.bf16 %v361_v17, %v360_v16  ;;  %v363_v23 = vld [vmem:[%s2639_s15 + $0xf8] sm:$0xff]  ;;  %v367_v24 = vpack.c.bf16 %v339_v21, %v338_v20  ;;  %v340_v26 = vld [vmem:[%s2639_s15 + $0x40] sm:$0xff]  ;;  %v341_v27 = vld [vmem:[%s2639_s15 + $0x48] sm:$0xff] }
  0x14   : > { %v379_v25 = vpack.c.bf16 %v363_v23, %v362_v22  ;;  %v368_v28 = vpack.c.bf16 %v341_v27, %v340_v26  ;;  %v342_v29 = vld [vmem:[%s2639_s15 + $0x50] sm:$0xff]  ;;  %v343_v30 = vld [vmem:[%s2639_s15 + $0x58] sm:$0xff]  ;;  %v344_v32 = vld [vmem:[%s2639_s15 + $0x60] sm:$0xff] }
  0x15   : > { %v369_v31 = vpack.c.bf16 %v343_v30, %v342_v29  ;;  %v345_v33 = vld [vmem:[%s2639_s15 + $0x68] sm:$0xff]  ;;  %v346_v35 = vld [vmem:[%s2639_s15 + $0x70] sm:$0xff]  ;;  %v347_v36 = vld [vmem:[%s2639_s15 + $0x78] sm:$0xff] }
  0x16   : > { %v370_v34 = vpack.c.bf16 %v345_v33, %v344_v32  ;;  %v371_v37 = vpack.c.bf16 %v347_v36, %v346_v35  ;;  %v348_v38 = vld [vmem:[%s2639_s15 + $0x80] sm:$0xff]  ;;  %v349_v39 = vld [vmem:[%s2639_s15 + $0x88] sm:$0xff]  ;;  %v350_v54 = vld [vmem:[%s2639_s15 + $0x90] sm:$0xff] }
  0x17   : > { %v372_v41 = vpack.c.bf16 %v349_v39, %v348_v38  ;;  %v351_v55 = vld [vmem:[%s2639_s15 + $0x98] sm:$0xff] }
  0x18   : > { %v373_v60 = vpack.c.bf16 %v351_v55, %v350_v54 }
  0x23   : > { %2348 = vmatmul.msk.bf16.gmra.mxu0 %vm400_vm0, %v365_v12  ;;  %2360 = vmatmul.msk.bf16.gmra.mxu3 %vm400_vm0, %v377_v13 }
  0x33   : > { %2349 = vmatmul.msk.bf16.gmra.mxu0 %vm400_vm0, %v366_v18  ;;  %2361 = vmatmul.msk.bf16.gmra.mxu3 %vm400_vm0, %v378_v19 }
  0x43   : > { %2350 = vmatmul.msk.bf16.gmra.mxu0 %vm400_vm0, %v367_v24  ;;  %2362 = vmatmul.msk.bf16.gmra.mxu3 %vm400_vm0, %v379_v25 }
  0x53   : > { %2351 = vmatmul.msk.bf16.gmra.mxu0 %vm400_vm0, %v368_v28 }
  0x63   : > { %2352 = vmatmul.msk.bf16.gmra.mxu0 %vm400_vm0, %v369_v31 }
  0x73   : > { %2353 = vmatmul.msk.bf16.gmra.mxu0 %vm400_vm0, %v370_v34 }
  0x83   : > { %2354 = vmatmul.msk.bf16.gmra.mxu0 %vm400_vm0, %v371_v37 }
  0x90   : > { %v458_v42 = vpop.f32.mrf.mxu0 }
  0x91   : > { %v2685_v43 = vadd.f32 %v2682_v40, %v458_v42 }
  0x93   : > { %v2688_v44 = vmul.f32 0.70710677, %v2685_v43  ;;  %2355 = vmatmul.msk.bf16.gmra.mxu0 %vm400_vm0, %v372_v41 }
  0x95   : > { %v2692_v45 = vand.u32 2147483647, %v2688_v44 }
  0x96   : > { %v518_v47 = vpop.f32.mrf.mxu3 }
  0x97   : > { %v634_v46 = vmul.f32 0.3275911, %v2692_v45  ;;  %v2696_v48 = vadd.f32 %v2682_v40, %v518_v47 }
  0x98   : > { %v460_v49 = vpop.f32.mrf.mxu0 }
  0x99   : > { %v666_v50 = vadd.f32 1.0, %v634_v46  ;;  %v2699_v51 = vadd.f32 %v2682_v40, %v460_v49  ;;  %v2702_v52 = vmul.f32 0.70710677, %v2696_v48 }
  0x9b   : > { %2436 = vrcp.f32 %v666_v50  ;;  %v2705_v53 = vand.u32 2147483647, %v2702_v52  ;;  %v2710_v56 = vmul.f32 0.70710677, %v2699_v51  ;;  %v707_v5 = vand.u32 2147483647, %v666_v50 }
  0x9c   : > { %v709_v8 = vand.u32 2147483648, %v666_v50  ;;  %vm703_vm2 = vweird.f32 %v666_v50 }
  0x9d   : > { %v658_v57 = vmul.f32 0.3275911, %v2705_v53  ;;  %v2714_v58 = vand.u32 2147483647, %v2710_v56  ;;  %vm708_vm3 = vcmp.eq.f32.partialorder %v707_v5, 8.507059e+37 }
  0x9e   : > { %v520_v59 = vpop.f32.mrf.mxu3  ;;  %v710_v14 = vor.u32 1.1754944e-38, %v709_v8 }
  0x9f   : > { %v690_v61 = vadd.f32 1.0, %v658_v57  ;;  %v2717_v62 = vadd.f32 %v2682_v40, %v520_v59  ;;  %v635_v0 = vmul.f32 0.3275911, %v2714_v58 }
  0xa0   : > { %v463_v1 = vpop.f32.mrf.mxu0 }
  0xa1   : > { %v2437_v63 = vpop.eup %2436  ;;  %2438 = vrcp.f32 %v690_v61  ;;  %v667_v3 = vadd.f32 1.0, %v635_v0  ;;  %v2722_v6 = vmul.f32 0.70710677, %v2717_v62  ;;  %v2725_v7 = vadd.f32 %v2682_v40, %v463_v1 }
  0xa2   : > { %v699_v2 = vmul.f32 %v2437_v63, %v666_v50  ;;  %vm704_vm1 = vweird.f32 %v2437_v63  ;;  %vm1063_vm5 = vweird.f32 %v690_v61  ;;  %v1067_v18 = vand.u32 2147483647, %v690_v61 }
  0xa3   : > { %2356 = vmatmul.msk.bf16.gmra.mxu0 %vm400_vm0, %v373_v60  ;;  %2440 = vrcp.f32 %v667_v3  ;;  %v2728_v10 = vand.u32 2147483647, %v2722_v6  ;;  %v2731_v13 = vmul.f32 0.70710677, %v2725_v7  ;;  %vm705_vm4 = vmor %vm703_vm2, %vm704_vm1  ;;  %v1069_v19 = vand.u32 2147483648, %v690_v61 }
  0xa4   : > { %v700_v4 = vsub.f32 1.0, %v699_v2  ;;  %vm1068_vm8 = vcmp.eq.f32.partialorder %v1067_v18, 8.507059e+37  ;;  %v722_v34 = vand.u32 2147483647, %v667_v3  ;;  %v724_v35 = vand.u32 2147483648, %v667_v3 }
  0xa5   : > { %v659_v16 = vmul.f32 0.3275911, %v2728_v10  ;;  %v2735_v20 = vand.u32 2147483647, %v2731_v13  ;;  %v1070_v29 = vor.u32 1.1754944e-38, %v1069_v19  ;;  %vm718_vm10 = vweird.f32 %v667_v3 }
  0xa6   : > { %v701_v9 = vmul.f32 %v2437_v63, %v700_v4  ;;  %v523_v39 = vpop.f32.mrf.mxu3  ;;  %vm723_vm12 = vcmp.eq.f32.partialorder %v722_v34, 8.507059e+37  ;;  %v725_v50 = vor.u32 1.1754944e-38, %v724_v35  ;;  %v1490_v19 = vsub.f32 0.0, %v2705_v53 }
  0xa7   : > { %v2439_v11 = vpop.eup %2438  ;;  %v691_v23 = vadd.f32 1.0, %v659_v16  ;;  %v636_v26 = vmul.f32 0.3275911, %v2735_v20  ;;  %v2750_v49 = vadd.f32 %v2682_v40, %v523_v39 }
  0xa8   : > { %v702_v12 = vadd.f32 %v2437_v63, %v701_v9  ;;  %v1059_v15 = vmul.f32 %v2439_v11, %v690_v61  ;;  %vm1064_vm6 = vweird.f32 %v2439_v11  ;;  %v1522_v39 = vmul.f32 %v1490_v19, %v2705_v53 }
  0xa9   : > { %v2441_v24 = vpop.eup %2440  ;;  %2442 = vrcp.f32 %v691_v23  ;;  %vm1065_vm7 = vmor %vm1063_vm5, %vm1064_vm6  ;;  %v2742_v33 = vadd.f32 1.0, %v636_v26  ;;  %vm1078_vm13 = vweird.f32 %v691_v23  ;;  %v1084_v59 = vand.u32 2147483648, %v691_v23 }
  0xaa   : > { %v706_v17 = vsel %vm705_vm4, %v2437_v63, %v702_v12  ;;  %v1060_v22 = vsub.f32 1.0, %v1059_v15  ;;  %v714_v28 = vmul.f32 %v2441_v24, %v667_v3  ;;  %vm719_vm9 = vweird.f32 %v2441_v24 }
  0xab   : > { %v2737_v21 = vsel %vm708_vm3, %v710_v14, %v706_v17  ;;  %2444 = vrcp.f32 %v2742_v33  ;;  %vm720_vm11 = vmor %vm718_vm10, %vm719_vm9  ;;  %v1082_v63 = vand.u32 2147483647, %v691_v23  ;;  %v2757_v3 = vmul.f32 0.70710677, %v2750_v49 }
  0xac   : > { %v1178_v25 = vmul.f32 1.0614054, %v2737_v21  ;;  %v1061_v27 = vmul.f32 %v2439_v11, %v1060_v22  ;;  %v715_v32 = vsub.f32 1.0, %v714_v28  ;;  %v1085_v12 = vor.u32 1.1754944e-38, %v1084_v59 }
  0xad   : > { %v1466_v15 = vsub.f32 0.0, %v2692_v45  ;;  %vm1083_vm1 = vcmp.eq.f32.partialorder %v1082_v63, 8.507059e+37  ;;  %v2766_v17 = vand.u32 2147483647, %v2757_v3  ;;  %vm733_vm3 = vweird.f32 %v2742_v33 }
  0xae   : > { %v1210_v30 = vadd.f32 -1.4531521, %v1178_v25  ;;  %v1062_v31 = vadd.f32 %v2439_v11, %v1061_v27  ;;  %v716_v37 = vmul.f32 %v2441_v24, %v715_v32  ;;  %v739_v27 = vand.u32 2147483648, %v2742_v33 }
  0xaf   : > { %v2443_v41 = vpop.eup %2442  ;;  %v660_v28 = vmul.f32 0.3275911, %v2766_v17  ;;  %v1498_v32 = vmul.f32 %v1466_v15, %v2692_v45  ;;  %vm1682_vm10 = vcmp.ge.f32.partialorder %v2702_v52, 0.0 }
  0xb0   : > { %v1066_v36 = vsel %vm1065_vm7, %v2439_v11, %v1062_v31  ;;  %v1242_v42 = vmul.f32 %v1210_v30, %v2737_v21  ;;  %v717_v47 = vadd.f32 %v2441_v24, %v716_v37  ;;  %v1074_v54 = vmul.f32 %v2443_v41, %v691_v23 }
  0xb1   : > { %v2744_v38 = vsel %vm1068_vm8, %v1070_v29, %v1066_v36  ;;  %vm1079_vm14 = vweird.f32 %v2443_v41  ;;  %v2445_v4 = vpop.eup %2444  ;;  %v737_v23 = vand.u32 2147483647, %v2742_v33  ;;  %v2781_v35 = vadd.f32 1.0, %v660_v28 }
  0xb2   : > { %v1202_v46 = vmul.f32 1.0614054, %v2744_v38  ;;  %v721_v57 = vsel %vm720_vm11, %v2441_v24, %v717_v47  ;;  %v1075_v61 = vsub.f32 1.0, %v1074_v54  ;;  %v1274_v0 = vadd.f32 1.4214138, %v1242_v42  ;;  %vm2759_vm15 = vmor %vm1078_vm13, %vm1079_vm14  ;;  %v465_v24 = vpop.f32.mrf.mxu0 }
  0xb3   : > { %v2752_v60 = vsel %vm723_vm12, %v725_v50, %v721_v57  ;;  %v729_v14 = vmul.f32 %v2445_v4, %v2742_v33  ;;  %vm734_vm2 = vweird.f32 %v2445_v4  ;;  %v2784_v36 = vadd.f32 %v2682_v40, %v465_v24 }
  0xb4   : > { %v1234_v55 = vadd.f32 -1.4531521, %v1202_v46  ;;  %v1179_v2 = vmul.f32 1.0614054, %v2752_v60  ;;  %v1076_v5 = vmul.f32 %v2443_v41, %v1075_v61  ;;  %v1306_v18 = vmul.f32 %v1274_v0, %v2737_v21  ;;  %vm735_vm4 = vmor %vm733_vm3, %vm734_vm2 }
  0xb5   : > { %v730_v22 = vsub.f32 1.0, %v729_v14  ;;  %v740_v47 = vor.u32 1.1754944e-38, %v739_v27  ;;  %2446 = vrcp.f32 %v2781_v35  ;;  %v1467_v50 = vsub.f32 0.0, %v2714_v58 }
  0xb6   : > { %v1266_v1 = vmul.f32 %v1234_v55, %v2744_v38  ;;  %v1211_v9 = vadd.f32 -1.4531521, %v1179_v2  ;;  %v1077_v16 = vadd.f32 %v2443_v41, %v1076_v5  ;;  %v1338_v37 = vadd.f32 -0.28449672, %v1306_v18 }
  0xb7   : > { %v731_v31 = vmul.f32 %v2445_v4, %v730_v22  ;;  %vm738_vm5 = vcmp.eq.f32.partialorder %v737_v23, 8.507059e+37  ;;  %v1491_v57 = vsub.f32 0.0, %v2728_v10  ;;  %v2795_v53 = vmul.f32 0.70710677, %v2784_v36 }
  0xb8   : > { %v1298_v8 = vadd.f32 1.4214138, %v1266_v1  ;;  %v1243_v25 = vmul.f32 %v1211_v9, %v2752_v60  ;;  %v1081_v26 = vsel %vm2759_vm15, %v2443_v41, %v1077_v16  ;;  %v1370_v33 = vmul.f32 %v1338_v37, %v2737_v21 }
  0xb9   : > { %v2777_v30 = vsel %vm1083_vm1, %v1085_v12, %v1081_v26  ;;  %v732_v41 = vadd.f32 %v2445_v4, %v731_v31  ;;  %v1578_v61 = vmul.f32 1.442695, %v1522_v39  ;;  %v1530_v2 = vmul.f32 1.442695, %v1498_v32 }
  0xba   : > { %v1330_v29 = vmul.f32 %v1298_v8, %v2744_v38  ;;  %v1203_v34 = vmul.f32 1.0614054, %v2777_v30  ;;  %v1275_v42 = vadd.f32 1.4214138, %v1243_v25  ;;  %v1499_v5 = vmul.f32 %v1467_v50, %v2714_v58 }
  0xbb   : > { %v736_v54 = vsel %vm735_vm4, %v2445_v4, %v732_v41  ;;  %v2802_v9 = vpop.eup %2446  ;;  %v1523_v12 = vmul.f32 %v1491_v57, %v2728_v10  ;;  %v2807_v14 = vand.u32 2147483647, %v2795_v53  ;;  %v1402_v15 = vadd.f32 0.2548296, %v1370_v33  ;;  %v468_v57 = vpop.f32.mrf.mxu0 }
  0xbc   : > { %v1235_v46 = vadd.f32 -1.4531521, %v1203_v34  ;;  %v1362_v45 = vadd.f32 -0.28449672, %v1330_v29  ;;  %v2792_v59 = vsel %vm738_vm5, %v740_v47, %v736_v54  ;;  %v1307_v0 = vmul.f32 %v1275_v42, %v2752_v60  ;;  %v525_v29 = vpop.f32.mrf.mxu3 }
  0xbd   : > { %v1180_v63 = vmul.f32 1.0614054, %v2792_v59  ;;  %2448 = vpow2.f32 %v1578_v61  ;;  %v1089_v22 = vmul.f32 %v2802_v9, %v2781_v35  ;;  %v637_v58 = vmul.f32 0.3275911, %v2807_v14 }
  0xbe   : > { %v1267_v55 = vmul.f32 %v1235_v46, %v2777_v30  ;;  %v1394_v4 = vmul.f32 %v1362_v45, %v2744_v38  ;;  %v1339_v18 = vadd.f32 -0.28449672, %v1307_v0  ;;  %2450 = vpow2.f32 %v1530_v2 }
  0xbf   : > { %v1212_v8 = vadd.f32 -1.4531521, %v1180_v63  ;;  %v1532_v24 = vmul.f32 1.442695, %v1499_v5  ;;  %v1468_v25 = vsub.f32 0.0, %v2735_v20  ;;  %v1090_v27 = vsub.f32 1.0, %v1089_v22 }
  0xc0   : > { %v1299_v1 = vadd.f32 1.4214138, %v1267_v55  ;;  %v1426_v23 = vadd.f32 0.2548296, %v1394_v4  ;;  %v1580_v10 = vmul.f32 1.442695, %v1523_v12  ;;  %v1434_v31 = vmul.f32 %v1402_v15, %v2737_v21 }
  0xc1   : > { %v1244_v16 = vmul.f32 %v1212_v8, %v2792_v59  ;;  %v2814_v28 = vadd.f32 1.0, %v637_v58  ;;  %vm1093_vm6 = vweird.f32 %v2781_v35  ;;  %vm1094_vm7 = vweird.f32 %v2802_v9 }
  0xc2   : > { %v1331_v11 = vmul.f32 %v1299_v1, %v2777_v30  ;;  %v1099_v32 = vand.u32 2147483648, %v2781_v35  ;;  %v1371_v34 = vmul.f32 %v1339_v18, %v2752_v60  ;;  %v1091_v39 = vmul.f32 %v2802_v9, %v1090_v27  ;;  %vm2831_vm8 = vmor %vm1093_vm6, %vm1094_vm7  ;;  %v2847_v1 = vld [vmem:[%s4185_s6 + $0x8] sm:$0xff] }
  0xc3   : > { %v1276_v26 = vadd.f32 1.4214138, %v1244_v16  ;;  %2452 = vrcp.f32 %v2814_v28  ;;  %v2449_v41 = vpop.eup %2448  ;;  %v1458_v42 = vmul.f32 %v1426_v23, %v2744_v38  ;;  %v1097_v46 = vand.u32 2147483647, %v2781_v35  ;;  %2113 = vmatpush.bf16.msra.mxu2 %v2847_v1 }
  0xc4   : > { %v1363_v19 = vadd.f32 -0.28449672, %v1331_v11  ;;  %v2827_v21 = vadd.f32 %v2682_v40, %v525_v29  ;;  %2454 = vpow2.f32 %v1532_v24  ;;  %v1092_v45 = vadd.f32 %v2802_v9, %v1091_v39  ;;  %v2451_v54 = vpop.eup %2450 }
  0xc5   : > { %v1308_v47 = vmul.f32 %v1276_v26, %v2792_v59  ;;  %v2836_v55 = vmul.f32 0.5, %v2685_v43  ;;  %v2839_v38 = vmul.f32 0.5, %v2699_v51  ;;  %2456 = vpow2.f32 %v1580_v10 }
  0xc6   : > { %v1395_v37 = vmul.f32 %v1363_v19, %v2777_v30  ;;  %v1500_v35 = vmul.f32 %v1468_v25, %v2735_v20  ;;  %v2842_v33 = vmul.f32 %v2451_v54, %v1434_v31  ;;  %v1403_v61 = vadd.f32 0.2548296, %v1371_v34 }
  0xc7   : > { %v1100_v0 = vor.u32 1.1754944e-38, %v1099_v32  ;;  %v2849_v2 = vmul.f32 %v2449_v41, %v1458_v42  ;;  %v1096_v43 = vsel %vm2831_vm8, %v2802_v9, %v1092_v45  ;;  %vm2854_vm9 = vcmp.eq.f32.partialorder %v1097_v46, 8.507059e+37 }
  0xc8   : > { %v1427_v63 = vadd.f32 0.2548296, %v1395_v37  ;;  %v2859_v20 = vmul.f32 0.70710677, %v2827_v21  ;;  %v2862_v5 = vmul.f32 0.5, %v2696_v48  ;;  %v2865_v8 = vmul.f32 0.5, %v2725_v7 }
  0xc9   : > { %v2453_v4 = vpop.eup %2452  ;;  %v1340_v11 = vadd.f32 -0.28449672, %v1308_v47  ;;  %v2868_v12 = vadd.f32 %v2682_v40, %v468_v57  ;;  %v1534_v9 = vmul.f32 1.442695, %v1500_v35  ;;  %v1492_v15 = vsub.f32 0.0, %v2766_v17 }
  0xca   : > { %v744_v16 = vmul.f32 %v2453_v4, %v2814_v28  ;;  %v2875_v18 = vand.u32 2147483647, %v2859_v20  ;;  %v2455_v48 = vpop.eup %2454  ;;  %v1435_v7 = vmul.f32 %v1403_v61, %v2752_v60  ;;  %v1459_v19 = vmul.f32 %v1427_v63, %v2777_v30 }
  0xcb   : > { %v2881_v22 = vsel %vm2854_vm9, %v1100_v0, %v1096_v43  ;;  %v2884_v58 = vmul.f32 0.70710677, %v2868_v12  ;;  %v2457_v23 = vpop.eup %2456  ;;  %v1626_v24 = vsub.f32 1.0, %v2842_v33  ;;  %vm1658_vm11 = vcmp.ge.f32.partialorder %v2688_v44, 0.0 }
  0xcc   : > { %v1650_v25 = vsub.f32 1.0, %v2849_v2  ;;  %v745_v10 = vsub.f32 1.0, %v744_v16  ;;  %v661_v26 = vmul.f32 0.3275911, %v2875_v18  ;;  %v1372_v60 = vmul.f32 %v1340_v11, %v2792_v59  ;;  %v353_v16 = vld [vmem:[%s2639_s15 + $0xa8] sm:$0xff] }
  0xcd   : > { %v752_v30 = vand.u32 2147483647, %v2814_v28  ;;  %v754_v27 = vand.u32 2147483648, %v2814_v28  ;;  %v2894_v29 = vand.u32 2147483647, %v2884_v58  ;;  %vm749_vm12 = vweird.f32 %v2453_v4 }
  0xce   : > { %v1204_v31 = vmul.f32 1.0614054, %v2881_v22  ;;  %v746_v32 = vmul.f32 %v2453_v4, %v745_v10  ;;  %v2897_v34 = vadd.f32 1.0, %v661_v26  ;;  %v2899_v37 = vmul.f32 %v2455_v48, %v1435_v7 }
  0xcf   : > { %v2902_v39 = vmul.f32 0.5, %v2717_v62  ;;  %v1619_v41 = vmul.f32 %v2457_v23, %v1459_v19  ;;  %2458 = vpow2.f32 %v1534_v9  ;;  %vm748_vm13 = vweird.f32 %v2814_v28 }
  0xd0   : > { %v747_v42 = vadd.f32 %v2453_v4, %v746_v32  ;;  %2460 = vrcp.f32 %v2897_v34  ;;  %v638_v46 = vmul.f32 0.3275911, %v2894_v29  ;;  %v1690_v47 = vsub.f32 0.0, %v1626_v24  ;;  %vm750_vm14 = vmor %vm748_vm13, %vm749_vm12 }
  0xd1   : > { %v1714_v45 = vsub.f32 0.0, %v1650_v25  ;;  %v1524_v50 = vmul.f32 %v1492_v15, %v2766_v17  ;;  %v755_v54 = vor.u32 1.1754944e-38, %v754_v27  ;;  %v1404_v35 = vadd.f32 0.2548296, %v1372_v60  ;;  %v352_v15 = vld [vmem:[%s2639_s15 + $0xa0] sm:$0xff] }
  0xd2   : > { %v1236_v57 = vadd.f32 -1.4531521, %v1204_v31  ;;  %v751_v33 = vsel %vm750_vm14, %v2453_v4, %v747_v42  ;;  %vm753_vm15 = vcmp.eq.f32.partialorder %v752_v30, 8.507059e+37  ;;  %v1627_v62 = vsub.f32 1.0, %v2899_v37 }
  0xd3   : > { %vm1659_vm1 = vcmp.ge.f32.partialorder %v2710_v56, 0.0  ;;  %v1651_v28 = vsub.f32 1.0, %v1619_v41  ;;  %v2910_v61 = vsel %vm753_vm15, %v755_v54, %v751_v33  ;;  %v1469_v63 = vsub.f32 0.0, %v2807_v14 }
  0xd4   : > { %vm1683_vm2 = vcmp.ge.f32.partialorder %v2722_v6, 0.0  ;;  %v2915_v17 = vmul.f32 0.5, %v2784_v36  ;;  %v1181_v0 = vmul.f32 1.0614054, %v2910_v61  ;;  %v2918_v2 = vadd.f32 1.0, %v638_v46 }
  0xd5   : > { %v2459_v43 = vpop.eup %2458  ;;  %v1722_v51 = vsel %vm1658_vm11, %v1626_v24, %v1690_v47  ;;  %v1746_v4 = vsel %vm1682_vm10, %v1650_v25, %v1714_v45  ;;  %v2925_v11 = vmul.f32 0.5, %v2750_v49  ;;  %v2927_v9 = vmul.f32 1.442695, %v1524_v50  ;;  %v470_v49 = vpop.f32.mrf.mxu0 }
  0xd6   : > { %v2461_v36 = vpop.eup %2460  ;;  %v1436_v48 = vmul.f32 %v1404_v35, %v2792_v59  ;;  %v1268_v7 = vmul.f32 %v1236_v57, %v2881_v22  ;;  %v1213_v19 = vadd.f32 -1.4531521, %v1181_v0  ;;  %2462 = vrcp.f32 %v2918_v2  ;;  %v528_v59 = vpop.f32.mrf.mxu3 }
  0xd7   : > { %v1691_v44 = vsub.f32 0.0, %v1627_v62  ;;  %v1715_v23 = vsub.f32 0.0, %v1651_v28  ;;  %v1501_v52 = vmul.f32 %v1469_v63, %v2807_v14  ;;  %v1104_v24 = vmul.f32 %v2461_v36, %v2897_v34  ;;  %v2946_v14 = vld [vmem:[%s4185_s6] sm:$0xff] }
  0xd8   : > { %v1245_v25 = vmul.f32 %v1213_v19, %v2910_v61  ;;  %vm1108_vm3 = vweird.f32 %v2897_v34  ;;  %v1114_v10 = vand.u32 2147483648, %v2897_v34  ;;  %v374_v26 = vpack.c.bf16 %v353_v16, %v352_v15  ;;  %2114 = vmatpush.bf16.msra.mxu2 %v2946_v14 }
  0xd9   : > { %v1105_v60 = vsub.f32 1.0, %v1104_v24  ;;  %vm1109_vm4 = vweird.f32 %v2461_v36  ;;  %v1112_v30 = vand.u32 2147483647, %v2897_v34  ;;  %v2941_v27 = vadd.f32 %v2682_v40, %v528_v59 }
  0xda   : > { %v2948_v31 = vadd.f32 1.0, %v1722_v51  ;;  %v2950_v32 = vmul.f32 %v2459_v43, %v1436_v48  ;;  %v1300_v37 = vadd.f32 1.4214138, %v1268_v7  ;;  %2357 = vmatmul.msk.bf16.gmra.mxu0 %vm400_vm0, %v374_v26  ;;  %v2954_v41 = vadd.f32 %v2682_v40, %v470_v49  ;;  %vm2967_vm5 = vmor %vm1108_vm3, %vm1109_vm4 }
  0xdb   : > { %v1747_v42 = vsel %vm1683_vm2, %v1651_v28, %v1715_v23  ;;  %v1277_v46 = vadd.f32 1.4214138, %v1245_v25  ;;  %v1106_v47 = vmul.f32 %v2461_v36, %v1105_v60  ;;  %v2959_v45 = vmul.f32 0.70710677, %v2941_v27 }
  0xdc   : > { %v2463_v50 = vpop.eup %2462  ;;  %v1778_v54 = vadd.f32 1.0, %v1746_v4  ;;  %v1723_v35 = vsel %vm1659_vm1, %v1627_v62, %v1691_v44  ;;  %v1115_v6 = vor.u32 1.1754944e-38, %v1114_v10  ;;  %v2972_v33 = vmul.f32 0.70710677, %v2954_v41  ;;  %v354_v10 = vld [vmem:[%s2639_s15 + $0xb0] sm:$0xff] }
  0xdd   : > { %v1536_v28 = vmul.f32 1.442695, %v1501_v52  ;;  %v1107_v63 = vadd.f32 %v2461_v36, %v1106_v47  ;;  %vm1113_vm6 = vcmp.eq.f32.partialorder %v1112_v30, 8.507059e+37  ;;  %v759_v0 = vmul.f32 %v2463_v50, %v2918_v2 }
  0xde   : > { %v1779_v43 = vadd.f32 1.0, %v1747_v42  ;;  %v1332_v56 = vmul.f32 %v1300_v37, %v2881_v22  ;;  %v2977_v62 = vand.u32 2147483647, %v2959_v45  ;;  %v2980_v34 = vand.u32 2147483647, %v2972_v33  ;;  %v355_v37 = vld [vmem:[%s2639_s15 + $0xb8] sm:$0xff] }
  0xdf   : > { %v1628_v51 = vsub.f32 1.0, %v2950_v32  ;;  %v1309_v4 = vmul.f32 %v1277_v46, %v2910_v61  ;;  %v1111_v15 = vsel %vm2967_vm5, %v2461_v36, %v1107_v63  ;;  %v760_v16 = vsub.f32 1.0, %v759_v0  ;;  %v530_v32 = vpop.f32.mrf.mxu3 }
  0xe0   : > { %v2986_v48 = vsel %vm1113_vm6, %v1115_v6, %v1111_v15  ;;  %v767_v7 = vand.u32 2147483647, %v2918_v2  ;;  %v769_v19 = vand.u32 2147483648, %v2918_v2  ;;  %v662_v44 = vmul.f32 0.3275911, %v2977_v62 }
  0xe1   : > { %vm1660_vm7 = vcmp.ge.f32.partialorder %v2731_v13, 0.0  ;;  %v1205_v23 = vmul.f32 1.0614054, %v2986_v48  ;;  %v761_v52 = vmul.f32 %v2463_v50, %v760_v16  ;;  %vm764_vm8 = vweird.f32 %v2463_v50 }
  0xe2   : > { %v639_v24 = vmul.f32 0.3275911, %v2980_v34  ;;  %v1755_v49 = vadd.f32 1.0, %v1723_v35  ;;  %v1364_v36 = vadd.f32 -0.28449672, %v1332_v56  ;;  %vm763_vm9 = vweird.f32 %v2918_v2 }
  0xe3   : > { %v2995_v25 = vadd.f32 1.0, %v662_v44  ;;  %v1341_v26 = vadd.f32 -0.28449672, %v1309_v4  ;;  %v1237_v59 = vadd.f32 -1.4531521, %v1205_v23  ;;  %v762_v60 = vadd.f32 %v2463_v50, %v761_v52  ;;  %vm765_vm10 = vmor %vm763_vm9, %vm764_vm8 }
  0xe4   : > { %v2998_v30 = vadd.f32 1.0, %v639_v24  ;;  %v3002_v42 = vmul.f32 %v1779_v43, %v2902_v39  ;;  %v1493_v46 = vsub.f32 0.0, %v2875_v18  ;;  %v770_v47 = vor.u32 1.1754944e-38, %v769_v19 }
  0xe5   : > { %2464 = vrcp.f32 %v2995_v25  ;;  %v1692_v2 = vsub.f32 0.0, %v1628_v51  ;;  %v1269_v35 = vmul.f32 %v1237_v59, %v2986_v48  ;;  %v766_v57 = vsel %vm765_vm10, %v2463_v50, %v762_v60 }
  0xe6   : > { %vm768_vm11 = vcmp.eq.f32.partialorder %v767_v7, 8.507059e+37  ;;  %2466 = vrcp.f32 %v2998_v30  ;;  %v3012_v63 = vadd.f32 %v2682_v40, %v530_v32  ;;  %v375_v39 = vpack.c.bf16 %v355_v37, %v354_v10 }
  0xe7   : > { %v3008_v6 = vsel %vm768_vm11, %v770_v47, %v766_v57  ;;  %v1396_v0 = vmul.f32 %v1364_v36, %v2881_v22  ;;  %2468 = vpow2.f32 %v2927_v9  ;;  %v1373_v43 = vmul.f32 %v1341_v26, %v2910_v61  ;;  %v2416_v26 = vld [vmem:[%s4183_s4 + $0x8] sm:$0xff] }
  0xe8   : > { %v1182_v56 = vmul.f32 1.0614054, %v3008_v6  ;;  %v3020_v50 = vmul.f32 %v2948_v31, %v2836_v55  ;;  %v3023_v4 = vmul.f32 %v1778_v54, %v2862_v5  ;;  %2470 = vpow2.f32 %v1536_v28  ;;  %1908 = vmatpush.bf16.msra.mxu1 %v2416_v26  ;;  %2421 = vmatpush.bf16.msrb.mxu3 %v2416_v26 }
  0xe9   : > { %v1301_v15 = vadd.f32 1.4214138, %v1269_v35  ;;  %v3026_v16 = vmul.f32 %v1755_v49, %v2839_v38  ;;  %v1525_v7 = vmul.f32 %v1493_v46, %v2875_v18  ;;  %v3030_v9 = vmul.f32 0.5, %v2868_v12 }
  0xea   : > { %v1214_v19 = vadd.f32 -1.4531521, %v1182_v56  ;;  %v1830_v23 = vpack.c.bf16 %v3002_v42, %v3023_v4  ;;  %v1724_v55 = vsel %vm1660_vm7, %v1628_v51, %v1692_v2  ;;  %v1470_v5 = vsub.f32 0.0, %v2894_v29  ;;  %2358 = vmatmul.msk.bf16.gmra.mxu0 %vm400_vm0, %v375_v39 }
  0xeb   : > { %v2465_v44 = vpop.eup %2464  ;;  %v3038_v31 = vmul.f32 0.70710677, %v3012_v63  ;;  %v1428_v38 = vadd.f32 0.2548296, %v1396_v0  ;;  %v1405_v18 = vadd.f32 0.2548296, %v1373_v43  ;;  %v1333_v52 = vmul.f32 %v1301_v15, %v2986_v48  ;;  %v473_v15 = vpop.f32.mrf.mxu0 }
  0xec   : > { %v1246_v12 = vmul.f32 %v1214_v19, %v3008_v6  ;;  %v1119_v54 = vmul.f32 %v2465_v44, %v2995_v25  ;;  %v2467_v28 = vpop.eup %2466  ;;  %vm1123_vm12 = vweird.f32 %v2995_v25  ;;  %v1129_v13 = vand.u32 2147483648, %v2995_v25 }
  0xed   : > { %v3047_v51 = vand.u32 2147483647, %v3038_v31  ;;  %v2469_v24 = vpop.eup %2468  ;;  %vm1124_vm13 = vweird.f32 %v2465_v44  ;;  %v1127_v10 = vand.u32 2147483647, %v2995_v25  ;;  %v1584_v60 = vmul.f32 1.442695, %v1525_v7 }
  0xee   : > { %v1278_v49 = vadd.f32 1.4214138, %v1246_v12  ;;  %v1120_v36 = vsub.f32 1.0, %v1119_v54  ;;  %v2471_v59 = vpop.eup %2470  ;;  %v1502_v32 = vmul.f32 %v1470_v5, %v2894_v29  ;;  %v774_v37 = vmul.f32 %v2467_v28, %v2998_v30  ;;  %vm3063_vm14 = vmor %vm1123_vm12, %vm1124_vm13  ;;  %v1991_v12 = vld [vmem:[%s3073_s26] sm:$0xff]  ;;  %v1992_v54 = vld [vmem:[%s3073_s26 + $0x8] sm:$0xff] }
  0xef   : > { %v663_v46 = vmul.f32 0.3275911, %v3047_v51  ;;  %v3056_v47 = vadd.f32 1.0, %v1724_v55  ;;  %v1460_v2 = vmul.f32 %v1428_v38, %v2881_v22  ;;  %v1437_v35 = vmul.f32 %v1405_v18, %v2910_v61 }
  0xf0   : > { %v1121_v57 = vmul.f32 %v2465_v44, %v1120_v36  ;;  %v1365_v39 = vadd.f32 -0.28449672, %v1333_v52  ;;  %v1130_v29 = vor.u32 1.1754944e-38, %v1129_v13  ;;  %v775_v43 = vsub.f32 1.0, %v774_v37 }
  0xf1   : > { %v3067_v56 = vadd.f32 1.0, %v663_v46  ;;  %v1310_v22 = vmul.f32 %v1278_v49, %v3008_v6  ;;  %vm1128_vm15 = vcmp.eq.f32.partialorder %v1127_v10, 8.507059e+37  ;;  %v784_v25 = vand.u32 2147483648, %v2998_v30 }
  0xf2   : > { %v1122_v61 = vadd.f32 %v2465_v44, %v1121_v57  ;;  %v776_v7 = vmul.f32 %v2467_v28, %v775_v43  ;;  %vm779_vm1 = vweird.f32 %v2467_v28  ;;  %v782_v19 = vand.u32 2147483647, %v2998_v30 }
  0xf3   : > { %2472 = vrcp.f32 %v3067_v56  ;;  %v3079_v55 = vmul.f32 %v2469_v24, %v1460_v2  ;;  %v1538_v5 = vmul.f32 1.442695, %v1502_v32  ;;  %v3084_v18 = vadd.f32 %v2682_v40, %v473_v15 }
  0xf4   : > { %v1126_v38 = vsel %vm3063_vm14, %v2465_v44, %v1122_v61  ;;  %v1397_v52 = vmul.f32 %v1365_v39, %v2986_v48  ;;  %v777_v49 = vadd.f32 %v2467_v28, %v776_v7  ;;  %vm778_vm2 = vweird.f32 %v2998_v30 }
  0xf5   : > { %v3089_v13 = vsel %vm1128_vm15, %v1130_v29, %v1126_v38  ;;  %vm1684_vm3 = vcmp.ge.f32.partialorder %v2757_v3, 0.0  ;;  %v3093_v24 = vmul.f32 %v2471_v59, %v1437_v35  ;;  %v1342_v36 = vadd.f32 -0.28449672, %v1310_v22  ;;  %vm780_vm4 = vmor %vm778_vm2, %vm779_vm1 }
  0xf6   : > { %v1206_v10 = vmul.f32 1.0614054, %v3089_v13  ;;  %v785_v44 = vor.u32 1.1754944e-38, %v784_v25  ;;  %2474 = vpow2.f32 %v1584_v60  ;;  %v781_v26 = vsel %vm780_vm4, %v2467_v28, %v777_v49 }
  0xf7   : > { %vm783_vm5 = vcmp.eq.f32.partialorder %v782_v19, 8.507059e+37  ;;  %v2023_v32 = vpack.c.bf16 %v1992_v54, %v1991_v12  ;;  %2476 = vpow2.f32 %v1538_v5  ;;  %v3100_v30 = vmul.f32 0.70710677, %v3084_v18  ;;  %v533_v19 = vpop.f32.mrf.mxu3 }
  0xf8   : > { %v1238_v37 = vadd.f32 -1.4531521, %v1206_v10  ;;  %v3097_v46 = vsel %vm783_vm5, %v785_v44, %v781_v26  ;;  %v1652_v59 = vsub.f32 1.0, %v3079_v55  ;;  %v1429_v35 = vadd.f32 0.2548296, %v1397_v52  ;;  %v2415_v52 = vld [vmem:[%s4183_s4] sm:$0xff] }
  0xf9   : > { %v2473_v2 = vpop.eup %2472  ;;  %v1494_v57 = vsub.f32 0.0, %v2977_v62  ;;  %v1183_v39 = vmul.f32 1.0614054, %v3097_v46  ;;  %2395 = vmatmul.msk.bf16.vlgmr.msra.gmra.mxu2 %vm400_vm0, %v2023_v32  ;;  %v1629_v28 = vsub.f32 1.0, %v3093_v24  ;;  %v1374_v60 = vmul.f32 %v1342_v36, %v3008_v6  ;;  %1909 = vmatpush.bf16.msra.mxu1 %v2415_v52 }
  0xfa   : > { %v1270_v0 = vmul.f32 %v1238_v37, %v3089_v13  ;;  %v1134_v29 = vmul.f32 %v2473_v2, %v3067_v56  ;;  %vm1661_vm6 = vcmp.ge.f32.partialorder %v2795_v53, 0.0  ;;  %vm1138_vm7 = vweird.f32 %v3067_v56  ;;  %2422 = vmatpush.bf16.msrb.mxu3 %v2415_v52 }
  0xfb   : > { %v1215_v43 = vadd.f32 -1.4531521, %v1183_v39  ;;  %v1142_v15 = vand.u32 2147483647, %v3067_v56  ;;  %v1144_v22 = vand.u32 2147483648, %v3067_v56  ;;  %vm1139_vm8 = vweird.f32 %v2473_v2 }
  0xfc   : > { %v1302_v61 = vadd.f32 1.4214138, %v1270_v0  ;;  %v1135_v25 = vsub.f32 1.0, %v1134_v29  ;;  %v3115_v7 = vand.u32 2147483647, %v3100_v30  ;;  %v2475_v55 = vpop.eup %2474  ;;  %v1716_v5 = vsub.f32 0.0, %v1652_v59  ;;  %vm3131_vm9 = vmor %vm1138_vm7, %vm1139_vm8 }
  0xfd   : > { %v1461_v38 = vmul.f32 %v1429_v35, %v2986_v48  ;;  %v1526_v12 = vmul.f32 %v1494_v57, %v2977_v62  ;;  %v3120_v54 = vadd.f32 %v2682_v40, %v533_v19  ;;  %v2477_v49 = vpop.eup %2476  ;;  %v1406_v24 = vadd.f32 0.2548296, %v1374_v60  ;;  %2383 = vmatmul.msk.bf16.vlgmr.msrb.gmra.mxu3 %vm400_vm0, %v1830_v23 }
  0xfe   : > { %v1247_v36 = vmul.f32 %v1215_v43, %v3097_v46  ;;  %v1136_v10 = vmul.f32 %v2473_v2, %v1135_v25  ;;  %v640_v44 = vmul.f32 0.3275911, %v3115_v7  ;;  %v1693_v26 = vsub.f32 0.0, %v1629_v28  ;;  %2423 = vmatpush.bf16.msra.mxu3 %v2847_v1 }
  0xff   : > { %v1334_v32 = vmul.f32 %v1302_v61, %v3089_v13  ;;  %v1145_v48 = vor.u32 1.1754944e-38, %v1144_v22  ;;  %v3136_v37 = vmul.f32 0.70710677, %v3120_v54  ;;  %v1471_v35 = vsub.f32 0.0, %v2980_v34  ;;  %v475_v22 = vpop.f32.mrf.mxu0 }
 0x100   : > { %v1137_v57 = vadd.f32 %v2473_v2, %v1136_v10  ;;  %vm3139_vm10 = vcmp.eq.f32.partialorder %v1142_v15, 8.507059e+37  ;;  %v3143_v60 = vadd.f32 1.0, %v640_v44  ;;  %v1748_v56 = vsel %vm1684_vm3, %v1652_v59, %v1716_v5 }
 0x101   : > { %v3149_v0 = vmul.f32 0.5, %v2827_v21  ;;  %v1621_v29 = vmul.f32 %v2475_v55, %v1461_v38  ;;  %v3152_v43 = vand.u32 2147483647, %v3136_v37  ;;  %v1438_v15 = vmul.f32 %v1406_v24, %v3008_v6 }
 0x102   : > { %v1279_v61 = vadd.f32 1.4214138, %v1247_v36  ;;  %v1141_v25 = vsel %vm3131_vm9, %v2473_v2, %v1137_v57  ;;  %2478 = vrcp.f32 %v3143_v60  ;;  %v3164_v3 = vmul.f32 %v3056_v47, %v2865_v8  ;;  %2424 = vmatpush.bf16.msra.mxu3 %v2946_v14 }
 0x103   : > { %v1366_v21 = vadd.f32 -0.28449672, %v1334_v32  ;;  %v1586_v1 = vmul.f32 1.442695, %v1526_v12  ;;  %v3168_v6 = vsel %vm3139_vm10, %v1145_v48, %v1141_v25  ;;  %v1725_v2 = vsel %vm1661_vm6, %v1629_v28, %v1693_v26 }
 0x104   : > { %v1503_v59 = vmul.f32 %v1471_v35, %v2980_v34  ;;  %v1207_v19 = vmul.f32 1.0614054, %v3168_v6  ;;  %v3175_v42 = vadd.f32 %v2682_v40, %v475_v22  ;;  %v1780_v8 = vadd.f32 1.0, %v1748_v56  ;;  %v535_v22 = vpop.f32.mrf.mxu3 }
 0x105   : > { %vm1685_vm11 = vcmp.ge.f32.partialorder %v2859_v20, 0.0  ;;  %v3180_v4 = vmul.f32 0.5, %v2954_v41  ;;  %v1495_v23 = vsub.f32 0.0, %v3047_v51  ;;  %v664_v53 = vmul.f32 0.3275911, %v3152_v43 }
 0x106   : > { %v1653_v47 = vsub.f32 1.0, %v1621_v29  ;;  %v3184_v28 = vmul.f32 %v2477_v49, %v1438_v15  ;;  %v1311_v34 = vmul.f32 %v1279_v61, %v3097_v46  ;;  %v1239_v55 = vadd.f32 -1.4531521, %v1207_v19  ;;  %v3227_v20 = vld [vmem:[%s4182_s3] ss:$0 sm:$0xff] }
 0x107   : > { %v1757_v40 = vadd.f32 1.0, %v1725_v2  ;;  %v3188_v5 = vmul.f32 0.5, %v2941_v27  ;;  %v1398_v14 = vmul.f32 %v1366_v21, %v3089_v13  ;;  %v3191_v38 = vadd.f32 1.0, %v664_v53 }
 0x108   : > { %v2479_v41 = vpop.eup %2478  ;;  %2480 = vpow2.f32 %v1586_v1  ;;  %v1540_v12 = vmul.f32 1.442695, %v1503_v59  ;;  %v1271_v52 = vmul.f32 %v1239_v55, %v3168_v6  ;;  %v3195_v24 = vmul.f32 0.70710677, %v3175_v42 }
 0x109   : > { %v3198_v49 = vmul.f32 %v1780_v8, %v2925_v11  ;;  %v1527_v36 = vmul.f32 %v1495_v23, %v3047_v51  ;;  %v789_v27 = vmul.f32 %v2479_v41, %v3143_v60  ;;  %2482 = vrcp.f32 %v3191_v38 }
 0x10a   : > { %v1717_v10 = vsub.f32 0.0, %v1653_v47  ;;  %v1630_v44 = vsub.f32 1.0, %v3184_v28  ;;  %v1343_v26 = vadd.f32 -0.28449672, %v1311_v34  ;;  %v1303_v32 = vadd.f32 1.4214138, %v1271_v52 }
 0x10b   : > { %v3205_v62 = vmul.f32 %v1757_v40, %v2915_v17  ;;  %v1430_v48 = vadd.f32 0.2548296, %v1398_v14  ;;  %v790_v35 = vsub.f32 1.0, %v789_v27  ;;  %v797_v57 = vand.u32 2147483647, %v3143_v60  ;;  %v478_v14 = vpop.f32.mrf.mxu0 }
 0x10c   : > { %vm1662_vm12 = vcmp.ge.f32.partialorder %v2884_v58, 0.0  ;;  %2484 = vpow2.f32 %v1540_v12  ;;  %v1335_v11 = vmul.f32 %v1303_v32, %v3168_v6  ;;  %v799_v51 = vand.u32 2147483648, %v3143_v60 }
 0x10d   : > { %v3212_v39 = vand.u32 2147483647, %v3195_v24  ;;  %v1588_v56 = vmul.f32 1.442695, %v1527_v36  ;;  %v3215_v29 = vmul.f32 0.5, %v3084_v18  ;;  %v791_v17 = vmul.f32 %v2479_v41, %v790_v35 }
 0x10e   : > { %vm794_vm13 = vweird.f32 %v2479_v41  ;;  %v2481_v15 = vpop.eup %2480  ;;  %v1749_v61 = vsel %vm1685_vm11, %v1653_v47, %v1717_v10  ;;  %v1694_v25 = vsub.f32 0.0, %v1630_v44  ;;  %v1375_v21 = vmul.f32 %v1343_v26, %v3097_v46 }
 0x10f   : > { %vm793_vm14 = vweird.f32 %v3143_v60  ;;  %v2483_v1 = vpop.eup %2482  ;;  %v1462_v2 = vmul.f32 %v1430_v48, %v3089_v13  ;;  %v792_v59 = vadd.f32 %v2479_v41, %v791_v17  ;;  %vm798_vm15 = vcmp.eq.f32.partialorder %v797_v57, 8.507059e+37 }
 0x110   : > { %v641_v18 = vmul.f32 0.3275911, %v3212_v39  ;;  %v1367_v19 = vadd.f32 -0.28449672, %v1335_v11  ;;  %vm795_vm1 = vmor %vm793_vm14, %vm794_vm13  ;;  %v800_v8 = vor.u32 1.1754944e-38, %v799_v51  ;;  %v1149_v23 = vmul.f32 %v2483_v1, %v3191_v38 }
 0x111   : > { %v3230_v53 = vadd.f32 %v3227_v20, %v535_v22  ;;  %v796_v60 = vsel %vm795_vm1, %v2479_v41, %v792_v59  ;;  %vm1153_vm2 = vweird.f32 %v3191_v38  ;;  %v1159_v13 = vand.u32 2147483648, %v3191_v38 }
 0x112   : > { %v3234_v47 = vadd.f32 1.0, %v641_v18  ;;  %v2485_v28 = vpop.eup %2484  ;;  %v3236_v34 = vsel %vm798_vm15, %v800_v8, %v796_v60  ;;  %v1150_v55 = vsub.f32 1.0, %v1149_v23  ;;  %vm1154_vm3 = vweird.f32 %v2483_v1 }
 0x113   : > { %v1157_v40 = vand.u32 2147483647, %v3191_v38  ;;  %v1781_v12 = vadd.f32 1.0, %v1749_v61  ;;  %v1407_v52 = vadd.f32 0.2548296, %v1375_v21  ;;  %v1399_v41 = vmul.f32 %v1367_v19, %v3168_v6  ;;  %vm3247_vm4 = vmor %vm1153_vm2, %vm1154_vm3 }
 0x114   : > { %v1184_v36 = vmul.f32 1.0614054, %v3236_v34  ;;  %2486 = vrcp.f32 %v3234_v47  ;;  %v1472_v27 = vsub.f32 0.0, %v3115_v7  ;;  %v1151_v10 = vmul.f32 %v2483_v1, %v1150_v55 }
 0x115   : > { %2488 = vpow2.f32 %v1588_v56  ;;  %v1726_v26 = vsel %vm1662_vm12, %v1630_v44, %v1694_v25  ;;  %v1160_v35 = vor.u32 1.1754944e-38, %v1159_v13  ;;  %v3252_v57 = vmul.f32 0.70710677, %v3230_v53 }
 0x116   : > { %v1216_v32 = vadd.f32 -1.4531521, %v1184_v36  ;;  %v1622_v11 = vmul.f32 %v2481_v15, %v1462_v2  ;;  %v1152_v51 = vadd.f32 %v2483_v1, %v1151_v10  ;;  %vm1158_vm5 = vcmp.eq.f32.partialorder %v1157_v40, 8.507059e+37  ;;  %v1993_v10 = vld [vmem:[%s3073_s26 + $0x10] sm:$0xff] }
 0x117   : > { %v3255_v56 = vadd.f32 %v3227_v20, %v478_v14  ;;  %vm1686_vm6 = vcmp.ge.f32.partialorder %v2959_v45, 0.0  ;;  %v1439_v58 = vmul.f32 %v1407_v52, %v3097_v46  ;;  %v3261_v44 = vand.u32 2147483647, %v3252_v57  ;;  %v480_v14 = vpop.f32.mrf.mxu0 }
 0x118   : > { %v1248_v38 = vmul.f32 %v1216_v32, %v3236_v34  ;;  %v1818_v17 = vpack.c.bf16 %v3026_v16, %v3020_v50  ;;  %v1431_v22 = vadd.f32 0.2548296, %v1399_v41  ;;  %v1504_v15 = vmul.f32 %v1472_v27, %v3115_v7 }
 0x119   : > { %v1156_v61 = vsel %vm3247_vm4, %v2483_v1, %v1152_v51  ;;  %v1496_v25 = vsub.f32 0.0, %v3152_v43  ;;  %v3270_v2 = vmul.f32 0.5, %v3012_v63  ;;  %v665_v59 = vmul.f32 0.3275911, %v3261_v44 }
 0x11a   : > { %v2487_v21 = vpop.eup %2486  ;;  %v3272_v46 = vsel %vm1158_vm5, %v1160_v35, %v1156_v61  ;;  %v3276_v18 = vmul.f32 0.70710677, %v3255_v56  ;;  %2371 = vmatmul.msk.bf16.vlgmr.msra.gmra.mxu1 %vm400_vm0, %v1818_v17  ;;  %v3280_v16 = vmul.f32 %v1781_v12, %v3149_v0  ;;  %v1654_v7 = vsub.f32 1.0, %v1622_v11 }
 0x11b   : > { %v2489_v50 = vpop.eup %2488  ;;  %v1208_v1 = vmul.f32 1.0614054, %v3272_v46  ;;  %v804_v19 = vmul.f32 %v2487_v21, %v3234_v47  ;;  %v1758_v63 = vadd.f32 1.0, %v1726_v26  ;;  %v3284_v8 = vmul.f32 %v2485_v28, %v1439_v58 }
 0x11c   : > { %v1280_v23 = vadd.f32 1.4214138, %v1248_v38  ;;  %v3286_v60 = vadd.f32 1.0, %v665_v59  ;;  %v1463_v13 = vmul.f32 %v1431_v22, %v3168_v6  ;;  %v1542_v55 = vmul.f32 1.442695, %v1504_v15  ;;  %v1994_v6 = vld [vmem:[%s3073_s26 + $0x18] sm:$0xff] }
 0x11d   : > { %v1528_v40 = vmul.f32 %v1496_v25, %v3152_v43  ;;  %v805_v0 = vsub.f32 1.0, %v804_v19  ;;  %v1240_v12 = vadd.f32 -1.4531521, %v1208_v1  ;;  %v814_v52 = vand.u32 2147483648, %v3234_v47 }
 0x11e   : > { %2490 = vrcp.f32 %v3286_v60  ;;  %v3293_v28 = vand.u32 2147483647, %v3276_v18  ;;  %v1718_v36 = vsub.f32 0.0, %v1654_v7  ;;  %vm809_vm7 = vweird.f32 %v2487_v21 }
 0x11f   : > { %v806_v41 = vmul.f32 %v2487_v21, %v805_v0  ;;  %v812_v27 = vand.u32 2147483647, %v3234_v47  ;;  %v3299_v26 = vmul.f32 %v1758_v63, %v3030_v9  ;;  %v1631_v43 = vsub.f32 1.0, %v3284_v8 }
 0x120   : > { %vm1663_vm8 = vcmp.ge.f32.partialorder %v2972_v33, 0.0  ;;  %v1312_v32 = vmul.f32 %v1280_v23, %v3236_v34  ;;  %v3305_v48 = vmul.f32 0.5, %v3175_v42  ;;  %v3307_v35 = vmul.f32 %v2489_v50, %v1463_v13 }
 0x121   : > { %2492 = vpow2.f32 %v1542_v55  ;;  %v807_v11 = vadd.f32 %v2487_v21, %v806_v41  ;;  %vm808_vm9 = vweird.f32 %v3234_v47  ;;  %v1272_v51 = vmul.f32 %v1240_v12, %v3272_v46  ;;  %v483_v55 = vpop.f32.mrf.mxu0 }
 0x122   : > { %vm810_vm10 = vmor %vm808_vm9, %vm809_vm7  ;;  %v815_v9 = vor.u32 1.1754944e-38, %v814_v52  ;;  %v642_v58 = vmul.f32 0.3275911, %v3293_v28  ;;  %v2024_v38 = vpack.c.bf16 %v1994_v6, %v1993_v10  ;;  %v1750_v17 = vsel %vm1686_vm6, %v1654_v7, %v1718_v36 }
 0x123   : > { %v1590_v22 = vmul.f32 1.442695, %v1528_v40  ;;  %v811_v15 = vsel %vm810_vm10, %v2487_v21, %v807_v11  ;;  %vm813_vm11 = vcmp.eq.f32.partialorder %v812_v27, 8.507059e+37  ;;  %v1695_v61 = vsub.f32 0.0, %v1631_v43 }
 0x124   : > { %v2491_v42 = vpop.eup %2490  ;;  %v1344_v25 = vadd.f32 -0.28449672, %v1312_v32  ;;  %v3314_v59 = vsel %vm813_vm11, %v815_v9, %v811_v15  ;;  %v3316_v50 = vadd.f32 1.0, %v642_v58  ;;  %2396 = vmatmul.msk.bf16.gmra.mxu2 %vm400_vm0, %v2024_v38  ;;  %v1655_v47 = vsub.f32 1.0, %v3307_v35 }
 0x125   : > { %v1185_v1 = vmul.f32 1.0614054, %v3314_v59  ;;  %v1473_v19 = vsub.f32 0.0, %v3212_v39  ;;  %v1164_v45 = vmul.f32 %v2491_v42, %v3286_v60  ;;  %vm1687_vm12 = vcmp.ge.f32.partialorder %v3038_v31, 0.0 }
 0x126   : > { %v1304_v21 = vadd.f32 1.4214138, %v1272_v51  ;;  %vm1168_vm13 = vweird.f32 %v3286_v60  ;;  %v1174_v7 = vand.u32 2147483648, %v3286_v60  ;;  %2494 = vrcp.f32 %v3316_v50 }
 0x127   : > { %v2493_v63 = vpop.eup %2492  ;;  %v1217_v8 = vadd.f32 -1.4531521, %v1185_v1  ;;  %v1165_v23 = vsub.f32 1.0, %v1164_v45  ;;  %vm1169_vm14 = vweird.f32 %v2491_v42  ;;  %v1172_v13 = vand.u32 2147483647, %v3286_v60 }
 0x128   : > { %v1782_v40 = vadd.f32 1.0, %v1750_v17  ;;  %v1376_v0 = vmul.f32 %v1344_v25, %v3236_v34  ;;  %2496 = vpow2.f32 %v1590_v22  ;;  %v3330_v12 = vadd.f32 %v3227_v20, %v480_v14  ;;  %vm3342_vm15 = vmor %vm1168_vm13, %vm1169_vm14 }
 0x129   : > { %v1727_v52 = vsel %vm1663_vm8, %v1631_v43, %v1695_v61  ;;  %v1249_v36 = vmul.f32 %v1217_v8, %v3314_v59  ;;  %v1505_v41 = vmul.f32 %v1473_v19, %v3212_v39  ;;  %v1166_v27 = vmul.f32 %v2491_v42, %v1165_v23 }
 0x12a   : > { %v3337_v10 = vmul.f32 0.5, %v3120_v54  ;;  %v1336_v6 = vmul.f32 %v1304_v21, %v3272_v46  ;;  %v1175_v14 = vor.u32 1.1754944e-38, %v1174_v7  ;;  %v3347_v33 = vmul.f32 0.70710677, %v3330_v12 }
 0x12b   : > { %v1719_v43 = vsub.f32 0.0, %v1655_v47  ;;  %v1281_v35 = vadd.f32 1.4214138, %v1249_v36  ;;  %v1167_v11 = vadd.f32 %v2491_v42, %v1166_v27  ;;  %vm1173_vm1 = vcmp.eq.f32.partialorder %v1172_v13, 8.507059e+37 }
 0x12c   : > { %v2495_v39 = vpop.eup %2494  ;;  %v3350_v54 = vmul.f32 %v1782_v40, %v3188_v5  ;;  %v1759_v51 = vadd.f32 1.0, %v1727_v52  ;;  %v1408_v9 = vadd.f32 0.2548296, %v1376_v0  ;;  %v3353_v60 = vand.u32 2147483647, %v3347_v33 }
 0x12d   : > { %v1313_v58 = vmul.f32 %v1281_v35, %v3314_v59  ;;  %v1544_v38 = vmul.f32 1.442695, %v1505_v41  ;;  %v1171_v17 = vsel %vm3342_vm15, %v2491_v42, %v1167_v11  ;;  %v3359_v22 = vadd.f32 %v3227_v20, %v483_v55 }
 0x12e   : > { %v3361_v15 = vpop.eup %2496  ;;  %v1368_v61 = vadd.f32 -0.28449672, %v1336_v6  ;;  %v3363_v25 = vsel %vm1173_vm1, %v1175_v14, %v1171_v17  ;;  %v819_v5 = vmul.f32 %v2495_v39, %v3316_v50  ;;  %v643_v1 = vmul.f32 0.3275911, %v3353_v60 }
 0x12f   : > { %v1751_v19 = vsel %vm1687_vm12, %v1655_v47, %v1719_v43  ;;  %v1345_v45 = vadd.f32 -0.28449672, %v1313_v58  ;;  %v1209_v21 = vmul.f32 1.0614054, %v3363_v25  ;;  %v1497_v42 = vsub.f32 0.0, %v3261_v44  ;;  %v485_v47 = vpop.f32.mrf.mxu0 }
 0x130   : > { %v1440_v7 = vmul.f32 %v1408_v9, %v3236_v34  ;;  %v820_v8 = vsub.f32 1.0, %v819_v5  ;;  %v829_v23 = vand.u32 2147483648, %v3316_v50  ;;  %v3373_v13 = vadd.f32 1.0, %v643_v1  ;;  %v1995_v1 = vld [vmem:[%s3073_s26 + $0x20] sm:$0xff] }
 0x131   : > { %v1377_v55 = vmul.f32 %v1345_v45, %v3314_v59  ;;  %v1241_v40 = vadd.f32 -1.4531521, %v1209_v21  ;;  %v827_v0 = vand.u32 2147483647, %v3316_v50  ;;  %v3378_v31 = vmul.f32 0.70710677, %v3359_v22 }
 0x132   : > { %v1400_v52 = vmul.f32 %v1368_v61, %v3272_v46  ;;  %v821_v36 = vmul.f32 %v2495_v39, %v820_v8  ;;  %vm824_vm2 = vweird.f32 %v2495_v39  ;;  %2498 = vrcp.f32 %v3373_v13 }
 0x133   : > { %v1783_v34 = vadd.f32 1.0, %v1751_v19  ;;  %v1273_v41 = vmul.f32 %v1241_v40, %v3363_v25  ;;  %v1529_v27 = vmul.f32 %v1497_v42, %v3261_v44  ;;  %v1474_v6 = vsub.f32 0.0, %v3293_v28 }
 0x134   : > { %v3385_v32 = vmul.f32 %v2493_v63, %v1440_v7  ;;  %v822_v14 = vadd.f32 %v2495_v39, %v821_v36  ;;  %vm823_vm3 = vweird.f32 %v3316_v50  ;;  %v830_v43 = vor.u32 1.1754944e-38, %v829_v23 }
 0x135   : > { %v3389_v35 = vmul.f32 %v1759_v51, %v3180_v4  ;;  %v1409_v11 = vadd.f32 0.2548296, %v1377_v55  ;;  %v1305_v9 = vadd.f32 1.4214138, %v1273_v41  ;;  %vm825_vm4 = vmor %vm823_vm3, %vm824_vm2  ;;  %v3392_v58 = vand.u32 2147483647, %v3378_v31 }
 0x136   : > { %v1432_v44 = vadd.f32 0.2548296, %v1400_v52  ;;  %2500 = vpow2.f32 %v1544_v38  ;;  %v826_v17 = vsel %vm825_vm4, %v2495_v39, %v822_v14  ;;  %vm828_vm5 = vcmp.eq.f32.partialorder %v827_v0, 8.507059e+37  ;;  %v1996_v4 = vld [vmem:[%s3073_s26 + $0x28] sm:$0xff] }
 0x137   : > { %v1337_v63 = vmul.f32 %v1305_v9, %v3363_v25  ;;  %v1592_v61 = vmul.f32 1.442695, %v1529_v27  ;;  %v3395_v5 = vsel %vm828_vm5, %v830_v43, %v826_v17  ;;  %v644_v50 = vmul.f32 0.3275911, %v3392_v58 }
 0x138   : > { %v2499_v51 = vpop.eup %2498  ;;  %v3401_v19 = vmul.f32 %v1783_v34, %v3270_v2  ;;  %v1632_v45 = vsub.f32 1.0, %v3385_v32  ;;  %v1186_v21 = vmul.f32 1.0614054, %v3395_v5  ;;  %v1819_v39 = vpack.c.bf16 %v3205_v62, %v3164_v3 }
 0x139   : > { %vm1664_vm6 = vcmp.ge.f32.partialorder %v3100_v30, 0.0  ;;  %v1441_v38 = vmul.f32 %v1409_v11, %v3314_v59  ;;  %v1369_v42 = vadd.f32 -0.28449672, %v1337_v63  ;;  %v1506_v7 = vmul.f32 %v1474_v6, %v3293_v28  ;;  %v488_v59 = vpop.f32.mrf.mxu0 }
 0x13a   : > { %v834_v8 = vmul.f32 %v2499_v51, %v3373_v13  ;;  %v1464_v23 = vmul.f32 %v1432_v44, %v3272_v46  ;;  %v1218_v2 = vadd.f32 -1.4531521, %v1186_v21  ;;  %v3412_v55 = vadd.f32 1.0, %v644_v50  ;;  %2372 = vmatmul.msk.bf16.gmra.mxu1 %vm400_vm0, %v1819_v39 }
 0x13b   : > { %v2025_v40 = vpack.c.bf16 %v1996_v4, %v1995_v1  ;;  %v1401_v0 = vmul.f32 %v1369_v42, %v3363_v25  ;;  %2502 = vpow2.f32 %v1592_v61  ;;  %v842_v62 = vand.u32 2147483647, %v3373_v13 }
 0x13c   : > { %v835_v3 = vsub.f32 1.0, %v834_v8  ;;  %v2501_v52 = vpop.eup %2500  ;;  %v1250_v28 = vmul.f32 %v1218_v2, %v3395_v5  ;;  %v844_v36 = vand.u32 2147483648, %v3373_v13  ;;  %2504 = vrcp.f32 %v3412_v55 }
 0x13d   : > { %2397 = vmatmul.msk.bf16.gmra.mxu2 %vm400_vm0, %v2025_v40  ;;  %v3422_v46 = vadd.f32 %v3227_v20, %v485_v47  ;;  %v1601_v34 = vmul.f32 %v2501_v52, %v1441_v38  ;;  %v1433_v41 = vadd.f32 0.2548296, %v1401_v0  ;;  %vm839_vm7 = vweird.f32 %v2499_v51 }
 0x13e   : > { %v836_v27 = vmul.f32 %v2499_v51, %v835_v3  ;;  %v1696_v6 = vsub.f32 0.0, %v1632_v45  ;;  %v3425_v32 = vmul.f32 %v3361_v15, %v1464_v23  ;;  %v1282_v14 = vadd.f32 1.4214138, %v1250_v28 }
 0x13f   : > { %v1546_v43 = vmul.f32 1.442695, %v1506_v7  ;;  %vm838_vm8 = vweird.f32 %v3373_v13  ;;  %vm3428_vm9 = vcmp.eq.f32.partialorder %v842_v62, 8.507059e+37  ;;  %v1475_v47 = vsub.f32 0.0, %v3353_v60 }
 0x140   : > { %v837_v11 = vadd.f32 %v2499_v51, %v836_v27  ;;  %vm1665_vm10 = vcmp.ge.f32.partialorder %v3195_v24, 0.0  ;;  %v1465_v44 = vmul.f32 %v1433_v41, %v3363_v25  ;;  %v1314_v17 = vmul.f32 %v1282_v14, %v3395_v5  ;;  %vm840_vm11 = vmor %vm838_vm8, %vm839_vm7 }
 0x141   : > { %v845_v15 = vor.u32 1.1754944e-38, %v844_v36  ;;  %v3437_v63 = vmul.f32 0.70710677, %v3422_v46  ;;  %v2503_v61 = vpop.eup %2502  ;;  %v1633_v50 = vsub.f32 1.0, %v1601_v34  ;;  %v1831_v1 = vpack.c.bf16 %v3280_v16, %v3198_v49  ;;  %v490_v3 = vpop.f32.mrf.mxu0 }
 0x142   : > { %v841_v13 = vsel %vm840_vm11, %v2499_v51, %v837_v11  ;;  %v3442_v4 = vadd.f32 %v3227_v20, %v488_v59  ;;  %v2505_v21 = vpop.eup %2504  ;;  %v1728_v25 = vsel %vm1664_vm6, %v1632_v45, %v1696_v6  ;;  %2506 = vpow2.f32 %v1546_v43 }
 0x143   : > { %v3448_v39 = vsel %vm3428_vm9, %v845_v15, %v841_v13  ;;  %v3451_v38 = vand.u32 2147483647, %v3437_v63  ;;  %v1656_v51 = vsub.f32 1.0, %v3425_v32  ;;  %v1507_v49 = vmul.f32 %v1475_v47, %v3353_v60  ;;  %2384 = vmatmul.msk.bf16.gmra.mxu3 %vm400_vm0, %v1831_v1 }
 0x144   : > { %v1187_v42 = vmul.f32 1.0614054, %v3448_v39  ;;  %v849_v16 = vmul.f32 %v2505_v21, %v3412_v55  ;;  %vm1688_vm12 = vcmp.ge.f32.partialorder %v3136_v37, 0.0  ;;  %v1625_v30 = vmul.f32 %v2503_v61, %v1465_v44 }
 0x145   : > { %v1346_v45 = vadd.f32 -0.28449672, %v1314_v17  ;;  %v1476_v7 = vsub.f32 0.0, %v3392_v58  ;;  %v645_v8 = vmul.f32 0.3275911, %v3451_v38  ;;  %v1697_v23 = vsub.f32 0.0, %v1633_v50 }
 0x146   : > { %v1219_v2 = vadd.f32 -1.4531521, %v1187_v42  ;;  %v850_v40 = vsub.f32 1.0, %v849_v16  ;;  %v3462_v0 = vmul.f32 0.70710677, %v3442_v4  ;;  %v859_v62 = vand.u32 2147483648, %v3412_v55 }
 0x147   : > { %v857_v60 = vand.u32 2147483647, %v3412_v55  ;;  %v3466_v59 = vadd.f32 1.0, %v645_v8  ;;  %v1820_v52 = vpack.c.bf16 %v3389_v35, %v3299_v26  ;;  %vm854_vm13 = vweird.f32 %v2505_v21  ;;  %v1998_v8 = vld [vmem:[%s3073_s26 + $0x38] sm:$0xff] }
 0x148   : > { %v1251_v28 = vmul.f32 %v1219_v2, %v3448_v39  ;;  %v851_v36 = vmul.f32 %v2505_v21, %v850_v40  ;;  %v3472_v34 = vand.u32 2147483647, %v3462_v0  ;;  %v3474_v41 = vpop.eup %2506  ;;  %v1657_v27 = vsub.f32 1.0, %v1625_v30 }
 0x149   : > { %v1548_v6 = vmul.f32 1.442695, %v1507_v49  ;;  %vm853_vm14 = vweird.f32 %v3412_v55  ;;  %2508 = vrcp.f32 %v3466_v59  ;;  %v1729_v32 = vsel %vm1665_vm10, %v1633_v50, %v1697_v23  ;;  %v493_v23 = vpop.f32.mrf.mxu0 }
 0x14a   : > { %v1378_v26 = vmul.f32 %v1346_v45, %v3395_v5  ;;  %v1283_v35 = vadd.f32 1.4214138, %v1251_v28  ;;  %v852_v14 = vadd.f32 %v2505_v21, %v851_v36  ;;  %v1760_v43 = vadd.f32 1.0, %v1728_v25  ;;  %vm855_vm15 = vmor %vm853_vm14, %vm854_vm13  ;;  %2373 = vmatmul.msk.bf16.gmra.mxu1 %vm400_vm0, %v1820_v52 }
 0x14b   : > { %v1720_v11 = vsub.f32 0.0, %v1656_v51  ;;  %v860_v9 = vor.u32 1.1754944e-38, %v859_v62  ;;  %v646_v47 = vmul.f32 0.3275911, %v3472_v34  ;;  %vm858_vm1 = vcmp.eq.f32.partialorder %v857_v60, 8.507059e+37 }
 0x14c   : > { %v1315_v44 = vmul.f32 %v1283_v35, %v3448_v39  ;;  %v856_v55 = vsel %vm855_vm15, %v2505_v21, %v852_v14  ;;  %v1508_v17 = vmul.f32 %v1476_v7, %v3392_v58  ;;  %v1761_v24 = vadd.f32 1.0, %v1729_v32  ;;  %v1997_v7 = vld [vmem:[%s3073_s26 + $0x30] sm:$0xff] }
 0x14d   : > { %v1721_v15 = vsub.f32 0.0, %v1657_v27  ;;  %v3485_v61 = vsel %vm858_vm1, %v860_v9, %v856_v55  ;;  %v3487_v50 = vadd.f32 1.0, %v646_v47  ;;  %v1410_v13 = vadd.f32 0.2548296, %v1378_v26 }
 0x14e   : > { %v1347_v1 = vadd.f32 -0.28449672, %v1315_v44  ;;  %2510 = vpow2.f32 %v1548_v6  ;;  %v1188_v25 = vmul.f32 1.0614054, %v3485_v61  ;;  %v3491_v49 = vmul.f32 %v1760_v43, %v3215_v29 }
 0x14f   : > { %v2509_v42 = vpop.eup %2508  ;;  %v3494_v21 = vmul.f32 0.5, %v3230_v53  ;;  %vm1689_vm2 = vcmp.ge.f32.partialorder %v3252_v57, 0.0  ;;  %2512 = vrcp.f32 %v3487_v50  ;;  %v1752_v58 = vsel %vm1688_vm12, %v1656_v51, %v1720_v11 }
 0x150   : > { %v1379_v16 = vmul.f32 %v1347_v1, %v3448_v39  ;;  %v1220_v30 = vadd.f32 -1.4531521, %v1188_v25  ;;  %v864_v45 = vmul.f32 %v2509_v42, %v3466_v59  ;;  %v1793_v29 = vmul.f32 %v1761_v24, %v3305_v48 }
 0x151   : > { %v1753_v2 = vsel %vm1689_vm2, %v1657_v27, %v1721_v15  ;;  %v3505_v53 = vmul.f32 1.442695, %v1508_v17  ;;  %v1477_v57 = vsub.f32 0.0, %v3451_v38  ;;  %v1442_v40 = vmul.f32 %v1410_v13, %v3395_v5 }
 0x152   : > { %v1411_v60 = vadd.f32 0.2548296, %v1379_v16  ;;  %v1252_v37 = vmul.f32 %v1220_v30, %v3485_v61  ;;  %v865_v51 = vsub.f32 1.0, %v864_v45  ;;  %v872_v62 = vand.u32 2147483647, %v3466_v59  ;;  %v495_v16 = vpop.f32.mrf.mxu0 }
 0x153   : > { %v874_v52 = vand.u32 2147483648, %v3466_v59  ;;  %v2026_v28 = vpack.c.bf16 %v1998_v8, %v1997_v7  ;;  %v3513_v36 = vadd.f32 %v3227_v20, %v490_v3  ;;  %vm869_vm3 = vweird.f32 %v2509_v42 }
 0x154   : > { %v2511_v48 = vpop.eup %2510  ;;  %v1443_v27 = vmul.f32 %v1411_v60, %v3448_v39  ;;  %v1284_v6 = vadd.f32 1.4214138, %v1252_v37  ;;  %v866_v32 = vmul.f32 %v2509_v42, %v865_v51  ;;  %v1785_v5 = vadd.f32 1.0, %v1753_v2 }
 0x155   : > { %v2513_v26 = vpop.eup %2512  ;;  %vm868_vm4 = vweird.f32 %v3466_v59  ;;  %2398 = vmatmul.msk.bf16.gmra.mxu2 %vm400_vm0, %v2026_v28  ;;  %v3519_v35 = vmul.f32 0.70710677, %v3513_v36  ;;  %v1832_v14 = vpack.c.bf16 %v3401_v19, %v3350_v54  ;;  %v1602_v9 = vmul.f32 %v3474_v41, %v1442_v40 }
 0x156   : > { %v1603_v3 = vmul.f32 %v2511_v48, %v1443_v27  ;;  %v1316_v43 = vmul.f32 %v1284_v6, %v3485_v61  ;;  %v867_v11 = vadd.f32 %v2509_v42, %v866_v32  ;;  %v879_v39 = vmul.f32 %v2513_v26, %v3487_v50  ;;  %vm870_vm5 = vmor %vm868_vm4, %vm869_vm3 }
 0x157   : > { %vm873_vm6 = vcmp.eq.f32.partialorder %v872_v62, 8.507059e+37  ;;  %v875_v47 = vor.u32 1.1754944e-38, %v874_v52  ;;  %v3527_v59 = vand.u32 2147483647, %v3519_v35  ;;  %2385 = vmatmul.msk.bf16.gmra.mxu3 %vm400_vm0, %v1832_v14  ;;  %v887_v54 = vand.u32 2147483647, %v3487_v50 }
 0x158   : > { %v1348_v44 = vadd.f32 -0.28449672, %v1316_v43  ;;  %v871_v55 = vsel %vm870_vm5, %v2509_v42, %v867_v11  ;;  %v880_v17 = vsub.f32 1.0, %v879_v39  ;;  %v889_v24 = vand.u32 2147483648, %v3487_v50  ;;  %v1999_v62 = vld [vmem:[%s3073_s26 + $0x40] sm:$0xff] }
 0x159   : > { %v3531_v19 = vsel %vm873_vm6, %v875_v47, %v871_v55  ;;  %v647_v15 = vmul.f32 0.3275911, %v3527_v59  ;;  %v3536_v41 = vadd.f32 %v3227_v20, %v493_v23  ;;  %v1635_v13 = vsub.f32 1.0, %v1603_v3 }
 0x15a   : > { %v1189_v1 = vmul.f32 1.0614054, %v3531_v19  ;;  %v881_v25 = vmul.f32 %v2513_v26, %v880_v17  ;;  %vm884_vm7 = vweird.f32 %v2513_v26  ;;  %v1634_v30 = vsub.f32 1.0, %v1602_v9  ;;  %v498_v9 = vpop.f32.mrf.mxu0 }
 0x15b   : > { %v1380_v42 = vmul.f32 %v1348_v44, %v3485_v61  ;;  %v3540_v45 = vadd.f32 1.0, %v647_v15  ;;  %v1821_v7 = vpack.c.bf16 %v1793_v29, %v3491_v49  ;;  %v1509_v2 = vmul.f32 %v1477_v57, %v3451_v38  ;;  %v2000_v38 = vld [vmem:[%s3073_s26 + $0x48] sm:$0xff] }
 0x15c   : > { %v1221_v8 = vadd.f32 -1.4531521, %v1189_v1  ;;  %v882_v23 = vadd.f32 %v2513_v26, %v881_v25  ;;  %vm883_vm8 = vweird.f32 %v3487_v50  ;;  %v1784_v40 = vadd.f32 1.0, %v1752_v58 }
 0x15d   : > { %vm885_vm9 = vmor %vm883_vm8, %vm884_vm7  ;;  %v890_v60 = vor.u32 1.1754944e-38, %v889_v24  ;;  %2514 = vrcp.f32 %v3540_v45  ;;  %v3547_v37 = vmul.f32 0.70710677, %v3536_v41  ;;  %2374 = vmatmul.msk.bf16.gmra.mxu1 %vm400_vm0, %v1821_v7  ;;  %v1699_v51 = vsub.f32 0.0, %v1635_v13 }
 0x15e   : > { %v1253_v49 = vmul.f32 %v1221_v8, %v3531_v19  ;;  %v886_v29 = vsel %vm885_vm9, %v2513_v26, %v882_v23  ;;  %vm888_vm10 = vcmp.eq.f32.partialorder %v887_v54, 8.507059e+37  ;;  %v1817_v57 = vmul.f32 %v1785_v5, %v3494_v21 }
 0x15f   : > { %v1698_v50 = vsub.f32 0.0, %v1634_v30  ;;  %v1412_v58 = vadd.f32 0.2548296, %v1380_v42  ;;  %v3554_v52 = vsel %vm888_vm10, %v890_v60, %v886_v29  ;;  %vm1667_vm11 = vcmp.ge.f32.partialorder %v3347_v33, 0.0 }
 0x160   : > { %2516 = vpow2.f32 %v3505_v53  ;;  %v1285_v28 = vadd.f32 1.4214138, %v1253_v49  ;;  %v1552_v48 = vmul.f32 1.442695, %v1509_v2  ;;  %v1816_v27 = vmul.f32 %v1784_v40, %v3337_v10 }
 0x161   : > { %v1190_v6 = vmul.f32 1.0614054, %v3554_v52  ;;  %v3561_v32 = vand.u32 2147483647, %v3547_v37  ;;  %v2027_v26 = vpack.c.bf16 %v2000_v38, %v1999_v62  ;;  %vm1666_vm12 = vcmp.ge.f32.partialorder %v3276_v18, 0.0 }
 0x162   : > { %v1731_v21 = vsel %vm1667_vm11, %v1635_v13, %v1699_v51  ;;  %v1317_v5 = vmul.f32 %v1285_v28, %v3531_v19  ;;  %v1730_v3 = vsel %vm1666_vm12, %v1634_v30, %v1698_v50  ;;  %v1444_v33 = vmul.f32 %v1412_v58, %v3485_v61 }
 0x163   : > { %v2515_v14 = vpop.eup %2514  ;;  %v648_v53 = vmul.f32 0.3275911, %v3561_v32  ;;  %v1833_v43 = vpack.c.bf16 %v1817_v57, %v1816_v27  ;;  %v546_v10 = vmul.f32 0.5, %v3255_v56  ;;  %2518 = vpow2.f32 %v1552_v48 }
 0x164   : > { %v1349_v11 = vadd.f32 -0.28449672, %v1317_v5  ;;  %v894_v39 = vmul.f32 %v2515_v14, %v3540_v45  ;;  %v1763_v47 = vadd.f32 1.0, %v1731_v21  ;;  %v1222_v44 = vadd.f32 -1.4531521, %v1190_v6  ;;  %v500_v21 = vpop.f32.mrf.mxu0 }
 0x165   : > { %v3569_v18 = vadd.f32 1.0, %v648_v53  ;;  %2399 = vmatmul.msk.bf16.gmra.mxu2 %vm400_vm0, %v2027_v26  ;;  %v3573_v55 = vadd.f32 %v3227_v20, %v495_v16  ;;  %v1762_v17 = vadd.f32 1.0, %v1730_v3  ;;  %v547_v54 = vmul.f32 0.5, %v3330_v12 }
 0x166   : > { %v2517_v61 = vpop.eup %2516  ;;  %v1381_v56 = vmul.f32 %v1349_v11, %v3531_v19  ;;  %v895_v24 = vsub.f32 1.0, %v894_v39  ;;  %v902_v13 = vand.u32 2147483647, %v3540_v45  ;;  %v904_v1 = vand.u32 2147483648, %v3540_v45 }
 0x167   : > { %v1604_v15 = vmul.f32 %v2517_v61, %v1444_v33  ;;  %2520 = vrcp.f32 %v3569_v18  ;;  %2386 = vmatmul.msk.bf16.gmra.mxu3 %vm400_vm0, %v1833_v43  ;;  %vm899_vm13 = vweird.f32 %v2515_v14  ;;  %v3582_v16 = vadd.f32 %v3227_v20, %v498_v9 }
 0x168   : > { %v1413_v25 = vadd.f32 0.2548296, %v1381_v56  ;;  %v896_v30 = vmul.f32 %v2515_v14, %v895_v24  ;;  %v1795_v42 = vmul.f32 %v1763_v47, %v547_v54  ;;  %v1254_v12 = vmul.f32 %v1222_v44, %v3554_v52 }
 0x169   : > { %v1478_v7 = vsub.f32 0.0, %v3472_v34  ;;  %v3587_v8 = vmul.f32 0.70710677, %v3573_v55  ;;  %v2519_v2 = vpop.eup %2518  ;;  %v1794_v23 = vmul.f32 %v1762_v17, %v546_v10  ;;  %vm898_vm14 = vweird.f32 %v3540_v45 }
 0x16a   : > { %v1445_v40 = vmul.f32 %v1413_v25, %v3531_v19  ;;  %v897_v60 = vadd.f32 %v2515_v14, %v896_v30  ;;  %v1636_v51 = vsub.f32 1.0, %v1604_v15  ;;  %vm900_vm15 = vmor %vm898_vm14, %vm899_vm13  ;;  %v905_v49 = vor.u32 1.1754944e-38, %v904_v1  ;;  %v2001_v15 = vld [vmem:[%s3073_s26 + $0x50] sm:$0xff] }
 0x16b   : > { %v1479_v29 = vsub.f32 0.0, %v3527_v59  ;;  %v3593_v62 = vand.u32 2147483647, %v3587_v8  ;;  %vm903_vm1 = vcmp.eq.f32.partialorder %v902_v13, 8.507059e+37  ;;  %v3596_v50 = vmul.f32 0.70710677, %v3582_v16 }
 0x16c   : > { %v1605_v38 = vmul.f32 %v2519_v2, %v1445_v40  ;;  %v901_v57 = vsel %vm900_vm15, %v2515_v14, %v897_v60  ;;  %v1286_v28 = vadd.f32 1.4214138, %v1254_v12  ;;  %v1822_v48 = vpack.c.bf16 %v1795_v42, %v1794_v23  ;;  %v2002_v13 = vld [vmem:[%s3073_s26 + $0x58] sm:$0xff] }
 0x16d   : > { %v2521_v58 = vpop.eup %2520  ;;  %v3598_v19 = vsel %vm903_vm1, %v905_v49, %v901_v57  ;;  %v649_v45 = vmul.f32 0.3275911, %v3593_v62  ;;  %vm1668_vm2 = vcmp.ge.f32.partialorder %v3378_v31, 0.0  ;;  %v1700_v5 = vsub.f32 0.0, %v1636_v51 }
 0x16e   : > { %v1637_v27 = vsub.f32 1.0, %v1605_v38  ;;  %v1191_v6 = vmul.f32 1.0614054, %v3598_v19  ;;  %v909_v26 = vmul.f32 %v2521_v58, %v3569_v18  ;;  %v1510_v14 = vmul.f32 %v1478_v7, %v3472_v34  ;;  %2375 = vmatmul.msk.bf16.gmra.mxu1 %vm400_vm0, %v1822_v48  ;;  %v2015_v48 = vld [vmem:[%s3073_s26 + $0xc0] sm:$0xff] }
 0x16f   : > { %v3605_v3 = vadd.f32 1.0, %v649_v45  ;;  %v3609_v10 = vand.u32 2147483647, %v3596_v50  ;;  %v1318_v11 = vmul.f32 %v1286_v28, %v3554_v52  ;;  %v1511_v39 = vmul.f32 %v1479_v29, %v3527_v59  ;;  %v503_v29 = vpop.f32.mrf.mxu0 }
 0x170   : > { %v1701_v33 = vsub.f32 0.0, %v1637_v27  ;;  %v1223_v53 = vadd.f32 -1.4531521, %v1191_v6  ;;  %v910_v43 = vsub.f32 1.0, %v909_v26  ;;  %v919_v9 = vand.u32 2147483648, %v3569_v18 }
 0x171   : > { %2522 = vrcp.f32 %v3605_v3  ;;  %vm914_vm3 = vweird.f32 %v2521_v58  ;;  %v917_v44 = vand.u32 2147483647, %v3569_v18  ;;  %v1732_v61 = vsel %vm1668_vm2, %v1636_v51, %v1700_v5 }
 0x172   : > { %v1255_v34 = vmul.f32 %v1223_v53, %v3598_v19  ;;  %v911_v47 = vmul.f32 %v2521_v58, %v910_v43  ;;  %vm1669_vm4 = vcmp.ge.f32.partialorder %v3437_v63, 0.0  ;;  %v1554_v17 = vmul.f32 1.442695, %v1510_v14 }
 0x173   : > { %vm913_vm5 = vweird.f32 %v3569_v18  ;;  %v1733_v59 = vsel %vm1669_vm4, %v1637_v27, %v1701_v33  ;;  %v650_v24 = vmul.f32 0.3275911, %v3609_v10  ;;  %v548_v1 = vmul.f32 0.5, %v3359_v22  ;;  %v2016_v27 = vld [vmem:[%s3073_s26 + $0xc8] sm:$0xff] }
 0x174   : > { %v1287_v54 = vadd.f32 1.4214138, %v1255_v34  ;;  %v912_v56 = vadd.f32 %v2521_v58, %v911_v47  ;;  %v1350_v25 = vadd.f32 -0.28449672, %v1318_v11  ;;  %v1556_v30 = vmul.f32 1.442695, %v1511_v39  ;;  %vm915_vm6 = vmor %vm913_vm5, %vm914_vm3 }
 0x175   : > { %v920_v31 = vor.u32 1.1754944e-38, %v919_v9  ;;  %vm918_vm7 = vcmp.eq.f32.partialorder %v917_v44, 8.507059e+37  ;;  %v3627_v12 = vadd.f32 1.0, %v650_v24  ;;  %v1764_v7 = vadd.f32 1.0, %v1732_v61 }
 0x176   : > { %v1319_v42 = vmul.f32 %v1287_v54, %v3598_v19  ;;  %v916_v63 = vsel %vm915_vm6, %v2521_v58, %v912_v56  ;;  %v1765_v2 = vadd.f32 1.0, %v1733_v59  ;;  %v2028_v40 = vpack.c.bf16 %v2002_v13, %v2001_v15 }
 0x177   : > { %v2523_v18 = vpop.eup %2522  ;;  %v3629_v23 = vsel %vm918_vm7, %v920_v31, %v916_v63  ;;  %v549_v22 = vmul.f32 0.5, %v3422_v46  ;;  %v3635_v38 = vmul.f32 0.5, %v3442_v4  ;;  %v1382_v57 = vmul.f32 %v1350_v25, %v3554_v52 }
 0x178   : > { %v1351_v60 = vadd.f32 -0.28449672, %v1319_v42  ;;  %v1192_v51 = vmul.f32 1.0614054, %v3629_v23  ;;  %v924_v49 = vmul.f32 %v2523_v18, %v3605_v3  ;;  %2524 = vrcp.f32 %v3627_v12  ;;  %2400 = vmatmul.msk.bf16.gmra.mxu2 %vm400_vm0, %v2028_v40  ;;  %v505_v40 = vpop.f32.mrf.mxu0 }
 0x179   : > { %v3641_v58 = vadd.f32 %v3227_v20, %v500_v21  ;;  %2526 = vpow2.f32 %v1554_v17  ;;  %v1796_v6 = vmul.f32 %v1764_v7, %v548_v1  ;;  %v1797_v26 = vmul.f32 %v1765_v2, %v549_v22  ;;  %v2003_v7 = vld [vmem:[%s3073_s26 + $0x60] sm:$0xff]  ;;  %v2004_v2 = vld [vmem:[%s3073_s26 + $0x68] sm:$0xff] }
 0x17a   : > { %v1383_v46 = vmul.f32 %v1351_v60, %v3598_v19  ;;  %v1224_v28 = vadd.f32 -1.4531521, %v1192_v51  ;;  %v925_v45 = vsub.f32 1.0, %v924_v49  ;;  %2528 = vpow2.f32 %v1556_v30 }
 0x17b   : > { %v934_v4 = vand.u32 2147483648, %v3605_v3  ;;  %vm929_vm8 = vweird.f32 %v2523_v18  ;;  %v932_v33 = vand.u32 2147483647, %v3605_v3  ;;  %v1414_v20 = vadd.f32 0.2548296, %v1382_v57 }
 0x17c   : > { %v1256_v5 = vmul.f32 %v1224_v28, %v3629_v23  ;;  %v926_v14 = vmul.f32 %v2523_v18, %v925_v45  ;;  %v1415_v21 = vadd.f32 0.2548296, %v1383_v46  ;;  %v3650_v53 = vmul.f32 0.70710677, %v3641_v58 }
 0x17d   : > { %v2035_v43 = vpack.c.bf16 %v2016_v27, %v2015_v48  ;;  %v1480_v11 = vsub.f32 0.0, %v3561_v32  ;;  %vm928_vm9 = vweird.f32 %v3605_v3  ;;  %v1481_v9 = vsub.f32 0.0, %v3593_v62  ;;  %v3663_v3 = vld [vmem:[%s4182_s3] ss:$0 sm:$0xff] }
 0x17e   : > { %v927_v39 = vadd.f32 %v2523_v18, %v926_v14  ;;  %v2525_v34 = vpop.eup %2524  ;;  %v1288_v47 = vadd.f32 1.4214138, %v1256_v5  ;;  %vm930_vm10 = vmor %vm928_vm9, %vm929_vm8  ;;  %v935_v44 = vor.u32 1.1754944e-38, %v934_v4  ;;  %v3656_v61 = vand.u32 2147483647, %v3650_v53 }
 0x17f   : > { %2407 = vmatmul.msk.bf16.vlgmr.msra.gmra.mxu3 %vm400_vm0, %v2035_v43  ;;  %v1823_v17 = vpack.c.bf16 %v1797_v26, %v1796_v6  ;;  %v2527_v59 = vpop.eup %2526  ;;  %vm933_vm11 = vcmp.eq.f32.partialorder %v932_v33, 8.507059e+37  ;;  %v939_v56 = vmul.f32 %v2525_v34, %v3627_v12  ;;  %v3666_v24 = vadd.f32 %v3663_v3, %v503_v29  ;;  %v2017_v6 = vld [vmem:[%s3073_s26 + $0xd0] sm:$0xff]  ;;  %v2018_v26 = vld [vmem:[%s3073_s26 + $0xd8] sm:$0xff] }
 0x180   : > { %v931_v54 = vsel %vm930_vm10, %v2523_v18, %v927_v39  ;;  %v2529_v15 = vpop.eup %2528  ;;  %v1446_v13 = vmul.f32 %v1414_v20, %v3554_v52  ;;  %v1447_v1 = vmul.f32 %v1415_v21, %v3598_v19  ;;  %v651_v30 = vmul.f32 0.3275911, %v3656_v61 }
 0x181   : > { %v3670_v25 = vsel %vm933_vm11, %v935_v44, %v931_v54  ;;  %2376 = vmatmul.msk.bf16.gmra.mxu1 %vm400_vm0, %v1823_v17  ;;  %v1512_v31 = vmul.f32 %v1480_v11, %v3561_v32  ;;  %v1513_v63 = vmul.f32 %v1481_v9, %v3593_v62  ;;  %v940_v18 = vsub.f32 1.0, %v939_v56 }
 0x182   : > { %v1193_v42 = vmul.f32 1.0614054, %v3670_v25  ;;  %v1320_v52 = vmul.f32 %v1288_v47, %v3629_v23  ;;  %v947_v19 = vand.u32 2147483647, %v3627_v12  ;;  %v949_v22 = vand.u32 2147483648, %v3627_v12 }
 0x183   : > { %v3682_v60 = vadd.f32 1.0, %v651_v30  ;;  %v941_v49 = vmul.f32 %v2525_v34, %v940_v18  ;;  %vm944_vm12 = vweird.f32 %v2525_v34  ;;  %v3685_v32 = vmul.f32 0.70710677, %v3666_v24 }
 0x184   : > { %v1225_v51 = vadd.f32 -1.4531521, %v1193_v42  ;;  %v1606_v62 = vmul.f32 %v2527_v59, %v1446_v13  ;;  %v1607_v29 = vmul.f32 %v2529_v15, %v1447_v1  ;;  %v2029_v57 = vpack.c.bf16 %v2004_v2, %v2003_v7  ;;  %v508_v15 = vpop.f32.mrf.mxu0 }
 0x185   : > { %2530 = vrcp.f32 %v3682_v60  ;;  %v1558_v46 = vmul.f32 1.442695, %v1512_v31  ;;  %v942_v45 = vadd.f32 %v2525_v34, %v941_v49  ;;  %vm943_vm13 = vweird.f32 %v3627_v12 }
 0x186   : > { %v1257_v28 = vmul.f32 %v1225_v51, %v3670_v25  ;;  %v1560_v48 = vmul.f32 1.442695, %v1513_v63  ;;  %vm945_vm14 = vmor %vm943_vm13, %vm944_vm12  ;;  %vm948_vm15 = vcmp.eq.f32.partialorder %v947_v19, 8.507059e+37  ;;  %v950_v27 = vor.u32 1.1754944e-38, %v949_v22 }
 0x187   : > { %vm1670_vm1 = vcmp.ge.f32.partialorder %v3462_v0, 0.0  ;;  %v1352_v4 = vadd.f32 -0.28449672, %v1320_v52  ;;  %v946_v14 = vsel %vm945_vm14, %v2525_v34, %v942_v45  ;;  %v3694_v33 = vand.u32 2147483647, %v3685_v32 }
 0x188   : > { %v1289_v5 = vadd.f32 1.4214138, %v1257_v28  ;;  %v1638_v20 = vsub.f32 1.0, %v1606_v62  ;;  %v1639_v21 = vsub.f32 1.0, %v1607_v29  ;;  %v3696_v43 = vsel %vm948_vm15, %v950_v27, %v946_v14  ;;  %2401 = vmatmul.msk.bf16.gmra.mxu2 %vm400_vm0, %v2029_v57 }
 0x189   : > { %v1482_v12 = vsub.f32 0.0, %v3609_v10  ;;  %2532 = vpow2.f32 %v1558_v46  ;;  %v1194_v39 = vmul.f32 1.0614054, %v3696_v43  ;;  %v652_v9 = vmul.f32 0.3275911, %v3694_v33 }
 0x18a   : > { %v1321_v11 = vmul.f32 %v1289_v5, %v3670_v25  ;;  %v3704_v34 = vmul.f32 0.5, %v3513_v36  ;;  %vm1671_vm2 = vcmp.ge.f32.partialorder %v3519_v35, 0.0  ;;  %2534 = vpow2.f32 %v1560_v48 }
 0x18b   : > { %v2531_v47 = vpop.eup %2530  ;;  %v2036_v44 = vpack.c.bf16 %v2018_v26, %v2017_v6  ;;  %v1384_v17 = vmul.f32 %v1352_v4, %v3629_v23  ;;  %v1226_v54 = vadd.f32 -1.4531521, %v1194_v39  ;;  %v1702_v13 = vsub.f32 0.0, %v1638_v20 }
 0x18c   : > { %v1353_v59 = vadd.f32 -0.28449672, %v1321_v11  ;;  %v954_v56 = vmul.f32 %v2531_v47, %v3682_v60  ;;  %v1703_v1 = vsub.f32 0.0, %v1639_v21  ;;  %v1514_v30 = vmul.f32 %v1482_v12, %v3609_v10 }
 0x18d   : > { %v3710_v31 = vadd.f32 1.0, %v652_v9  ;;  %v1258_v36 = vmul.f32 %v1226_v54, %v3696_v43  ;;  %v962_v63 = vand.u32 2147483647, %v3682_v60  ;;  %v3715_v18 = vadd.f32 %v3663_v3, %v505_v40 }
 0x18e   : > { %v955_v42 = vsub.f32 1.0, %v954_v56  ;;  %v1385_v7 = vmul.f32 %v1353_v59, %v3670_v25  ;;  %v964_v2 = vand.u32 2147483648, %v3682_v60  ;;  %v3722_v10 = vadd.f32 %v3663_v3, %v508_v15 }
 0x18f   : > { %2536 = vrcp.f32 %v3710_v31  ;;  %2408 = vmatmul.msk.bf16.gmra.mxu3 %vm400_vm0, %v2036_v44  ;;  %v2533_v52 = vpop.eup %2532  ;;  %v1416_v19 = vadd.f32 0.2548296, %v1384_v17  ;;  %v1290_v22 = vadd.f32 1.4214138, %v1258_v36  ;;  %vm959_vm3 = vweird.f32 %v2531_v47 }
 0x190   : > { %v956_v51 = vmul.f32 %v2531_v47, %v955_v42  ;;  %v2535_v49 = vpop.eup %2534  ;;  %v1734_v40 = vsel %vm1670_vm1, %v1638_v20, %v1702_v13  ;;  %v1562_v62 = vmul.f32 1.442695, %v1514_v30  ;;  %vm958_vm4 = vweird.f32 %v3682_v60  ;;  %v510_v42 = vpop.f32.mrf.mxu0 }
 0x191   : > { %v1483_v29 = vsub.f32 0.0, %v3656_v61  ;;  %v1735_v57 = vsel %vm1671_vm2, %v1639_v21, %v1703_v1  ;;  %v1322_v46 = vmul.f32 %v1290_v22, %v3696_v43  ;;  %v3732_v45 = vmul.f32 0.70710677, %v3715_v18  ;;  %vm960_vm5 = vmor %vm958_vm4, %vm959_vm3 }
 0x192   : > { %v957_v28 = vadd.f32 %v2531_v47, %v956_v51  ;;  %v1417_v48 = vadd.f32 0.2548296, %v1385_v7  ;;  %vm963_vm6 = vcmp.eq.f32.partialorder %v962_v63, 8.507059e+37  ;;  %v965_v27 = vor.u32 1.1754944e-38, %v964_v2 }
 0x193   : > { %v3735_v0 = vmul.f32 0.70710677, %v3722_v10  ;;  %v1448_v60 = vmul.f32 %v1416_v19, %v3629_v23  ;;  %v1354_v6 = vadd.f32 -0.28449672, %v1322_v46  ;;  %v3739_v35 = vand.u32 2147483647, %v3732_v45 }
 0x194   : > { %v961_v26 = vsel %vm960_vm5, %v2531_v47, %v957_v28  ;;  %v1766_v5 = vadd.f32 1.0, %v1734_v40  ;;  %2538 = vpow2.f32 %v1562_v62  ;;  %v1515_v11 = vmul.f32 %v1483_v29, %v3656_v61  ;;  %v2005_v46 = vld [vmem:[%s3073_s26 + $0x70] sm:$0xff]  ;;  %v2006_v28 = vld [vmem:[%s3073_s26 + $0x78] sm:$0xff] }
 0x195   : > { %v2537_v4 = vpop.eup %2536  ;;  %v3741_v14 = vsel %vm963_vm6, %v965_v27, %v961_v26  ;;  %v3744_v20 = vand.u32 2147483647, %v3735_v0  ;;  %v1386_v21 = vmul.f32 %v1354_v6, %v3696_v43  ;;  %v1767_v39 = vadd.f32 1.0, %v1735_v57 }
 0x196   : > { %v1195_v12 = vmul.f32 1.0614054, %v3741_v14  ;;  %v969_v23 = vmul.f32 %v2537_v4, %v3710_v31  ;;  %v1449_v9 = vmul.f32 %v1417_v48, %v3670_v25  ;;  %v653_v47 = vmul.f32 0.3275911, %v3739_v35  ;;  %v3778_v48 = vpop.f32.mrf.mxu2 }
 0x197   : > { %v654_v44 = vmul.f32 0.3275911, %v3744_v20  ;;  %v3753_v17 = vmul.f32 %v2533_v52, %v1448_v60  ;;  %v1484_v56 = vsub.f32 0.0, %v3694_v33  ;;  %v1418_v15 = vadd.f32 0.2548296, %v1386_v21 }
 0x198   : > { %v1227_v59 = vadd.f32 -1.4531521, %v1195_v12  ;;  %v970_v54 = vsub.f32 1.0, %v969_v23  ;;  %v979_v13 = vand.u32 2147483648, %v3710_v31  ;;  %v3757_v1 = vadd.f32 1.0, %v653_v47 }
 0x199   : > { %v3759_v61 = vadd.f32 1.0, %v654_v44  ;;  %vm974_vm7 = vweird.f32 %v2537_v4  ;;  %v977_v36 = vand.u32 2147483647, %v3710_v31  ;;  %v1799_v7 = vmul.f32 %v1767_v39, %v3704_v34 }
 0x19a   : > { %v1259_v30 = vmul.f32 %v1227_v59, %v3741_v14  ;;  %v971_v25 = vmul.f32 %v2537_v4, %v970_v54  ;;  %v2539_v63 = vpop.eup %2538  ;;  %v3764_v2 = vmul.f32 %v2535_v49, %v1449_v9  ;;  %v1564_v52 = vmul.f32 1.442695, %v1515_v11 }
 0x19b   : > { %2540 = vrcp.f32 %v3757_v1  ;;  %v1640_v19 = vsub.f32 1.0, %v3753_v17  ;;  %vm973_vm8 = vweird.f32 %v3710_v31  ;;  %v1450_v40 = vmul.f32 %v1418_v15, %v3696_v43 }
 0x19c   : > { %v1291_v22 = vadd.f32 1.4214138, %v1259_v30  ;;  %v972_v51 = vadd.f32 %v2537_v4, %v971_v25  ;;  %vm975_vm9 = vmor %vm973_vm8, %vm974_vm7  ;;  %v980_v62 = vor.u32 1.1754944e-38, %v979_v13  ;;  %v1516_v29 = vmul.f32 %v1484_v56, %v3694_v33  ;;  %v2019_v30 = vld [vmem:[%s3073_s26 + $0xe0] sm:$0xff]  ;;  %v2020_v25 = vld [vmem:[%s3073_s26 + $0xe8] sm:$0xff] }
 0x19d   : > { %2542 = vrcp.f32 %v3759_v61  ;;  %v3773_v34 = vmul.f32 0.5, %v3536_v41  ;;  %vm978_vm10 = vcmp.eq.f32.partialorder %v977_v36, 8.507059e+37  ;;  %v1798_v31 = vmul.f32 %v1766_v5, %v3635_v38  ;;  %v513_v36 = vpop.f32.mrf.mxu0 }
 0x19e   : > { %v1323_v49 = vmul.f32 %v1291_v22, %v3741_v14  ;;  %v976_v57 = vsel %vm975_vm9, %v2537_v4, %v972_v51  ;;  %v1641_v43 = vsub.f32 1.0, %v3764_v2  ;;  %v992_v33 = vand.u32 2147483647, %v3757_v1 }
 0x19f   : > { %v3782_v27 = vsel %vm978_vm10, %v980_v62, %v976_v57  ;;  %v3787_v41 = vsub.f32 0.0, %v1640_v19  ;;  %2544 = vpow2.f32 %v1564_v52  ;;  %v3790_v4 = vmul.f32 %v2539_v63, %v1450_v40  ;;  %v3821_v57 = vpop.f32.mrf.mxu2 }
 0x1a0   : > { %v1355_v60 = vadd.f32 -0.28449672, %v1323_v49  ;;  %v1196_v6 = vmul.f32 1.0614054, %v3782_v27  ;;  %v3792_v21 = vmul.f32 1.442695, %v1516_v29  ;;  %v1824_v38 = vpack.c.bf16 %v1799_v7, %v1798_v31  ;;  %v3819_v49 = vpop.f32.mrf.mxu1 }
 0x1a1   : > { %v2541_v26 = vpop.eup %2540  ;;  %v2030_v5 = vpack.c.bf16 %v2006_v28, %v2005_v46  ;;  %v1485_v39 = vsub.f32 0.0, %v3739_v35  ;;  %vm1673_vm11 = vcmp.ge.f32.partialorder %v3587_v8, 0.0  ;;  %v1705_v47 = vsub.f32 0.0, %v1641_v43 }
 0x1a2   : > { %v1387_v12 = vmul.f32 %v1355_v60, %v3741_v14  ;;  %v1228_v11 = vadd.f32 -1.4531521, %v1196_v6  ;;  %v984_v23 = vmul.f32 %v2541_v26, %v3757_v1  ;;  %vm988_vm12 = vweird.f32 %v3757_v1  ;;  %2377 = vmatmul.msk.bf16.gmra.mxu1 %vm400_vm0, %v1824_v38 }
 0x1a3   : > { %v2543_v9 = vpop.eup %2542  ;;  %vm3801_vm13 = vcmp.eq.f32.partialorder %v992_v33, 8.507059e+37  ;;  %v994_v59 = vand.u32 2147483648, %v3757_v1  ;;  %2402 = vmatmul.msk.bf16.gmra.mxu2 %vm400_vm0, %v2030_v5  ;;  %vm1672_vm14 = vcmp.ge.f32.partialorder %v3547_v37, 0.0  ;;  %v1642_v63 = vsub.f32 1.0, %v3790_v4 }
 0x1a4   : > { %v1419_v54 = vadd.f32 0.2548296, %v1387_v12  ;;  %v1260_v56 = vmul.f32 %v1228_v11, %v3782_v27  ;;  %v985_v15 = vsub.f32 1.0, %v984_v23  ;;  %v999_v13 = vmul.f32 %v2543_v9, %v3759_v61 }
 0x1a5   : > { %vm989_vm15 = vweird.f32 %v2541_v26  ;;  %v1009_v7 = vand.u32 2147483648, %v3759_v61  ;;  %v3816_v52 = vadd.f32 %v3663_v3, %v510_v42  ;;  %v2545_v22 = vpop.eup %2544  ;;  %v1007_v46 = vand.u32 2147483647, %v3759_v61 }
 0x1a6   : > { %v1451_v51 = vmul.f32 %v1419_v54, %v3741_v14  ;;  %v1292_v40 = vadd.f32 1.4214138, %v1260_v56  ;;  %v986_v62 = vmul.f32 %v2541_v26, %v985_v15  ;;  %v1000_v29 = vsub.f32 1.0, %v999_v13  ;;  %vm990_vm2 = vmor %vm988_vm12, %vm989_vm15 }
 0x1a7   : > { %v3825_v28 = vmul.f32 0.70710677, %v3816_v52  ;;  %v2037_v31 = vpack.c.bf16 %v2020_v25, %v2019_v30  ;;  %v3828_v33 = vadd.f32 %v3663_v3, %v513_v36  ;;  %vm1004_vm1 = vweird.f32 %v2543_v9 }
 0x1a8   : > { %v1324_v42 = vmul.f32 %v1292_v40, %v3782_v27  ;;  %v987_v60 = vadd.f32 %v2541_v26, %v986_v62  ;;  %v1001_v14 = vmul.f32 %v2543_v9, %v1000_v29  ;;  %v995_v6 = vor.u32 1.1754944e-38, %v994_v59 }
 0x1a9   : > { %vm1003_vm3 = vweird.f32 %v3759_v61  ;;  %v3836_v38 = vand.u32 2147483647, %v3825_v28  ;;  %2409 = vmatmul.msk.bf16.gmra.mxu3 %vm400_vm0, %v2037_v31  ;;  %v3840_v5 = vmul.f32 0.70710677, %v3828_v33  ;;  %v1611_v12 = vmul.f32 %v2545_v22, %v1451_v51 }
 0x1aa   : > { %v991_v11 = vsel %vm990_vm2, %v2541_v26, %v987_v60  ;;  %v1002_v23 = vadd.f32 %v2543_v9, %v1001_v14  ;;  %v1010_v54 = vor.u32 1.1754944e-38, %v1009_v7  ;;  %v1356_v56 = vadd.f32 -0.28449672, %v1324_v42  ;;  %vm1005_vm4 = vmor %vm1003_vm3, %vm1004_vm1 }
 0x1ab   : > { %v3844_v1 = vsel %vm3801_vm13, %v995_v6, %v991_v11  ;;  %v655_v61 = vmul.f32 0.3275911, %v3836_v38  ;;  %v3848_v59 = vand.u32 2147483647, %v3840_v5  ;;  %v1737_v15 = vsel %vm1673_vm11, %v1641_v43, %v1705_v47  ;;  %v2007_v11 = vld [vmem:[%s3073_s26 + $0x80] sm:$0xff] }
 0x1ac   : > { %v1197_v26 = vmul.f32 1.0614054, %v3844_v1  ;;  %v1006_v13 = vsel %vm1005_vm4, %v2543_v9, %v1002_v23  ;;  %vm1008_vm5 = vcmp.eq.f32.partialorder %v1007_v46, 8.507059e+37  ;;  %v1517_v30 = vmul.f32 %v1485_v39, %v3739_v35  ;;  %v3867_v9 = vpop.f32.mrf.mxu1  ;;  %v2008_v23 = vld [vmem:[%s3073_s26 + $0x88] sm:$0xff] }
 0x1ad   : > { %v3856_v44 = vsel %vm1008_vm5, %v1010_v54, %v1006_v13  ;;  %v3858_v25 = vadd.f32 1.0, %v655_v61  ;;  %v656_v36 = vmul.f32 0.3275911, %v3848_v59  ;;  %v1736_v2 = vsel %vm1672_vm14, %v1640_v19, %v3787_v41  ;;  %v3876_v41 = vpop.f32.mrf.mxu2 }
 0x1ae   : > { %v1643_v8 = vsub.f32 1.0, %v1611_v12  ;;  %v1229_v43 = vadd.f32 -1.4531521, %v1197_v26  ;;  %v1198_v47 = vmul.f32 1.0614054, %v3856_v44  ;;  %v1769_v7 = vadd.f32 1.0, %v1737_v15  ;;  %v515_v15 = vpop.f32.mrf.mxu0 }
 0x1af   : > { %v1706_v35 = vsub.f32 0.0, %v1642_v63  ;;  %v1388_v39 = vmul.f32 %v1356_v56, %v3782_v27  ;;  %2546 = vrcp.f32 %v3858_v25  ;;  %v553_v22 = vmul.f32 0.5, %v3573_v55 }
 0x1b0   : > { %v1261_v17 = vmul.f32 %v1229_v43, %v3844_v1  ;;  %v1230_v37 = vadd.f32 -1.4531521, %v1198_v47  ;;  %v1486_v19 = vsub.f32 0.0, %v3744_v20  ;;  %v1768_v51 = vadd.f32 1.0, %v1736_v2  ;;  %v2022_v2 = vld [vmem:[%s3073_s26 + $0xf8] sm:$0xff] }
 0x1b1   : > { %v3879_v40 = vmul.f32 0.5, %v3582_v16  ;;  %v1568_v62 = vmul.f32 1.442695, %v1517_v30  ;;  %v3881_v29 = vadd.f32 1.0, %v656_v36  ;;  %vm1674_vm6 = vcmp.ge.f32.partialorder %v3596_v50, 0.0  ;;  %v3888_v16 = vpop.f32.mrf.mxu3  ;;  %v2021_v36 = vld [vmem:[%s3073_s26 + $0xf0] sm:$0xff] }
 0x1b2   : > { %v1707_v46 = vsub.f32 0.0, %v1643_v8  ;;  %v1293_v55 = vadd.f32 1.4214138, %v1261_v17  ;;  %v1262_v31 = vmul.f32 %v1230_v37, %v3856_v44  ;;  %v1801_v42 = vmul.f32 %v1769_v7, %v553_v22  ;;  %v3926_v37 = vld [vmem:[%s4184_s5] ss:$0 sm:$0xff] }
 0x1b3   : > { %v1738_v60 = vsel %vm1674_vm6, %v1642_v63, %v1706_v35  ;;  %v1420_v14 = vadd.f32 0.2548296, %v1388_v39  ;;  %2548 = vpow2.f32 %v3792_v21  ;;  %v3891_v6 = vmul.f32 0.5, %v3641_v58 }
 0x1b4   : > { %v1325_v12 = vmul.f32 %v1293_v55, %v3844_v1  ;;  %v1518_v50 = vmul.f32 %v1486_v19, %v3744_v20  ;;  %2550 = vrcp.f32 %v3881_v29  ;;  %v1800_v63 = vmul.f32 %v1768_v51, %v3773_v34 }
 0x1b5   : > { %v2547_v4 = vpop.eup %2546  ;;  %vm1675_vm7 = vcmp.ge.f32.partialorder %v3650_v53, 0.0  ;;  %2552 = vpow2.f32 %v1568_v62  ;;  %v1294_v21 = vadd.f32 1.4214138, %v1262_v31  ;;  %v1770_v54 = vadd.f32 1.0, %v1738_v60  ;;  %v3928_v55 = vpop.f32.mrf.mxu2 }
 0x1b6   : > { %v1739_v58 = vsel %vm1675_vm7, %v1643_v8, %v1707_v46  ;;  %v1357_v56 = vadd.f32 -0.28449672, %v1325_v12  ;;  %v1014_v61 = vmul.f32 %v2547_v4, %v3858_v25  ;;  %v1452_v20 = vmul.f32 %v1420_v14, %v3782_v27  ;;  %v3912_v8 = vld [vmem:[%s4186_s7] ss:$0 sm:$0xff] }
 0x1b7   : > { %v1022_v26 = vand.u32 2147483647, %v3858_v25  ;;  %v1825_v13 = vpack.c.bf16 %v1801_v42, %v1800_v63  ;;  %v2031_v30 = vpack.c.bf16 %v2008_v23, %v2007_v11  ;;  %v3906_v43 = vmul.f32 1.442695, %v1518_v50  ;;  %v3914_v7 = vpop.f32.mrf.mxu1 }
 0x1b8   : > { %v1389_v34 = vmul.f32 %v1357_v56, %v3844_v1  ;;  %v1015_v53 = vsub.f32 1.0, %v1014_v61  ;;  %v1024_v47 = vand.u32 2147483648, %v3858_v25  ;;  %v1771_v35 = vadd.f32 1.0, %v1739_v58 }
 0x1b9   : > { %v2549_v27 = vpop.eup %2548  ;;  %v1326_v39 = vmul.f32 %v1294_v21, %v3856_v44  ;;  %v1487_v22 = vsub.f32 0.0, %v3836_v38  ;;  %2378 = vmatmul.msk.bf16.gmra.mxu1 %vm400_vm0, %v1825_v13  ;;  %2403 = vmatmul.msk.bf16.gmra.mxu2 %vm400_vm0, %v2031_v30  ;;  %v3921_v17 = vadd.f32 %v3663_v3, %v515_v15  ;;  %vm1019_vm8 = vweird.f32 %v2547_v4  ;;  %v3948_v58 = vpop.f32.mrf.mxu3 }
 0x1ba   : > { %v2551_v19 = vpop.eup %2550  ;;  %v1421_v51 = vadd.f32 0.2548296, %v1389_v34  ;;  %v1016_v62 = vmul.f32 %v2547_v4, %v1015_v53  ;;  %v2038_v46 = vpack.c.bf16 %v2022_v2, %v2021_v36  ;;  %v3930_v42 = vmul.f32 %v2549_v27, %v1452_v20  ;;  %v2010_v27 = vld [vmem:[%s3073_s26 + $0x98] sm:$0xff] }
 0x1bb   : > { %v2553_v31 = vpop.eup %2552  ;;  %vm1018_vm9 = vweird.f32 %v3858_v25  ;;  %vm3933_vm10 = vcmp.eq.f32.partialorder %v1022_v26, 8.507059e+37  ;;  %v1029_v60 = vmul.f32 %v2551_v19, %v3881_v29  ;;  %v1025_v50 = vor.u32 1.1754944e-38, %v1024_v47  ;;  %v2009_v47 = vld [vmem:[%s3073_s26 + $0x90] sm:$0xff] }
 0x1bc   : > { %v1453_v14 = vmul.f32 %v1421_v51, %v3844_v1  ;;  %v1017_v12 = vadd.f32 %v2547_v4, %v1016_v62  ;;  %v2117_v11 = vadd.f32 %v3912_v8, %v3778_v48  ;;  %2410 = vmatmul.msk.bf16.gmra.mxu3 %vm400_vm0, %v2038_v46  ;;  %vm1020_vm11 = vmor %vm1018_vm9, %vm1019_vm8  ;;  %v1037_v25 = vand.u32 2147483647, %v3881_v29 }
 0x1bd   : > { %v1030_v23 = vsub.f32 1.0, %v1029_v60  ;;  %v3944_v63 = vmul.f32 0.70710677, %v3921_v17  ;;  %v1912_v21 = vadd.f32 %v3926_v37, %v3819_v49  ;;  %v1358_v56 = vadd.f32 -0.28449672, %v1326_v39 }
 0x1be   : > { %v1613_v1 = vmul.f32 %v2553_v31, %v1453_v14  ;;  %v1021_v61 = vsel %vm1020_vm11, %v2547_v4, %v1017_v12  ;;  %v1039_v48 = vand.u32 2147483648, %v3881_v29  ;;  %vm1034_vm12 = vweird.f32 %v2551_v19 }
 0x1bf   : > { %v3953_v15 = vsel %vm3933_vm10, %v1025_v50, %v1021_v61  ;;  %v1031_v20 = vmul.f32 %v2551_v19, %v1030_v23  ;;  %v3956_v26 = vand.u32 2147483647, %v3944_v63  ;;  %v1802_v49 = vmul.f32 %v1770_v54, %v3879_v40  ;;  %v1918_v36 = vpop.f32.mrf.mxu1 }
 0x1c0   : > { %v1199_v4 = vmul.f32 1.0614054, %v3953_v15  ;;  %v1519_v13 = vmul.f32 %v1487_v22, %v3836_v38  ;;  %v2196_v30 = vadd.f32 %v2117_v11, %v1912_v21  ;;  %v1803_v2 = vmul.f32 %v1771_v35, %v3891_v6  ;;  %v2126_v31 = vpop.f32.mrf.mxu2 }
 0x1c1   : > { %v1032_v34 = vadd.f32 %v2551_v19, %v1031_v20  ;;  %vm1033_vm13 = vweird.f32 %v3881_v29  ;;  %v657_v53 = vmul.f32 0.3275911, %v3956_v26  ;;  %v1644_v39 = vsub.f32 1.0, %v3930_v42 }
 0x1c2   : > { %v1645_v51 = vsub.f32 1.0, %v1613_v1  ;;  %v1231_v40 = vadd.f32 -1.4531521, %v1199_v4  ;;  %vm1035_vm14 = vmor %vm1033_vm13, %vm1034_vm12  ;;  %v1040_v54 = vor.u32 1.1754944e-38, %v1039_v48  ;;  %2228 = vst.msk [vmem:[%s3962_s19] sm:$0xff] %vm400_vm0, %v2196_v30  ;;  %v1390_v38 = vmul.f32 %v1358_v56, %v3856_v44 }
 0x1c3   : > { %v1036_v22 = vsel %vm1035_vm14, %v2551_v19, %v1032_v34  ;;  %vm1038_vm15 = vcmp.eq.f32.partialorder %v1037_v25, 8.507059e+37  ;;  %v3977_v6 = vadd.f32 1.0, %v657_v53  ;;  %v1572_v35 = vmul.f32 1.442695, %v1519_v13 }
 0x1c4   : > { %v1263_v29 = vmul.f32 %v1231_v40, %v3953_v15  ;;  %v3980_v62 = vsel %vm1038_vm15, %v1040_v54, %v1036_v22  ;;  %v1914_v46 = vadd.f32 %v3926_v37, %v3867_v9  ;;  %v1826_v3 = vpack.c.bf16 %v1803_v2, %v1802_v49 }
 0x1c5   : > { %v1200_v42 = vmul.f32 1.0614054, %v3980_v62  ;;  %2554 = vrcp.f32 %v3977_v6  ;;  %v2032_v60 = vpack.c.bf16 %v2010_v27, %v2009_v47  ;;  %v1708_v14 = vsub.f32 0.0, %v1644_v39 }
 0x1c6   : > { %v1709_v19 = vsub.f32 0.0, %v1645_v51  ;;  %v1295_v12 = vadd.f32 1.4214138, %v1263_v29  ;;  %v2119_v50 = vadd.f32 %v3912_v8, %v3821_v57  ;;  %vm1676_vm1 = vcmp.ge.f32.partialorder %v3685_v32, 0.0  ;;  %v3990_v9 = vpop.f32.mrf.mxu3 }
 0x1c7   : > { %v1422_v11 = vadd.f32 0.2548296, %v1390_v38  ;;  %2556 = vpow2.f32 %v3906_v43  ;;  %v1232_v23 = vadd.f32 -1.4531521, %v1200_v42  ;;  %v1488_v21 = vsub.f32 0.0, %v3848_v59  ;;  %v1921_v61 = vpop.f32.mrf.mxu1 }
 0x1c8   : > { %v1327_v25 = vmul.f32 %v1295_v12, %v3953_v15  ;;  %v2197_v1 = vadd.f32 %v2119_v50, %v1914_v46  ;;  %v2122_v56 = vadd.f32 %v3912_v8, %v3876_v41  ;;  %v557_v57 = vmul.f32 0.5, %v3715_v18  ;;  %v2128_v54 = vpop.f32.mrf.mxu2 }
 0x1c9   : > { %vm1677_vm2 = vcmp.ge.f32.partialorder %v3732_v45, 0.0  ;;  %2558 = vpow2.f32 %v1572_v35  ;;  %v1264_v43 = vmul.f32 %v1232_v23, %v3980_v62  ;;  %2379 = vmatmul.msk.bf16.gmra.mxu1 %vm400_vm0, %v1826_v3  ;;  %2404 = vmatmul.msk.bf16.gmra.mxu2 %vm400_vm0, %v2032_v60  ;;  %v1740_v48 = vsel %vm1676_vm1, %v1644_v39, %v1708_v14 }
 0x1ca   : > { %v1741_v20 = vsel %vm1677_vm2, %v1645_v51, %v1709_v19  ;;  %v1359_v49 = vadd.f32 -0.28449672, %v1327_v25  ;;  %2229 = vst.msk [vmem:[%s3962_s19 + $0x8] sm:$0xff] %vm400_vm0, %v2197_v1  ;;  %v1917_v41 = vadd.f32 %v3926_v37, %v3914_v7  ;;  %v1454_v45 = vmul.f32 %v1422_v11, %v3856_v44 }
 0x1cb   : > { %v2555_v18 = vpop.eup %2554  ;;  %v1296_v4 = vadd.f32 1.4214138, %v1264_v43  ;;  %v2124_v13 = vadd.f32 %v3912_v8, %v3928_v55  ;;  %v1919_v30 = vadd.f32 %v3926_v37, %v1918_v36  ;;  %v1520_v2 = vmul.f32 %v1488_v21, %v3848_v59  ;;  %v2012_v21 = vld [vmem:[%s3073_s26 + $0xa8] sm:$0xff] }
 0x1cc   : > { %v1391_v32 = vmul.f32 %v1359_v49, %v3953_v15  ;;  %v1044_v34 = vmul.f32 %v2555_v18, %v3977_v6  ;;  %v2198_v53 = vadd.f32 %v2122_v56, %v1917_v41  ;;  %v1773_v7 = vadd.f32 1.0, %v1741_v20 }
 0x1cd   : > { %v2557_v47 = vpop.eup %2556  ;;  %v1328_v27 = vmul.f32 %v1296_v4, %v3980_v62  ;;  %v2199_v44 = vadd.f32 %v2124_v13, %v1919_v30  ;;  %v2127_v39 = vadd.f32 %v3912_v8, %v2126_v31  ;;  %v1772_v51 = vadd.f32 1.0, %v1740_v48 }
 0x1ce   : > { %v1423_v40 = vadd.f32 0.2548296, %v1391_v32  ;;  %v1045_v55 = vsub.f32 1.0, %v1044_v34  ;;  %2230 = vst.msk [vmem:[%s3962_s19 + $0x10] sm:$0xff] %vm400_vm0, %v2198_v53  ;;  %v1922_v36 = vadd.f32 %v3926_v37, %v1921_v61  ;;  %v1614_v38 = vmul.f32 %v2557_v47, %v1454_v45  ;;  %v4024_v3 = vpop.f32.mrf.mxu3 }
 0x1cf   : > { %v2559_v59 = vpop.eup %2558  ;;  %vm1049_vm3 = vweird.f32 %v2555_v18  ;;  %v1052_v22 = vand.u32 2147483647, %v3977_v6  ;;  %v1054_v29 = vand.u32 2147483648, %v3977_v6  ;;  %2231 = vst.msk [vmem:[%s3962_s19 + $0x18] sm:$0xff] %vm400_vm0, %v2199_v44  ;;  %v1360_v46 = vadd.f32 -0.28449672, %v1328_v27  ;;  %v1923_v60 = vpop.f32.mrf.mxu1 }
 0x1d0   : > { %v1455_v35 = vmul.f32 %v1423_v40, %v3953_v15  ;;  %v1046_v31 = vmul.f32 %v2555_v18, %v1045_v55  ;;  %v2200_v42 = vadd.f32 %v2127_v39, %v1922_v36  ;;  %v556_v14 = vmul.f32 0.5, %v3666_v24  ;;  %v2011_v15 = vld [vmem:[%s3073_s26 + $0xa0] sm:$0xff] }
 0x1d1   : > { %v1805_v19 = vmul.f32 %v1773_v7, %v557_v57  ;;  %v2129_v12 = vadd.f32 %v3912_v8, %v2128_v54  ;;  %v1924_v50 = vadd.f32 %v3926_v37, %v1923_v60  ;;  %v1574_v23 = vmul.f32 1.442695, %v1520_v2 }
 0x1d2   : > { %v1615_v11 = vmul.f32 %v2559_v59, %v1455_v35  ;;  %v1047_v25 = vadd.f32 %v2555_v18, %v1046_v31  ;;  %vm1048_vm4 = vweird.f32 %v3977_v6  ;;  %2232 = vst.msk [vmem:[%s3962_s19 + $0x20] sm:$0xff] %vm400_vm0, %v2200_v42  ;;  %v1804_v1 = vmul.f32 %v1772_v51, %v556_v14  ;;  %v2013_v31 = vld [vmem:[%s3073_s26 + $0xb0] sm:$0xff]  ;;  %v2014_v42 = vld [vmem:[%s3073_s26 + $0xb8] sm:$0xff] }
 0x1d3   : > { %v1646_v56 = vsub.f32 1.0, %v1614_v38  ;;  %vm1050_vm5 = vmor %vm1048_vm4, %vm1049_vm3  ;;  %v1055_v24 = vor.u32 1.1754944e-38, %v1054_v29  ;;  %v2201_v61 = vadd.f32 %v2129_v12, %v1924_v50  ;;  %v1392_v43 = vmul.f32 %v1360_v46, %v3980_v62 }
 0x1d4   : > { %v1647_v57 = vsub.f32 1.0, %v1615_v11  ;;  %v1051_v48 = vsel %vm1050_vm5, %v2555_v18, %v1047_v25  ;;  %vm1053_vm6 = vcmp.eq.f32.partialorder %v1052_v22, 8.507059e+37  ;;  %v1489_v49 = vsub.f32 0.0, %v3956_v26 }
 0x1d5   : > { %v1056_v20 = vsel %vm1053_vm6, %v1055_v24, %v1051_v48  ;;  %v1827_v6 = vpack.c.bf16 %v1805_v19, %v1804_v1  ;;  %v2033_v41 = vpack.c.bf16 %v2012_v21, %v2011_v15  ;;  %2233 = vst.msk [vmem:[%s3962_s19 + $0x28] sm:$0xff] %vm400_vm0, %v2201_v61  ;;  %v1710_v13 = vsub.f32 0.0, %v1646_v56 }
 0x1d6   : > { %v1711_v45 = vsub.f32 0.0, %v1647_v57  ;;  %v1201_v4 = vmul.f32 1.0614054, %v1056_v20  ;;  %v1424_v30 = vadd.f32 0.2548296, %v1392_v43  ;;  %vm1679_vm7 = vcmp.ge.f32.partialorder %v3825_v28, 0.0 }
 0x1d7   : > { %2560 = vpow2.f32 %v1574_v23  ;;  %v1521_v34 = vmul.f32 %v1489_v49, %v3956_v26  ;;  %vm1678_vm8 = vcmp.ge.f32.partialorder %v3735_v0, 0.0  ;;  %v559_v38 = vmul.f32 0.5, %v3816_v52 }
 0x1d8   : > { %v1233_v32 = vadd.f32 -1.4531521, %v1201_v4  ;;  %v2131_v2 = vpop.f32.mrf.mxu2  ;;  %v1743_v53 = vsel %vm1679_vm7, %v1647_v57, %v1711_v45  ;;  %v1742_v28 = vsel %vm1678_vm8, %v1646_v56, %v1710_v13  ;;  %v1456_v39 = vmul.f32 %v1424_v30, %v3980_v62 }
 0x1d9   : > { %2380 = vmatmul.msk.bf16.gmra.mxu1 %vm400_vm0, %v1827_v6  ;;  %2405 = vmatmul.msk.bf16.gmra.mxu2 %vm400_vm0, %v2033_v41  ;;  %v2132_v18 = vadd.f32 %v3912_v8, %v2131_v2  ;;  %v1775_v51 = vadd.f32 1.0, %v1743_v53  ;;  %v1576_v40 = vmul.f32 1.442695, %v1521_v34  ;;  %v1774_v59 = vadd.f32 1.0, %v1742_v28 }
 0x1da   : > { %v1265_v47 = vmul.f32 %v1233_v32, %v1056_v20  ;;  %v4044_v7 = vpop.f32.mrf.mxu3  ;;  %v1926_v27 = vpop.f32.mrf.mxu1  ;;  %v558_v35 = vmul.f32 0.5, %v3722_v10  ;;  %v2034_v25 = vpack.c.bf16 %v2014_v42, %v2013_v31  ;;  %vm1680_vm9 = vcmp.ge.f32.partialorder %v3840_v5, 0.0 }
 0x1db   : > { %v1927_v44 = vadd.f32 %v3926_v37, %v1926_v27  ;;  %v1807_v46 = vmul.f32 %v1775_v51, %v559_v38  ;;  %2562 = vpow2.f32 %v1576_v40  ;;  %vm1681_vm10 = vcmp.ge.f32.partialorder %v3944_v63, 0.0 }
 0x1dc   : > { %v1297_v26 = vadd.f32 1.4214138, %v1265_v47  ;;  %v1806_v14 = vmul.f32 %v1774_v59, %v558_v35  ;;  %v561_v4 = vmul.f32 0.5, %v3921_v17  ;;  %v560_v5 = vmul.f32 0.5, %v3828_v33 }
 0x1dd   : > { %v2202_v55 = vadd.f32 %v2132_v18, %v1927_v44  ;;  %v2561_v54 = vpop.eup %2560  ;;  %v1972_v40 = vadd.f32 %v3926_v37, %v3888_v16  ;;  %v1974_v35 = vadd.f32 %v3926_v37, %v3948_v58  ;;  %v1977_v31 = vadd.f32 %v3926_v37, %v3990_v9 }
 0x1de   : > { %v1329_v36 = vmul.f32 %v1297_v26, %v1056_v20  ;;  %v1616_v22 = vmul.f32 %v2561_v54, %v1456_v39  ;;  %v1828_v23 = vpack.c.bf16 %v1807_v46, %v1806_v14 }
 0x1df   : > { %2234 = vst.msk [vmem:[%s3962_s19 + $0x30] sm:$0xff] %vm400_vm0, %v2202_v55 }
 0x1e0   : > { %v1361_v0 = vadd.f32 -0.28449672, %v1329_v36  ;;  %v2133_v29 = vpop.f32.mrf.mxu2  ;;  %v1648_v52 = vsub.f32 1.0, %v1616_v22 }
 0x1e1   : > { %v2134_v19 = vadd.f32 %v3912_v8, %v2133_v29  ;;  %v2563_v21 = vpop.eup %2562 }
 0x1e2   : > { %v1393_v62 = vmul.f32 %v1361_v0, %v1056_v20  ;;  %v1928_v60 = vpop.f32.mrf.mxu1  ;;  %v4057_v11 = vpop.f32.mrf.mxu3  ;;  %v1712_v1 = vsub.f32 0.0, %v1648_v52 }
 0x1e3   : > { %v1929_v12 = vadd.f32 %v3926_v37, %v1928_v60 }
 0x1e4   : > { %v1425_v50 = vadd.f32 0.2548296, %v1393_v62  ;;  %v1744_v43 = vsel %vm1680_vm9, %v1648_v52, %v1712_v1 }
 0x1e5   : > { %v2203_v15 = vadd.f32 %v2134_v19, %v1929_v12  ;;  %v1776_v45 = vadd.f32 1.0, %v1744_v43  ;;  %v1979_v19 = vadd.f32 %v3926_v37, %v4024_v3 }
 0x1e6   : > { %v1457_v10 = vmul.f32 %v1425_v50, %v1056_v20 }
 0x1e7   : > { %2235 = vst.msk [vmem:[%s3962_s19 + $0x38] sm:$0xff] %vm400_vm0, %v2203_v15  ;;  %v1808_v34 = vmul.f32 %v1776_v45, %v560_v5 }
 0x1e8   : > { %v1617_v56 = vmul.f32 %v2563_v21, %v1457_v10  ;;  %v2136_v24 = vpop.f32.mrf.mxu2 }
 0x1e9   : > { %2381 = vmatmul.msk.bf16.gmra.mxu1 %vm400_vm0, %v1828_v23  ;;  %2406 = vmatmul.msk.bf16.gmra.mxu2 %vm400_vm0, %v2034_v25  ;;  %v2137_v57 = vadd.f32 %v3912_v8, %v2136_v24 }
 0x1ea   : > { %v1649_v61 = vsub.f32 1.0, %v1617_v56  ;;  %v4067_v41 = vpop.f32.mrf.mxu3 }
 0x1eb   : > { %v1931_v49 = vpop.f32.mrf.mxu1 }
 0x1ec   : > { %v1713_v48 = vsub.f32 0.0, %v1649_v61  ;;  %v1932_v20 = vadd.f32 %v3926_v37, %v1931_v49 }
 0x1ee   : > { %v1745_v6 = vsel %vm1681_vm10, %v1649_v61, %v1713_v48  ;;  %v2204_v30 = vadd.f32 %v2137_v57, %v1932_v20  ;;  %v1982_v61 = vadd.f32 %v3926_v37, %v4044_v7  ;;  %v1984_v20 = vadd.f32 %v3926_v37, %v4057_v11 }
 0x1ef   : > { %v1777_v13 = vadd.f32 1.0, %v1745_v6 }
 0x1f0   : > { %2236 = vst.msk [vmem:[%s3962_s19 + $0x40] sm:$0xff] %vm400_vm0, %v2204_v30  ;;  %v2138_v2 = vpop.f32.mrf.mxu2 }
 0x1f1   : > { %v1809_v32 = vmul.f32 %v1777_v13, %v561_v4  ;;  %v2139_v53 = vadd.f32 %v3912_v8, %v2138_v2 }
 0x1f2   : > { %v4075_v44 = vpop.f32.mrf.mxu3 }
 0x1f3   : > { %v1933_v18 = vpop.f32.mrf.mxu1  ;;  %v1829_v63 = vpack.c.bf16 %v1809_v32, %v1808_v34 }
 0x1f4   : > { %v1934_v47 = vadd.f32 %v3926_v37, %v1933_v18  ;;  %v1987_v18 = vadd.f32 %v3926_v37, %v4067_v41  ;;  %v1989_v41 = vadd.f32 %v3926_v37, %v4075_v44 }
 0x1f6   : > { %v2205_v27 = vadd.f32 %v2139_v53, %v1934_v47 }
 0x1f8   : > { %2237 = vst.msk [vmem:[%s3962_s19 + $0x48] sm:$0xff] %vm400_vm0, %v2205_v27 }
 0x1f9   : > { %2382 = vmatmul.msk.bf16.gmra.mxu1 %vm400_vm0, %v1829_v63 }
 0x1fb   : > { %v2141_v33 = vpop.f32.mrf.mxu2 }
 0x1fc   : > { %v2142_v17 = vadd.f32 %v3912_v8, %v2141_v33 }
 0x1fe   : > { %v1936_v28 = vpop.f32.mrf.mxu1 }
 0x1ff   : > { %v1937_v39 = vadd.f32 %v3926_v37, %v1936_v28 }
 0x201   : > { %v2206_v26 = vadd.f32 %v2142_v17, %v1937_v39 }
 0x202   : > { %v2176_v51 = vpop.f32.mrf.mxu3 }
 0x203   : > { %v2177_v55 = vadd.f32 %v3912_v8, %v2176_v51  ;;  %2238 = vst.msk [vmem:[%s3962_s19 + $0x50] sm:$0xff] %vm400_vm0, %v2206_v26  ;;  %v2143_v36 = vpop.f32.mrf.mxu2 }
 0x204   : > { %v2144_v38 = vadd.f32 %v3912_v8, %v2143_v36 }
 0x205   : > { %v2220_v54 = vadd.f32 %v2177_v55, %v1972_v40 }
 0x206   : > { %v1938_v59 = vpop.f32.mrf.mxu1 }
 0x207   : > { %2252 = vst.msk [vmem:[%s3962_s19 + $0xc0] sm:$0xff] %vm400_vm0, %v2220_v54  ;;  %v1939_v22 = vadd.f32 %v3926_v37, %v1938_v59 }
 0x209   : > { %v2207_v0 = vadd.f32 %v2144_v38, %v1939_v22 }
 0x20a   : > { %v2178_v29 = vpop.f32.mrf.mxu3 }
 0x20b   : > { %v2179_v16 = vadd.f32 %v3912_v8, %v2178_v29  ;;  %2239 = vst.msk [vmem:[%s3962_s19 + $0x58] sm:$0xff] %vm400_vm0, %v2207_v0  ;;  %v2146_v60 = vpop.f32.mrf.mxu2 }
 0x20c   : > { %v2147_v23 = vadd.f32 %v3912_v8, %v2146_v60 }
 0x20d   : > { %v2221_v46 = vadd.f32 %v2179_v16, %v1974_v35 }
 0x20f   : > { %2253 = vst.msk [vmem:[%s3962_s19 + $0xc8] sm:$0xff] %vm400_vm0, %v2221_v46 }
 0x212   : > { %v2181_v62 = vpop.f32.mrf.mxu3 }
 0x213   : > { %v2182_v42 = vadd.f32 %v3912_v8, %v2181_v62  ;;  %v2148_v50 = vpop.f32.mrf.mxu2 }
 0x214   : > { %v2149_v3 = vadd.f32 %v3912_v8, %v2148_v50 }
 0x215   : > { %v2222_v14 = vadd.f32 %v2182_v42, %v1977_v31 }
 0x217   : > { %2254 = vst.msk [vmem:[%s3962_s19 + $0xd0] sm:$0xff] %vm400_vm0, %v2222_v14 }
 0x21a   : > { %v2183_v58 = vpop.f32.mrf.mxu3 }
 0x21b   : > { %v2184_v12 = vadd.f32 %v3912_v8, %v2183_v58 }
 0x21d   : > { %v2223_v52 = vadd.f32 %v2184_v12, %v1979_v19 }
 0x21f   : > { %2255 = vst.msk [vmem:[%s3962_s19 + $0xd8] sm:$0xff] %vm400_vm0, %v2223_v52  ;;  %v1941_v9 = vpop.f32.mrf.mxu1 }
 0x220   : > { %v1942_v25 = vadd.f32 %v3926_v37, %v1941_v9 }
 0x222   : > { %v2208_v15 = vadd.f32 %v2147_v23, %v1942_v25 }
 0x224   : > { %2240 = vst.msk [vmem:[%s3962_s19 + $0x60] sm:$0xff] %vm400_vm0, %v2208_v15 }
 0x226   : > { %v2151_v21 = vpop.f32.mrf.mxu2 }
 0x227   : > { %v1943_v10 = vpop.f32.mrf.mxu1  ;;  %v2152_v6 = vadd.f32 %v3912_v8, %v2151_v21 }
 0x228   : > { %v1944_v1 = vadd.f32 %v3926_v37, %v1943_v10 }
 0x22a   : > { %v2209_v56 = vadd.f32 %v2149_v3, %v1944_v1 }
 0x22c   : > { %v2186_v24 = vpop.f32.mrf.mxu3  ;;  %2241 = vst.msk [vmem:[%s3962_s19 + $0x68] sm:$0xff] %vm400_vm0, %v2209_v56 }
 0x22d   : > { %v2187_v57 = vadd.f32 %v3912_v8, %v2186_v24 }
 0x22e   : > { %v2153_v48 = vpop.f32.mrf.mxu2 }
 0x22f   : > { %v2224_v43 = vadd.f32 %v2187_v57, %v1982_v61  ;;  %v2154_v2 = vadd.f32 %v3912_v8, %v2153_v48 }
 0x231   : > { %2256 = vst.msk [vmem:[%s3962_s19 + $0xe0] sm:$0xff] %vm400_vm0, %v2224_v43 }
 0x234   : > { %v2188_v49 = vpop.f32.mrf.mxu3 }
 0x235   : > { %v2189_v45 = vadd.f32 %v3912_v8, %v2188_v49 }
 0x236   : > { %v1946_v4 = vpop.f32.mrf.mxu1 }
 0x237   : > { %v1947_v7 = vadd.f32 %v3926_v37, %v1946_v4  ;;  %v2225_v13 = vadd.f32 %v2189_v45, %v1984_v20 }
 0x239   : > { %v2210_v30 = vadd.f32 %v2152_v6, %v1947_v7  ;;  %2257 = vst.msk [vmem:[%s3962_s19 + $0xe8] sm:$0xff] %vm400_vm0, %v2225_v13 }
 0x23b   : > { %2242 = vst.msk [vmem:[%s3962_s19 + $0x70] sm:$0xff] %vm400_vm0, %v2210_v30 }
 0x23c   : > { %v2156_v5 = vpop.f32.mrf.mxu2 }
 0x23d   : > { %v2157_v33 = vadd.f32 %v3912_v8, %v2156_v5 }
 0x23e   : > { %v1948_v32 = vpop.f32.mrf.mxu1 }
 0x23f   : > { %v1949_v11 = vadd.f32 %v3926_v37, %v1948_v32  ;;  %v2191_v34 = vpop.f32.mrf.mxu3 }
 0x240   : > { %v2192_v63 = vadd.f32 %v3912_v8, %v2191_v34 }
 0x241   : > { %v2211_v53 = vadd.f32 %v2154_v2, %v1949_v11 }
 0x242   : > { %v2226_v47 = vadd.f32 %v2192_v63, %v1987_v18 }
 0x243   : > { %2243 = vst.msk [vmem:[%s3962_s19 + $0x78] sm:$0xff] %vm400_vm0, %v2211_v53 }
 0x244   : > { %2258 = vst.msk [vmem:[%s3962_s19 + $0xf0] sm:$0xff] %vm400_vm0, %v2226_v47  ;;  %v2158_v27 = vpop.f32.mrf.mxu2 }
 0x245   : > { %v2159_v54 = vadd.f32 %v3912_v8, %v2158_v27 }
 0x246   : > { %v1951_v17 = vpop.f32.mrf.mxu1 }
 0x247   : > { %v1952_v28 = vadd.f32 %v3926_v37, %v1951_v17  ;;  %v2193_v39 = vpop.f32.mrf.mxu3 }
 0x248   : > { %v2194_v26 = vadd.f32 %v3912_v8, %v2193_v39 }
 0x249   : > { %v2212_v51 = vadd.f32 %v2157_v33, %v1952_v28 }
 0x24a   : > { %v2227_v40 = vadd.f32 %v2194_v26, %v1989_v41 }
 0x24b   : > { %2244 = vst.msk [vmem:[%s3962_s19 + $0x80] sm:$0xff] %vm400_vm0, %v2212_v51 }
 0x24c   : > { %2259 = vst.msk [vmem:[%s3962_s19 + $0xf8] sm:$0xff] %vm400_vm0, %v2227_v40  ;;  %v2161_v55 = vpop.f32.mrf.mxu2 }
 0x24d   : > { %v2162_v22 = vadd.f32 %v3912_v8, %v2161_v55 }
 0x24e   : > { %v1953_v36 = vpop.f32.mrf.mxu1 }
 0x24f   : > { %v1954_v59 = vadd.f32 %v3926_v37, %v1953_v36 }
 0x251   : > { %v2213_v38 = vadd.f32 %v2159_v54, %v1954_v59 }
 0x253   : > { %2245 = vst.msk [vmem:[%s3962_s19 + $0x88] sm:$0xff] %vm400_vm0, %v2213_v38 }
 0x254   : > { %v2163_v44 = vpop.f32.mrf.mxu2 }
 0x255   : > { %v2164_v62 = vadd.f32 %v3912_v8, %v2163_v44 }
 0x256   : > { %v1956_v0 = vpop.f32.mrf.mxu1 }
 0x257   : > { %v1957_v29 = vadd.f32 %v3926_v37, %v1956_v0 }
 0x259   : > { %v2214_v35 = vadd.f32 %v2162_v22, %v1957_v29 }
 0x25b   : > { %2246 = vst.msk [vmem:[%s3962_s19 + $0x90] sm:$0xff] %vm400_vm0, %v2214_v35 }
 0x25c   : > { %v2166_v46 = vpop.f32.mrf.mxu2 }
 0x25d   : > { %v2167_v60 = vadd.f32 %v3912_v8, %v2166_v46 }
 0x25e   : > { %v1958_v16 = vpop.f32.mrf.mxu1 }
 0x25f   : > { %v1959_v31 = vadd.f32 %v3926_v37, %v1958_v16 }
 0x261   : > { %v2215_v42 = vadd.f32 %v2164_v62, %v1959_v31 }
 0x263   : > { %2247 = vst.msk [vmem:[%s3962_s19 + $0x98] sm:$0xff] %vm400_vm0, %v2215_v42 }
 0x264   : > { %v2168_v19 = vpop.f32.mrf.mxu2 }
 0x265   : > { %v2169_v50 = vadd.f32 %v3912_v8, %v2168_v19 }
 0x266   : > { %v1961_v14 = vpop.f32.mrf.mxu1 }
 0x267   : > { %v1962_v58 = vadd.f32 %v3926_v37, %v1961_v14 }
 0x269   : > { %v2216_v12 = vadd.f32 %v2167_v60, %v1962_v58 }
 0x26b   : > { %2248 = vst.msk [vmem:[%s3962_s19 + $0xa0] sm:$0xff] %vm400_vm0, %v2216_v12 }
 0x26c   : > { %v2171_v25 = vpop.f32.mrf.mxu2 }
 0x26d   : > { %v2172_v15 = vadd.f32 %v3912_v8, %v2171_v25 }
 0x26e   : > { %v1963_v52 = vpop.f32.mrf.mxu1 }
 0x26f   : > { %v1964_v23 = vadd.f32 %v3926_v37, %v1963_v52 }
 0x271   : > { %v2217_v9 = vadd.f32 %v2169_v50, %v1964_v23 }
 0x273   : > { %2249 = vst.msk [vmem:[%s3962_s19 + $0xa8] sm:$0xff] %vm400_vm0, %v2217_v9 }
 0x274   : > { %v2173_v1 = vpop.f32.mrf.mxu2 }
 0x275   : > { %v2174_v24 = vadd.f32 %v3912_v8, %v2173_v1 }
 0x276   : > { %v1966_v10 = vpop.f32.mrf.mxu1 }
 0x277   : > { %v1967_v21 = vadd.f32 %v3926_v37, %v1966_v10 }
 0x279   : > { %v2218_v3 = vadd.f32 %v2172_v15, %v1967_v21 }
 0x27b   : > { %2250 = vst.msk [vmem:[%s3962_s19 + $0xb0] sm:$0xff] %vm400_vm0, %v2218_v3 }
 0x27e   : > { %v1968_v56 = vpop.f32.mrf.mxu1 }
 0x27f   : > { %v1969_v61 = vadd.f32 %v3926_v37, %v1968_v56 }
 0x281   : > { %v2219_v57 = vadd.f32 %v2174_v24, %v1969_v61 }
 0x283   : > { %2251 = vst.msk [vmem:[%s3962_s19 + $0xb8] sm:$0xff] %vm400_vm0, %v2219_v57 }
 0x284 PF: > { %s18_s27 = sadd.s32 1, %s2572_s27  }
 0x285   : > { %p15_p4 = scmp.ge.s32.totalorder %s18_s27, 7  }
 0x287   :  { %17 = sbr.rel (!%p15_p4) target bundleno = 1 (0x1), region = 85 }

// kernel: _lambda_.19
= control target key start
LH: loop header
LB: loop body
LE: loop exit
PB: predicated region body
PF: predicated region fallthrough
CT: control target
= control target key end

     0   :  { %s1375_s18 = smov 0   ;;  %s2332_s0 = inlined_call_operand.vmem [shape: f32[512,32], index: 0, kind: input, shape index: {}]   ;;  %s2333_s1 = inlined_call_operand.vmem [shape: bf16[32,128], index: 1, kind: input, shape index: {}]   ;;  %s2334_s2 = inlined_call_operand.vmem [shape: f32[1,128], index: 2, kind: input, shape index: {}]   ;;  %s2335_s3 = inlined_call_operand.vmem [shape: bf16[128,128], index: 3, kind: input, shape index: {}]   ;;  %s2336_s4 = inlined_call_operand.vmem [shape: f32[1,128], index: 4, kind: input, shape index: {}]   ;;  %s2337_s5 = inlined_call_operand.vmem [shape: f32[512,128], index: 5, kind: output, shape index: {}]  }
   0x1 LB: > { %s1184_s19 = sadd.s32 4294967295, %s1343_s18   ;;  %p1188_p0 = scmp.ge.s32.totalorder %s1343_s18, 1  ;;  %s1343_s18 = sphi %s1375_s18, %s15_s18  }
   0x2   : > { %p188_p1 = scmp.lt.s32.totalorder %s1343_s18, 5 }
   0x4   : > { %p189_p2 = pnand %p1188_p0, %p188_p1 }
   0x6   : > { %192 = sbr.rel (%p189_p2) target bundleno = 492 (0x1ec), region = 40 }
   0xb   : > { %v1244_v0 = vld [vmem:[%s2333_s1 + $0x8] sm:$0xff]  ;;  %s1189_s22 = sshll.u32 %s1184_s19, 4  ;;  %v1243_v1 = vld [vmem:[%s2333_s1] sm:$0xff]  ;;  %vm273_vm0 = vcmask 261120   ;;  %v1252_v29 = vld [vmem:[%s2335_s3 + $0x38] sm:$0xff] }
   0xc   : > { %p217_p3 = scmp.lt.s32.totalorder %s1189_s22, 63  ;;  %304 = vmatpush.bf16.msra.mxu0 %v1244_v0  ;;  %1253 = vmatpush.bf16.msra.mxu3 %v1244_v0  ;;  %v1426_v26 = vld [vmem:[%s2334_s2] ss:$0 sm:$0xff]  ;;  %v1251_v33 = vld [vmem:[%s2335_s3 + $0x30] sm:$0xff]  ;;  %v1250_v37 = vld [vmem:[%s2335_s3 + $0x28] sm:$0xff] }
   0xd   : > { %1063 = vmatpush.bf16.msra.mxu1 %v1252_v29  ;;  %1255 = vmatpush.bf16.msra.mxu2 %v1252_v29  ;;  %v1249_v44 = vld [vmem:[%s2335_s3 + $0x20] sm:$0xff]  ;;  %v1248_v50 = vld [vmem:[%s2335_s3 + $0x18] sm:$0xff]  ;;  %v1247_v60 = vld [vmem:[%s2335_s3 + $0x10] sm:$0xff] }
   0xe   : > { %s2505_s22 = smov (!%p217_p3, %s1189_s22), 63 }
   0xf   : > { %s1190_s25 = sshll.u32 %s2505_s22, 3 }
  0x10   : > { %305 = vmatpush.bf16.msra.mxu0 %v1243_v1  ;;  %s1397_s28 = scalar_lea.vmem %s2332_s0, %s1190_s25  ;;  %1254 = vmatpush.bf16.msra.mxu3 %v1243_v1  ;;  %s2311_s29 = scalar_lea.vmem %s2337_s5, %s1190_s25 }
  0x11   : > { %v229_v2 = vld [vmem:[%s1397_s28] sm:$0xff]  ;;  %v230_v3 = vld [vmem:[%s1397_s28 + $0x8] sm:$0xff]  ;;  %v239_v5 = vld [vmem:[%s1397_s28 + $0x50] sm:$0xff]  ;;  %1064 = vmatpush.bf16.msra.mxu1 %v1251_v33  ;;  %1256 = vmatpush.bf16.msra.mxu2 %v1251_v33 }
  0x12   : > { %v245_v4 = vpack.c.bf16 %v230_v3, %v229_v2  ;;  %v240_v6 = vld [vmem:[%s1397_s28 + $0x58] sm:$0xff]  ;;  %v231_v8 = vld [vmem:[%s1397_s28 + $0x10] sm:$0xff]  ;;  %v241_v10 = vld [vmem:[%s1397_s28 + $0x60] sm:$0xff] }
  0x13   : > { %v250_v7 = vpack.c.bf16 %v240_v6, %v239_v5  ;;  %v232_v9 = vld [vmem:[%s1397_s28 + $0x18] sm:$0xff]  ;;  %v242_v11 = vld [vmem:[%s1397_s28 + $0x68] sm:$0xff]  ;;  %v233_v14 = vld [vmem:[%s1397_s28 + $0x20] sm:$0xff] }
  0x14   : > { %1201 = vmatmul.msk.bf16.vlgmr.msra.gmra.mxu0 %vm273_vm0, %v245_v4  ;;  %v246_v12 = vpack.c.bf16 %v232_v9, %v231_v8  ;;  %v251_v13 = vpack.c.bf16 %v242_v11, %v241_v10  ;;  %v234_v15 = vld [vmem:[%s1397_s28 + $0x28] sm:$0xff]  ;;  %v243_v16 = vld [vmem:[%s1397_s28 + $0x70] sm:$0xff]  ;;  %v244_v17 = vld [vmem:[%s1397_s28 + $0x78] sm:$0xff] }
  0x15   : > { %1206 = vmatmul.msk.bf16.vlgmr.msra.gmra.mxu3 %vm273_vm0, %v250_v7  ;;  %v247_v18 = vpack.c.bf16 %v234_v15, %v233_v14  ;;  %v252_v19 = vpack.c.bf16 %v244_v17, %v243_v16  ;;  %v235_v20 = vld [vmem:[%s1397_s28 + $0x30] sm:$0xff]  ;;  %v236_v21 = vld [vmem:[%s1397_s28 + $0x38] sm:$0xff]  ;;  %v237_v23 = vld [vmem:[%s1397_s28 + $0x40] sm:$0xff]  ;;  %1065 = vmatpush.bf16.msra.mxu1 %v1250_v37 }
  0x16   : > { %v248_v22 = vpack.c.bf16 %v236_v21, %v235_v20  ;;  %v238_v24 = vld [vmem:[%s1397_s28 + $0x48] sm:$0xff]  ;;  %1257 = vmatpush.bf16.msra.mxu2 %v1250_v37  ;;  %v1245_v21 = vld [vmem:[%s2335_s3] sm:$0xff] }
  0x17   : > { %v249_v25 = vpack.c.bf16 %v238_v24, %v237_v23  ;;  %v1246_v6 = vld [vmem:[%s2335_s3 + $0x8] sm:$0xff] }
  0x19   : > { %1066 = vmatpush.bf16.msra.mxu1 %v1249_v44 }
  0x1a   : > { %1258 = vmatpush.bf16.msra.mxu2 %v1249_v44 }
  0x1d   : > { %1067 = vmatpush.bf16.msra.mxu1 %v1248_v50 }
  0x1e   : > { %1259 = vmatpush.bf16.msra.mxu2 %v1248_v50 }
  0x21   : > { %1068 = vmatpush.bf16.msra.mxu1 %v1247_v60 }
  0x22   : > { %1260 = vmatpush.bf16.msra.mxu2 %v1247_v60 }
  0x24   : > { %1202 = vmatmul.msk.bf16.gmra.mxu0 %vm273_vm0, %v246_v12 }
  0x25   : > { %1207 = vmatmul.msk.bf16.gmra.mxu3 %vm273_vm0, %v251_v13  ;;  %1069 = vmatpush.bf16.msra.mxu1 %v1246_v6 }
  0x26   : > { %1261 = vmatpush.bf16.msra.mxu2 %v1246_v6 }
  0x29   : > { %1070 = vmatpush.bf16.msra.mxu1 %v1245_v21 }
  0x2a   : > { %1262 = vmatpush.bf16.msra.mxu2 %v1245_v21 }
  0x34   : > { %1203 = vmatmul.msk.bf16.gmra.mxu0 %vm273_vm0, %v247_v18 }
  0x35   : > { %1208 = vmatmul.msk.bf16.gmra.mxu3 %vm273_vm0, %v252_v19 }
  0x44   : > { %1204 = vmatmul.msk.bf16.gmra.mxu0 %vm273_vm0, %v248_v22 }
  0x54   : > { %1205 = vmatmul.msk.bf16.gmra.mxu0 %vm273_vm0, %v249_v25 }
  0x91   : > { %v307_v27 = vpop.f32.mrf.mxu0 }
  0x92   : > { %v1429_v28 = vadd.f32 %v1426_v26, %v307_v27 }
  0x94   : > { %v1435_v31 = vmul.f32 0.70710677, %v1429_v28  ;;  %v1519_v17 = vmul.f32 0.5, %v1429_v28 }
  0x96   : > { %v379_v34 = vand.u32 2147483647, %v1435_v31 }
  0x98   : > { %v332_v30 = vpop.f32.mrf.mxu3  ;;  %v395_v38 = vmul.f32 0.3275911, %v379_v34  ;;  %v811_v54 = vsub.f32 0.0, %v379_v34 }
  0x99   : > { %v309_v32 = vpop.f32.mrf.mxu0  ;;  %v1442_v35 = vadd.f32 %v1426_v26, %v332_v30 }
  0x9a   : > { %v310_v36 = vadd.f32 %v1426_v26, %v309_v32  ;;  %v1459_v45 = vadd.f32 1.0, %v395_v38  ;;  %v827_v0 = vmul.f32 %v811_v54, %v379_v34 }
  0x9b   : > { %2375 = vst [vmem:[#allocation2_spill] sm:$0xff] %v1442_v35  ;;  %v1449_v40 = vmul.f32 0.70710677, %v1442_v35 }
  0x9c   : > { %v1454_v43 = vmul.f32 0.70710677, %v310_v36  ;;  %1273 = vrcp.f32 %v1459_v45  ;;  %v438_v11 = vand.u32 2147483648, %v1459_v45  ;;  %v843_v12 = vmul.f32 1.442695, %v827_v0 }
  0x9d   : > { %2376 = vst [vmem:[#allocation3_spill] sm:$0xff] %v1449_v40  ;;  %v389_v46 = vand.u32 2147483647, %v1449_v40  ;;  %v1521_v18 = vmul.f32 0.5, %v310_v36  ;;  %vm432_vm2 = vweird.f32 %v1459_v45  ;;  %v2396_v35 = vand.u32 2147483647, %v1459_v45 }
  0x9e   : > { %v380_v49 = vand.u32 2147483647, %v1454_v43  ;;  %v1529_v27 = vor.u32 1.1754944e-38, %v438_v11 }
  0x9f   : > { %v405_v51 = vmul.f32 0.3275911, %v389_v46  ;;  %v821_v10 = vsub.f32 0.0, %v389_v46  ;;  %vm1665_vm4 = vcmp.eq.f32.partialorder %v2396_v35, 8.507059e+37 }
  0xa0   : > { %v334_v41 = vpop.f32.mrf.mxu3  ;;  %v396_v57 = vmul.f32 0.3275911, %v380_v49  ;;  %v812_v61 = vsub.f32 0.0, %v380_v49 }
  0xa1   : > { %v312_v39 = vpop.f32.mrf.mxu0  ;;  %v1466_v48 = vadd.f32 %v1426_v26, %v334_v41  ;;  %v1480_v59 = vadd.f32 1.0, %v405_v51  ;;  %v837_v24 = vmul.f32 %v821_v10, %v389_v46 }
  0xa2   : > { %v1452_v42 = vadd.f32 %v1426_v26, %v312_v39  ;;  %v1485_v63 = vpop.eup %1273  ;;  %v1490_v2 = vadd.f32 1.0, %v396_v57  ;;  %v828_v8 = vmul.f32 %v812_v61, %v380_v49 }
  0xa3   : > { %2377 = vst [vmem:[#allocation4_spill] sm:$0xff] %v1466_v48  ;;  %v1475_v55 = vmul.f32 0.70710677, %v1466_v48  ;;  %1275 = vrcp.f32 %v1480_v59  ;;  %v428_v7 = vmul.f32 %v1485_v63, %v1459_v45  ;;  %v588_v37 = vand.u32 2147483648, %v1480_v59 }
  0xa4   : > { %v1463_v47 = vmul.f32 0.70710677, %v1452_v42  ;;  %1277 = vrcp.f32 %v1490_v2  ;;  %v845_v23 = vmul.f32 1.442695, %v828_v8  ;;  %v453_v28 = vand.u32 2147483648, %v1490_v2 }
  0xa5   : > { %2378 = vst [vmem:[#allocation5_spill] sm:$0xff] %v1475_v55  ;;  %v1488_v1 = vand.u32 2147483647, %v1475_v55  ;;  %v429_v22 = vsub.f32 1.0, %v428_v7  ;;  %vm433_vm1 = vweird.f32 %v1485_v63  ;;  %v863_v50 = vmul.f32 1.442695, %v837_v24 }
  0xa6   : > { %v381_v53 = vand.u32 2147483647, %v1463_v47  ;;  %v1555_v51 = vor.u32 1.1754944e-38, %v453_v28  ;;  %v1580_v8 = vor.u32 1.1754944e-38, %v588_v37  ;;  %vm1629_vm3 = vmor %vm432_vm2, %vm433_vm1  ;;  %vm447_vm6 = vweird.f32 %v1490_v2 }
  0xa7   : > { %v406_v13 = vmul.f32 0.3275911, %v1488_v1  ;;  %v430_v46 = vmul.f32 %v1485_v63, %v429_v22 }
  0xa8   : > { %v337_v56 = vpop.f32.mrf.mxu3  ;;  %v397_v62 = vmul.f32 0.3275911, %v381_v53  ;;  %v813_v19 = vsub.f32 0.0, %v381_v53  ;;  %2384 = vst [vmem:[#allocation11_spill] sm:$0xff] %v1580_v8 }
  0xa9   : > { %v314_v52 = vpop.f32.mrf.mxu0  ;;  %v1496_v4 = vadd.f32 %v1426_v26, %v337_v56  ;;  %v1527_v25 = vpop.eup %1275  ;;  %v1532_v29 = vadd.f32 1.0, %v406_v13  ;;  %v1583_v10 = vadd.f32 %v1485_v63, %v430_v46 }
  0xaa   : > { %v1478_v58 = vadd.f32 %v1426_v26, %v314_v52  ;;  %v1504_v9 = vadd.f32 1.0, %v397_v62  ;;  %v829_v36 = vmul.f32 %v813_v19, %v381_v53  ;;  %v1549_v44 = vpop.eup %1277  ;;  %v578_v49 = vmul.f32 %v1527_v25, %v1480_v59 }
  0xab   : > { %2379 = vst [vmem:[#allocation6_spill] sm:$0xff] %v1496_v4  ;;  %v1516_v16 = vmul.f32 0.70710677, %v1496_v4  ;;  %v1558_v52 = vmul.f32 0.5, %v1452_v42  ;;  %v822_v53 = vsub.f32 0.0, %v1488_v1  ;;  %v443_v42 = vmul.f32 %v1549_v44, %v1490_v2 }
  0xac   : > { %v1493_v3 = vmul.f32 0.70710677, %v1478_v58  ;;  %1279 = vrcp.f32 %v1504_v9  ;;  %v468_v62 = vand.u32 2147483648, %v1504_v9  ;;  %v847_v0 = vmul.f32 1.442695, %v829_v36 }
  0xad   : > { %2380 = vst [vmem:[#allocation7_spill] sm:$0xff] %v1516_v16  ;;  %1281 = vpow2.f32 %v843_v12  ;;  %v1539_v33 = vand.u32 2147483647, %v1516_v16  ;;  %v579_v7 = vsub.f32 1.0, %v578_v49  ;;  %v1588_v12 = vmul.f32 0.5, %v1478_v58 }
  0xae   : > { %v1510_v14 = vand.u32 2147483647, %v1493_v3  ;;  %1283 = vpow2.f32 %v845_v23  ;;  %2382 = vst [vmem:[#allocation9_spill] sm:$0xff] %v1558_v52  ;;  %v838_v19 = vmul.f32 %v822_v53, %v1488_v1  ;;  %v444_v58 = vsub.f32 1.0, %v443_v42 }
  0xaf   : > { %1285 = vrcp.f32 %v1532_v29  ;;  %v407_v57 = vmul.f32 0.3275911, %v1539_v33  ;;  %2385 = vst [vmem:[#allocation12_spill] sm:$0xff] %v1588_v12  ;;  %v1605_v28 = vor.u32 1.1754944e-38, %v468_v62  ;;  %v603_v37 = vand.u32 2147483648, %v1532_v29 }
  0xb0   : > { %v339_v20 = vpop.f32.mrf.mxu3  ;;  %v398_v32 = vmul.f32 0.3275911, %v1510_v14  ;;  %1287 = vpow2.f32 %v863_v50  ;;  %v814_v13 = vsub.f32 0.0, %v1510_v14  ;;  %v865_v53 = vmul.f32 1.442695, %v838_v19 }
  0xb1   : > { %v317_v5 = vpop.f32.mrf.mxu0  ;;  %v1542_v34 = vadd.f32 %v1426_v26, %v339_v20  ;;  %v1595_v21 = vadd.f32 1.0, %v407_v57  ;;  %v823_v57 = vsub.f32 0.0, %v1539_v33  ;;  %v1637_v19 = vmul.f32 %v1527_v25, %v579_v7 }
  0xb2   : > { %v1513_v15 = vadd.f32 %v1426_v26, %v317_v5  ;;  %v1562_v54 = vpop.eup %1279  ;;  %v1565_v56 = vadd.f32 1.0, %v398_v32  ;;  %v830_v50 = vmul.f32 %v814_v13, %v1510_v14  ;;  %v1634_v13 = vmul.f32 %v1549_v44, %v444_v58 }
  0xb3   : > { %2381 = vst [vmem:[#allocation8_spill] sm:$0xff] %v1542_v34  ;;  %v1572_v61 = vmul.f32 0.70710677, %v1542_v34  ;;  %v1578_v6 = vpop.eup %1281  ;;  %v458_v11 = vmul.f32 %v1562_v54, %v1504_v9  ;;  %v435_v7 = vsel %vm1629_vm3, %v1485_v63, %v1583_v10  ;;  %v618_v45 = vand.u32 2147483648, %v1595_v21 }
  0xb4   : > { %v1535_v30 = vmul.f32 0.70710677, %v1513_v15  ;;  %v1592_v20 = vpop.eup %1283  ;;  %1289 = vrcp.f32 %v1565_v56  ;;  %2386 = vst [vmem:[#allocation13_spill] sm:$0xff] %v1595_v21  ;;  %v849_v63 = vmul.f32 1.442695, %v830_v50  ;;  %vm448_vm5 = vweird.f32 %v1549_v44 }
  0xb5   : > { %2383 = vst [vmem:[#allocation10_spill] sm:$0xff] %v1572_v61  ;;  %v1601_v23 = vand.u32 2147483647, %v1572_v61  ;;  %v1603_v24 = vpop.eup %1285  ;;  %1291 = vpow2.f32 %v847_v0  ;;  %v459_v0 = vsub.f32 1.0, %v458_v11  ;;  %v483_v11 = vand.u32 2147483648, %v1565_v56  ;;  %vm449_vm9 = vmor %vm447_vm6, %vm448_vm5 }
  0xb6   : > { %v1546_v38 = vand.u32 2147483647, %v1535_v30  ;;  %v1620_v62 = vpop.eup %1287  ;;  %1293 = vrcp.f32 %v1595_v21  ;;  %2391 = vst [vmem:[#allocation16_spill] sm:$0xff] %v1637_v19  ;;  %v1657_v61 = vor.u32 1.1754944e-38, %v603_v37  ;;  %vm463_vm7 = vweird.f32 %v1562_v54 }
  0xb7   : > { %v408_v46 = vmul.f32 0.3275911, %v1601_v23  ;;  %2388 = vst [vmem:[#allocation15_spill] sm:$0xff] %v1620_v62  ;;  %v1670_v55 = vmul.f32 %v1562_v54, %v459_v0  ;;  %v1674_v14 = vor.u32 1.1754944e-38, %v483_v11  ;;  %vm462_vm8 = vweird.f32 %v1504_v9 }
  0xb8   : > { %v399_v5 = vmul.f32 0.3275911, %v1546_v38  ;;  %v342_v36 = vpop.f32.mrf.mxu3  ;;  %2395 = vst [vmem:[#allocation20_spill] sm:$0xff] %v1657_v61  ;;  %v815_v16 = vsub.f32 0.0, %v1546_v38  ;;  %vm477_vm12 = vweird.f32 %v1565_v56  ;;  %vm1856_vm14 = vmor %vm462_vm8, %vm463_vm7  ;;  %vm907_vm7 = vcmp.ge.f32.partialorder %v1435_v31, 0.0 }
  0xb9   : > { %v319_v39 = vpop.f32.mrf.mxu0  ;;  %v1613_v49 = vadd.f32 %v1426_v26, %v342_v36  ;;  %v1643_v36 = vadd.f32 1.0, %v408_v46  ;;  %v839_v46 = vmul.f32 %v823_v57, %v1539_v33  ;;  %v1677_v33 = vmul.f32 0.5, %v1513_v15 }
  0xba   : > { %v1569_v60 = vadd.f32 %v1426_v26, %v319_v39  ;;  %v1607_v32 = vadd.f32 1.0, %v399_v5  ;;  %v593_v5 = vmul.f32 %v1603_v24, %v1532_v29  ;;  %vm908_vm8 = vcmp.ge.f32.partialorder %v1454_v43, 0.0 }
  0xbb   : > { %2387 = vst [vmem:[#allocation14_spill] sm:$0xff] %v1613_v49  ;;  %v1649_v4 = vmul.f32 0.70710677, %v1613_v49  ;;  %v867_v11 = vmul.f32 1.442695, %v839_v46 }
  0xbc   : > { %v1598_v22 = vmul.f32 0.70710677, %v1569_v60  ;;  %1295 = vrcp.f32 %v1607_v32  ;;  %2392 = vst [vmem:[#allocation17_spill] sm:$0xff] %v1643_v36  ;;  %v594_v10 = vsub.f32 1.0, %v593_v5  ;;  %v831_v5 = vmul.f32 %v815_v16, %v1546_v38 }
  0xbd   : > { %2394 = vst [vmem:[#allocation19_spill] sm:$0xff] %v1649_v4  ;;  %1297 = vpow2.f32 %v865_v53  ;;  %v1685_v53 = vand.u32 2147483647, %v1649_v4  ;;  %v498_v4 = vand.u32 2147483648, %v1607_v32  ;;  %v1701_v16 = vor.u32 1.1754944e-38, %v618_v45 }
  0xbe   : > { %v384_v39 = vand.u32 2147483647, %v1598_v22  ;;  %2399 = vst [vmem:[#allocation21_spill] sm:$0xff] %v1677_v33  ;;  %1299 = vrcp.f32 %v1643_v36  ;;  %v1695_v62 = vmul.f32 %v1603_v24, %v594_v10  ;;  %v824_v10 = vsub.f32 0.0, %v1601_v23 }
  0xbf   : > { %2401 = vst [vmem:[#allocation23_spill] sm:$0xff] %v1685_v53  ;;  %v409_v33 = vmul.f32 0.3275911, %v1685_v53  ;;  %v851_v53 = vmul.f32 1.442695, %v831_v5  ;;  %v1734_v5 = vor.u32 1.1754944e-38, %v498_v4  ;;  %vm492_vm15 = vweird.f32 %v1607_v32 }
  0xc0   : > { %v400_v41 = vmul.f32 0.3275911, %v384_v39  ;;  %v816_v57 = vsub.f32 0.0, %v384_v39  ;;  %2402 = vst [vmem:[#allocation24_spill] sm:$0xff] %v1695_v62  ;;  %v344_v38 = vpop.f32.mrf.mxu3 }
  0xc1   : > { %v322_v1 = vpop.f32.mrf.mxu0  ;;  %2403 = vst [vmem:[#allocation25_spill] sm:$0xff] %v1701_v16  ;;  %v1718_v16 = vmul.f32 0.5, %v1569_v60  ;;  %v633_v60 = vand.u32 2147483648, %v1643_v36 }
  0xc2   : > { %v1618_v42 = vadd.f32 %v1426_v26, %v322_v1  ;;  %v1641_v1 = vpop.eup %1289  ;;  %v1661_v48 = vadd.f32 1.0, %v400_v41 }
  0xc3   : > { %v1655_v58 = vpop.eup %1291  ;;  %v473_v37 = vmul.f32 %v1641_v1, %v1565_v56  ;;  %2407 = vst [vmem:[#allocation29_spill] sm:$0xff] %v1718_v16  ;;  %vm478_vm11 = vweird.f32 %v1641_v1 }
  0xc4   : > { %v1646_v34 = vmul.f32 0.70710677, %v1618_v42  ;;  %v1680_v41 = vpop.eup %1293  ;;  %1301 = vrcp.f32 %v1661_v48  ;;  %vm507_vm2 = vweird.f32 %v1661_v48  ;;  %vm1904_vm3 = vmor %vm477_vm12, %vm478_vm11 }
  0xc5   : > { %2400 = vst [vmem:[#allocation22_spill] sm:$0xff] %v1680_v41  ;;  %v1687_v0 = vpop.eup %1295  ;;  %1303 = vpow2.f32 %v849_v63  ;;  %v474_v61 = vsub.f32 1.0, %v473_v37  ;;  %v608_v8 = vmul.f32 %v1680_v41, %v1595_v21  ;;  %v1710_v37 = vadd.f32 1.0, %v409_v33 }
  0xc6   : > { %2393 = vst [vmem:[#allocation18_spill] sm:$0xff] %v1646_v34  ;;  %v385_v50 = vand.u32 2147483647, %v1646_v34  ;;  %v1703_v46 = vpop.eup %1297  ;;  %v488_v63 = vmul.f32 %v1687_v0, %v1607_v32  ;;  %1305 = vpow2.f32 %v867_v11  ;;  %vm493_vm13 = vweird.f32 %v1687_v0 }
  0xc7   : > { %2404 = vst [vmem:[#allocation26_spill] sm:$0xff] %v1703_v46  ;;  %v1715_v45 = vpop.eup %1299  ;;  %v609_v11 = vsub.f32 1.0, %v608_v8 }
  0xc8   : > { %v401_v40 = vmul.f32 0.3275911, %v385_v50  ;;  %2405 = vst [vmem:[#allocation27_spill] sm:$0xff] %v1710_v37  ;;  %v817_v4 = vsub.f32 0.0, %v385_v50 }
  0xc9   : > { %v324_v35 = vpop.f32.mrf.mxu0 }
  0xca   : > { %v1692_v15 = vadd.f32 %v1426_v26, %v324_v35  ;;  %v832_v35 = vmul.f32 %v816_v57, %v384_v39  ;;  %v1708_v62 = vadd.f32 1.0, %v401_v40  ;;  %v1722_v39 = vadd.f32 %v1426_v26, %v344_v38  ;;  %v1729_v33 = vpop.eup %1301 }
  0xcb   : > { %v1727_v40 = vsel %vm1665_vm4, %v1529_v27, %v435_v7  ;;  %v1732_v57 = vmul.f32 %v1641_v1, %v474_v61  ;;  %v1737_v16 = vpop.eup %1303  ;;  %v489_v38 = vsub.f32 1.0, %v488_v63  ;;  %v840_v27 = vmul.f32 %v824_v10, %v1601_v23  ;;  %vm1929_vm4 = vmor %vm492_vm15, %vm493_vm13 }
  0xcc   : > { %v1713_v34 = vmul.f32 0.70710677, %v1692_v15  ;;  %1307 = vrcp.f32 %v1708_v62  ;;  %2408 = vst [vmem:[#allocation30_spill] sm:$0xff] %v1722_v39  ;;  %v853_v21 = vmul.f32 1.442695, %v832_v35  ;;  %v623_v61 = vmul.f32 %v1715_v45, %v1643_v36 }
  0xcd   : > { %1309 = vrcp.f32 %v1710_v37  ;;  %v503_v49 = vmul.f32 %v1729_v33, %v1661_v48  ;;  %v1749_v7 = vmul.f32 0.5, %v1618_v42  ;;  %v1752_v63 = vmul.f32 0.70710677, %v1722_v39 }
  0xce   : > { %2406 = vst [vmem:[#allocation28_spill] sm:$0xff] %v1713_v34  ;;  %1311 = vpow2.f32 %v851_v53  ;;  %v386_v8 = vand.u32 2147483647, %v1713_v34  ;;  %v1757_v53 = vpop.eup %1305  ;;  %v1760_v35 = vmul.f32 %v1680_v41, %v609_v11  ;;  %v513_v10 = vand.u32 2147483648, %v1661_v48 }
  0xcf   : > { %2409 = vst [vmem:[#allocation31_spill] sm:$0xff] %v1749_v7  ;;  %v1763_v34 = vor.u32 1.1754944e-38, %v633_v60  ;;  %v1768_v42 = vmul.f32 %v1687_v0, %v489_v38  ;;  %1313 = vpow2.f32 %v853_v21  ;;  %v869_v39 = vmul.f32 1.442695, %v840_v27 }
  0xd0   : > { %2410 = vst [vmem:[#allocation32_spill] sm:$0xff] %v1752_v63  ;;  %v402_v36 = vmul.f32 0.3275911, %v386_v8  ;;  %v624_v7 = vsub.f32 1.0, %v623_v61  ;;  %v818_v41 = vsub.f32 0.0, %v386_v8  ;;  %v1785_v27 = vor.u32 1.1754944e-38, %v513_v10 }
  0xd1   : > { %v327_v46 = vpop.f32.mrf.mxu0  ;;  %2411 = vst [vmem:[#allocation33_spill] sm:$0xff] %v1757_v53  ;;  %v833_v53 = vmul.f32 %v817_v4, %v385_v50  ;;  %v648_v50 = vand.u32 2147483648, %v1710_v37  ;;  %v1792_v61 = vmul.f32 0.5, %v1692_v15  ;;  %v446_v4 = vadd.f32 %v1549_v44, %v1634_v13 }
  0xd2   : > { %v1755_v23 = vadd.f32 %v1426_v26, %v327_v46  ;;  %2412 = vst [vmem:[#allocation34_spill] sm:$0xff] %v1760_v35  ;;  %v1765_v19 = vpop.eup %1307  ;;  %v1771_v46 = vand.u32 2147483647, %v1752_v63  ;;  %v1773_v12 = vadd.f32 1.0, %v402_v36  ;;  %v528_v35 = vand.u32 2147483648, %v1708_v62 }
  0xd3   : > { %2413 = vst [vmem:[#allocation35_spill] sm:$0xff] %v1763_v34  ;;  %v1778_v60 = vpop.eup %1309  ;;  %v504_v34 = vsub.f32 1.0, %v503_v49  ;;  %v518_v36 = vmul.f32 %v1765_v19, %v1708_v62  ;;  %v451_v49 = vand.u32 2147483647, %v1490_v2  ;;  %v855_v10 = vmul.f32 1.442695, %v833_v53 }
  0xd4   : > { %2414 = vst [vmem:[#allocation36_spill] sm:$0xff] %v1771_v46  ;;  %v1776_v11 = vmul.f32 0.70710677, %v1755_v23  ;;  %v410_v38 = vmul.f32 0.3275911, %v1771_v46  ;;  %v1782_v21 = vpop.eup %1311  ;;  %1315 = vrcp.f32 %v1773_v12  ;;  %v638_v63 = vmul.f32 %v1778_v60, %v1710_v37 }
  0xd5   : > { %2416 = vst [vmem:[#allocation38_spill] sm:$0xff] %v1778_v60  ;;  %1317 = vpow2.f32 %v869_v39  ;;  %v1806_v15 = vmul.f32 %v1729_v33, %v504_v34  ;;  %v1809_v39 = vmul.f32 %v1715_v45, %v624_v7  ;;  %v1811_v13 = vor.u32 1.1754944e-38, %v528_v35 }
  0xd6   : > { %2415 = vst [vmem:[#allocation37_spill] sm:$0xff] %v1776_v11  ;;  %v1800_v46 = vadd.f32 1.0, %v410_v38  ;;  %v387_v52 = vand.u32 2147483647, %v1776_v11  ;;  %v519_v53 = vsub.f32 1.0, %v518_v36  ;;  %v1817_v38 = vor.u32 1.1754944e-38, %v648_v50 }
  0xd7   : > { %2417 = vst [vmem:[#allocation39_spill] sm:$0xff] %v1782_v21  ;;  %v1803_v21 = vpop.eup %1313  ;;  %v450_v34 = vsel %vm449_vm9, %v1549_v44, %v446_v4  ;;  %vm452_vm10 = vcmp.eq.f32.partialorder %v451_v49, 8.507059e+37  ;;  %v667_v7 = vmul.f32 1.0614054, %v1727_v40  ;;  %vm508_vm0 = vweird.f32 %v1729_v33 }
  0xd8   : > { %2418 = vst [vmem:[#allocation40_spill] sm:$0xff] %v1792_v61  ;;  %v834_v61 = vmul.f32 %v818_v41, %v386_v8  ;;  %v403_v11 = vmul.f32 0.3275911, %v387_v52  ;;  %v819_v37 = vsub.f32 0.0, %v387_v52  ;;  %v639_v41 = vsub.f32 1.0, %v638_v63 }
  0xd9   : > { %2419 = vst [vmem:[#allocation41_spill] sm:$0xff] %v1800_v46  ;;  %1319 = vrcp.f32 %v1800_v46  ;;  %v1829_v8 = vsel %vm452_vm10, %v1555_v51, %v450_v34  ;;  %v329_v36 = vpop.f32.mrf.mxu0  ;;  %v683_v49 = vadd.f32 -1.4531521, %v667_v7  ;;  %v1844_v7 = vmul.f32 %v1765_v19, %v519_v53  ;;  %vm1963_vm10 = vmor %vm507_vm2, %vm508_vm0 }
  0xda   : > { %2420 = vst [vmem:[#allocation42_spill] sm:$0xff] %v1803_v21  ;;  %v543_v21 = vand.u32 2147483648, %v1773_v12  ;;  %v1822_v35 = vpop.eup %1315  ;;  %v1826_v2 = vadd.f32 1.0, %v403_v11  ;;  %1321 = vpow2.f32 %v855_v10  ;;  %v857_v44 = vmul.f32 1.442695, %v834_v61 }
  0xdb   : > { %2421 = vst [vmem:[#allocation43_spill] sm:$0xff] %v1809_v39  ;;  %v1831_v50 = vpop.eup %1317  ;;  %v668_v4 = vmul.f32 1.0614054, %v1829_v8  ;;  %v533_v63 = vmul.f32 %v1822_v35, %v1773_v12  ;;  %v835_v11 = vmul.f32 %v819_v37, %v387_v52  ;;  %v699_v61 = vmul.f32 %v683_v49, %v1727_v40 }
  0xdc   : > { %2422 = vst [vmem:[#allocation44_spill] sm:$0xff] %v1817_v38  ;;  %v663_v38 = vand.u32 2147483648, %v1800_v46  ;;  %1323 = vrcp.f32 %v1826_v2  ;;  %v558_v51 = vand.u32 2147483648, %v1826_v2  ;;  %v330_v10 = vadd.f32 %v1426_v26, %v329_v36 }
  0xdd   : > { %2423 = vst [vmem:[#allocation45_spill] sm:$0xff] %v1831_v50  ;;  %v684_v34 = vadd.f32 -1.4531521, %v668_v4  ;;  %v1847_v50 = vmul.f32 0.5, %v1755_v23  ;;  %v461_v39 = vadd.f32 %v1562_v54, %v1670_v55  ;;  %v466_v52 = vand.u32 2147483647, %v1504_v9 }
  0xde   : > { %v1862_v26 = vmul.f32 %v1778_v60, %v639_v41  ;;  %v1864_v23 = vor.u32 1.1754944e-38, %v543_v21  ;;  %1325 = vpow2.f32 %v857_v44  ;;  %v859_v36 = vmul.f32 1.442695, %v835_v11 }
  0xdf   : > { %2424 = vst [vmem:[#allocation46_spill] sm:$0xff] %v1847_v50  ;;  %v700_v55 = vmul.f32 %v684_v34, %v1829_v8  ;;  %v1867_v53 = vpop.eup %1319  ;;  %v715_v4 = vadd.f32 1.4214138, %v699_v61  ;;  %v1869_v49 = vmul.f32 0.70710677, %v330_v10  ;;  %v465_v9 = vsel %vm1856_vm14, %v1562_v54, %v461_v39 }
  0xe0   : > { %2427 = vst [vmem:[#allocation47_spill] sm:$0xff] %v1862_v26  ;;  %v1874_v50 = vpop.eup %1321  ;;  %v534_v41 = vsub.f32 1.0, %v533_v63  ;;  %v1877_v21 = vor.u32 1.1754944e-38, %v663_v38  ;;  %v1879_v44 = vor.u32 1.1754944e-38, %v558_v51  ;;  %vm467_vm1 = vcmp.eq.f32.partialorder %v466_v52, 8.507059e+37 }
  0xe1   : > { %2428 = vst [vmem:[#allocation48_spill] sm:$0xff] %v1869_v49  ;;  %v716_v34 = vadd.f32 1.4214138, %v700_v55  ;;  %v731_v11 = vmul.f32 %v715_v4, %v1727_v40  ;;  %v388_v61 = vand.u32 2147483647, %v1869_v49  ;;  %v476_v54 = vadd.f32 %v1641_v1, %v1732_v57 }
  0xe2   : > { %2429 = vst [vmem:[#allocation49_spill] sm:$0xff] %v1877_v21  ;;  %v1881_v26 = vpop.eup %1323  ;;  %v1890_v39 = vmul.f32 %v1867_v53, %v1800_v46  ;;  %v1896_v51 = vsel %vm467_vm1, %v1605_v28, %v465_v9  ;;  %1327 = vpow2.f32 %v859_v36  ;;  %v1909_v21 = vmul.f32 %v1822_v35, %v534_v41 }
  0xe3   : > { %v548_v38 = vmul.f32 %v1881_v26, %v1826_v2  ;;  %v732_v63 = vmul.f32 %v716_v34, %v1829_v8  ;;  %v747_v37 = vadd.f32 -0.28449672, %v731_v11  ;;  %v404_v52 = vmul.f32 0.3275911, %v388_v61 }
  0xe4   : > { %v820_v55 = vsub.f32 0.0, %v388_v61  ;;  %v1898_v4 = vpop.eup %1325  ;;  %v481_v28 = vand.u32 2147483647, %v1565_v56  ;;  %v491_v36 = vadd.f32 %v1687_v0, %v1768_v42  ;;  %v480_v49 = vsel %vm1904_vm3, %v1641_v1, %v476_v54 }
  0xe5   : > { %2430 = vst [vmem:[#allocation50_spill] sm:$0xff] %v1898_v4  ;;  %v748_v34 = vadd.f32 -0.28449672, %v732_v63  ;;  %v763_v9 = vmul.f32 %v747_v37, %v1727_v40  ;;  %v1915_v11 = vadd.f32 1.0, %v404_v52  ;;  %v669_v46 = vmul.f32 1.0614054, %v1896_v51 }
  0xe6   : > { %v654_v60 = vsub.f32 1.0, %v1890_v39  ;;  %v549_v41 = vsub.f32 1.0, %v548_v38  ;;  %v1923_v4 = vmul.f32 0.5, %v330_v10  ;;  %vm523_vm5 = vweird.f32 %v1765_v19 }
  0xe7   : > { %v764_v63 = vmul.f32 %v748_v34, %v1829_v8  ;;  %v779_v1 = vadd.f32 0.2548296, %v763_v9  ;;  %1329 = vrcp.f32 %v1915_v11  ;;  %v1935_v42 = vmul.f32 %v820_v55, %v388_v61 }
  0xe8   : > { %vm482_vm6 = vcmp.eq.f32.partialorder %v481_v28, 8.507059e+37  ;;  %v685_v38 = vadd.f32 -1.4531521, %v669_v46  ;;  %v495_v37 = vsel %vm1929_vm4, %v1687_v0, %v491_v36  ;;  %v1944_v52 = vpop.eup %1327  ;;  %vm522_vm9 = vweird.f32 %v1708_v62 }
  0xe9   : > { %v780_v10 = vadd.f32 0.2548296, %v764_v63  ;;  %v1939_v54 = vsel %vm482_vm6, %v1674_v14, %v480_v49  ;;  %v795_v61 = vmul.f32 %v779_v1, %v1727_v40  ;;  %v573_v55 = vand.u32 2147483648, %v1915_v11  ;;  %vm2002_vm0 = vmor %vm522_vm9, %vm523_vm5 }
  0xea   : > { %v670_v57 = vmul.f32 1.0614054, %v1939_v54  ;;  %v496_v14 = vand.u32 2147483647, %v1607_v32  ;;  %v1953_v46 = vmul.f32 %v1881_v26, %v549_v41  ;;  %v701_v0 = vmul.f32 %v685_v38, %v1896_v51 }
  0xeb   : > { %v796_v49 = vmul.f32 %v780_v10, %v1829_v8  ;;  %v506_v34 = vadd.f32 %v1729_v33, %v1806_v15  ;;  %v875_v32 = vmul.f32 %v1578_v6, %v795_v61  ;;  %v511_v36 = vand.u32 2147483647, %v1661_v48 }
  0xec   : > { %v686_v28 = vadd.f32 -1.4531521, %v670_v57  ;;  %vm497_vm11 = vcmp.eq.f32.partialorder %v496_v14, 8.507059e+37  ;;  %vm538_vm12 = vweird.f32 %v1822_v35  ;;  %v717_v9 = vadd.f32 1.4214138, %v701_v0 }
  0xed   : > { %v876_v8 = vmul.f32 %v1592_v20, %v796_v49  ;;  %v1972_v15 = vsel %vm497_vm11, %v1734_v5, %v495_v37  ;;  %v510_v41 = vsel %vm1963_vm10, %v1729_v33, %v506_v34  ;;  %v1977_v63 = vpop.eup %1329  ;;  %v891_v56 = vsub.f32 1.0, %v875_v32 }
  0xee   : > { %v1979_v6 = vor.u32 1.1754944e-38, %v573_v55  ;;  %v702_v1 = vmul.f32 %v686_v28, %v1939_v54  ;;  %v671_v48 = vmul.f32 1.0614054, %v1972_v15  ;;  %vm537_vm13 = vweird.f32 %v1773_v12 }
  0xef   : > { %v892_v20 = vsub.f32 1.0, %v876_v8  ;;  %v563_v5 = vmul.f32 %v1977_v63, %v1915_v11  ;;  %v733_v10 = vmul.f32 %v717_v9, %v1896_v51  ;;  %vm512_vm14 = vcmp.eq.f32.partialorder %v511_v36, 8.507059e+37  ;;  %vm539_vm4 = vmor %vm537_vm13, %vm538_vm12 }
  0xf0   : > { %v923_v38 = vsub.f32 0.0, %v891_v56  ;;  %v718_v33 = vadd.f32 1.4214138, %v702_v1  ;;  %v1988_v37 = vsel %vm512_vm14, %v1785_v27, %v510_v41  ;;  %v687_v61 = vadd.f32 -1.4531521, %v671_v48 }
  0xf1   : > { %v924_v55 = vsub.f32 0.0, %v892_v20  ;;  %v564_v57 = vsub.f32 1.0, %v563_v5  ;;  %v749_v14 = vadd.f32 -0.28449672, %v733_v10  ;;  %v672_v49 = vmul.f32 1.0614054, %v1988_v37 }
  0xf2   : > { %vm553_vm15 = vweird.f32 %v1881_v26  ;;  %v939_v0 = vsel %vm907_vm7, %v891_v56, %v923_v38  ;;  %v734_v34 = vmul.f32 %v718_v33, %v1939_v54  ;;  %v703_v40 = vmul.f32 %v687_v61, %v1972_v15 }
  0xf3   : > { %v521_v32 = vadd.f32 %v1765_v19, %v1844_v7  ;;  %v940_v28 = vsel %vm908_vm8, %v892_v20, %v924_v55  ;;  %v955_v31 = vadd.f32 1.0, %v939_v0  ;;  %v2009_v36 = vmul.f32 %v1977_v63, %v564_v57 }
  0xf4   : > { %v765_v8 = vmul.f32 %v749_v14, %v1896_v51  ;;  %vm552_vm1 = vweird.f32 %v1826_v2  ;;  %v956_v7 = vadd.f32 1.0, %v940_v28  ;;  %v750_v9 = vadd.f32 -0.28449672, %v734_v34 }
  0xf5   : > { %v688_v41 = vadd.f32 -1.4531521, %v672_v49  ;;  %v525_v56 = vsel %vm2002_vm0, %v1765_v19, %v521_v32  ;;  %v971_v1 = vmul.f32 %v955_v31, %v1519_v17  ;;  %v719_v43 = vadd.f32 1.4214138, %v703_v40  ;;  %vm554_vm11 = vmor %vm552_vm1, %vm553_vm15 }
  0xf6   : > { %v781_v48 = vadd.f32 0.2548296, %v765_v8  ;;  %v526_v20 = vand.u32 2147483647, %v1708_v62  ;;  %vm909_vm2 = vcmp.ge.f32.partialorder %v1463_v47, 0.0  ;;  %v972_v5 = vmul.f32 %v956_v7, %v1521_v18  ;;  %v2439_v47 = vld [vmem:[#allocation39_spill] sm:$0xff] }
  0xf7   : > { %v766_v10 = vmul.f32 %v750_v9, %v1939_v54  ;;  %v704_v38 = vmul.f32 %v688_v41, %v1988_v37  ;;  %v536_v33 = vadd.f32 %v1822_v35, %v1909_v21  ;;  %v735_v19 = vmul.f32 %v719_v43, %v1972_v15 }
  0xf8   : > { %v797_v61 = vmul.f32 %v781_v48, %v1896_v51  ;;  %vm527_vm3 = vcmp.eq.f32.partialorder %v526_v20, 8.507059e+37  ;;  %v541_v17 = vand.u32 2147483647, %v1773_v12  ;;  %v987_v18 = vpack.c.bf16 %v972_v5, %v971_v1 }
  0xf9   : > { %v782_v62 = vadd.f32 0.2548296, %v766_v10  ;;  %v720_v55 = vadd.f32 1.4214138, %v704_v38  ;;  %v2032_v57 = vsel %vm527_vm3, %v1811_v13, %v525_v56  ;;  %vm910_vm5 = vcmp.ge.f32.partialorder %v1493_v3, 0.0 }
  0xfa   : > { %v877_v21 = vmul.f32 %v1655_v58, %v797_v61  ;;  %v751_v51 = vadd.f32 -0.28449672, %v735_v19  ;;  %v540_v14 = vsel %vm539_vm4, %v1822_v35, %v536_v33  ;;  %vm542_vm6 = vcmp.eq.f32.partialorder %v541_v17, 8.507059e+37  ;;  %1071 = vmatmul.bf16.vlgmr.msra.gmra.mxu1 %v987_v18  ;;  %v2440_v33 = vld [vmem:[#allocation9_spill] sm:$0xff] }
  0xfb   : > { %vm568_vm7 = vweird.f32 %v1977_v63  ;;  %v798_v12 = vmul.f32 %v782_v62, %v1939_v54  ;;  %v736_v49 = vmul.f32 %v720_v55, %v1988_v37  ;;  %v2041_v0 = vsel %vm542_vm6, %v1864_v23, %v540_v14 }
  0xfc   : > { %v673_v13 = vmul.f32 1.0614054, %v2032_v57  ;;  %vm582_vm8 = vweird.f32 %v1480_v59  ;;  %vm583_vm9 = vweird.f32 %v1527_v25  ;;  %v893_v58 = vsub.f32 1.0, %v877_v21 }
  0xfd   : > { %v767_v35 = vmul.f32 %v751_v51, %v1972_v15  ;;  %v674_v34 = vmul.f32 1.0614054, %v2041_v0  ;;  %v556_v40 = vand.u32 2147483647, %v1826_v2  ;;  %vm567_vm10 = vweird.f32 %v1915_v11  ;;  %v2443_v51 = vld [vmem:[#allocation42_spill] sm:$0xff]  ;;  %vm2102_vm3 = vmor %vm582_vm8, %vm583_vm9 }
  0xfe   : > { %v878_v54 = vmul.f32 %v1737_v16, %v798_v12  ;;  %v752_v32 = vadd.f32 -0.28449672, %v736_v49  ;;  %v689_v23 = vadd.f32 -1.4531521, %v673_v13  ;;  %v551_v27 = vadd.f32 %v1881_v26, %v1953_v46  ;;  %v2446_v13 = vld [vmem:[#allocation12_spill] sm:$0xff] }
  0xff   : > { %v925_v28 = vsub.f32 0.0, %v893_v58  ;;  %v783_v31 = vadd.f32 0.2548296, %v767_v35  ;;  %v690_v8 = vadd.f32 -1.4531521, %v674_v34  ;;  %vm557_vm12 = vcmp.eq.f32.partialorder %v556_v40, 8.507059e+37 }
 0x100   : > { %v894_v7 = vsub.f32 1.0, %v878_v54  ;;  %v768_v9 = vmul.f32 %v752_v32, %v1988_v37  ;;  %v705_v41 = vmul.f32 %v689_v23, %v2032_v57  ;;  %v555_v16 = vsel %vm554_vm11, %v1881_v26, %v551_v27  ;;  %v2447_v40 = vld [vmem:[#allocation16_spill] sm:$0xff]  ;;  %v2451_v32 = vld [vmem:[#allocation22_spill] sm:$0xff] }
 0x101   : > { %v941_v56 = vsel %vm909_vm2, %v893_v58, %v925_v28  ;;  %v799_v46 = vmul.f32 %v783_v31, %v1972_v15  ;;  %v706_v1 = vmul.f32 %v690_v8, %v2041_v0  ;;  %v2065_v2 = vsel %vm557_vm12, %v1879_v44, %v555_v16  ;;  %vm2091_vm2 = vmor %vm567_vm10, %vm568_vm7 }
 0x102   : > { %vm597_vm13 = vweird.f32 %v1532_v29  ;;  %vm598_vm14 = vweird.f32 %v1603_v24  ;;  %v926_v48 = vsub.f32 0.0, %v894_v7  ;;  %v957_v43 = vadd.f32 1.0, %v941_v56 }
 0x103   : > { %v784_v20 = vadd.f32 0.2548296, %v768_v9  ;;  %v721_v5 = vadd.f32 1.4214138, %v705_v41  ;;  %vm911_vm15 = vcmp.ge.f32.partialorder %v1535_v30, 0.0  ;;  %vm912_vm0 = vcmp.ge.f32.partialorder %v1598_v22, 0.0  ;;  %vm2140_vm7 = vmor %vm597_vm13, %vm598_vm14 }
 0x104   : > { %v879_v26 = vmul.f32 %v2439_v47, %v799_v46  ;;  %v722_v15 = vadd.f32 1.4214138, %v706_v1  ;;  %v571_v10 = vand.u32 2147483647, %v1915_v11  ;;  %v675_v44 = vmul.f32 1.0614054, %v2065_v2 }
 0x105   : > { %v942_v38 = vsel %vm910_vm5, %v894_v7, %v926_v48  ;;  %v973_v61 = vmul.f32 %v957_v43, %v2440_v33  ;;  %v800_v19 = vmul.f32 %v784_v20, %v1988_v37  ;;  %v737_v17 = vmul.f32 %v721_v5, %v2032_v57  ;;  %v2450_v11 = vld [vmem:[#allocation13_spill] sm:$0xff]  ;;  %v2452_v20 = vld [vmem:[#allocation18_spill] sm:$0xff] }
 0x106   : > { %v958_v18 = vadd.f32 1.0, %v942_v38  ;;  %v895_v62 = vsub.f32 1.0, %v879_v26  ;;  %v738_v55 = vmul.f32 %v722_v15, %v2041_v0  ;;  %vm2080_vm1 = vcmp.eq.f32.partialorder %v571_v10, 8.507059e+37  ;;  %v2457_v10 = vld [vmem:[#allocation11_spill] sm:$0xff]  ;;  %v2458_v38 = vld [vmem:[#allocation24_spill] sm:$0xff] }
 0x107   : > { %v880_v14 = vmul.f32 %v2443_v51, %v800_v19  ;;  %v753_v12 = vadd.f32 -0.28449672, %v737_v17  ;;  %v566_v3 = vadd.f32 %v1977_v63, %v2009_v36  ;;  %v691_v49 = vadd.f32 -1.4531521, %v675_v44  ;;  %v2459_v19 = vld [vmem:[#allocation50_spill] sm:$0xff]  ;;  %v2460_v51 = vld [vmem:[#allocation27_spill] sm:$0xff] }
 0x108   : > { %v974_v58 = vmul.f32 %v958_v18, %v2446_v13  ;;  %v927_v35 = vsub.f32 0.0, %v895_v62  ;;  %v754_v34 = vadd.f32 -0.28449672, %v738_v55  ;;  %v581_v54 = vadd.f32 %v1527_v25, %v2447_v40 }
 0x109   : > { %vm612_vm4 = vweird.f32 %v2450_v11  ;;  %vm613_vm5 = vweird.f32 %v2451_v32  ;;  %v896_v23 = vsub.f32 1.0, %v880_v14  ;;  %v769_v27 = vmul.f32 %v753_v12, %v2032_v57  ;;  %v2461_v14 = vld [vmem:[#allocation38_spill] sm:$0xff]  ;;  %v2462_v12 = vld [vmem:[#allocation29_spill] sm:$0xff] }
 0x10a   : > { %v570_v28 = vsel %vm2091_vm2, %v1977_v63, %v566_v3  ;;  %v707_v31 = vmul.f32 %v691_v49, %v2065_v2  ;;  %v861_v8 = vmul.f32 1.442695, %v1935_v42  ;;  %v988_v7 = vpack.c.bf16 %v974_v58, %v973_v61  ;;  %v2463_v58 = vld [vmem:[#allocation20_spill] sm:$0xff] }
 0x10b   : > { %v770_v9 = vmul.f32 %v754_v34, %v2041_v0  ;;  %v2118_v41 = vsel %vm2080_vm1, %v1979_v6, %v570_v28  ;;  %v2123_v16 = vmul.f32 %v1867_v53, %v654_v60  ;;  %v928_v56 = vsub.f32 0.0, %v896_v23  ;;  %v2467_v28 = vld [vmem:[#allocation37_spill] sm:$0xff] }
 0x10c   : > { %v785_v46 = vadd.f32 0.2548296, %v769_v27  ;;  %v676_v63 = vmul.f32 1.0614054, %v2118_v41  ;;  %v723_v48 = vadd.f32 1.4214138, %v707_v31  ;;  %v585_v42 = vsel %vm2102_vm3, %v1527_v25, %v581_v54  ;;  %1076 = vmatmul.bf16.gmra.mxu1 %v988_v7 }
 0x10d   : > { %v786_v1 = vadd.f32 0.2548296, %v770_v9  ;;  %v586_v43 = vand.u32 2147483647, %v1480_v59  ;;  %vm913_vm6 = vcmp.ge.f32.partialorder %v2452_v20, 0.0  ;;  %v943_v39 = vsel %vm911_vm15, %v895_v62, %v927_v35  ;;  %v2455_v59 = vld [vmem:[#allocation17_spill] sm:$0xff]  ;;  %vm2174_vm15 = vmor %vm612_vm4, %vm613_vm5 }
 0x10e   : > { %v944_v60 = vsel %vm912_vm0, %v896_v23, %v928_v56  ;;  %v801_v6 = vmul.f32 %v785_v46, %v2032_v57  ;;  %v692_v5 = vadd.f32 -1.4531521, %v676_v63  ;;  %vm627_vm8 = vweird.f32 %v2455_v59  ;;  %v2456_v57 = vld [vmem:[#allocation28_spill] sm:$0xff]  ;;  %v2466_v23 = vld [vmem:[#allocation34_spill] sm:$0xff]  ;;  %v2468_v31 = vld [vmem:[#allocation21_spill] sm:$0xff] }
 0x10f   : > { %vm628_vm9 = vweird.f32 %v1715_v45  ;;  %v960_v30 = vadd.f32 1.0, %v944_v60  ;;  %v802_v47 = vmul.f32 %v786_v1, %v2041_v0  ;;  %v739_v22 = vmul.f32 %v723_v48, %v2065_v2 }
 0x110   : > { %vm587_vm10 = vcmp.eq.f32.partialorder %v586_v43, 8.507059e+37  ;;  %vm914_vm11 = vcmp.ge.f32.partialorder %v2456_v57, 0.0  ;;  %v881_v26 = vmul.f32 %v1874_v50, %v801_v6  ;;  %v708_v15 = vmul.f32 %v692_v5, %v2118_v41  ;;  %vm2202_vm4 = vmor %vm627_vm8, %vm628_vm9 }
 0x111   : > { %v2152_v44 = vsel %vm587_vm10, %v2457_v10, %v585_v42  ;;  %v596_v33 = vadd.f32 %v1603_v24, %v2458_v38  ;;  %v959_v61 = vadd.f32 1.0, %v943_v39  ;;  %v882_v17 = vmul.f32 %v2459_v19, %v802_v47  ;;  %v2469_v42 = vld [vmem:[#allocation41_spill] sm:$0xff] }
 0x112   : > { %v755_v18 = vadd.f32 -0.28449672, %v739_v22  ;;  %v601_v0 = vand.u32 2147483647, %v1532_v29  ;;  %v897_v62 = vsub.f32 1.0, %v881_v26  ;;  %vm642_vm12 = vweird.f32 %v2460_v51  ;;  %v2473_v22 = vld [vmem:[#allocation48_spill] sm:$0xff] }
 0x113   : > { %v724_v55 = vadd.f32 1.4214138, %v708_v15  ;;  %v600_v50 = vsel %vm2140_vm7, %v1603_v24, %v596_v33  ;;  %v677_v21 = vmul.f32 1.0614054, %v2152_v44  ;;  %vm643_vm13 = vweird.f32 %v2461_v14  ;;  %v2474_v26 = vld [vmem:[#allocation43_spill] sm:$0xff] }
 0x114   : > { %v976_v3 = vmul.f32 %v960_v30, %v2462_v12  ;;  %v898_v49 = vsub.f32 1.0, %v882_v17  ;;  %v771_v37 = vmul.f32 %v755_v18, %v2065_v2  ;;  %vm602_vm14 = vcmp.eq.f32.partialorder %v601_v0, 8.507059e+37  ;;  %v2472_v30 = vld [vmem:[#allocation25_spill] sm:$0xff]  ;;  %vm2224_vm7 = vmor %vm642_vm12, %vm643_vm13 }
 0x115   : > { %v929_v13 = vsub.f32 0.0, %v897_v62  ;;  %v740_v29 = vmul.f32 %v724_v55, %v2118_v41  ;;  %v2168_v35 = vsel %vm602_vm14, %v2463_v58, %v600_v50  ;;  %v693_v34 = vadd.f32 -1.4531521, %v677_v21  ;;  %v2477_v50 = vld [vmem:[#allocation35_spill] sm:$0xff] }
 0x116   : > { %v930_v40 = vsub.f32 0.0, %v898_v49  ;;  %v787_v54 = vadd.f32 0.2548296, %v771_v37  ;;  %v678_v36 = vmul.f32 1.0614054, %v2168_v35  ;;  %v611_v27 = vadd.f32 %v2451_v32, %v2466_v23  ;;  %v2478_v37 = vld [vmem:[#allocation47_spill] sm:$0xff] }
 0x117   : > { %vm915_vm0 = vcmp.ge.f32.partialorder %v2467_v28, 0.0  ;;  %v975_v7 = vmul.f32 %v959_v61, %v2468_v31  ;;  %v756_v9 = vadd.f32 -0.28449672, %v740_v29  ;;  %v709_v56 = vmul.f32 %v693_v34, %v2152_v44  ;;  %v2480_v28 = vld [vmem:[#allocation40_spill] sm:$0xff] }
 0x118   : > { %v616_v46 = vand.u32 2147483647, %v2450_v11  ;;  %1331 = vpow2.f32 %v861_v8  ;;  %v945_v63 = vsel %vm913_vm6, %v897_v62, %v929_v13  ;;  %v803_v1 = vmul.f32 %v787_v54, %v2065_v2 }
 0x119   : > { %v694_v48 = vadd.f32 -1.4531521, %v678_v36  ;;  %vm657_vm1 = vweird.f32 %v2469_v42  ;;  %vm658_vm2 = vweird.f32 %v1867_v53  ;;  %v989_v43 = vpack.c.bf16 %v976_v3, %v975_v7 }
 0x11a   : > { %v772_v39 = vmul.f32 %v756_v9, %v2118_v41  ;;  %v725_v60 = vadd.f32 1.4214138, %v709_v56  ;;  %v615_v6 = vsel %vm2174_vm15, %v2451_v32, %v611_v27  ;;  %v946_v11 = vsel %vm914_vm11, %v898_v49, %v930_v40  ;;  %v2479_v27 = vld [vmem:[#allocation3_spill] sm:$0xff]  ;;  %vm2250_vm9 = vmor %vm657_vm1, %vm658_vm2 }
 0x11b   : > { %v883_v8 = vmul.f32 %v1944_v52, %v803_v1  ;;  %v710_v2 = vmul.f32 %v694_v48, %v2168_v35  ;;  %vm617_vm3 = vcmp.eq.f32.partialorder %v616_v46, 8.507059e+37  ;;  %v961_v5 = vadd.f32 1.0, %v945_v63 }
 0x11c   : > { %v788_v25 = vadd.f32 0.2548296, %v772_v39  ;;  %v741_v32 = vmul.f32 %v725_v60, %v2152_v44  ;;  %v2208_v47 = vsel %vm617_vm3, %v2472_v30, %v615_v6  ;;  %vm916_vm5 = vcmp.ge.f32.partialorder %v2473_v22, 0.0  ;;  %1081 = vmatmul.bf16.gmra.mxu1 %v989_v43  ;;  %v2484_v39 = vld [vmem:[#allocation44_spill] sm:$0xff] }
 0x11d   : > { %v899_v52 = vsub.f32 1.0, %v883_v8  ;;  %v726_v57 = vadd.f32 1.4214138, %v710_v2  ;;  %v626_v15 = vadd.f32 %v1715_v45, %v2474_v26  ;;  %v631_v10 = vand.u32 2147483647, %v2455_v59  ;;  %v2489_v59 = vld [vmem:[#allocation5_spill] sm:$0xff] }
 0x11e   : > { %v962_v38 = vadd.f32 1.0, %v946_v11  ;;  %v804_v33 = vmul.f32 %v788_v25, %v2118_v41  ;;  %v757_v61 = vadd.f32 -0.28449672, %v741_v32  ;;  %v679_v19 = vmul.f32 1.0614054, %v2208_v47  ;;  %v1332_v17 = vpop.eup %1331  ;;  %v2485_v11 = vld [vmem:[#allocation46_spill] sm:$0xff] }
 0x11f   : > { %v931_v18 = vsub.f32 0.0, %v899_v52  ;;  %v742_v0 = vmul.f32 %v726_v57, %v2168_v35  ;;  %v630_v62 = vsel %vm2202_vm4, %v1715_v45, %v626_v15  ;;  %vm632_vm6 = vcmp.eq.f32.partialorder %v631_v10, 8.507059e+37  ;;  %v2487_v10 = vld [vmem:[#allocation31_spill] sm:$0xff] }
 0x120   : > { %v884_v41 = vmul.f32 %v1332_v17, %v804_v33  ;;  %v773_v55 = vmul.f32 %v757_v61, %v2152_v44  ;;  %v2230_v21 = vsel %vm632_vm6, %v2477_v50, %v630_v62  ;;  %v695_v12 = vadd.f32 -1.4531521, %v679_v19 }
 0x121   : > { %v947_v45 = vsel %vm915_vm0, %v899_v52, %v931_v18  ;;  %v758_v3 = vadd.f32 -0.28449672, %v742_v0  ;;  %v680_v49 = vmul.f32 1.0614054, %v2230_v21  ;;  %v641_v13 = vadd.f32 %v2461_v14, %v2478_v37  ;;  %v2486_v52 = vld [vmem:[#allocation26_spill] sm:$0xff] }
 0x122   : > { %v900_v29 = vsub.f32 1.0, %v884_v41  ;;  %v963_v58 = vadd.f32 1.0, %v947_v45  ;;  %v789_v34 = vadd.f32 0.2548296, %v773_v55  ;;  %v711_v24 = vmul.f32 %v695_v12, %v2208_v47 }
 0x123   : > { %v774_v40 = vmul.f32 %v758_v3, %v2168_v35  ;;  %v696_v54 = vadd.f32 -1.4531521, %v680_v49  ;;  %v645_v36 = vsel %vm2224_vm7, %v2461_v14, %v641_v13  ;;  %v646_v23 = vand.u32 2147483647, %v2460_v51  ;;  %v2491_v3 = vld [vmem:[#allocation36_spill] sm:$0xff] }
 0x124   : > { %vm917_vm8 = vcmp.ge.f32.partialorder %v2479_v27, 0.0  ;;  %v978_v31 = vmul.f32 %v962_v38, %v2480_v28  ;;  %v932_v7 = vsub.f32 0.0, %v900_v29  ;;  %v805_v9 = vmul.f32 %v789_v34, %v2152_v44  ;;  %v2483_v44 = vld [vmem:[#allocation15_spill] sm:$0xff] }
 0x125   : > { %v727_v56 = vadd.f32 1.4214138, %v711_v24  ;;  %v790_v63 = vadd.f32 0.2548296, %v774_v40  ;;  %v712_v14 = vmul.f32 %v696_v54, %v2230_v21  ;;  %vm647_vm10 = vcmp.eq.f32.partialorder %v646_v23, 8.507059e+37  ;;  %v2492_v54 = vld [vmem:[#allocation2_spill] sm:$0xff] }
 0x126   : > { %v656_v51 = vadd.f32 %v1867_v53, %v2123_v16  ;;  %v948_v1 = vsel %vm916_vm5, %v900_v29, %v932_v7  ;;  %v885_v48 = vmul.f32 %v2483_v44, %v805_v9  ;;  %v2262_v60 = vsel %vm647_vm10, %v2484_v39, %v645_v36  ;;  %v2493_v7 = vld [vmem:[#allocation4_spill] sm:$0xff] }
 0x127   : > { %v743_v43 = vmul.f32 %v727_v56, %v2208_v47  ;;  %v964_v6 = vadd.f32 1.0, %v948_v1  ;;  %v979_v8 = vmul.f32 %v963_v58, %v2485_v11  ;;  %v806_v2 = vmul.f32 %v790_v63, %v2168_v35  ;;  %v2494_v63 = vld [vmem:[#allocation33_spill] sm:$0xff] }
 0x128   : > { %v728_v20 = vadd.f32 1.4214138, %v712_v14  ;;  %v901_v25 = vsub.f32 1.0, %v885_v48  ;;  %v660_v16 = vsel %vm2250_vm9, %v1867_v53, %v656_v51  ;;  %v661_v30 = vand.u32 2147483647, %v2469_v42  ;;  %v2488_v53 = vld [vmem:[#allocation49_spill] sm:$0xff] }
 0x129   : > { %v759_v32 = vadd.f32 -0.28449672, %v743_v43  ;;  %v980_v22 = vmul.f32 %v964_v6, %v1923_v4  ;;  %v886_v57 = vmul.f32 %v2486_v52, %v806_v2  ;;  %v681_v15 = vmul.f32 1.0614054, %v2262_v60  ;;  %v2496_v52 = vld [vmem:[#allocation7_spill] sm:$0xff] }
 0x12a   : > { %v744_v26 = vmul.f32 %v728_v20, %v2230_v21  ;;  %v977_v38 = vmul.f32 %v961_v5, %v2487_v10  ;;  %v933_v35 = vsub.f32 0.0, %v901_v25  ;;  %vm662_vm11 = vcmp.eq.f32.partialorder %v661_v30, 8.507059e+37  ;;  %v2490_v5 = vld [vmem:[#allocation23_spill] sm:$0xff] }
 0x12b   : > { %v775_v33 = vmul.f32 %v759_v32, %v2208_v47  ;;  %v991_v61 = vpack.c.bf16 %v980_v22, %v979_v8  ;;  %v902_v19 = vsub.f32 1.0, %v886_v57  ;;  %v665_v18 = vsel %vm662_vm11, %v2488_v53, %v660_v16  ;;  %v2497_v57 = vld [vmem:[#allocation10_spill] sm:$0xff] }
 0x12c   : > { %v760_v17 = vadd.f32 -0.28449672, %v744_v26  ;;  %v990_v42 = vpack.c.bf16 %v978_v31, %v977_v38  ;;  %v682_v4 = vmul.f32 1.0614054, %v665_v18  ;;  %v697_v62 = vadd.f32 -1.4531521, %v681_v15 }
 0x12d   : > { %v791_v0 = vadd.f32 0.2548296, %v775_v33  ;;  %vm918_vm12 = vcmp.ge.f32.partialorder %v2489_v59, 0.0  ;;  %1091 = vmatmul.bf16.vlgmr.msra.gmra.mxu2 %v991_v61  ;;  %v934_v41 = vsub.f32 0.0, %v902_v19  ;;  %v825_v50 = vsub.f32 0.0, %v2490_v5  ;;  %v2498_v61 = vld [vmem:[#allocation6_spill] sm:$0xff] }
 0x12e   : > { %v776_v55 = vmul.f32 %v760_v17, %v2230_v21  ;;  %v698_v12 = vadd.f32 -1.4531521, %v682_v4  ;;  %v713_v45 = vmul.f32 %v697_v62, %v2262_v60  ;;  %v826_v49 = vsub.f32 0.0, %v2491_v3  ;;  %1086 = vmatmul.bf16.gmra.mxu1 %v990_v42  ;;  %v2499_v17 = vld [vmem:[#allocation8_spill] sm:$0xff] }
 0x12f   : > { %v949_v37 = vsel %vm917_vm8, %v901_v25, %v933_v35  ;;  %v950_v29 = vsel %vm918_vm12, %v902_v19, %v934_v41  ;;  %v807_v58 = vmul.f32 %v791_v0, %v2208_v47  ;;  %v357_v36 = vmul.f32 0.5, %v2492_v54  ;;  %v2495_v47 = vld [vmem:[#allocation45_spill] sm:$0xff] }
 0x130   : > { %v792_v13 = vadd.f32 0.2548296, %v776_v55  ;;  %v714_v34 = vmul.f32 %v698_v12, %v665_v18  ;;  %v729_v24 = vadd.f32 1.4214138, %v713_v45  ;;  %v841_v23 = vmul.f32 %v825_v50, %v2490_v5 }
 0x131   : > { %v358_v9 = vmul.f32 0.5, %v2493_v7  ;;  %v842_v27 = vmul.f32 %v826_v49, %v2491_v3  ;;  %v965_v56 = vadd.f32 1.0, %v949_v37  ;;  %v966_v46 = vadd.f32 1.0, %v950_v29  ;;  %v2500_v3 = vld [vmem:[#allocation19_spill] sm:$0xff]  ;;  %v2502_v37 = vld [vmem:[#allocation14_spill] sm:$0xff] }
 0x132   : > { %v808_v40 = vmul.f32 %v792_v13, %v2230_v21  ;;  %v730_v28 = vadd.f32 1.4214138, %v714_v34  ;;  %v745_v31 = vmul.f32 %v729_v24, %v2262_v60  ;;  %v887_v14 = vmul.f32 %v2494_v63, %v807_v58  ;;  %v2503_v29 = vld [vmem:[#allocation30_spill] sm:$0xff] }
 0x133   : > { %v871_v21 = vmul.f32 1.442695, %v841_v23  ;;  %v873_v43 = vmul.f32 1.442695, %v842_v27  ;;  %v981_v39 = vmul.f32 %v965_v56, %v357_v36  ;;  %v982_v6 = vmul.f32 %v966_v46, %v358_v9  ;;  %v1272_v23 = vld [vmem:[%s2336_s4] ss:$0 sm:$0xff] }
 0x134   : > { %v888_v51 = vmul.f32 %v2495_v47, %v808_v40  ;;  %v746_v1 = vmul.f32 %v730_v28, %v665_v18  ;;  %v761_v44 = vadd.f32 -0.28449672, %v745_v31  ;;  %v903_v11 = vsub.f32 1.0, %v887_v14 }
 0x135   : > { %1333 = vpow2.f32 %v871_v21  ;;  %v992_v25 = vpack.c.bf16 %v982_v6, %v981_v39  ;;  %vm919_vm13 = vcmp.ge.f32.partialorder %v2496_v52, 0.0  ;;  %vm920_vm14 = vcmp.ge.f32.partialorder %v2497_v57, 0.0 }
 0x136   : > { %v762_v48 = vadd.f32 -0.28449672, %v746_v1  ;;  %v904_v8 = vsub.f32 1.0, %v888_v51  ;;  %v777_v2 = vmul.f32 %v761_v44, %v2262_v60  ;;  %1335 = vpow2.f32 %v873_v43 }
 0x137   : > { %v935_v32 = vsub.f32 0.0, %v903_v11  ;;  %v359_v19 = vmul.f32 0.5, %v2498_v61  ;;  %v360_v53 = vmul.f32 0.5, %v2499_v17  ;;  %vm921_vm15 = vcmp.ge.f32.partialorder %v2500_v3, 0.0 }
 0x138   : > { %v778_v20 = vmul.f32 %v762_v48, %v665_v18  ;;  %v936_v16 = vsub.f32 0.0, %v904_v8  ;;  %v793_v30 = vadd.f32 0.2548296, %v777_v2  ;;  %v361_v13 = vmul.f32 0.5, %v2502_v37 }
 0x139   : > { %v951_v15 = vsel %vm919_vm13, %v903_v11, %v935_v32  ;;  %v362_v58 = vmul.f32 0.5, %v2503_v29 }
 0x13a   : > { %v794_v22 = vadd.f32 0.2548296, %v778_v20  ;;  %v952_v10 = vsel %vm920_vm14, %v904_v8, %v936_v16  ;;  %v809_v38 = vmul.f32 %v793_v30, %v2262_v60  ;;  %v967_v42 = vadd.f32 1.0, %v951_v15  ;;  %v2501_v60 = vld [vmem:[#allocation32_spill] sm:$0xff] }
 0x13b   : > { %v1334_v26 = vpop.eup %1333  ;;  %v968_v0 = vadd.f32 1.0, %v952_v10  ;;  %vm922_vm0 = vcmp.ge.f32.partialorder %v2501_v60, 0.0 }
 0x13c   : > { %v810_v35 = vmul.f32 %v794_v22, %v665_v18  ;;  %v1336_v33 = vpop.eup %1335  ;;  %v889_v4 = vmul.f32 %v1334_v26, %v809_v38  ;;  %v983_v59 = vmul.f32 %v967_v42, %v359_v19 }
 0x13d   : > { %1096 = vmatmul.bf16.gmra.mxu2 %v992_v25  ;;  %v984_v41 = vmul.f32 %v968_v0, %v360_v53 }
 0x13e   : > { %v890_v62 = vmul.f32 %v1336_v33, %v810_v35  ;;  %v905_v55 = vsub.f32 1.0, %v889_v4 }
 0x13f   : > { %v993_v50 = vpack.c.bf16 %v984_v41, %v983_v59 }
 0x140   : > { %v906_v5 = vsub.f32 1.0, %v890_v62  ;;  %v937_v12 = vsub.f32 0.0, %v905_v55 }
 0x142   : > { %v938_v45 = vsub.f32 0.0, %v906_v5  ;;  %v953_v18 = vsel %vm921_vm15, %v905_v55, %v937_v12 }
 0x143   : > { %v969_v34 = vadd.f32 1.0, %v953_v18 }
 0x144   : > { %v954_v49 = vsel %vm922_vm0, %v906_v5, %v938_v45 }
 0x145   : > { %v970_v24 = vadd.f32 1.0, %v954_v49  ;;  %v985_v40 = vmul.f32 %v969_v34, %v361_v13 }
 0x147   : > { %v986_v54 = vmul.f32 %v970_v24, %v362_v58 }
 0x149   : > { %v994_v36 = vpack.c.bf16 %v986_v54, %v985_v40 }
 0x14d   : > { %1101 = vmatmul.bf16.gmra.mxu2 %v993_v50 }
 0x15d   : > { %1106 = vmatmul.bf16.gmra.mxu2 %v994_v36 }
 0x177   : > { %v1072_v28 = vpop.f32.mrf.mxu1 }
 0x178   : > { %v1073_v31 = vadd.f32 %v1272_v23, %v1072_v28 }
 0x17a   : > { %1112 = vst [vmem:[%s2311_s29] sm:$0xff] %v1073_v31 }
 0x17f   : > { %v1074_v7 = vpop.f32.mrf.mxu1 }
 0x180   : > { %v1075_v9 = vadd.f32 %v1272_v23, %v1074_v7 }
 0x182   : > { %1113 = vst [vmem:[%s2311_s29 + $0x8] sm:$0xff] %v1075_v9 }
 0x189   : > { %v1077_v27 = vpop.f32.mrf.mxu1 }
 0x18a   : > { %v1078_v56 = vadd.f32 %v1272_v23, %v1077_v27 }
 0x18c   : > { %1114 = vst [vmem:[%s2311_s29 + $0x10] sm:$0xff] %v1078_v56 }
 0x191   : > { %v1079_v46 = vpop.f32.mrf.mxu1 }
 0x192   : > { %v1080_v63 = vadd.f32 %v1272_v23, %v1079_v46 }
 0x194   : > { %1115 = vst [vmem:[%s2311_s29 + $0x18] sm:$0xff] %v1080_v63 }
 0x199   : > { %v1082_v14 = vpop.f32.mrf.mxu1 }
 0x19a   : > { %v1083_v47 = vadd.f32 %v1272_v23, %v1082_v14 }
 0x19c   : > { %1116 = vst [vmem:[%s2311_s29 + $0x20] sm:$0xff] %v1083_v47 }
 0x1a1   : > { %v1084_v51 = vpop.f32.mrf.mxu1 }
 0x1a2   : > { %v1085_v1 = vadd.f32 %v1272_v23, %v1084_v51 }
 0x1a4   : > { %1117 = vst [vmem:[%s2311_s29 + $0x28] sm:$0xff] %v1085_v1 }
 0x1ab   : > { %v1087_v44 = vpop.f32.mrf.mxu1 }
 0x1ac   : > { %v1088_v21 = vadd.f32 %v1272_v23, %v1087_v44 }
 0x1ae   : > { %1118 = vst [vmem:[%s2311_s29 + $0x30] sm:$0xff] %v1088_v21 }
 0x1b0   : > { %v1092_v48 = vpop.f32.mrf.mxu2 }
 0x1b1   : > { %v1093_v43 = vadd.f32 %v1272_v23, %v1092_v48 }
 0x1b3   : > { %1120 = vst [vmem:[%s2311_s29 + $0x40] sm:$0xff] %v1093_v43  ;;  %v1089_v39 = vpop.f32.mrf.mxu1 }
 0x1b4   : > { %v1090_v6 = vadd.f32 %v1272_v23, %v1089_v39 }
 0x1b6   : > { %1119 = vst [vmem:[%s2311_s29 + $0x38] sm:$0xff] %v1090_v6 }
 0x1b8   : > { %v1094_v11 = vpop.f32.mrf.mxu2 }
 0x1b9   : > { %v1095_v8 = vadd.f32 %v1272_v23, %v1094_v11 }
 0x1bb   : > { %1121 = vst [vmem:[%s2311_s29 + $0x48] sm:$0xff] %v1095_v8 }
 0x1c0   : > { %v1097_v2 = vpop.f32.mrf.mxu2 }
 0x1c1   : > { %v1098_v20 = vadd.f32 %v1272_v23, %v1097_v2 }
 0x1c3   : > { %1122 = vst [vmem:[%s2311_s29 + $0x50] sm:$0xff] %v1098_v20 }
 0x1c8   : > { %v1099_v25 = vpop.f32.mrf.mxu2 }
 0x1c9   : > { %v1100_v32 = vadd.f32 %v1272_v23, %v1099_v25 }
 0x1cb   : > { %1123 = vst [vmem:[%s2311_s29 + $0x58] sm:$0xff] %v1100_v32 }
 0x1d0   : > { %v1102_v16 = vpop.f32.mrf.mxu2 }
 0x1d1   : > { %v1103_v30 = vadd.f32 %v1272_v23, %v1102_v16 }
 0x1d3   : > { %1124 = vst [vmem:[%s2311_s29 + $0x60] sm:$0xff] %v1103_v30 }
 0x1d8   : > { %v1104_v22 = vpop.f32.mrf.mxu2 }
 0x1d9   : > { %v1105_v52 = vadd.f32 %v1272_v23, %v1104_v22 }
 0x1db   : > { %1125 = vst [vmem:[%s2311_s29 + $0x68] sm:$0xff] %v1105_v52 }
 0x1e0   : > { %v1107_v57 = vpop.f32.mrf.mxu2 }
 0x1e1   : > { %v1108_v26 = vadd.f32 %v1272_v23, %v1107_v57 }
 0x1e3   : > { %1126 = vst [vmem:[%s2311_s29 + $0x70] sm:$0xff] %v1108_v26 }
 0x1e8   : > { %v1109_v15 = vpop.f32.mrf.mxu2 }
 0x1e9   : > { %v1110_v10 = vadd.f32 %v1272_v23, %v1109_v15 }
 0x1eb   : > { %1127 = vst [vmem:[%s2311_s29 + $0x78] sm:$0xff] %v1110_v10 }
 0x1ec PF: > { %s15_s18 = sadd.s32 1, %s1343_s18  }
 0x1ed   : > { %p12_p4 = scmp.ge.s32.totalorder %s15_s18, 6  }
 0x1ef   :  { %14 = sbr.rel (!%p12_p4) target bundleno = 1 (0x1), region = 70 }

</bundles_post_ra>
